<compile_context>
chip_gen: v7x
topology: tpu7x:2x2x1
jax: 0.10.0
libtpu: 0.0.40
codegen_flags: <defaults>
</compile_context>

<pallas_src>
import numpy as np
import jax
import jax.numpy as jnp
from jax.experimental import pallas as pl
from jax.experimental.pallas import tpu as pltpu

WEIGHT_DTYPE = jnp.bfloat16   # bf16 weights / matmul inputs; f32 accumulation


# ----------------------------------------------------------------------------
# Kernel factory: one batch tile -> full forward pass, processed as n_chunks
# independent row-chunks so MXU (matmul) and EUP (tanh) work can overlap.
# ----------------------------------------------------------------------------
def make_sae_kernel(n_chunks, chunk_rows, act_dtype):

    def sae_kernel(x_ref,
                   w_enc, b_enc,
                   w_mu1, b_mu1,
                   w_mu2, b_mu2,
                   w_lat, b_lat,
                   w_d12, b_d12,
                   w_d3, b_d3,
                   w_d4, b_d4,
                   w_d5, b_d5,
                   w_dec, b_dec,
                   recon_ref, lat_ref):

        def mm(h, w_ref):
            # bf16 x bf16 MXU matmul with f32 accumulation.  When act_dtype is
            # bf16 the astype is a no-op (no extra VPU cast).
            return jnp.dot(h.astype(w_ref.dtype), w_ref[...],
                           preferred_element_type=jnp.float32)

        def act(pre):
            # pre is the f32 accumulator (+bias).  tanh runs in bf16 on
            # v6e/v7x (bf16 EUP, ~2x), in f32 on v5e.
            return jnp.tanh(pre.astype(act_dtype))

        def run_chunk(rows):
            x = x_ref[rows, :]                               # (cr, 384) bf16

            # encoder: folded Conv2d + Tanh                  (cr,384) -> (cr,512)
            h = act(mm(x, w_enc) + b_enc[...])
            # fc_mu[0], fc_mu[1]: Linear(480,480) + Tanh
            m = act(mm(h, w_mu1) + b_mu1[...])
            m = act(mm(m, w_mu2) + b_mu2[...])

            # fused latent projection: [m | h] @ w_lat  (one K=1024 matmul).
            # cols 0:6 = mu (folded fc_mu[2]@fc_mu[3], from m),
            # cols 64:70 = log_var (fc_var, from h).
            mh = jnp.concatenate([m, h], axis=-1)            # (cr, 1024)
            lat = mm(mh, w_lat) + b_lat[...]                 # (cr, 128) f32
            lat_ref[rows, :] = lat

            # decoder_input: folded Linear(6,6)@Linear(6,60) + Tanh (z = mu;
            # zero rows of w_d12 ignore the log_var / padding columns of lat).
            d = act(mm(lat, w_d12) + b_d12[...])             # (cr, 128)
            d = act(mm(d, w_d3) + b_d3[...])                 # (cr, 512)
            d = act(mm(d, w_d4) + b_d4[...])
            d = act(mm(d, w_d5) + b_d5[...])
            # decoder: folded ConvTranspose2d + Tanh         (cr,512) -> (cr,384)
            # (final tanh kept f32: output is f32 and it is only 384 lanes)
            recon_ref[rows, :] = jnp.tanh(mm(d, w_dec) + b_dec[...])

        # Two independent dependency chains -> LLO can co-issue chunk-B matmuls
        # with chunk-A tanh.
        for c in range(n_chunks):
            run_chunk(pl.ds(c * chunk_rows, chunk_rows))

    return sae_kernel


# ----------------------------------------------------------------------------
# Parameter init (PyTorch-default-style) and folding / padding.
# ----------------------------------------------------------------------------
def init_params(key):
    def linear(k, out_f, in_f):
        k1, k2 = jax.random.split(k)
        bound = 1.0 / np.sqrt(in_f)
        W = jax.random.uniform(k1, (out_f, in_f), jnp.float32, -bound, bound)
        b = jax.random.uniform(k2, (out_f,), jnp.float32, -bound, bound)
        return W, b

    keys = jax.random.split(key, 13)
    p = {}
    p['conv'] = linear(keys[0], 16, 10)       # Conv2d weight [16,1,10,1] -> [16,10]
    p['mu1'] = linear(keys[1], 480, 480)
    p['mu2'] = linear(keys[2], 480, 480)
    p['mu3'] = linear(keys[3], 6, 480)
    p['mu4'] = linear(keys[4], 6, 6)
    p['var'] = linear(keys[5], 6, 480)
    p['d1'] = linear(keys[6], 6, 6)
    p['d2'] = linear(keys[7], 60, 6)
    p['d3'] = linear(keys[8], 480, 60)
    p['d4'] = linear(keys[9], 480, 480)
    p['d5'] = linear(keys[10], 480, 480)
    Wt, _ = linear(keys[11], 16, 10)          # ConvT weight [16,1,10,1] -> [16,10]
    bt = jax.random.uniform(keys[12], (), jnp.float32,
                            -1.0 / np.sqrt(10.0), 1.0 / np.sqrt(10.0))
    p['convT'] = (Wt, bt)
    return p


def fold_params(p, weight_dtype=WEIGHT_DTYPE):
    """Fold convs + activation-free Linear chains into dense matrices and
    zero-pad everything to lane-friendly widths (384 / 512 / 128)."""
    def t(name):
        W, b = p[name]
        return np.asarray(W, np.float32), np.asarray(b, np.float32)

    # encoder Conv2d(1,16,(10,1),s=(10,1)) -> dense [300, 480]
    Wc, bc = t('conv')
    Wenc = np.zeros((300, 480), np.float32)
    for o in range(16):
        for hb in range(10):
            for kh in range(10):
                for w in range(3):
                    Wenc[(hb * 10 + kh) * 3 + w, o * 30 + hb * 3 + w] = Wc[o, kh]
    benc = np.repeat(bc, 30)

    # decoder ConvTranspose2d(16,1,(10,1),s=(10,1)) -> dense [480, 300]
    Wt, bt = p['convT']
    Wt = np.asarray(Wt, np.float32)
    Wdec = np.zeros((480, 300), np.float32)
    for c in range(16):
        for h in range(10):
            for kh in range(10):
                for w in range(3):
                    Wdec[c * 30 + h * 3 + w, (10 * h + kh) * 3 + w] = Wt[c, kh]
    bdec = np.full((300,), float(bt), np.float32)

    W1, b1 = t('mu1')
    W2, b2 = t('mu2')
    W3, b3 = t('mu3')
    W4, b4 = t('mu4')
    Wmu = W3.T @ W4.T                 # folded fc_mu[2..3]  [480, 6]
    bmu = b3 @ W4.T + b4
    Wv, bv = t('var')
    Wv = Wv.T                         # [480, 6]
    Wd1, bd1 = t('d1')
    Wd2, bd2 = t('d2')
    Wd12 = Wd1.T @ Wd2.T              # folded decoder_input[0..1]  [6, 60]
    bd12 = bd1 @ Wd2.T + bd2
    Wd3, bd3 = t('d3')
    Wd4, bd4 = t('d4')
    Wd5, bd5 = t('d5')

    def padw(W, rows, cols, row_off=0, col_off=0):
        out = np.zeros((rows, cols), np.float32)
        out[row_off:row_off + W.shape[0], col_off:col_off + W.shape[1]] = W
        return jnp.asarray(out, weight_dtype)

    def padb(b, cols, off=0):
        out = np.zeros((1, cols), np.float32)
        out[0, off:off + b.shape[0]] = b
        return jnp.asarray(out, jnp.float32)           # biases stay f32

    # fused latent projection weight [1024, 128]:
    #   rows   0:512  = m-path  (mu      -> cols  0:6)
    #   rows 512:1024 = h-path  (log_var -> cols 64:70)
    W_lat = np.zeros((1024, 128), np.float32)
    W_lat[0:480, 0:6] = Wmu
    W_lat[512:512 + 480, 64:70] = Wv
    b_lat = np.zeros((1, 128), np.float32)
    b_lat[0, 0:6] = bmu
    b_lat[0, 64:70] = bv

    # TODO(synk): v5e is MXU-bound here; replace the folded conv/convT dense
    # matrices (>95% structural zeros, ~24% of MACs) with the true small-K
    # contraction form for that generation.
    folded = [
        padw(Wenc, 384, 512), padb(benc, 512),
        padw(W1.T, 512, 512), padb(b1, 512),
        padw(W2.T, 512, 512), padb(b2, 512),
        jnp.asarray(W_lat, weight_dtype), jnp.asarray(b_lat, jnp.float32),
        padw(Wd12, 128, 128), padb(bd12, 128),
        padw(Wd3.T, 128, 512), padb(bd3, 512),
        padw(Wd4.T, 512, 512), padb(bd4, 512),
        padw(Wd5.T, 512, 512), padb(bd5, 512),
        padw(Wdec, 512, 384), padb(bdec, 384),
    ]
    return folded


# ----------------------------------------------------------------------------
# Wrapper: batch-tiled pallas_call with per-generation defaults.
# ----------------------------------------------------------------------------
def _round_up(x, m):
    return ((x + m - 1) // m) * m


def _tpu_defaults():
    """Per-generation defaults: (tile_n, vmem_limit_bytes, activation dtype)."""
    kind = ""
    try:
        kind = jax.devices()[0].device_kind.lower()
    except Exception:
        pass
    if ("v5 lite" in kind) or ("v5e" in kind) or ("v5litepod" in kind):
        # 128 MiB VMEM, no bf16 VPU/EUP -> keep elementwise math in f32.
        return 1024, 96 * 1024 * 1024, jnp.float32
    if "v6" in kind:
        # 128 MiB VMEM, bf16 EUP -> bf16 tanh, large tiles.
        return 1024, 96 * 1024 * 1024, jnp.bfloat16
    # v7x (64 MiB VMEM / TC, 2 TCs) and unknown parts: conservative VMEM.
    return 512, 48 * 1024 * 1024, jnp.bfloat16


def sae_forward(x_nchw, folded, *, tile_n=None, vmem_limit_bytes=None,
                act_dtype=None):
    """Equivalent of SAE.forward: returns [recon, input, mu, log_var]."""
    N = x_nchw.shape[0]
    d_tile, d_vmem, d_act = _tpu_defaults()
    tile_n = d_tile if tile_n is None else tile_n
    vmem_limit_bytes = d_vmem if vmem_limit_bytes is None else vmem_limit_bytes
    act_dtype = d_act if act_dtype is None else act_dtype

    # Batch tile: multiple of 16 (two >=8-row chunks per tile) and capped so the
    # grid has >=2 steps when "parallel" megacore sharding is relied on (keeps
    # v7x's second TensorCore busy).
    tile_n = max(16, _round_up(int(tile_n), 16))
    half_batch = _round_up(max(1, (N + 1) // 2), 16)
    tn = min(tile_n, half_batch)
    n_pad = _round_up(max(N, tn), tn)
    grid = (n_pad // tn,)

    # bf16 input slab (halves the dominant input DMA stream), padded to 384
    # lanes + n_pad rows in one fused pad-of-cast (no zeros+set full pass).
    x_flat = x_nchw.reshape(N, 300)
    x_pad = jnp.pad(x_flat.astype(jnp.bfloat16), ((0, n_pad - N), (0, 84)))

    kernel = make_sae_kernel(n_chunks=2, chunk_rows=tn // 2, act_dtype=act_dtype)

    x_spec = pl.BlockSpec((tn, 384), lambda i: (i, 0))
    # constant index_map -> weights fetched once, VMEM-resident across the grid.
    # TODO(synk): pipeline_mode=pl.Buffered(1) on these specs would drop the
    # unused second resident-weight buffer (~3 MiB); left out pending support.
    w_specs = [pl.BlockSpec(w.shape, lambda i: (0, 0)) for w in folded]
    out_specs = (pl.BlockSpec((tn, 384), lambda i: (i, 0)),
                 pl.BlockSpec((tn, 128), lambda i: (i, 0)))
    out_shapes = (jax.ShapeDtypeStruct((n_pad, 384), jnp.float32),
                  jax.ShapeDtypeStruct((n_pad, 128), jnp.float32))

    # Advisory cost estimate so XLA overlaps the pad/cast & output slicing.
    w_bytes = sum(int(w.size) * w.dtype.itemsize for w in folded)
    macs_per_row = (384 * 512 + 2 * 512 * 512 + 1024 * 128 + 128 * 128
                    + 128 * 512 + 2 * 512 * 512 + 512 * 384)
    cost = pl.CostEstimate(
        flops=2 * macs_per_row * n_pad,
        transcendentals=3584 * n_pad,
        bytes_accessed=n_pad * (384 * 2 + 384 * 4 + 128 * 4) + w_bytes)

    recon_pad, lat = pl.pallas_call(
        kernel,
        grid=grid,
        in_specs=[x_spec] + w_specs,
        out_specs=out_specs,
        out_shape=out_shapes,
        compiler_params=pltpu.CompilerParams(
            dimension_semantics=("parallel",),      # shards batch over v7x's 2 TCs
            vmem_limit_bytes=vmem_limit_bytes),
        cost_estimate=cost,
    )(x_pad, *folded)

    recon = recon_pad[:N, :300].reshape(N, 1, 100, 3)
    mu = lat[:N, 0:6]
    logvar = lat[:N, 64:70]
    return [recon, x_nchw, mu, logvar]


# ----------------------------------------------------------------------------
# Pure-JAX f32 reference with the original (un-folded) module semantics.
# ----------------------------------------------------------------------------
def ref_forward(x_nchw, p):
    N = x_nchw.shape[0]

    def lin(v, name):
        W, b = p[name]
        return v @ W.T + b

    Wc, bc = p['conv']
    xr = x_nchw.reshape(N, 10, 10, 3)                       # [n, hb, kh, w]
    h = jnp.tanh(jnp.einsum('nbkw,ok->nobw', xr, Wc) + bc[None, :, None, None])
    flat = h.reshape(N, 480)
    m = jnp.tanh(lin(flat, 'mu1'))
    m = jnp.tanh(lin(m, 'mu2'))
    m = lin(m, 'mu3')
    mu = lin(m, 'mu4')
    logvar = lin(flat, 'var')
    d = lin(mu, 'd1')                                       # z = mu (forward)
    d = jnp.tanh(lin(d, 'd2'))
    d = jnp.tanh(lin(d, 'd3'))
    d = jnp.tanh(lin(d, 'd4'))
    d = jnp.tanh(lin(d, 'd5'))
    dv = d.reshape(N, 16, 10, 3)
    Wt, bt = p['convT']
    out = jnp.einsum('nchw,ck->nhkw', dv, Wt) + bt
    recon = jnp.tanh(out.reshape(N, 1, 100, 3))
    return recon, mu, logvar


if __name__ == "__main__":
    key = jax.random.PRNGKey(0)
    kp, kx = jax.random.split(key)

    params = init_params(kp)
    folded = fold_params(params)

    # Shapes fixed by the module: flatten(encoder(x)) must be 480 => input is
    # [N, 1, 100, 3].  Small batch of 2 for the self-test.
    x = jax.random.normal(kx, (2, 1, 100, 3), jnp.float32)

    recon, x_in, mu, logvar = sae_forward(x, folded)
    jax.block_until_ready((recon, mu, logvar))

    # Tolerance covers bf16 weights/matmul inputs (f32 accumulation) plus the
    # bf16 tanh path used on v6e/v7x; observed error is a few 1e-3.
    r_recon, r_mu, r_lv = ref_forward(x, params)
    np.testing.assert_allclose(np.asarray(recon), np.asarray(r_recon), rtol=5e-2, atol=5e-2)
    np.testing.assert_allclose(np.asarray(mu), np.asarray(r_mu), rtol=5e-2, atol=5e-2)
    np.testing.assert_allclose(np.asarray(logvar), np.asarray(r_lv), rtol=5e-2, atol=5e-2)

    print("KERNEL_OK")
</pallas_src>

<mosaic_0001>
module attributes {stable_mosaic.version = 11 : i64} {
  func.func @sae_kernel(%arg0: i32, %arg1: memref<16x384xbf16, #tpu.memory_space<vmem>>, %arg2: memref<384x512xbf16, #tpu.memory_space<vmem>>, %arg3: memref<1x512xf32, #tpu.memory_space<vmem>>, %arg4: memref<512x512xbf16, #tpu.memory_space<vmem>>, %arg5: memref<1x512xf32, #tpu.memory_space<vmem>>, %arg6: memref<512x512xbf16, #tpu.memory_space<vmem>>, %arg7: memref<1x512xf32, #tpu.memory_space<vmem>>, %arg8: memref<1024x128xbf16, #tpu.memory_space<vmem>>, %arg9: memref<1x128xf32, #tpu.memory_space<vmem>>, %arg10: memref<128x128xbf16, #tpu.memory_space<vmem>>, %arg11: memref<1x128xf32, #tpu.memory_space<vmem>>, %arg12: memref<128x512xbf16, #tpu.memory_space<vmem>>, %arg13: memref<1x512xf32, #tpu.memory_space<vmem>>, %arg14: memref<512x512xbf16, #tpu.memory_space<vmem>>, %arg15: memref<1x512xf32, #tpu.memory_space<vmem>>, %arg16: memref<512x512xbf16, #tpu.memory_space<vmem>>, %arg17: memref<1x512xf32, #tpu.memory_space<vmem>>, %arg18: memref<512x384xbf16, #tpu.memory_space<vmem>>, %arg19: memref<1x384xf32, #tpu.memory_space<vmem>>, %arg20: memref<16x384xf32, #tpu.memory_space<vmem>>, %arg21: memref<16x128xf32, #tpu.memory_space<vmem>>) attributes {dimension_semantics = [#tpu.dimension_semantics<parallel>], iteration_bounds = array<i64: 1>, scalar_prefetch = 0 : i64, scratch_operands = 0 : i64, tpu.core_type = #tpu.core_type<tc>, window_params = [{transform_indices = @transform_0, window_bounds = array<i64: 16, 384>}, {pipeline_mode = #tpu.pipeline_mode<synchronous>, transform_indices = @transform_1, window_bounds = array<i64: 384, 512>}, {pipeline_mode = #tpu.pipeline_mode<synchronous>, transform_indices = @transform_2, window_bounds = array<i64: 1, 512>}, {pipeline_mode = #tpu.pipeline_mode<synchronous>, transform_indices = @transform_3, window_bounds = array<i64: 512, 512>}, {pipeline_mode = #tpu.pipeline_mode<synchronous>, transform_indices = @transform_4, window_bounds = array<i64: 1, 512>}, {pipeline_mode = #tpu.pipeline_mode<synchronous>, transform_indices = @transform_5, window_bounds = array<i64: 512, 512>}, {pipeline_mode = #tpu.pipeline_mode<synchronous>, transform_indices = @transform_6, window_bounds = array<i64: 1, 512>}, {pipeline_mode = #tpu.pipeline_mode<synchronous>, transform_indices = @transform_7, window_bounds = array<i64: 1024, 128>}, {pipeline_mode = #tpu.pipeline_mode<synchronous>, transform_indices = @transform_8, window_bounds = array<i64: 1, 128>}, {pipeline_mode = #tpu.pipeline_mode<synchronous>, transform_indices = @transform_9, window_bounds = array<i64: 128, 128>}, {pipeline_mode = #tpu.pipeline_mode<synchronous>, transform_indices = @transform_10, window_bounds = array<i64: 1, 128>}, {pipeline_mode = #tpu.pipeline_mode<synchronous>, transform_indices = @transform_11, window_bounds = array<i64: 128, 512>}, {pipeline_mode = #tpu.pipeline_mode<synchronous>, transform_indices = @transform_12, window_bounds = array<i64: 1, 512>}, {pipeline_mode = #tpu.pipeline_mode<synchronous>, transform_indices = @transform_13, window_bounds = array<i64: 512, 512>}, {pipeline_mode = #tpu.pipeline_mode<synchronous>, transform_indices = @transform_14, window_bounds = array<i64: 1, 512>}, {pipeline_mode = #tpu.pipeline_mode<synchronous>, transform_indices = @transform_15, window_bounds = array<i64: 512, 512>}, {pipeline_mode = #tpu.pipeline_mode<synchronous>, transform_indices = @transform_16, window_bounds = array<i64: 1, 512>}, {pipeline_mode = #tpu.pipeline_mode<synchronous>, transform_indices = @transform_17, window_bounds = array<i64: 512, 384>}, {pipeline_mode = #tpu.pipeline_mode<synchronous>, transform_indices = @transform_18, window_bounds = array<i64: 1, 384>}, {transform_indices = @transform_19, window_bounds = array<i64: 16, 384>}, {transform_indices = @transform_20, window_bounds = array<i64: 16, 128>}]} {
    %c0 = arith.constant 0 : index
    %c0_0 = arith.constant 0 : index
    %0 = vector.load %arg1[%c0, %c0_0] : memref<16x384xbf16, #tpu.memory_space<vmem>>, vector<8x384xbf16>
    %c0_1 = arith.constant 0 : index
    %c0_2 = arith.constant 0 : index
    %1 = vector.load %arg2[%c0_1, %c0_2] : memref<384x512xbf16, #tpu.memory_space<vmem>>, vector<384x512xbf16>
    %cst = arith.constant dense<0.000000e+00> : vector<8x512xf32>
    %2 = tpu.matmul %0, %1, %cst {dimension_numbers = #tpu.dot_dimension_numbers<[1], [0], [0], [1], [0, 0, 1, 1], [], []>} : vector<8x384xbf16>, vector<384x512xbf16>, vector<8x512xf32> -> vector<8x512xf32>
    %c0_3 = arith.constant 0 : index
    %c0_4 = arith.constant 0 : index
    %3 = vector.load %arg3[%c0_3, %c0_4] : memref<1x512xf32, #tpu.memory_space<vmem>>, vector<1x512xf32>
    %4 = vector.broadcast %3 : vector<1x512xf32> to vector<8x512xf32>
    %5 = arith.addf %2, %4 : vector<8x512xf32>
    %6 = arith.truncf %5 : vector<8x512xf32> to vector<8x512xbf16>
    %7 = math.tanh %6 : vector<8x512xbf16>
    %c0_5 = arith.constant 0 : index
    %c0_6 = arith.constant 0 : index
    %8 = vector.load %arg4[%c0_5, %c0_6] : memref<512x512xbf16, #tpu.memory_space<vmem>>, vector<512x512xbf16>
    %cst_7 = arith.constant dense<0.000000e+00> : vector<8x512xf32>
    %9 = tpu.matmul %7, %8, %cst_7 {dimension_numbers = #tpu.dot_dimension_numbers<[1], [0], [0], [1], [0, 0, 1, 1], [], []>} : vector<8x512xbf16>, vector<512x512xbf16>, vector<8x512xf32> -> vector<8x512xf32>
    %c0_8 = arith.constant 0 : index
    %c0_9 = arith.constant 0 : index
    %10 = vector.load %arg5[%c0_8, %c0_9] : memref<1x512xf32, #tpu.memory_space<vmem>>, vector<1x512xf32>
    %11 = vector.broadcast %10 : vector<1x512xf32> to vector<8x512xf32>
    %12 = arith.addf %9, %11 : vector<8x512xf32>
    %13 = arith.truncf %12 : vector<8x512xf32> to vector<8x512xbf16>
    %14 = math.tanh %13 : vector<8x512xbf16>
    %c0_10 = arith.constant 0 : index
    %c0_11 = arith.constant 0 : index
    %15 = vector.load %arg6[%c0_10, %c0_11] : memref<512x512xbf16, #tpu.memory_space<vmem>>, vector<512x512xbf16>
    %cst_12 = arith.constant dense<0.000000e+00> : vector<8x512xf32>
    %16 = tpu.matmul %14, %15, %cst_12 {dimension_numbers = #tpu.dot_dimension_numbers<[1], [0], [0], [1], [0, 0, 1, 1], [], []>} : vector<8x512xbf16>, vector<512x512xbf16>, vector<8x512xf32> -> vector<8x512xf32>
    %c0_13 = arith.constant 0 : index
    %c0_14 = arith.constant 0 : index
    %17 = vector.load %arg7[%c0_13, %c0_14] : memref<1x512xf32, #tpu.memory_space<vmem>>, vector<1x512xf32>
    %18 = vector.broadcast %17 : vector<1x512xf32> to vector<8x512xf32>
    %19 = arith.addf %16, %18 : vector<8x512xf32>
    %20 = arith.truncf %19 : vector<8x512xf32> to vector<8x512xbf16>
    %21 = math.tanh %20 : vector<8x512xbf16>
    %22 = tpu.concatenate %21, %7 in 1 : vector<8x512xbf16>, vector<8x512xbf16> -> vector<8x1024xbf16>
    %c0_15 = arith.constant 0 : index
    %c0_16 = arith.constant 0 : index
    %23 = vector.load %arg8[%c0_15, %c0_16] : memref<1024x128xbf16, #tpu.memory_space<vmem>>, vector<1024x128xbf16>
    %cst_17 = arith.constant dense<0.000000e+00> : vector<8x128xf32>
    %24 = tpu.matmul %22, %23, %cst_17 {dimension_numbers = #tpu.dot_dimension_numbers<[1], [0], [0], [1], [0, 0, 1, 1], [], []>} : vector<8x1024xbf16>, vector<1024x128xbf16>, vector<8x128xf32> -> vector<8x128xf32>
    %c0_18 = arith.constant 0 : index
    %c0_19 = arith.constant 0 : index
    %25 = vector.load %arg9[%c0_18, %c0_19] : memref<1x128xf32, #tpu.memory_space<vmem>>, vector<1x128xf32>
    %26 = vector.broadcast %25 : vector<1x128xf32> to vector<8x128xf32>
    %27 = arith.addf %24, %26 : vector<8x128xf32>
    %c0_20 = arith.constant 0 : index
    %c0_21 = arith.constant 0 : index
    %28 = vector.load %arg21[%c0_20, %c0_21] : memref<16x128xf32, #tpu.memory_space<vmem>>, vector<8x128xf32>
    tpu.vector_store %arg21[%c0_20, %c0_21], %27 {strides = array<i32>} : memref<16x128xf32, #tpu.memory_space<vmem>>, vector<8x128xf32>,
    %29 = arith.truncf %27 : vector<8x128xf32> to vector<8x128xbf16>
    %c0_22 = arith.constant 0 : index
    %c0_23 = arith.constant 0 : index
    %30 = vector.load %arg10[%c0_22, %c0_23] : memref<128x128xbf16, #tpu.memory_space<vmem>>, vector<128x128xbf16>
    %cst_24 = arith.constant dense<0.000000e+00> : vector<8x128xf32>
    %31 = tpu.matmul %29, %30, %cst_24 {dimension_numbers = #tpu.dot_dimension_numbers<[1], [0], [0], [1], [0, 0, 1, 1], [], []>} : vector<8x128xbf16>, vector<128x128xbf16>, vector<8x128xf32> -> vector<8x128xf32>
    %c0_25 = arith.constant 0 : index
    %c0_26 = arith.constant 0 : index
    %32 = vector.load %arg11[%c0_25, %c0_26] : memref<1x128xf32, #tpu.memory_space<vmem>>, vector<1x128xf32>
    %33 = vector.broadcast %32 : vector<1x128xf32> to vector<8x128xf32>
    %34 = arith.addf %31, %33 : vector<8x128xf32>
    %35 = arith.truncf %34 : vector<8x128xf32> to vector<8x128xbf16>
    %36 = math.tanh %35 : vector<8x128xbf16>
    %c0_27 = arith.constant 0 : index
    %c0_28 = arith.constant 0 : index
    %37 = vector.load %arg12[%c0_27, %c0_28] : memref<128x512xbf16, #tpu.memory_space<vmem>>, vector<128x512xbf16>
    %cst_29 = arith.constant dense<0.000000e+00> : vector<8x512xf32>
    %38 = tpu.matmul %36, %37, %cst_29 {dimension_numbers = #tpu.dot_dimension_numbers<[1], [0], [0], [1], [0, 0, 1, 1], [], []>} : vector<8x128xbf16>, vector<128x512xbf16>, vector<8x512xf32> -> vector<8x512xf32>
    %c0_30 = arith.constant 0 : index
    %c0_31 = arith.constant 0 : index
    %39 = vector.load %arg13[%c0_30, %c0_31] : memref<1x512xf32, #tpu.memory_space<vmem>>, vector<1x512xf32>
    %40 = vector.broadcast %39 : vector<1x512xf32> to vector<8x512xf32>
    %41 = arith.addf %38, %40 : vector<8x512xf32>
    %42 = arith.truncf %41 : vector<8x512xf32> to vector<8x512xbf16>
    %43 = math.tanh %42 : vector<8x512xbf16>
    %c0_32 = arith.constant 0 : index
    %c0_33 = arith.constant 0 : index
    %44 = vector.load %arg14[%c0_32, %c0_33] : memref<512x512xbf16, #tpu.memory_space<vmem>>, vector<512x512xbf16>
    %cst_34 = arith.constant dense<0.000000e+00> : vector<8x512xf32>
    %45 = tpu.matmul %43, %44, %cst_34 {dimension_numbers = #tpu.dot_dimension_numbers<[1], [0], [0], [1], [0, 0, 1, 1], [], []>} : vector<8x512xbf16>, vector<512x512xbf16>, vector<8x512xf32> -> vector<8x512xf32>
    %c0_35 = arith.constant 0 : index
    %c0_36 = arith.constant 0 : index
    %46 = vector.load %arg15[%c0_35, %c0_36] : memref<1x512xf32, #tpu.memory_space<vmem>>, vector<1x512xf32>
    %47 = vector.broadcast %46 : vector<1x512xf32> to vector<8x512xf32>
    %48 = arith.addf %45, %47 : vector<8x512xf32>
    %49 = arith.truncf %48 : vector<8x512xf32> to vector<8x512xbf16>
    %50 = math.tanh %49 : vector<8x512xbf16>
    %c0_37 = arith.constant 0 : index
    %c0_38 = arith.constant 0 : index
    %51 = vector.load %arg16[%c0_37, %c0_38] : memref<512x512xbf16, #tpu.memory_space<vmem>>, vector<512x512xbf16>
    %cst_39 = arith.constant dense<0.000000e+00> : vector<8x512xf32>
    %52 = tpu.matmul %50, %51, %cst_39 {dimension_numbers = #tpu.dot_dimension_numbers<[1], [0], [0], [1], [0, 0, 1, 1], [], []>} : vector<8x512xbf16>, vector<512x512xbf16>, vector<8x512xf32> -> vector<8x512xf32>
    %c0_40 = arith.constant 0 : index
    %c0_41 = arith.constant 0 : index
    %53 = vector.load %arg17[%c0_40, %c0_41] : memref<1x512xf32, #tpu.memory_space<vmem>>, vector<1x512xf32>
    %54 = vector.broadcast %53 : vector<1x512xf32> to vector<8x512xf32>
    %55 = arith.addf %52, %54 : vector<8x512xf32>
    %56 = arith.truncf %55 : vector<8x512xf32> to vector<8x512xbf16>
    %57 = math.tanh %56 : vector<8x512xbf16>
    %c0_42 = arith.constant 0 : index
    %c0_43 = arith.constant 0 : index
    %58 = vector.load %arg18[%c0_42, %c0_43] : memref<512x384xbf16, #tpu.memory_space<vmem>>, vector<512x384xbf16>
    %cst_44 = arith.constant dense<0.000000e+00> : vector<8x384xf32>
    %59 = tpu.matmul %57, %58, %cst_44 {dimension_numbers = #tpu.dot_dimension_numbers<[1], [0], [0], [1], [0, 0, 1, 1], [], []>} : vector<8x512xbf16>, vector<512x384xbf16>, vector<8x384xf32> -> vector<8x384xf32>
    %c0_45 = arith.constant 0 : index
    %c0_46 = arith.constant 0 : index
    %60 = vector.load %arg19[%c0_45, %c0_46] : memref<1x384xf32, #tpu.memory_space<vmem>>, vector<1x384xf32>
    %61 = vector.broadcast %60 : vector<1x384xf32> to vector<8x384xf32>
    %62 = arith.addf %59, %61 : vector<8x384xf32>
    %63 = math.tanh %62 : vector<8x384xf32>
    %c0_47 = arith.constant 0 : index
    %c0_48 = arith.constant 0 : index
    %64 = vector.load %arg20[%c0_47, %c0_48] : memref<16x384xf32, #tpu.memory_space<vmem>>, vector<8x384xf32>
    tpu.vector_store %arg20[%c0_47, %c0_48], %63 {strides = array<i32>} : memref<16x384xf32, #tpu.memory_space<vmem>>, vector<8x384xf32>,
    %c8 = arith.constant 8 : index
    %c0_49 = arith.constant 0 : index
    %65 = vector.load %arg1[%c8, %c0_49] : memref<16x384xbf16, #tpu.memory_space<vmem>>, vector<8x384xbf16>
    %c0_50 = arith.constant 0 : index
    %c0_51 = arith.constant 0 : index
    %66 = vector.load %arg2[%c0_50, %c0_51] : memref<384x512xbf16, #tpu.memory_space<vmem>>, vector<384x512xbf16>
    %cst_52 = arith.constant dense<0.000000e+00> : vector<8x512xf32>
    %67 = tpu.matmul %65, %66, %cst_52 {dimension_numbers = #tpu.dot_dimension_numbers<[1], [0], [0], [1], [0, 0, 1, 1], [], []>} : vector<8x384xbf16>, vector<384x512xbf16>, vector<8x512xf32> -> vector<8x512xf32>
    %c0_53 = arith.constant 0 : index
    %c0_54 = arith.constant 0 : index
    %68 = vector.load %arg3[%c0_53, %c0_54] : memref<1x512xf32, #tpu.memory_space<vmem>>, vector<1x512xf32>
    %69 = vector.broadcast %68 : vector<1x512xf32> to vector<8x512xf32>
    %70 = arith.addf %67, %69 : vector<8x512xf32>
    %71 = arith.truncf %70 : vector<8x512xf32> to vector<8x512xbf16>
    %72 = math.tanh %71 : vector<8x512xbf16>
    %c0_55 = arith.constant 0 : index
    %c0_56 = arith.constant 0 : index
    %73 = vector.load %arg4[%c0_55, %c0_56] : memref<512x512xbf16, #tpu.memory_space<vmem>>, vector<512x512xbf16>
    %cst_57 = arith.constant dense<0.000000e+00> : vector<8x512xf32>
    %74 = tpu.matmul %72, %73, %cst_57 {dimension_numbers = #tpu.dot_dimension_numbers<[1], [0], [0], [1], [0, 0, 1, 1], [], []>} : vector<8x512xbf16>, vector<512x512xbf16>, vector<8x512xf32> -> vector<8x512xf32>
    %c0_58 = arith.constant 0 : index
    %c0_59 = arith.constant 0 : index
    %75 = vector.load %arg5[%c0_58, %c0_59] : memref<1x512xf32, #tpu.memory_space<vmem>>, vector<1x512xf32>
    %76 = vector.broadcast %75 : vector<1x512xf32> to vector<8x512xf32>
    %77 = arith.addf %74, %76 : vector<8x512xf32>
    %78 = arith.truncf %77 : vector<8x512xf32> to vector<8x512xbf16>
    %79 = math.tanh %78 : vector<8x512xbf16>
    %c0_60 = arith.constant 0 : index
    %c0_61 = arith.constant 0 : index
    %80 = vector.load %arg6[%c0_60, %c0_61] : memref<512x512xbf16, #tpu.memory_space<vmem>>, vector<512x512xbf16>
    %cst_62 = arith.constant dense<0.000000e+00> : vector<8x512xf32>
    %81 = tpu.matmul %79, %80, %cst_62 {dimension_numbers = #tpu.dot_dimension_numbers<[1], [0], [0], [1], [0, 0, 1, 1], [], []>} : vector<8x512xbf16>, vector<512x512xbf16>, vector<8x512xf32> -> vector<8x512xf32>
    %c0_63 = arith.constant 0 : index
    %c0_64 = arith.constant 0 : index
    %82 = vector.load %arg7[%c0_63, %c0_64] : memref<1x512xf32, #tpu.memory_space<vmem>>, vector<1x512xf32>
    %83 = vector.broadcast %82 : vector<1x512xf32> to vector<8x512xf32>
    %84 = arith.addf %81, %83 : vector<8x512xf32>
    %85 = arith.truncf %84 : vector<8x512xf32> to vector<8x512xbf16>
    %86 = math.tanh %85 : vector<8x512xbf16>
    %87 = tpu.concatenate %86, %72 in 1 : vector<8x512xbf16>, vector<8x512xbf16> -> vector<8x1024xbf16>
    %c0_65 = arith.constant 0 : index
    %c0_66 = arith.constant 0 : index
    %88 = vector.load %arg8[%c0_65, %c0_66] : memref<1024x128xbf16, #tpu.memory_space<vmem>>, vector<1024x128xbf16>
    %cst_67 = arith.constant dense<0.000000e+00> : vector<8x128xf32>
    %89 = tpu.matmul %87, %88, %cst_67 {dimension_numbers = #tpu.dot_dimension_numbers<[1], [0], [0], [1], [0, 0, 1, 1], [], []>} : vector<8x1024xbf16>, vector<1024x128xbf16>, vector<8x128xf32> -> vector<8x128xf32>
    %c0_68 = arith.constant 0 : index
    %c0_69 = arith.constant 0 : index
    %90 = vector.load %arg9[%c0_68, %c0_69] : memref<1x128xf32, #tpu.memory_space<vmem>>, vector<1x128xf32>
    %91 = vector.broadcast %90 : vector<1x128xf32> to vector<8x128xf32>
    %92 = arith.addf %89, %91 : vector<8x128xf32>
    %c8_70 = arith.constant 8 : index
    %c0_71 = arith.constant 0 : index
    %93 = vector.load %arg21[%c8_70, %c0_71] : memref<16x128xf32, #tpu.memory_space<vmem>>, vector<8x128xf32>
    tpu.vector_store %arg21[%c8_70, %c0_71], %92 {strides = array<i32>} : memref<16x128xf32, #tpu.memory_space<vmem>>, vector<8x128xf32>,
    %94 = arith.truncf %92 : vector<8x128xf32> to vector<8x128xbf16>
    %c0_72 = arith.constant 0 : index
    %c0_73 = arith.constant 0 : index
    %95 = vector.load %arg10[%c0_72, %c0_73] : memref<128x128xbf16, #tpu.memory_space<vmem>>, vector<128x128xbf16>
    %cst_74 = arith.constant dense<0.000000e+00> : vector<8x128xf32>
    %96 = tpu.matmul %94, %95, %cst_74 {dimension_numbers = #tpu.dot_dimension_numbers<[1], [0], [0], [1], [0, 0, 1, 1], [], []>} : vector<8x128xbf16>, vector<128x128xbf16>, vector<8x128xf32> -> vector<8x128xf32>
    %c0_75 = arith.constant 0 : index
    %c0_76 = arith.constant 0 : index
    %97 = vector.load %arg11[%c0_75, %c0_76] : memref<1x128xf32, #tpu.memory_space<vmem>>, vector<1x128xf32>
    %98 = vector.broadcast %97 : vector<1x128xf32> to vector<8x128xf32>
    %99 = arith.addf %96, %98 : vector<8x128xf32>
    %100 = arith.truncf %99 : vector<8x128xf32> to vector<8x128xbf16>
    %101 = math.tanh %100 : vector<8x128xbf16>
    %c0_77 = arith.constant 0 : index
    %c0_78 = arith.constant 0 : index
    %102 = vector.load %arg12[%c0_77, %c0_78] : memref<128x512xbf16, #tpu.memory_space<vmem>>, vector<128x512xbf16>
    %cst_79 = arith.constant dense<0.000000e+00> : vector<8x512xf32>
    %103 = tpu.matmul %101, %102, %cst_79 {dimension_numbers = #tpu.dot_dimension_numbers<[1], [0], [0], [1], [0, 0, 1, 1], [], []>} : vector<8x128xbf16>, vector<128x512xbf16>, vector<8x512xf32> -> vector<8x512xf32>
    %c0_80 = arith.constant 0 : index
    %c0_81 = arith.constant 0 : index
    %104 = vector.load %arg13[%c0_80, %c0_81] : memref<1x512xf32, #tpu.memory_space<vmem>>, vector<1x512xf32>
    %105 = vector.broadcast %104 : vector<1x512xf32> to vector<8x512xf32>
    %106 = arith.addf %103, %105 : vector<8x512xf32>
    %107 = arith.truncf %106 : vector<8x512xf32> to vector<8x512xbf16>
    %108 = math.tanh %107 : vector<8x512xbf16>
    %c0_82 = arith.constant 0 : index
    %c0_83 = arith.constant 0 : index
    %109 = vector.load %arg14[%c0_82, %c0_83] : memref<512x512xbf16, #tpu.memory_space<vmem>>, vector<512x512xbf16>
    %cst_84 = arith.constant dense<0.000000e+00> : vector<8x512xf32>
    %110 = tpu.matmul %108, %109, %cst_84 {dimension_numbers = #tpu.dot_dimension_numbers<[1], [0], [0], [1], [0, 0, 1, 1], [], []>} : vector<8x512xbf16>, vector<512x512xbf16>, vector<8x512xf32> -> vector<8x512xf32>
    %c0_85 = arith.constant 0 : index
    %c0_86 = arith.constant 0 : index
    %111 = vector.load %arg15[%c0_85, %c0_86] : memref<1x512xf32, #tpu.memory_space<vmem>>, vector<1x512xf32>
    %112 = vector.broadcast %111 : vector<1x512xf32> to vector<8x512xf32>
    %113 = arith.addf %110, %112 : vector<8x512xf32>
    %114 = arith.truncf %113 : vector<8x512xf32> to vector<8x512xbf16>
    %115 = math.tanh %114 : vector<8x512xbf16>
    %c0_87 = arith.constant 0 : index
    %c0_88 = arith.constant 0 : index
    %116 = vector.load %arg16[%c0_87, %c0_88] : memref<512x512xbf16, #tpu.memory_space<vmem>>, vector<512x512xbf16>
    %cst_89 = arith.constant dense<0.000000e+00> : vector<8x512xf32>
    %117 = tpu.matmul %115, %116, %cst_89 {dimension_numbers = #tpu.dot_dimension_numbers<[1], [0], [0], [1], [0, 0, 1, 1], [], []>} : vector<8x512xbf16>, vector<512x512xbf16>, vector<8x512xf32> -> vector<8x512xf32>
    %c0_90 = arith.constant 0 : index
    %c0_91 = arith.constant 0 : index
    %118 = vector.load %arg17[%c0_90, %c0_91] : memref<1x512xf32, #tpu.memory_space<vmem>>, vector<1x512xf32>
    %119 = vector.broadcast %118 : vector<1x512xf32> to vector<8x512xf32>
    %120 = arith.addf %117, %119 : vector<8x512xf32>
    %121 = arith.truncf %120 : vector<8x512xf32> to vector<8x512xbf16>
    %122 = math.tanh %121 : vector<8x512xbf16>
    %c0_92 = arith.constant 0 : index
    %c0_93 = arith.constant 0 : index
    %123 = vector.load %arg18[%c0_92, %c0_93] : memref<512x384xbf16, #tpu.memory_space<vmem>>, vector<512x384xbf16>
    %cst_94 = arith.constant dense<0.000000e+00> : vector<8x384xf32>
    %124 = tpu.matmul %122, %123, %cst_94 {dimension_numbers = #tpu.dot_dimension_numbers<[1], [0], [0], [1], [0, 0, 1, 1], [], []>} : vector<8x512xbf16>, vector<512x384xbf16>, vector<8x384xf32> -> vector<8x384xf32>
    %c0_95 = arith.constant 0 : index
    %c0_96 = arith.constant 0 : index
    %125 = vector.load %arg19[%c0_95, %c0_96] : memref<1x384xf32, #tpu.memory_space<vmem>>, vector<1x384xf32>
    %126 = vector.broadcast %125 : vector<1x384xf32> to vector<8x384xf32>
    %127 = arith.addf %124, %126 : vector<8x384xf32>
    %128 = math.tanh %127 : vector<8x384xf32>
    %c8_97 = arith.constant 8 : index
    %c0_98 = arith.constant 0 : index
    %129 = vector.load %arg20[%c8_97, %c0_98] : memref<16x384xf32, #tpu.memory_space<vmem>>, vector<8x384xf32>
    tpu.vector_store %arg20[%c8_97, %c0_98], %128 {strides = array<i32>} : memref<16x384xf32, #tpu.memory_space<vmem>>, vector<8x384xf32>,
    return
  }
  func.func @transform_0(%arg0: i32) -> (i32, i32) {
    %c0_i32 = arith.constant 0 : i32
    %c0_i32_0 = arith.constant 0 : i32
    return %arg0, %c0_i32 : i32, i32
  }
  func.func @transform_1(%arg0: i32) -> (i32, i32) {
    %c0_i32 = arith.constant 0 : i32
    %c0_i32_0 = arith.constant 0 : i32
    %c0_i32_1 = arith.constant 0 : i32
    return %c0_i32, %c0_i32_0 : i32, i32
  }
  func.func @transform_2(%arg0: i32) -> (i32, i32) {
    %c0_i32 = arith.constant 0 : i32
    %c0_i32_0 = arith.constant 0 : i32
    %c0_i32_1 = arith.constant 0 : i32
    return %c0_i32, %c0_i32_0 : i32, i32
  }
  func.func @transform_3(%arg0: i32) -> (i32, i32) {
    %c0_i32 = arith.constant 0 : i32
    %c0_i32_0 = arith.constant 0 : i32
    %c0_i32_1 = arith.constant 0 : i32
    return %c0_i32, %c0_i32_0 : i32, i32
  }
  func.func @transform_4(%arg0: i32) -> (i32, i32) {
    %c0_i32 = arith.constant 0 : i32
    %c0_i32_0 = arith.constant 0 : i32
    %c0_i32_1 = arith.constant 0 : i32
    return %c0_i32, %c0_i32_0 : i32, i32
  }
  func.func @transform_5(%arg0: i32) -> (i32, i32) {
    %c0_i32 = arith.constant 0 : i32
    %c0_i32_0 = arith.constant 0 : i32
    %c0_i32_1 = arith.constant 0 : i32
    return %c0_i32, %c0_i32_0 : i32, i32
  }
  func.func @transform_6(%arg0: i32) -> (i32, i32) {
    %c0_i32 = arith.constant 0 : i32
    %c0_i32_0 = arith.constant 0 : i32
    %c0_i32_1 = arith.constant 0 : i32
    return %c0_i32, %c0_i32_0 : i32, i32
  }
  func.func @transform_7(%arg0: i32) -> (i32, i32) {
    %c0_i32 = arith.constant 0 : i32
    %c0_i32_0 = arith.constant 0 : i32
    %c0_i32_1 = arith.constant 0 : i32
    return %c0_i32, %c0_i32_0 : i32, i32
  }
  func.func @transform_8(%arg0: i32) -> (i32, i32) {
    %c0_i32 = arith.constant 0 : i32
    %c0_i32_0 = arith.constant 0 : i32
    %c0_i32_1 = arith.constant 0 : i32
    return %c0_i32, %c0_i32_0 : i32, i32
  }
  func.func @transform_9(%arg0: i32) -> (i32, i32) {
    %c0_i32 = arith.constant 0 : i32
    %c0_i32_0 = arith.constant 0 : i32
    %c0_i32_1 = arith.constant 0 : i32
    return %c0_i32, %c0_i32_0 : i32, i32
  }
  func.func @transform_10(%arg0: i32) -> (i32, i32) {
    %c0_i32 = arith.constant 0 : i32
    %c0_i32_0 = arith.constant 0 : i32
    %c0_i32_1 = arith.constant 0 : i32
    return %c0_i32, %c0_i32_0 : i32, i32
  }
  func.func @transform_11(%arg0: i32) -> (i32, i32) {
    %c0_i32 = arith.constant 0 : i32
    %c0_i32_0 = arith.constant 0 : i32
    %c0_i32_1 = arith.constant 0 : i32
    return %c0_i32, %c0_i32_0 : i32, i32
  }
  func.func @transform_12(%arg0: i32) -> (i32, i32) {
    %c0_i32 = arith.constant 0 : i32
    %c0_i32_0 = arith.constant 0 : i32
    %c0_i32_1 = arith.constant 0 : i32
    return %c0_i32, %c0_i32_0 : i32, i32
  }
  func.func @transform_13(%arg0: i32) -> (i32, i32) {
    %c0_i32 = arith.constant 0 : i32
    %c0_i32_0 = arith.constant 0 : i32
    %c0_i32_1 = arith.constant 0 : i32
    return %c0_i32, %c0_i32_0 : i32, i32
  }
  func.func @transform_14(%arg0: i32) -> (i32, i32) {
    %c0_i32 = arith.constant 0 : i32
    %c0_i32_0 = arith.constant 0 : i32
    %c0_i32_1 = arith.constant 0 : i32
    return %c0_i32, %c0_i32_0 : i32, i32
  }
  func.func @transform_15(%arg0: i32) -> (i32, i32) {
    %c0_i32 = arith.constant 0 : i32
    %c0_i32_0 = arith.constant 0 : i32
    %c0_i32_1 = arith.constant 0 : i32
    return %c0_i32, %c0_i32_0 : i32, i32
  }
  func.func @transform_16(%arg0: i32) -> (i32, i32) {
    %c0_i32 = arith.constant 0 : i32
    %c0_i32_0 = arith.constant 0 : i32
    %c0_i32_1 = arith.constant 0 : i32
    return %c0_i32, %c0_i32_0 : i32, i32
  }
  func.func @transform_17(%arg0: i32) -> (i32, i32) {
    %c0_i32 = arith.constant 0 : i32
    %c0_i32_0 = arith.constant 0 : i32
    %c0_i32_1 = arith.constant 0 : i32
    return %c0_i32, %c0_i32_0 : i32, i32
  }
  func.func @transform_18(%arg0: i32) -> (i32, i32) {
    %c0_i32 = arith.constant 0 : i32
    %c0_i32_0 = arith.constant 0 : i32
    %c0_i32_1 = arith.constant 0 : i32
    return %c0_i32, %c0_i32_0 : i32, i32
  }
  func.func @transform_19(%arg0: i32) -> (i32, i32) {
    %c0_i32 = arith.constant 0 : i32
    %c0_i32_0 = arith.constant 0 : i32
    return %arg0, %c0_i32 : i32, i32
  }
  func.func @transform_20(%arg0: i32) -> (i32, i32) {
    %c0_i32 = arith.constant 0 : i32
    %c0_i32_0 = arith.constant 0 : i32
    return %arg0, %c0_i32 : i32, i32
  }
}

</mosaic_0001>

<bundles_post_ra>
// kernel: tpu_custom_call.1
= control target key start
LH: loop header
LB: loop body
LE: loop exit
PB: predicated region body
PF: predicated region fallthrough
CT: control target
= control target key end

     0   :  { %s18765_s0 = inlined_call_operand.hbm [shape: bf16[16,384], index: 0, kind: input, shape index: {}]   ;;  %s18766_s1 = inlined_call_operand.hbm [shape: bf16[384,512], index: 1, kind: input, shape index: {}]   ;;  %s18767_s2 = inlined_call_operand.vmem [shape: f32[1,512], index: 2, kind: input, shape index: {}]   ;;  %s18768_s3 = inlined_call_operand.hbm [shape: bf16[512,512], index: 3, kind: input, shape index: {}]   ;;  %s18769_s4 = inlined_call_operand.vmem [shape: f32[1,512], index: 4, kind: input, shape index: {}]   ;;  %s18770_s5 = inlined_call_operand.hbm [shape: bf16[512,512], index: 5, kind: input, shape index: {}]   ;;  %s18771_s6 = inlined_call_operand.vmem [shape: f32[1,512], index: 6, kind: input, shape index: {}]   ;;  %s18772_s7 = inlined_call_operand.hbm [shape: bf16[1024,128], index: 7, kind: input, shape index: {}]   ;;  %s18773_s8 = inlined_call_operand.vmem [shape: f32[1,128], index: 8, kind: input, shape index: {}]   ;;  %s18774_s9 = inlined_call_operand.hbm [shape: bf16[128,128], index: 9, kind: input, shape index: {}]   ;;  %s18775_s10 = inlined_call_operand.vmem [shape: f32[1,128], index: 10, kind: input, shape index: {}]   ;;  %s18776_s11 = inlined_call_operand.hbm [shape: bf16[128,512], index: 11, kind: input, shape index: {}]   ;;  %s18777_s12 = inlined_call_operand.vmem [shape: f32[1,512], index: 12, kind: input, shape index: {}]   ;;  %s18778_s13 = inlined_call_operand.hbm [shape: bf16[512,512], index: 13, kind: input, shape index: {}]   ;;  %s18779_s14 = inlined_call_operand.vmem [shape: f32[1,512], index: 14, kind: input, shape index: {}]   ;;  %s18780_s15 = inlined_call_operand.hbm [shape: bf16[512,512], index: 15, kind: input, shape index: {}]   ;;  %s18781_s16 = inlined_call_operand.vmem [shape: f32[1,512], index: 16, kind: input, shape index: {}]   ;;  %s18782_s17 = inlined_call_operand.hbm [shape: bf16[512,384], index: 17, kind: input, shape index: {}]   ;;  %s18783_s18 = inlined_call_operand.vmem [shape: f32[1,384], index: 18, kind: input, shape index: {}]   ;;  %s18784_s19 = inlined_call_operand.hbm [shape: f32[16,384], index: 19, kind: output, shape index: {0}]   ;;  %s18785_s20 = inlined_call_operand.hbm [shape: f32[16,128], index: 20, kind: output, shape index: {1}]  }
   0x1   :  { %18797 = sst [smem:[#allocation30_spill]] %s18765_s0 }
   0x2   :  { %18798 = sst [smem:[#allocation31_spill]] %s18766_s1 }
   0x3   :  { %18799 = sst [smem:[#allocation32_spill]] %s18767_s2 }
   0x4   :  { %18800 = sst [smem:[#allocation33_spill]] %s18768_s3 }
   0x5   :  { %18801 = sst [smem:[#allocation34_spill]] %s18769_s4 }
   0x6   :  { %18802 = sst [smem:[#allocation35_spill]] %s18784_s19 }
   0x7   :  { %26 = vsyncpa [#allocation3], 0 }
   0x8   :  { %27 = vsyncpa [#allocation6], 0 }
   0x9   :  { %28 = vsyncpa [#allocation9], 0 }
   0xa   :  { %29 = vsyncpa [#allocation12], 0 }
   0xb   :  { %30 = vsyncpa [#allocation15], 0 }
   0xc   :  { %31 = vsyncpa [#allocation18], 0 }
   0xd   :  { %32 = vsyncpa [#allocation4], 0 }
   0xe   :  { %33 = vsyncpa [#allocation21], 0  ;;  %s18170_s1 = smov [#allocation5]   ;;  %s18803_s2 = sld [smem:[#allocation31_spill]] }
   0xf   :  { %s51_s22 = sshll.u32 %s18170_s1, 4  ;;  %s52_s22 = int_to_ptr.vmem [resolvable:$true] %s51_s22 }
  0x14   :  { %s17890_s25 = scalar_lea.hbm %s18803_s2, 12288 }
  0x15   :  { %p17891_p0 = scmp.ne.s32.totalorder %s18803_s2, %s17890_s25  ;;  %p17894_p1 = scmp.lt.u32.totalorder %s17890_s25, %s18803_s2 }
  0x17   :  { %p17896_p2 = pnand %p17894_p1, %p17891_p0 }
  0x19   :  { %17899 = shalt.err (!%p17896_p2)
}
  0x1a   :  { %s17900_s4 = scalar_lea.vmem %s52_s22, 12288  ;;  %p17905_p4 = scmp.lt.s32.totalorder %s52_s22, %s52_s22 }
  0x1b   :  { %p17901_p3 = scmp.ne.s32.totalorder %s52_s22, %s17900_s4  ;;  %p17906_p5 = scmp.lt.s32.totalorder %s17900_s4, %s17900_s4 }
  0x1d   :  { %p17907_p6 = por %p17906_p5, %p17905_p4 }
  0x1f   :  { %p17908_p7 = pnand %p17907_p6, %p17901_p3 }
  0x21   :  { %17911 = shalt.err (!%p17908_p7)
}
  0x22   :  { %s18794_s29 = smov 256   ;;  %s18172_s30 = smov 16  }
  0x23   :  { %57 = dma.hbm_to_vmem [thread:$0]  %s18803_s2, 12288, %s52_s22, [#allocation6], %s18794_s29, %s18794_s29, %s18172_s30  }
  0x24   :  { %s18173_s1 = smov [#allocation8]   ;;  %s17912_s3 = scalar_lea.hbm %s18770_s5, 16384 }
  0x25   :  { %s79_s23 = sshll.u32 %s18173_s1, 4  ;;  %p17913_p8 = scmp.ne.s32.totalorder %s18770_s5, %s17912_s3  ;;  %s80_s23 = int_to_ptr.vmem [resolvable:$true] %s79_s23 }
  0x26   :  { %p17916_p9 = scmp.lt.u32.totalorder %s17912_s3, %s18770_s5 }
  0x28   :  { %p17918_p10 = pnand %p17916_p9, %p17913_p8 }
  0x2a   :  { %17921 = shalt.err (!%p17918_p10)
}
  0x2b   :  { %s17922_s19 = scalar_lea.vmem %s80_s23, 16384  ;;  %p17927_p12 = scmp.lt.s32.totalorder %s80_s23, %s80_s23 }
  0x2c   :  { %p17923_p11 = scmp.ne.s32.totalorder %s80_s23, %s17922_s19  ;;  %p17928_p13 = scmp.lt.s32.totalorder %s17922_s19, %s17922_s19 }
  0x2e   :  { %p17929_p0 = por %p17928_p13, %p17927_p12 }
  0x30   :  { %p17930_p1 = pnand %p17929_p0, %p17923_p11 }
  0x32   :  { %17933 = shalt.err (!%p17930_p1)
}
  0x33   :  { %85 = dma.hbm_to_vmem [thread:$0]  %s18770_s5, 16384, %s80_s23, [#allocation9], %s18794_s29, %s18794_s29, %s18172_s30  }
  0x34   :  { %s18174_s0 = smov [#allocation11]   ;;  %s18175_s1 = smov [#allocation14]  }
  0x35   :  { %s107_s21 = sshll.u32 %s18174_s0, 4  ;;  %s135_s24 = sshll.u32 %s18175_s1, 4  ;;  %s108_s21 = int_to_ptr.vmem [resolvable:$true] %s107_s21  ;;  %s18330_s24 = int_to_ptr.vmem [resolvable:$true] %s135_s24 }
  0x36   :  { %s17934_s19 = scalar_lea.hbm %s18774_s9, 1024 }
  0x37   :  { %p17935_p2 = scmp.ne.s32.totalorder %s18774_s9, %s17934_s19  ;;  %p17938_p3 = scmp.lt.u32.totalorder %s17934_s19, %s18774_s9 }
  0x39   :  { %p17940_p4 = pnand %p17938_p3, %p17935_p2 }
  0x3b   :  { %17943 = shalt.err (!%p17940_p4)
}
  0x3c   :  { %s17944_s5 = scalar_lea.vmem %s108_s21, 1024  ;;  %p17949_p6 = scmp.lt.s32.totalorder %s108_s21, %s108_s21 }
  0x3d   :  { %p17945_p5 = scmp.ne.s32.totalorder %s108_s21, %s17944_s5  ;;  %p17950_p7 = scmp.lt.s32.totalorder %s17944_s5, %s17944_s5 }
  0x3f   :  { %p17951_p8 = por %p17950_p7, %p17949_p6 }
  0x41   :  { %p17952_p9 = pnand %p17951_p8, %p17945_p5 }
  0x43   :  { %17955 = shalt.err (!%p17952_p9)
}
  0x44   :  { %s18792_s23 = smov 64   ;;  %s18793_s22 = smov 4  }
  0x45   :  { %113 = dma.hbm_to_vmem [thread:$0]  %s18774_s9, 1024, %s108_s21, [#allocation12], %s18792_s23, %s18792_s23, %s18793_s22  }
  0x46   :  { %s17956_s3 = scalar_lea.hbm %s18778_s13, 16384 }
  0x47   :  { %p17957_p10 = scmp.ne.s32.totalorder %s18778_s13, %s17956_s3  ;;  %p17960_p11 = scmp.lt.u32.totalorder %s17956_s3, %s18778_s13 }
  0x49   :  { %p17962_p12 = pnand %p17960_p11, %p17957_p10 }
  0x4b   :  { %17965 = shalt.err (!%p17962_p12)
}
  0x4c   :  { %s17966_s4 = scalar_lea.vmem %s18330_s24, 16384  ;;  %p17971_p0 = scmp.lt.s32.totalorder %s18330_s24, %s18330_s24 }
  0x4d   :  { %p17967_p13 = scmp.ne.s32.totalorder %s18330_s24, %s17966_s4  ;;  %p17972_p1 = scmp.lt.s32.totalorder %s17966_s4, %s17966_s4 }
  0x4f   :  { %p17973_p2 = por %p17972_p1, %p17971_p0 }
  0x51   :  { %p17974_p3 = pnand %p17973_p2, %p17967_p13 }
  0x53   :  { %17977 = shalt.err (!%p17974_p3)
}
  0x54   :  { %141 = dma.hbm_to_vmem [thread:$0]  %s18778_s13, 16384, %s18330_s24, [#allocation15], %s18794_s29, %s18794_s29, %s18172_s30  }
  0x55   :  { %s18178_s5 = smov [#allocation2]   ;;  %s18804_s25 = sld [smem:[#allocation30_spill]] }
  0x56   :  { %s39_s2 = sshll.u32 %s18178_s5, 4  ;;  %s40_s2 = int_to_ptr.vmem [resolvable:$true] %s39_s2 }
  0x5b   :  { %s17978_s3 = scalar_lea.hbm %s18804_s25, 384 }
  0x5c   :  { %p17979_p4 = scmp.ne.s32.totalorder %s18804_s25, %s17978_s3  ;;  %p17982_p5 = scmp.lt.u32.totalorder %s17978_s3, %s18804_s25 }
  0x5e   :  { %p17984_p6 = pnand %p17982_p5, %p17979_p4 }
  0x60   :  { %17987 = shalt.err (!%p17984_p6)
}
  0x61   :  { %s17988_s4 = scalar_lea.vmem %s40_s2, 384  ;;  %p17993_p8 = scmp.lt.s32.totalorder %s40_s2, %s40_s2 }
  0x62   :  { %p17989_p7 = scmp.ne.s32.totalorder %s40_s2, %s17988_s4  ;;  %p17994_p9 = scmp.lt.s32.totalorder %s17988_s4, %s17988_s4 }
  0x64   :  { %p17995_p10 = por %p17994_p9, %p17993_p8 }
  0x66   :  { %p17996_p11 = pnand %p17995_p10, %p17989_p7 }
  0x68   :  { %17999 = shalt.err (!%p17996_p11)
}
  0x69   :  { %s18796_s13 = smov 192   ;;  %s18180_s24 = smov 12  }
  0x6a   :  { %45 = dma.hbm_to_vmem [thread:$0]  %s18804_s25, 384, %s40_s2, [#allocation3], %s18796_s13, %s18796_s13, %s18180_s24  }
  0x6b   :  { %s18181_s5 = smov [#allocation7]   ;;  %s18182_s1 = smov [#allocation10]  }
  0x6c   :  { %s65_s0 = sshll.u32 %s18181_s5, 4  ;;  %s93_s3 = sshll.u32 %s18182_s1, 4  ;;  %s66_s0 = int_to_ptr.vmem [resolvable:$true] %s65_s0  ;;  %s94_s3 = int_to_ptr.vmem [resolvable:$true] %s93_s3 }
  0x6d   :  { %s18805_s27 = sld [smem:[#allocation33_spill]] }
  0x73   :  { %s18000_s28 = scalar_lea.hbm %s18805_s27, 16384 }
  0x74   :  { %p18001_p12 = scmp.ne.s32.totalorder %s18805_s27, %s18000_s28  ;;  %p18004_p13 = scmp.lt.u32.totalorder %s18000_s28, %s18805_s27 }
  0x76   :  { %p18006_p0 = pnand %p18004_p13, %p18001_p12 }
  0x78   :  { %18009 = shalt.err (!%p18006_p0)
}
  0x79   :  { %s18010_s2 = scalar_lea.vmem %s66_s0, 16384  ;;  %p18015_p2 = scmp.lt.s32.totalorder %s66_s0, %s66_s0 }
  0x7a   :  { %p18011_p1 = scmp.ne.s32.totalorder %s66_s0, %s18010_s2  ;;  %p18016_p3 = scmp.lt.s32.totalorder %s18010_s2, %s18010_s2 }
  0x7c   :  { %p18017_p4 = por %p18016_p3, %p18015_p2 }
  0x7e   :  { %p18018_p5 = pnand %p18017_p4, %p18011_p1 }
  0x80   :  { %18021 = shalt.err (!%p18018_p5)
}
  0x81   :  { %s18806_s25 = smov 256   ;;  %s18022_s22 = scalar_lea.hbm %s18772_s7, 8192 }
  0x82   :  { %71 = dma.hbm_to_vmem [thread:$0]  %s18805_s27, 16384, %s66_s0, [#allocation6], %s18806_s25, %s18806_s25, %s18172_s30  }
  0x83   :  { %p18023_p6 = scmp.ne.s32.totalorder %s18772_s7, %s18022_s22  ;;  %p18026_p7 = scmp.lt.u32.totalorder %s18022_s22, %s18772_s7 }
  0x85   :  { %p18028_p8 = pnand %p18026_p7, %p18023_p6 }
  0x87   :  { %18031 = shalt.err (!%p18028_p8)
}
  0x88   :  { %s18032_s28 = scalar_lea.vmem %s94_s3, 8192  ;;  %p18037_p10 = scmp.lt.s32.totalorder %s94_s3, %s94_s3 }
  0x89   :  { %p18033_p9 = scmp.ne.s32.totalorder %s94_s3, %s18032_s28  ;;  %p18038_p11 = scmp.lt.s32.totalorder %s18032_s28, %s18032_s28 }
  0x8b   :  { %p18039_p12 = por %p18038_p11, %p18037_p10 }
  0x8d   :  { %p18040_p13 = pnand %p18039_p12, %p18033_p9 }
  0x8f   :  { %18043 = shalt.err (!%p18040_p13)
}
  0x90   :  { %s18807_s0 = smov 4   ;;  %s18808_s27 = smov 64  }
  0x91   :  { %99 = dma.hbm_to_vmem [thread:$0]  %s18772_s7, 8192, %s94_s3, [#allocation9], %s18808_s27, %s18808_s27, %s18807_s0  }
  0x92   :  { %s18183_s9 = smov [#allocation13]   ;;  %s18184_s23 = smov [#allocation16]  }
  0x93   :  { %s121_s21 = sshll.u32 %s18183_s9, 4  ;;  %s149_s29 = sshll.u32 %s18184_s23, 4  ;;  %s122_s21 = int_to_ptr.vmem [resolvable:$true] %s121_s21  ;;  %s150_s29 = int_to_ptr.vmem [resolvable:$true] %s149_s29 }
  0x94   :  { %s18044_s1 = scalar_lea.hbm %s18776_s11, 4096 }
  0x95   :  { %p18045_p0 = scmp.ne.s32.totalorder %s18776_s11, %s18044_s1  ;;  %p18048_p1 = scmp.lt.u32.totalorder %s18044_s1, %s18776_s11 }
  0x97   :  { %p18050_p2 = pnand %p18048_p1, %p18045_p0 }
  0x99   :  { %18053 = shalt.err (!%p18050_p2)
}
  0x9a   :  { %s18054_s7 = scalar_lea.vmem %s122_s21, 4096  ;;  %p18059_p4 = scmp.lt.s32.totalorder %s122_s21, %s122_s21 }
  0x9b   :  { %p18055_p3 = scmp.ne.s32.totalorder %s122_s21, %s18054_s7  ;;  %p18060_p5 = scmp.lt.s32.totalorder %s18054_s7, %s18054_s7 }
  0x9d   :  { %p18061_p6 = por %p18060_p5, %p18059_p4 }
  0x9f   :  { %p18062_p7 = pnand %p18061_p6, %p18055_p3 }
  0xa1   :  { %18065 = shalt.err (!%p18062_p7)
}
  0xa2   :  { %127 = dma.hbm_to_vmem [thread:$0]  %s18776_s11, 4096, %s122_s21, [#allocation12], %s18806_s25, %s18806_s25, %s18172_s30  }
  0xa3   :  { %s18066_s4 = scalar_lea.hbm %s18780_s15, 16384 }
  0xa4   :  { %p18067_p8 = scmp.ne.s32.totalorder %s18780_s15, %s18066_s4  ;;  %p18070_p9 = scmp.lt.u32.totalorder %s18066_s4, %s18780_s15 }
  0xa6   :  { %p18072_p10 = pnand %p18070_p9, %p18067_p8 }
  0xa8   :  { %18075 = shalt.err (!%p18072_p10)
}
  0xa9   :  { %s18076_s5 = scalar_lea.vmem %s150_s29, 16384  ;;  %p18081_p12 = scmp.lt.s32.totalorder %s150_s29, %s150_s29 }
  0xaa   :  { %p18077_p11 = scmp.ne.s32.totalorder %s150_s29, %s18076_s5  ;;  %p18082_p13 = scmp.lt.s32.totalorder %s18076_s5, %s18076_s5 }
  0xac   :  { %p18083_p0 = por %p18082_p13, %p18081_p12 }
  0xae   :  { %p18084_p1 = pnand %p18083_p0, %p18077_p11 }
  0xb0   :  { %18087 = shalt.err (!%p18084_p1)
}
  0xb1   :  { %155 = dma.hbm_to_vmem [thread:$0]  %s18780_s15, 16384, %s150_s29, [#allocation15], %s18806_s25, %s18806_s25, %s18172_s30  }
  0xb2   :  { %s18185_s1 = smov [#allocation17]   ;;  %s18088_s7 = scalar_lea.hbm %s18782_s17, 12288 }
  0xb3   :  { %s163_s19 = sshll.u32 %s18185_s1, 4  ;;  %p18089_p2 = scmp.ne.s32.totalorder %s18782_s17, %s18088_s7  ;;  %s164_s19 = int_to_ptr.vmem [resolvable:$true] %s163_s19 }
  0xb4   :  { %p18092_p3 = scmp.lt.u32.totalorder %s18088_s7, %s18782_s17 }
  0xb6   :  { %p18094_p4 = pnand %p18092_p3, %p18089_p2 }
  0xb8   :  { %18097 = shalt.err (!%p18094_p4)
}
  0xb9   :  { %s18098_s4 = scalar_lea.vmem %s164_s19, 12288  ;;  %p18103_p6 = scmp.lt.s32.totalorder %s164_s19, %s164_s19 }
  0xba   :  { %p18099_p5 = scmp.ne.s32.totalorder %s164_s19, %s18098_s4  ;;  %p18104_p7 = scmp.lt.s32.totalorder %s18098_s4, %s18098_s4 }
  0xbc   :  { %p18105_p8 = por %p18104_p7, %p18103_p6 }
  0xbe   :  { %p18106_p9 = pnand %p18105_p8, %p18099_p5 }
  0xc0   :  { %18109 = shalt.err (!%p18106_p9)
}
  0xc1   :  { %s18809_s15 = smov 192  }
  0xc2   :  { %169 = dma.hbm_to_vmem [thread:$0]  %s18782_s17, 12288, %s164_s19, [#allocation18], %s18809_s15, %s18809_s15, %s18180_s24  }
  0xc3   :  { %18154 = dma.done.wait [#allocation3], 384  }
  0xc4   :  { %18155 = vsyncadd [#allocation3], 4294966912 }
  0xc5   :  { %18156 = dma.done.wait [#allocation6], 28672  }
  0xc6   :  { %18157 = vsyncadd [#allocation6], 4294938624 }
  0xc7   :  { %18158 = dma.done.wait [#allocation9], 24576  }
  0xc8   :  { %18159 = vsyncadd [#allocation9], 4294942720 }
  0xc9   :  { %18160 = dma.done.wait [#allocation12], 5120  }
  0xca   :  { %18161 = vsyncadd [#allocation12], 4294962176 }
  0xcb   :  { %18162 = dma.done.wait [#allocation15], 32768  }
  0xcc   :  { %18163 = vsyncadd [#allocation15], 4294934528 }
  0xcd   :  { %18164 = dma.done.wait [#allocation18], 12288  }
  0xce   :  { %18165 = vsyncadd [#allocation18], 4294955008  ;;  %v18186_v0 = vmov 0   ;;  %v15452_v1 = vld [vmem:[#allocation5 + $0x4] ss:$16 sps:$4 sm:$0xff]   ;;  %v203_v49 = vld [vmem:[#allocation2] sm:$0xff] }
  0xcf   :  { %887 = vmatprep.mubr.bf16.mxu1 %v18186_v0  ;;  %v15454_v2 = vld [vmem:[#allocation5 + $0x204] ss:$16 sps:$4 sm:$0xff]   ;;  %814 = vmatprep.subr.bf16.mxu0 %v15452_v1  ;;  %v15456_v3 = vld [vmem:[#allocation5] ss:$16 sps:$4 sm:$0xff]   ;;  %v15505_v34 = vld [vmem:[#allocation5 + $0xc] ss:$16 sps:$4 sm:$0xff]   ;;  %v13350_v52 = vcombine.high %v203_v49, %v203_v49 }
  0xd0   :  { %v15457_v4 = vld [vmem:[#allocation5 + $0x200] ss:$16 sps:$4 sm:$0xff]   ;;  %855 = vmatprep.subr.bf16.mxu1 %v15454_v2  ;;  %v15458_v5 = vld [vmem:[#allocation5 + $0x24] ss:$16 sps:$4 sm:$0xff]   ;;  %815 = vmatpush1.bf16.msra.mxu0 %v15456_v3  ;;  %v15503_v36 = vld [vmem:[#allocation5 + $0x8] ss:$16 sps:$4 sm:$0xff]  }
  0xd1   :  { %856 = vmatpush1.bf16.msra.mxu1 %v15457_v4  ;;  %v15460_v6 = vld [vmem:[#allocation5 + $0x224] ss:$16 sps:$4 sm:$0xff]   ;;  %v15462_v7 = vld [vmem:[#allocation5 + $0x20] ss:$16 sps:$4 sm:$0xff]   ;;  %816 = vmatprep.subr.bf16.mxu0 %v15458_v5  ;;  %v15511_v39 = vld [vmem:[#allocation5 + $0x2c] ss:$16 sps:$4 sm:$0xff]  }
  0xd2   :  { %v15463_v8 = vld [vmem:[#allocation5 + $0x220] ss:$16 sps:$4 sm:$0xff]   ;;  %857 = vmatprep.subr.bf16.mxu1 %v15460_v6  ;;  %v15464_v9 = vld [vmem:[#allocation5 + $0x44] ss:$16 sps:$4 sm:$0xff]   ;;  %v15509_v40 = vld [vmem:[#allocation5 + $0x28] ss:$16 sps:$4 sm:$0xff]   ;;  %846 = vmatprep.mubr.bf16.mxu0 %v13350_v52  ;;  %v13349_v6 = vcombine.low %v203_v49, %v203_v49 }
  0xd3   :  { %v15466_v10 = vld [vmem:[#allocation5 + $0x244] ss:$16 sps:$4 sm:$0xff]   ;;  %v15468_v11 = vld [vmem:[#allocation5 + $0x40] ss:$16 sps:$4 sm:$0xff]   ;;  %v15517_v43 = vld [vmem:[#allocation5 + $0x4c] ss:$16 sps:$4 sm:$0xff]  }
  0xd4   :  { %v15469_v12 = vld [vmem:[#allocation5 + $0x240] ss:$16 sps:$4 sm:$0xff]   ;;  %817 = vmatpush1.bf16.msra.mxu0 %v15462_v7  ;;  %v15470_v13 = vld [vmem:[#allocation5 + $0x64] ss:$16 sps:$4 sm:$0xff]   ;;  %v15515_v44 = vld [vmem:[#allocation5 + $0x48] ss:$16 sps:$4 sm:$0xff]  }
  0xd5   :  { %858 = vmatpush1.bf16.msra.mxu1 %v15463_v8  ;;  %818 = vmatprep.subr.bf16.mxu0 %v15464_v9  ;;  %v15472_v14 = vld [vmem:[#allocation5 + $0x264] ss:$16 sps:$4 sm:$0xff]   ;;  %v15474_v15 = vld [vmem:[#allocation5 + $0x60] ss:$16 sps:$4 sm:$0xff]   ;;  %v15523_v47 = vld [vmem:[#allocation5 + $0x6c] ss:$16 sps:$4 sm:$0xff]  }
  0xd6   :  { %859 = vmatprep.subr.bf16.mxu1 %v15466_v10  ;;  %v15475_v16 = vld [vmem:[#allocation5 + $0x260] ss:$16 sps:$4 sm:$0xff]   ;;  %v15476_v17 = vld [vmem:[#allocation5 + $0x84] ss:$16 sps:$4 sm:$0xff]   ;;  %v15521_v48 = vld [vmem:[#allocation5 + $0x68] ss:$16 sps:$4 sm:$0xff]  }
  0xd7   :  { %v15478_v18 = vld [vmem:[#allocation5 + $0x284] ss:$16 sps:$4 sm:$0xff]   ;;  %v15480_v19 = vld [vmem:[#allocation5 + $0x80] ss:$16 sps:$4 sm:$0xff]   ;;  %v15529_v53 = vld [vmem:[#allocation5 + $0x8c] ss:$16 sps:$4 sm:$0xff]  }
  0xd8   :  { %819 = vmatpush1.bf16.msra.mxu0 %v15468_v11  ;;  %v15481_v20 = vld [vmem:[#allocation5 + $0x280] ss:$16 sps:$4 sm:$0xff]   ;;  %v15482_v21 = vld [vmem:[#allocation5 + $0xa4] ss:$16 sps:$4 sm:$0xff]   ;;  %v15527_v54 = vld [vmem:[#allocation5 + $0x88] ss:$16 sps:$4 sm:$0xff]  }
  0xd9   :  { %860 = vmatpush1.bf16.msra.mxu1 %v15469_v12  ;;  %820 = vmatprep.subr.bf16.mxu0 %v15470_v13  ;;  %v15484_v22 = vld [vmem:[#allocation5 + $0x2a4] ss:$16 sps:$4 sm:$0xff]   ;;  %v15486_v23 = vld [vmem:[#allocation5 + $0xa0] ss:$16 sps:$4 sm:$0xff]   ;;  %v15535_v57 = vld [vmem:[#allocation5 + $0xac] ss:$16 sps:$4 sm:$0xff]  }
  0xda   :  { %861 = vmatprep.subr.bf16.mxu1 %v15472_v14  ;;  %v15487_v24 = vld [vmem:[#allocation5 + $0x2a0] ss:$16 sps:$4 sm:$0xff]   ;;  %v15488_v25 = vld [vmem:[#allocation5 + $0xc4] ss:$16 sps:$4 sm:$0xff]   ;;  %v15533_v58 = vld [vmem:[#allocation5 + $0xa8] ss:$16 sps:$4 sm:$0xff]  }
  0xdb   :  { %v15490_v26 = vld [vmem:[#allocation5 + $0x2c4] ss:$16 sps:$4 sm:$0xff]   ;;  %v15492_v27 = vld [vmem:[#allocation5 + $0xc0] ss:$16 sps:$4 sm:$0xff]   ;;  %v15541_v61 = vld [vmem:[#allocation5 + $0xcc] ss:$16 sps:$4 sm:$0xff]  }
  0xdc   :  { %821 = vmatpush1.bf16.msra.mxu0 %v15474_v15  ;;  %v15493_v28 = vld [vmem:[#allocation5 + $0x2c0] ss:$16 sps:$4 sm:$0xff]   ;;  %v15494_v29 = vld [vmem:[#allocation5 + $0xe4] ss:$16 sps:$4 sm:$0xff]   ;;  %v15539_v62 = vld [vmem:[#allocation5 + $0xc8] ss:$16 sps:$4 sm:$0xff]  }
  0xdd   :  { %862 = vmatpush1.bf16.msra.mxu1 %v15475_v16  ;;  %822 = vmatprep.subr.bf16.mxu0 %v15476_v17  ;;  %v15496_v30 = vld [vmem:[#allocation5 + $0x2e4] ss:$16 sps:$4 sm:$0xff]   ;;  %v15498_v31 = vld [vmem:[#allocation5 + $0xe0] ss:$16 sps:$4 sm:$0xff]   ;;  %v15547_v2 = vld [vmem:[#allocation5 + $0xec] ss:$16 sps:$4 sm:$0xff]  }
  0xde   :  { %863 = vmatprep.subr.bf16.mxu1 %v15478_v18  ;;  %v15499_v32 = vld [vmem:[#allocation5 + $0x2e0] ss:$16 sps:$4 sm:$0xff]   ;;  %v15500_v33 = vld [vmem:[#allocation5 + $0x104] ss:$16 sps:$4 sm:$0xff]   ;;  %v15545_v3 = vld [vmem:[#allocation5 + $0xe8] ss:$16 sps:$4 sm:$0xff]  }
  0xdf   :  { %v18458_v35 = vld [vmem:[#allocation2 + $0x8] ss:$0 sps:$4 sm:$0xff]   ;;  %v15507_v38 = vld [vmem:[#allocation5 + $0x124] ss:$16 sps:$4 sm:$0xff]   ;;  %v15553_v5 = vld [vmem:[#allocation5 + $0x10c] ss:$16 sps:$4 sm:$0xff]  }
  0xe0   :  { %823 = vmatpush1.bf16.msra.mxu0 %v15480_v19  ;;  %v15506_v37 = vld [vmem:[#allocation5 + $0x100] ss:$16 sps:$4 sm:$0xff]   ;;  %v15513_v42 = vld [vmem:[#allocation5 + $0x144] ss:$16 sps:$4 sm:$0xff]   ;;  %v15551_v7 = vld [vmem:[#allocation5 + $0x108] ss:$16 sps:$4 sm:$0xff]  }
  0xe1   :  { %864 = vmatpush1.bf16.msra.mxu1 %v15481_v20  ;;  %824 = vmatprep.subr.bf16.mxu0 %v15482_v21  ;;  %v15512_v41 = vld [vmem:[#allocation5 + $0x120] ss:$16 sps:$4 sm:$0xff]   ;;  %v15519_v46 = vld [vmem:[#allocation5 + $0x164] ss:$16 sps:$4 sm:$0xff]   ;;  %v15556_v8 = vld [vmem:[#allocation5 + $0x12c] ss:$16 sps:$4 sm:$0xff]  }
  0xe2   :  { %865 = vmatprep.subr.bf16.mxu1 %v15484_v22  ;;  %v15518_v45 = vld [vmem:[#allocation5 + $0x140] ss:$16 sps:$4 sm:$0xff]   ;;  %v15525_v51 = vld [vmem:[#allocation5 + $0x184] ss:$16 sps:$4 sm:$0xff]   ;;  %v15554_v11 = vld [vmem:[#allocation5 + $0x128] ss:$16 sps:$4 sm:$0xff]  }
  0xe3   :  { %v15524_v50 = vld [vmem:[#allocation5 + $0x160] ss:$16 sps:$4 sm:$0xff]   ;;  %v15531_v56 = vld [vmem:[#allocation5 + $0x1a4] ss:$16 sps:$4 sm:$0xff]   ;;  %v15559_v12 = vld [vmem:[#allocation5 + $0x14c] ss:$16 sps:$4 sm:$0xff]  }
  0xe4   :  { %825 = vmatpush1.bf16.msra.mxu0 %v15486_v23  ;;  %v15530_v55 = vld [vmem:[#allocation5 + $0x180] ss:$16 sps:$4 sm:$0xff]   ;;  %v15537_v60 = vld [vmem:[#allocation5 + $0x1c4] ss:$16 sps:$4 sm:$0xff]   ;;  %v15557_v15 = vld [vmem:[#allocation5 + $0x148] ss:$16 sps:$4 sm:$0xff]  }
  0xe5   :  { %866 = vmatpush1.bf16.msra.mxu1 %v15487_v24  ;;  %826 = vmatprep.subr.bf16.mxu0 %v15488_v25  ;;  %v15536_v59 = vld [vmem:[#allocation5 + $0x1a0] ss:$16 sps:$4 sm:$0xff]   ;;  %v15543_v1 = vld [vmem:[#allocation5 + $0x1e4] ss:$16 sps:$4 sm:$0xff]   ;;  %v15562_v17 = vld [vmem:[#allocation5 + $0x16c] ss:$16 sps:$4 sm:$0xff]  }
  0xe6   :  { %867 = vmatprep.subr.bf16.mxu1 %v15490_v26  ;;  %v15542_v63 = vld [vmem:[#allocation5 + $0x1c0] ss:$16 sps:$4 sm:$0xff]   ;;  %v15601_v10 = vld [vmem:[#allocation7 + $0x4] ss:$16 sps:$4 sm:$0xff]   ;;  %v15560_v19 = vld [vmem:[#allocation5 + $0x168] ss:$16 sps:$4 sm:$0xff]  }
  0xe7   :  { %v15548_v4 = vld [vmem:[#allocation5 + $0x1e0] ss:$16 sps:$4 sm:$0xff]   ;;  %v15607_v13 = vld [vmem:[#allocation7 + $0x24] ss:$16 sps:$4 sm:$0xff]   ;;  %v15565_v20 = vld [vmem:[#allocation5 + $0x18c] ss:$16 sps:$4 sm:$0xff]  }
  0xe8   :  { %827 = vmatpush1.bf16.msra.mxu0 %v15492_v27  ;;  %v15599_v9 = vld [vmem:[#allocation7] ss:$16 sps:$4 sm:$0xff]   ;;  %v15613_v16 = vld [vmem:[#allocation7 + $0x44] ss:$16 sps:$4 sm:$0xff]   ;;  %v15563_v21 = vld [vmem:[#allocation5 + $0x188] ss:$16 sps:$4 sm:$0xff]  }
  0xe9   :  { %868 = vmatpush1.bf16.msra.mxu1 %v15493_v28  ;;  %828 = vmatprep.subr.bf16.mxu0 %v15494_v29  ;;  %v15605_v14 = vld [vmem:[#allocation7 + $0x20] ss:$16 sps:$4 sm:$0xff]   ;;  %v15568_v22 = vld [vmem:[#allocation5 + $0x1ac] ss:$16 sps:$4 sm:$0xff]   ;;  %v15566_v23 = vld [vmem:[#allocation5 + $0x1a8] ss:$16 sps:$4 sm:$0xff]  }
  0xea   :  { %869 = vmatprep.subr.bf16.mxu1 %v15496_v30  ;;  %v15611_v18 = vld [vmem:[#allocation7 + $0x40] ss:$16 sps:$4 sm:$0xff]   ;;  %v15571_v24 = vld [vmem:[#allocation5 + $0x1cc] ss:$16 sps:$4 sm:$0xff]   ;;  %v15569_v25 = vld [vmem:[#allocation5 + $0x1c8] ss:$16 sps:$4 sm:$0xff]  }
  0xeb   :  { %v15574_v26 = vld [vmem:[#allocation5 + $0x1ec] ss:$16 sps:$4 sm:$0xff]   ;;  %v15572_v27 = vld [vmem:[#allocation5 + $0x1e8] ss:$16 sps:$4 sm:$0xff]   ;;  %v15629_v49 = vld [vmem:[#allocation7 + $0xa0] ss:$16 sps:$4 sm:$0xff]  }
  0xec   :  { %829 = vmatpush1.bf16.msra.mxu0 %v15498_v31  ;;  %v15577_v28 = vld [vmem:[#allocation5 + $0x20c] ss:$16 sps:$4 sm:$0xff]   ;;  %v15575_v29 = vld [vmem:[#allocation5 + $0x208] ss:$16 sps:$4 sm:$0xff]   ;;  %s18810_s29 = sld [smem:[#allocation32_spill]]  ;;  %s18811_s23 = sld [smem:[#allocation34_spill]] }
  0xed   :  { %870 = vmatpush1.bf16.msra.mxu1 %v15499_v32  ;;  %830 = vmatprep.subr.bf16.mxu0 %v15500_v33  ;;  %v15580_v30 = vld [vmem:[#allocation5 + $0x22c] ss:$16 sps:$4 sm:$0xff]   ;;  %v15578_v31 = vld [vmem:[#allocation5 + $0x228] ss:$16 sps:$4 sm:$0xff]   ;;  %vm18188_vm0 = vmmov 0  }
  0xee   :  { %896 = vmatprep.subr.bf16.mxu1 %v15505_v34  ;;  %v15583_v32 = vld [vmem:[#allocation5 + $0x24c] ss:$16 sps:$4 sm:$0xff]   ;;  %v15581_v33 = vld [vmem:[#allocation5 + $0x248] ss:$16 sps:$4 sm:$0xff]  }
  0xef   :  { %v15586_v34 = vld [vmem:[#allocation5 + $0x26c] ss:$16 sps:$4 sm:$0xff]  }
  0xf0   :  { %888 = vmatmul.mubr.bf16.vlgmr.msra.gmra.mrb[0].mxu1 %v18458_v35  ;;  %831 = vmatpush1.bf16.msra.mxu0 %v15506_v37  ;;  %v15589_v37 = vld [vmem:[#allocation5 + $0x28c] ss:$16 sps:$4 sm:$0xff]  }
  0xf1   :  { %897 = vmatpush1.bf16.msra.mxu1 %v15503_v36  ;;  %832 = vmatprep.subr.bf16.mxu0 %v15507_v38  ;;  %v15584_v36 = vld [vmem:[#allocation5 + $0x268] ss:$16 sps:$4 sm:$0xff]  }
  0xf2   :  { %898 = vmatprep.subr.bf16.mxu1 %v15511_v39  ;;  %928 = vmatprep.mubr.bf16.mxu1 %v13350_v52  ;;  %v15587_v38 = vld [vmem:[#allocation5 + $0x288] ss:$16 sps:$4 sm:$0xff]   ;;  %v15592_v39 = vld [vmem:[#allocation5 + $0x2ac] ss:$16 sps:$4 sm:$0xff]  }
  0xf3   :  { %v15604_v52 = vld [vmem:[#allocation7 + $0xc] ss:$16 sps:$4 sm:$0xff]  }
  0xf4   :  { %833 = vmatpush1.bf16.msra.mxu0 %v15512_v41  ;;  %v15619_v41 = vld [vmem:[#allocation7 + $0x64] ss:$16 sps:$4 sm:$0xff]  }
  0xf5   :  { %899 = vmatpush1.bf16.msra.mxu1 %v15509_v40  ;;  %834 = vmatprep.subr.bf16.mxu0 %v15513_v42  ;;  %v15590_v40 = vld [vmem:[#allocation5 + $0x2a8] ss:$16 sps:$4 sm:$0xff]   ;;  %v15595_v42 = vld [vmem:[#allocation5 + $0x2cc] ss:$16 sps:$4 sm:$0xff]  }
  0xf6   :  { %900 = vmatprep.subr.bf16.mxu1 %v15517_v43  ;;  %v15617_v43 = vld [vmem:[#allocation7 + $0x60] ss:$16 sps:$4 sm:$0xff]  }
  0xf8   :  { %835 = vmatpush1.bf16.msra.mxu0 %v15518_v45  ;;  %v15625_v45 = vld [vmem:[#allocation7 + $0x84] ss:$16 sps:$4 sm:$0xff]  }
  0xf9   :  { %901 = vmatpush1.bf16.msra.mxu1 %v15515_v44  ;;  %836 = vmatprep.subr.bf16.mxu0 %v15519_v46  ;;  %v15593_v44 = vld [vmem:[#allocation5 + $0x2c8] ss:$16 sps:$4 sm:$0xff]   ;;  %v15598_v46 = vld [vmem:[#allocation5 + $0x2ec] ss:$16 sps:$4 sm:$0xff]  }
  0xfa   :  { %902 = vmatprep.subr.bf16.mxu1 %v15523_v47  ;;  %v15623_v47 = vld [vmem:[#allocation7 + $0x80] ss:$16 sps:$4 sm:$0xff]  }
  0xfc   :  { %837 = vmatpush1.bf16.msra.mxu0 %v15524_v50  ;;  %v15596_v50 = vld [vmem:[#allocation5 + $0x2e8] ss:$16 sps:$4 sm:$0xff]  }
  0xfd   :  { %903 = vmatpush1.bf16.msra.mxu1 %v15521_v48  ;;  %838 = vmatprep.subr.bf16.mxu0 %v15525_v51  ;;  %v15631_v48 = vld [vmem:[#allocation7 + $0xa4] ss:$16 sps:$4 sm:$0xff]  }
  0xfe   :  { %904 = vmatprep.subr.bf16.mxu1 %v15529_v53  ;;  %v15637_v51 = vld [vmem:[#allocation7 + $0xc4] ss:$16 sps:$4 sm:$0xff]   ;;  %v15635_v53 = vld [vmem:[#allocation7 + $0xc0] ss:$16 sps:$4 sm:$0xff]  }
 0x100   :  { %839 = vmatpush1.bf16.msra.mxu0 %v15530_v55  ;;  %v15643_v55 = vld [vmem:[#allocation7 + $0xe4] ss:$16 sps:$4 sm:$0xff]  }
 0x101   :  { %905 = vmatpush1.bf16.msra.mxu1 %v15527_v54  ;;  %840 = vmatprep.subr.bf16.mxu0 %v15531_v56  ;;  %v15602_v54 = vld [vmem:[#allocation7 + $0x8] ss:$16 sps:$4 sm:$0xff]   ;;  %v15610_v56 = vld [vmem:[#allocation7 + $0x2c] ss:$16 sps:$4 sm:$0xff]  }
 0x102   :  { %906 = vmatprep.subr.bf16.mxu1 %v15535_v57  ;;  %v15641_v57 = vld [vmem:[#allocation7 + $0xe0] ss:$16 sps:$4 sm:$0xff]  }
 0x104   :  { %841 = vmatpush1.bf16.msra.mxu0 %v15536_v59  ;;  %v15649_v59 = vld [vmem:[#allocation7 + $0x104] ss:$16 sps:$4 sm:$0xff]  }
 0x105   :  { %907 = vmatpush1.bf16.msra.mxu1 %v15533_v58  ;;  %842 = vmatprep.subr.bf16.mxu0 %v15537_v60  ;;  %v15608_v58 = vld [vmem:[#allocation7 + $0x28] ss:$16 sps:$4 sm:$0xff]   ;;  %v15616_v60 = vld [vmem:[#allocation7 + $0x4c] ss:$16 sps:$4 sm:$0xff]  }
 0x106   :  { %908 = vmatprep.subr.bf16.mxu1 %v15541_v61  ;;  %v15647_v61 = vld [vmem:[#allocation7 + $0x100] ss:$16 sps:$4 sm:$0xff]  }
 0x108   :  { %843 = vmatpush1.bf16.msra.mxu0 %v15542_v63  ;;  %v15655_v63 = vld [vmem:[#allocation7 + $0x124] ss:$16 sps:$4 sm:$0xff]  }
 0x109   :  { %909 = vmatpush1.bf16.msra.mxu1 %v15539_v62  ;;  %844 = vmatprep.subr.bf16.mxu0 %v15543_v1  ;;  %v15614_v62 = vld [vmem:[#allocation7 + $0x48] ss:$16 sps:$4 sm:$0xff]   ;;  %v15622_v1 = vld [vmem:[#allocation7 + $0x6c] ss:$16 sps:$4 sm:$0xff]  }
 0x10a   :  { %910 = vmatprep.subr.bf16.mxu1 %v15547_v2  ;;  %v15653_v2 = vld [vmem:[#allocation7 + $0x120] ss:$16 sps:$4 sm:$0xff]  }
 0x10c   :  { %845 = vmatpush1.bf16.msra.mxu0 %v15548_v4  ;;  %v15661_v4 = vld [vmem:[#allocation7 + $0x144] ss:$16 sps:$4 sm:$0xff]  }
 0x10d   :  { %911 = vmatpush1.bf16.msra.mxu1 %v15545_v3  ;;  %1776 = vmatprep.subr.bf16.mxu0 %v15601_v10  ;;  %v15620_v3 = vld [vmem:[#allocation7 + $0x68] ss:$16 sps:$4 sm:$0xff]   ;;  %v15640_v10 = vld [vmem:[#allocation7 + $0xcc] ss:$16 sps:$4 sm:$0xff]  }
 0x10e   :  { %912 = vmatprep.subr.bf16.mxu1 %v15553_v5  ;;  %v15628_v5 = vld [vmem:[#allocation7 + $0x8c] ss:$16 sps:$4 sm:$0xff]  }
 0x10f   :  { %847 = vmatmul.mubr.bf16.vlgmr.msra.gmra.mrb[0].mxu0 %v13349_v6 }
 0x110   :  { %1777 = vmatpush1.bf16.msra.mxu0 %v15599_v9  ;;  %v15667_v9 = vld [vmem:[#allocation7 + $0x164] ss:$16 sps:$4 sm:$0xff]  }
 0x111   :  { %913 = vmatpush1.bf16.msra.mxu1 %v15551_v7  ;;  %1778 = vmatprep.subr.bf16.mxu0 %v15607_v13  ;;  %v15634_v7 = vld [vmem:[#allocation7 + $0xac] ss:$16 sps:$4 sm:$0xff]   ;;  %v15673_v13 = vld [vmem:[#allocation7 + $0x184] ss:$16 sps:$4 sm:$0xff]  }
 0x112   :  { %914 = vmatprep.subr.bf16.mxu1 %v15556_v8  ;;  %v15632_v8 = vld [vmem:[#allocation7 + $0xa8] ss:$16 sps:$4 sm:$0xff]  }
 0x114   :  { %1779 = vmatpush1.bf16.msra.mxu0 %v15605_v14  ;;  %v15646_v14 = vld [vmem:[#allocation7 + $0xec] ss:$16 sps:$4 sm:$0xff]  }
 0x115   :  { %915 = vmatpush1.bf16.msra.mxu1 %v15554_v11  ;;  %1780 = vmatprep.subr.bf16.mxu0 %v15613_v16  ;;  %v15665_v11 = vld [vmem:[#allocation7 + $0x160] ss:$16 sps:$4 sm:$0xff]   ;;  %v15644_v16 = vld [vmem:[#allocation7 + $0xe8] ss:$16 sps:$4 sm:$0xff]  }
 0x116   :  { %916 = vmatprep.subr.bf16.mxu1 %v15559_v12  ;;  %v15638_v12 = vld [vmem:[#allocation7 + $0xc8] ss:$16 sps:$4 sm:$0xff]  }
 0x118   :  { %1781 = vmatpush1.bf16.msra.mxu0 %v15611_v18  ;;  %v15652_v18 = vld [vmem:[#allocation7 + $0x10c] ss:$16 sps:$4 sm:$0xff]  }
 0x119   :  { %917 = vmatpush1.bf16.msra.mxu1 %v15557_v15  ;;  %1782 = vmatprep.subr.bf16.mxu0 %v15619_v41  ;;  %v15671_v15 = vld [vmem:[#allocation7 + $0x180] ss:$16 sps:$4 sm:$0xff]   ;;  %v15700_v41 = vld [vmem:[#allocation7 + $0x20c] ss:$16 sps:$4 sm:$0xff]  }
 0x11a   :  { %918 = vmatprep.subr.bf16.mxu1 %v15562_v17  ;;  %v15679_v17 = vld [vmem:[#allocation7 + $0x1a4] ss:$16 sps:$4 sm:$0xff]  }
 0x11c   :  { %1783 = vmatpush1.bf16.msra.mxu0 %v15617_v43 }
 0x11d   :  { %919 = vmatpush1.bf16.msra.mxu1 %v15560_v19  ;;  %1784 = vmatprep.subr.bf16.mxu0 %v15625_v45  ;;  %v15677_v19 = vld [vmem:[#allocation7 + $0x1a0] ss:$16 sps:$4 sm:$0xff]  }
 0x11e   :  { %920 = vmatprep.subr.bf16.mxu1 %v15565_v20  ;;  %v15685_v20 = vld [vmem:[#allocation7 + $0x1c4] ss:$16 sps:$4 sm:$0xff]  }
 0x120   :  { %1785 = vmatpush1.bf16.msra.mxu0 %v15623_v47 }
 0x121   :  { %921 = vmatpush1.bf16.msra.mxu1 %v15563_v21  ;;  %1786 = vmatprep.subr.bf16.mxu0 %v15631_v48  ;;  %v15650_v21 = vld [vmem:[#allocation7 + $0x108] ss:$16 sps:$4 sm:$0xff]  }
 0x122   :  { %922 = vmatprep.subr.bf16.mxu1 %v15568_v22  ;;  %v15683_v22 = vld [vmem:[#allocation7 + $0x1c0] ss:$16 sps:$4 sm:$0xff]  }
 0x124   :  { %1787 = vmatpush1.bf16.msra.mxu0 %v15629_v49  ;;  %v18471_v49 = vld [vmem:[%s18810_s29] sm:$0xf] }
 0x125   :  { %923 = vmatpush1.bf16.msra.mxu1 %v15566_v23  ;;  %1788 = vmatprep.subr.bf16.mxu0 %v15637_v51  ;;  %v15658_v23 = vld [vmem:[#allocation7 + $0x12c] ss:$16 sps:$4 sm:$0xff]  }
 0x126   :  { %924 = vmatprep.subr.bf16.mxu1 %v15571_v24  ;;  %v15691_v24 = vld [vmem:[#allocation7 + $0x1e4] ss:$16 sps:$4 sm:$0xff]  }
 0x128   :  { %1789 = vmatpush1.bf16.msra.mxu0 %v15635_v53 }
 0x129   :  { %925 = vmatpush1.bf16.msra.mxu1 %v15569_v25  ;;  %1790 = vmatprep.subr.bf16.mxu0 %v15643_v55  ;;  %v15689_v25 = vld [vmem:[#allocation7 + $0x1e0] ss:$16 sps:$4 sm:$0xff]  }
 0x12a   :  { %926 = vmatprep.subr.bf16.mxu1 %v15574_v26  ;;  %v15656_v26 = vld [vmem:[#allocation7 + $0x128] ss:$16 sps:$4 sm:$0xff]  }
 0x12c   :  { %1791 = vmatpush1.bf16.msra.mxu0 %v15641_v57 }
 0x12d   :  { %927 = vmatpush1.bf16.msra.mxu1 %v15572_v27  ;;  %1792 = vmatprep.subr.bf16.mxu0 %v15649_v59  ;;  %v15664_v27 = vld [vmem:[#allocation7 + $0x14c] ss:$16 sps:$4 sm:$0xff]  }
 0x12e   :  { %937 = vmatprep.subr.bf16.mxu1 %v15577_v28  ;;  %v15662_v28 = vld [vmem:[#allocation7 + $0x148] ss:$16 sps:$4 sm:$0xff]  }
 0x130   :  { %929 = vmatmul.mubr.bf16.vlgmr.msra.gmra.mrb[4].mxu1 %v13349_v6  ;;  %1793 = vmatpush1.bf16.msra.mxu0 %v15647_v61  ;;  %v15626_v6 = vld [vmem:[#allocation7 + $0x88] ss:$16 sps:$4 sm:$0xff]  }
 0x131   :  { %938 = vmatpush1.bf16.msra.mxu1 %v15575_v29  ;;  %969 = vmatprep.mubr.bf16.mxu1 %v18186_v0  ;;  %v15697_v29 = vld [vmem:[#allocation7 + $0x204] ss:$16 sps:$4 sm:$0xff]  }
 0x132   :  { %939 = vmatprep.subr.bf16.mxu1 %v15580_v30  ;;  %1794 = vmatprep.subr.bf16.mxu0 %v15655_v63  ;;  %v15670_v30 = vld [vmem:[#allocation7 + $0x16c] ss:$16 sps:$4 sm:$0xff]   ;;  %v15695_v63 = vld [vmem:[#allocation7 + $0x200] ss:$16 sps:$4 sm:$0xff]  }
 0x134   :  { %1795 = vmatpush1.bf16.msra.mxu0 %v15653_v2  ;;  %v15703_v2 = vld [vmem:[#allocation7 + $0x224] ss:$16 sps:$4 sm:$0xff]  }
 0x135   :  { %940 = vmatpush1.bf16.msra.mxu1 %v15578_v31  ;;  %1796 = vmatprep.subr.bf16.mxu0 %v15661_v4  ;;  %v15668_v31 = vld [vmem:[#allocation7 + $0x168] ss:$16 sps:$4 sm:$0xff]  }
 0x136   :  { %941 = vmatprep.subr.bf16.mxu1 %v15583_v32  ;;  %v15676_v32 = vld [vmem:[#allocation7 + $0x18c] ss:$16 sps:$4 sm:$0xff]  }
 0x139   :  { %942 = vmatpush1.bf16.msra.mxu1 %v15581_v33  ;;  %v15674_v33 = vld [vmem:[#allocation7 + $0x188] ss:$16 sps:$4 sm:$0xff]  }
 0x13a   :  { %943 = vmatprep.subr.bf16.mxu1 %v15586_v34  ;;  %v15682_v34 = vld [vmem:[#allocation7 + $0x1ac] ss:$16 sps:$4 sm:$0xff]  }
 0x13d   :  { %944 = vmatpush1.bf16.msra.mxu1 %v15584_v36  ;;  %v15680_v36 = vld [vmem:[#allocation7 + $0x1a8] ss:$16 sps:$4 sm:$0xff]  }
 0x13e   :  { %945 = vmatprep.subr.bf16.mxu1 %v15589_v37  ;;  %v15688_v37 = vld [vmem:[#allocation7 + $0x1cc] ss:$16 sps:$4 sm:$0xff]  }
 0x141   :  { %946 = vmatpush1.bf16.msra.mxu1 %v15587_v38  ;;  %v15686_v38 = vld [vmem:[#allocation7 + $0x1c8] ss:$16 sps:$4 sm:$0xff]  }
 0x142   :  { %947 = vmatprep.subr.bf16.mxu1 %v15592_v39  ;;  %v15694_v39 = vld [vmem:[#allocation7 + $0x1ec] ss:$16 sps:$4 sm:$0xff]  }
 0x145   :  { %948 = vmatpush1.bf16.msra.mxu1 %v15590_v40  ;;  %v15692_v40 = vld [vmem:[#allocation7 + $0x1e8] ss:$16 sps:$4 sm:$0xff]  }
 0x146   :  { %949 = vmatprep.subr.bf16.mxu1 %v15595_v42 }
 0x149   :  { %950 = vmatpush1.bf16.msra.mxu1 %v15593_v44 }
 0x14a   :  { %951 = vmatprep.subr.bf16.mxu1 %v15598_v46  ;;  %v303_v46 = vlaneseq }
 0x14c   :  { %v18463_v47 = vshrl.u32 %v303_v46, 7  ;;  %v15766_v46 = vld [vmem:[#allocation7 + $0x36c] ss:$16 sps:$4 sm:$0xff]  }
 0x14d   :  { %952 = vmatpush1.bf16.msra.mxu1 %v15596_v50 }
 0x14e   :  { %1858 = vmatprep.subr.bf16.mxu1 %v15604_v52  ;;  %v18466_v48 = vsub.s32 0, %v18463_v47  ;;  %v18474_v50 = vsub.s32 1, %v18463_v47 }
 0x150   :  { %970 = vmatmul.mubr.bf16.vlgmr.msra.gmra.mrb[4].mxu1 %v18458_v35  ;;  %v15659_v35 = vld [vmem:[#allocation7 + $0x140] ss:$16 sps:$4 sm:$0xff]   ;;  %v306_v51 = vrot.slane %v18471_v49, %v18466_v48  ;;  %v310_v52 = vrot.slane %v18471_v49, %v18474_v50 }
 0x151   :  { %1859 = vmatpush1.bf16.msra.mxu1 %v15602_v54  ;;  %1797 = vmatpush1.bf16.msra.mxu0 %v15659_v35  ;;  %v15701_v35 = vld [vmem:[#allocation7 + $0x220] ss:$16 sps:$4 sm:$0xff]  }
 0x152   :  { %1860 = vmatprep.subr.bf16.mxu1 %v15610_v56  ;;  %1798 = vmatprep.subr.bf16.mxu0 %v15667_v9  ;;  %v15707_v9 = vld [vmem:[#allocation7 + $0x240] ss:$16 sps:$4 sm:$0xff]  }
 0x155   :  { %1861 = vmatpush1.bf16.msra.mxu1 %v15608_v58  ;;  %1799 = vmatpush1.bf16.msra.mxu0 %v15665_v11  ;;  %v15715_v11 = vld [vmem:[#allocation7 + $0x264] ss:$16 sps:$4 sm:$0xff]  }
 0x156   :  { %1862 = vmatprep.subr.bf16.mxu1 %v15616_v60  ;;  %1800 = vmatprep.subr.bf16.mxu0 %v15673_v13  ;;  %v15713_v13 = vld [vmem:[#allocation7 + $0x260] ss:$16 sps:$4 sm:$0xff]  }
 0x159   :  { %1863 = vmatpush1.bf16.msra.mxu1 %v15614_v62  ;;  %1801 = vmatpush1.bf16.msra.mxu0 %v15671_v15  ;;  %v15721_v15 = vld [vmem:[#allocation7 + $0x284] ss:$16 sps:$4 sm:$0xff]  }
 0x15a   :  { %1864 = vmatprep.subr.bf16.mxu1 %v15622_v1  ;;  %1802 = vmatprep.subr.bf16.mxu0 %v15679_v17  ;;  %v15698_v1 = vld [vmem:[#allocation7 + $0x208] ss:$16 sps:$4 sm:$0xff]   ;;  %v15719_v17 = vld [vmem:[#allocation7 + $0x280] ss:$16 sps:$4 sm:$0xff]  }
 0x15d   :  { %1865 = vmatpush1.bf16.msra.mxu1 %v15620_v3  ;;  %1803 = vmatpush1.bf16.msra.mxu0 %v15677_v19  ;;  %v15706_v3 = vld [vmem:[#allocation7 + $0x22c] ss:$16 sps:$4 sm:$0xff]   ;;  %v15727_v19 = vld [vmem:[#allocation7 + $0x2a4] ss:$16 sps:$4 sm:$0xff]  }
 0x15e   :  { %1866 = vmatprep.subr.bf16.mxu1 %v15628_v5  ;;  %1804 = vmatprep.subr.bf16.mxu0 %v15685_v20  ;;  %v15730_v20 = vld [vmem:[#allocation7 + $0x2ac] ss:$16 sps:$4 sm:$0xff]  }
 0x161   :  { %1867 = vmatpush1.bf16.msra.mxu1 %v15626_v6  ;;  %1805 = vmatpush1.bf16.msra.mxu0 %v15683_v22  ;;  %v15704_v6 = vld [vmem:[#allocation7 + $0x228] ss:$16 sps:$4 sm:$0xff]  }
 0x162   :  { %1868 = vmatprep.subr.bf16.mxu1 %v15634_v7  ;;  %1806 = vmatprep.subr.bf16.mxu0 %v15691_v24  ;;  %v15709_v7 = vld [vmem:[#allocation7 + $0x244] ss:$16 sps:$4 sm:$0xff]   ;;  %v15728_v22 = vld [vmem:[#allocation7 + $0x2a8] ss:$16 sps:$4 sm:$0xff]   ;;  %v15736_v24 = vld [vmem:[#allocation7 + $0x2cc] ss:$16 sps:$4 sm:$0xff]  }
 0x165   :  { %1869 = vmatpush1.bf16.msra.mxu1 %v15632_v8  ;;  %1807 = vmatpush1.bf16.msra.mxu0 %v15689_v25  ;;  %v15712_v8 = vld [vmem:[#allocation7 + $0x24c] ss:$16 sps:$4 sm:$0xff]   ;;  %v15731_v25 = vld [vmem:[#allocation7 + $0x2c0] ss:$16 sps:$4 sm:$0xff]  }
 0x166   :  { %1870 = vmatprep.subr.bf16.mxu1 %v15640_v10  ;;  %1817 = vmatprep.subr.bf16.mxu0 %v15697_v29  ;;  %v15710_v10 = vld [vmem:[#allocation7 + $0x248] ss:$16 sps:$4 sm:$0xff]   ;;  %v15737_v29 = vld [vmem:[#allocation7 + $0x2e0] ss:$16 sps:$4 sm:$0xff]  }
 0x169   :  { %1871 = vmatpush1.bf16.msra.mxu1 %v15638_v12  ;;  %v15718_v12 = vld [vmem:[#allocation7 + $0x26c] ss:$16 sps:$4 sm:$0xff]  }
 0x16a   :  { %1872 = vmatprep.subr.bf16.mxu1 %v15646_v14  ;;  %v15716_v14 = vld [vmem:[#allocation7 + $0x268] ss:$16 sps:$4 sm:$0xff]  }
 0x16d   :  { %1873 = vmatpush1.bf16.msra.mxu1 %v15644_v16  ;;  %v15724_v16 = vld [vmem:[#allocation7 + $0x28c] ss:$16 sps:$4 sm:$0xff]  }
 0x16e   :  { %1874 = vmatprep.subr.bf16.mxu1 %v15652_v18  ;;  %v15722_v18 = vld [vmem:[#allocation7 + $0x288] ss:$16 sps:$4 sm:$0xff]  }
 0x171   :  { %1875 = vmatpush1.bf16.msra.mxu1 %v15650_v21  ;;  %v15725_v21 = vld [vmem:[#allocation7 + $0x2a0] ss:$16 sps:$4 sm:$0xff]  }
 0x172   :  { %1876 = vmatprep.subr.bf16.mxu1 %v15658_v23  ;;  %v15733_v23 = vld [vmem:[#allocation7 + $0x2c4] ss:$16 sps:$4 sm:$0xff]  }
 0x175   :  { %1877 = vmatpush1.bf16.msra.mxu1 %v15656_v26  ;;  %v15734_v26 = vld [vmem:[#allocation7 + $0x2c8] ss:$16 sps:$4 sm:$0xff]  }
 0x176   :  { %1878 = vmatprep.subr.bf16.mxu1 %v15664_v27  ;;  %v15739_v27 = vld [vmem:[#allocation7 + $0x2e4] ss:$16 sps:$4 sm:$0xff]  }
 0x179   :  { %1879 = vmatpush1.bf16.msra.mxu1 %v15662_v28  ;;  %v15742_v28 = vld [vmem:[#allocation7 + $0x2ec] ss:$16 sps:$4 sm:$0xff]  }
 0x17a   :  { %1880 = vmatprep.subr.bf16.mxu1 %v15670_v30  ;;  %v15740_v30 = vld [vmem:[#allocation7 + $0x2e8] ss:$16 sps:$4 sm:$0xff]  }
 0x17d   :  { %1881 = vmatpush1.bf16.msra.mxu1 %v15668_v31  ;;  %v15745_v31 = vld [vmem:[#allocation7 + $0x304] ss:$16 sps:$4 sm:$0xff]  }
 0x17e   :  { %1882 = vmatprep.subr.bf16.mxu1 %v15676_v32  ;;  %v15748_v32 = vld [vmem:[#allocation7 + $0x30c] ss:$16 sps:$4 sm:$0xff]  }
 0x181   :  { %1883 = vmatpush1.bf16.msra.mxu1 %v15674_v33  ;;  %v15743_v33 = vld [vmem:[#allocation7 + $0x300] ss:$16 sps:$4 sm:$0xff]  }
 0x182   :  { %1884 = vmatprep.subr.bf16.mxu1 %v15682_v34  ;;  %v15746_v34 = vld [vmem:[#allocation7 + $0x308] ss:$16 sps:$4 sm:$0xff]  }
 0x185   :  { %1885 = vmatpush1.bf16.msra.mxu1 %v15680_v36  ;;  %v15751_v36 = vld [vmem:[#allocation7 + $0x324] ss:$16 sps:$4 sm:$0xff]  }
 0x186   :  { %1886 = vmatprep.subr.bf16.mxu1 %v15688_v37  ;;  %v15754_v37 = vld [vmem:[#allocation7 + $0x32c] ss:$16 sps:$4 sm:$0xff]  }
 0x189   :  { %1887 = vmatpush1.bf16.msra.mxu1 %v15686_v38  ;;  %v15749_v38 = vld [vmem:[#allocation7 + $0x320] ss:$16 sps:$4 sm:$0xff]  }
 0x18a   :  { %1888 = vmatprep.subr.bf16.mxu1 %v15694_v39  ;;  %v15752_v39 = vld [vmem:[#allocation7 + $0x328] ss:$16 sps:$4 sm:$0xff]  }
 0x18d   :  { %1889 = vmatpush1.bf16.msra.mxu1 %v15692_v40  ;;  %v15757_v40 = vld [vmem:[#allocation7 + $0x344] ss:$16 sps:$4 sm:$0xff]  }
 0x18e   :  { %1899 = vmatprep.subr.bf16.mxu1 %v15700_v41  ;;  %v15760_v41 = vld [vmem:[#allocation7 + $0x34c] ss:$16 sps:$4 sm:$0xff]  }
 0x1c3   :  { %v889_v42 = vpop.f32.mrb[0].mxu1 }
 0x1c4   :  { %v891_v43 = vpop.f32.mrb[1].mxu1 }
 0x1c5   :  { %v893_v44 = vpop.f32.mrb[2].mxu1 }
 0x1c6   :  { %v894_v45 = vpop.f32.mrb[3].mxu1  ;;  %v18489_v44 = vsub.s32 2, %v18463_v47 }
 0x1c7   :  { %v15763_v45 = vld [vmem:[#allocation7 + $0x364] ss:$16 sps:$4 sm:$0xff]  }
 0x1e2   :  { %v848_v53 = vpop.f32.mrb[0].mxu0 }
 0x1e3   :  { %v849_v54 = vadd.f32 %v848_v53, %v306_v51  ;;  %v850_v55 = vpop.f32.mrb[1].mxu0  ;;  %v18492_v51 = vsub.s32 3, %v18463_v47  ;;  %v15764_v53 = vld [vmem:[#allocation7 + $0x368] ss:$16 sps:$4 sm:$0xff]  }
 0x1e4   :  { %v851_v56 = vadd.f32 %v850_v55, %v310_v52  ;;  %v852_v57 = vpop.f32.mrb[2].mxu0  ;;  %v15761_v52 = vld [vmem:[#allocation7 + $0x360] ss:$16 sps:$4 sm:$0xff]   ;;  %v15769_v55 = vld [vmem:[#allocation7 + $0x384] ss:$16 sps:$4 sm:$0xff]  }
 0x1e5   :  { %v890_v58 = vadd.f32 %v889_v42, %v849_v54  ;;  %v853_v59 = vpop.f32.mrb[3].mxu0  ;;  %v15755_v42 = vld [vmem:[#allocation7 + $0x340] ss:$16 sps:$4 sm:$0xff]   ;;  %v314_v54 = vrot.slane %v18471_v49, %v18489_v44  ;;  %v318_v57 = vrot.slane %v18471_v49, %v18492_v51  ;;  %v15770_v47 = vld [vmem:[#allocation7 + $0x388] ss:$16 sps:$4 sm:$0xff]  }
 0x1e6   :  { %v892_v60 = vadd.f32 %v891_v43, %v851_v56  ;;  %v15758_v43 = vld [vmem:[#allocation7 + $0x348] ss:$16 sps:$4 sm:$0xff]   ;;  %v15772_v56 = vld [vmem:[#allocation7 + $0x38c] ss:$16 sps:$4 sm:$0xff]   ;;  %v15767_v59 = vld [vmem:[#allocation7 + $0x380] ss:$16 sps:$4 sm:$0xff]  }
 0x1e7   :  { %v978_v61 = vpack.c.bf16 %v890_v58, %v890_v58 }
 0x1e8   :  { %v979_v62 = vpack.c.bf16 %v892_v60, %v892_v60 }
 0x1ea   :  { %17778 = vtanh.bf16 %v979_v62  ;;  %v15775_v62 = vld [vmem:[#allocation7 + $0x3a4] ss:$16 sps:$4 sm:$0xff]  }
 0x1eb   :  { %17780 = vtanh.bf16 %v978_v61 }
 0x1f5   :  { %v18480_v4 = vpop.eup %17778 }
 0x1f6   :  { %v18482_v5 = vpop.eup %17780  ;;  %1808 = vmatprep.mubr.bf16.mxu0 %v18480_v4  ;;  %1890 = vmatprep.mubr.bf16.mxu1 %v18480_v4 }
 0x1f7   :  { %1809 = vmatmul.mubr.bf16.vlgmr.msra.gmra.mrb[4].mxu0 %v18482_v5  ;;  %1891 = vmatmul.mubr.bf16.vlgmr.msra.gmra.mrb[8].mxu1 %v18482_v5 }
 0x1f8   :  { %1818 = vmatpush1.bf16.msra.mxu0 %v15695_v63  ;;  %1900 = vmatpush1.bf16.msra.mxu1 %v15698_v1  ;;  %v15778_v63 = vld [vmem:[#allocation7 + $0x3ac] ss:$16 sps:$4 sm:$0xff]  }
 0x1f9   :  { %1819 = vmatprep.subr.bf16.mxu0 %v15703_v2  ;;  %1901 = vmatprep.subr.bf16.mxu1 %v15706_v3 }
 0x1fc   :  { %1820 = vmatpush1.bf16.msra.mxu0 %v15701_v35  ;;  %1902 = vmatpush1.bf16.msra.mxu1 %v15704_v6  ;;  %v15773_v6 = vld [vmem:[#allocation7 + $0x3a0] ss:$16 sps:$4 sm:$0xff]  }
 0x1fd   :  { %1821 = vmatprep.subr.bf16.mxu0 %v15709_v7  ;;  %1903 = vmatprep.subr.bf16.mxu1 %v15712_v8  ;;  %v15776_v7 = vld [vmem:[#allocation7 + $0x3a8] ss:$16 sps:$4 sm:$0xff]   ;;  %v15781_v8 = vld [vmem:[#allocation7 + $0x3c4] ss:$16 sps:$4 sm:$0xff]  }
 0x200   :  { %1822 = vmatpush1.bf16.msra.mxu0 %v15707_v9  ;;  %1904 = vmatpush1.bf16.msra.mxu1 %v15710_v10  ;;  %v15784_v9 = vld [vmem:[#allocation7 + $0x3cc] ss:$16 sps:$4 sm:$0xff]   ;;  %v15779_v10 = vld [vmem:[#allocation7 + $0x3c0] ss:$16 sps:$4 sm:$0xff]  }
 0x201   :  { %1823 = vmatprep.subr.bf16.mxu0 %v15715_v11  ;;  %1905 = vmatprep.subr.bf16.mxu1 %v15718_v12  ;;  %v15782_v11 = vld [vmem:[#allocation7 + $0x3c8] ss:$16 sps:$4 sm:$0xff]   ;;  %v15787_v12 = vld [vmem:[#allocation7 + $0x3e4] ss:$16 sps:$4 sm:$0xff]  }
 0x204   :  { %1824 = vmatpush1.bf16.msra.mxu0 %v15713_v13  ;;  %1906 = vmatpush1.bf16.msra.mxu1 %v15716_v14  ;;  %v15790_v13 = vld [vmem:[#allocation7 + $0x3ec] ss:$16 sps:$4 sm:$0xff]   ;;  %v15785_v14 = vld [vmem:[#allocation7 + $0x3e0] ss:$16 sps:$4 sm:$0xff]  }
 0x205   :  { %1825 = vmatprep.subr.bf16.mxu0 %v15721_v15  ;;  %1907 = vmatprep.subr.bf16.mxu1 %v15724_v16  ;;  %v15788_v15 = vld [vmem:[#allocation7 + $0x3e8] ss:$16 sps:$4 sm:$0xff]   ;;  %v15793_v16 = vld [vmem:[#allocation8 + $0x4] ss:$16 sps:$4 sm:$0xff]  }
 0x208   :  { %1826 = vmatpush1.bf16.msra.mxu0 %v15719_v17  ;;  %1908 = vmatpush1.bf16.msra.mxu1 %v15722_v18  ;;  %v15796_v17 = vld [vmem:[#allocation8 + $0xc] ss:$16 sps:$4 sm:$0xff]   ;;  %v15791_v18 = vld [vmem:[#allocation8] ss:$16 sps:$4 sm:$0xff]  }
 0x209   :  { %1827 = vmatprep.subr.bf16.mxu0 %v15727_v19  ;;  %1909 = vmatprep.subr.bf16.mxu1 %v15730_v20  ;;  %v15794_v19 = vld [vmem:[#allocation8 + $0x8] ss:$16 sps:$4 sm:$0xff]  }
 0x20c   :  { %1828 = vmatpush1.bf16.msra.mxu0 %v15725_v21  ;;  %1910 = vmatpush1.bf16.msra.mxu1 %v15728_v22  ;;  %v15799_v21 = vld [vmem:[#allocation8 + $0x24] ss:$16 sps:$4 sm:$0xff]   ;;  %v15802_v22 = vld [vmem:[#allocation8 + $0x2c] ss:$16 sps:$4 sm:$0xff]  }
 0x20d   :  { %1829 = vmatprep.subr.bf16.mxu0 %v15733_v23  ;;  %1911 = vmatprep.subr.bf16.mxu1 %v15736_v24  ;;  %v15797_v24 = vld [vmem:[#allocation8 + $0x20] ss:$16 sps:$4 sm:$0xff]  }
 0x210   :  { %1830 = vmatpush1.bf16.msra.mxu0 %v15731_v25  ;;  %1912 = vmatpush1.bf16.msra.mxu1 %v15734_v26  ;;  %v15800_v25 = vld [vmem:[#allocation8 + $0x28] ss:$16 sps:$4 sm:$0xff]   ;;  %v15805_v26 = vld [vmem:[#allocation8 + $0x44] ss:$16 sps:$4 sm:$0xff]  }
 0x211   :  { %1831 = vmatprep.subr.bf16.mxu0 %v15739_v27  ;;  %1913 = vmatprep.subr.bf16.mxu1 %v15742_v28  ;;  %v15808_v27 = vld [vmem:[#allocation8 + $0x4c] ss:$16 sps:$4 sm:$0xff]   ;;  %v15803_v28 = vld [vmem:[#allocation8 + $0x40] ss:$16 sps:$4 sm:$0xff]  }
 0x214   :  { %1832 = vmatpush1.bf16.msra.mxu0 %v15737_v29  ;;  %1914 = vmatpush1.bf16.msra.mxu1 %v15740_v30  ;;  %v15806_v29 = vld [vmem:[#allocation8 + $0x48] ss:$16 sps:$4 sm:$0xff]   ;;  %v15811_v30 = vld [vmem:[#allocation8 + $0x64] ss:$16 sps:$4 sm:$0xff]  }
 0x215   :  { %1833 = vmatprep.subr.bf16.mxu0 %v15745_v31  ;;  %1915 = vmatprep.subr.bf16.mxu1 %v15748_v32  ;;  %v15814_v31 = vld [vmem:[#allocation8 + $0x6c] ss:$16 sps:$4 sm:$0xff]   ;;  %v15809_v32 = vld [vmem:[#allocation8 + $0x60] ss:$16 sps:$4 sm:$0xff]  }
 0x218   :  { %1834 = vmatpush1.bf16.msra.mxu0 %v15743_v33  ;;  %1916 = vmatpush1.bf16.msra.mxu1 %v15746_v34  ;;  %v15812_v33 = vld [vmem:[#allocation8 + $0x68] ss:$16 sps:$4 sm:$0xff]   ;;  %v15817_v34 = vld [vmem:[#allocation8 + $0x84] ss:$16 sps:$4 sm:$0xff]  }
 0x219   :  { %1835 = vmatprep.subr.bf16.mxu0 %v15751_v36  ;;  %1917 = vmatprep.subr.bf16.mxu1 %v15754_v37  ;;  %v15820_v36 = vld [vmem:[#allocation8 + $0x8c] ss:$16 sps:$4 sm:$0xff]   ;;  %v15815_v37 = vld [vmem:[#allocation8 + $0x80] ss:$16 sps:$4 sm:$0xff]  }
 0x21c   :  { %1836 = vmatpush1.bf16.msra.mxu0 %v15749_v38  ;;  %1918 = vmatpush1.bf16.msra.mxu1 %v15752_v39  ;;  %v15818_v38 = vld [vmem:[#allocation8 + $0x88] ss:$16 sps:$4 sm:$0xff]   ;;  %v15823_v39 = vld [vmem:[#allocation8 + $0xa4] ss:$16 sps:$4 sm:$0xff]  }
 0x21d   :  { %1837 = vmatprep.subr.bf16.mxu0 %v15757_v40  ;;  %1919 = vmatprep.subr.bf16.mxu1 %v15760_v41  ;;  %v15826_v40 = vld [vmem:[#allocation8 + $0xac] ss:$16 sps:$4 sm:$0xff]   ;;  %v15821_v41 = vld [vmem:[#allocation8 + $0xa0] ss:$16 sps:$4 sm:$0xff]  }
 0x220   :  { %1838 = vmatpush1.bf16.msra.mxu0 %v15755_v42  ;;  %1920 = vmatpush1.bf16.msra.mxu1 %v15758_v43  ;;  %v15824_v42 = vld [vmem:[#allocation8 + $0xa8] ss:$16 sps:$4 sm:$0xff]   ;;  %v15829_v43 = vld [vmem:[#allocation8 + $0xc4] ss:$16 sps:$4 sm:$0xff]  }
 0x221   :  { %1839 = vmatprep.subr.bf16.mxu0 %v15763_v45  ;;  %1921 = vmatprep.subr.bf16.mxu1 %v15766_v46  ;;  %v15832_v45 = vld [vmem:[#allocation8 + $0xcc] ss:$16 sps:$4 sm:$0xff]   ;;  %v15827_v46 = vld [vmem:[#allocation8 + $0xc0] ss:$16 sps:$4 sm:$0xff]  }
 0x223   :  { %v971_v58 = vpop.f32.mrb[4].mxu1 }
 0x224   :  { %v15301_v60 = vadd.f32 %v971_v58, %v314_v54  ;;  %v973_v61 = vpop.f32.mrb[5].mxu1  ;;  %1840 = vmatpush1.bf16.msra.mxu0 %v15761_v52  ;;  %1922 = vmatpush1.bf16.msra.mxu1 %v15764_v53  ;;  %v15830_v52 = vld [vmem:[#allocation8 + $0xc8] ss:$16 sps:$4 sm:$0xff]   ;;  %v15835_v53 = vld [vmem:[#allocation8 + $0xe4] ss:$16 sps:$4 sm:$0xff]  }
 0x225   :  { %v15302_v1 = vadd.f32 %v973_v61, %v318_v57  ;;  %v975_v2 = vpop.f32.mrb[6].mxu1  ;;  %1841 = vmatprep.subr.bf16.mxu0 %v15769_v55  ;;  %1923 = vmatprep.subr.bf16.mxu1 %v15772_v56  ;;  %v15838_v54 = vld [vmem:[#allocation8 + $0xec] ss:$16 sps:$4 sm:$0xff]   ;;  %v15833_v55 = vld [vmem:[#allocation8 + $0xe0] ss:$16 sps:$4 sm:$0xff]  }
 0x226   :  { %v976_v3 = vpop.f32.mrb[7].mxu1  ;;  %v980_v49 = vpack.c.bf16 %v15301_v60, %v15301_v60  ;;  %v15836_v56 = vld [vmem:[#allocation8 + $0xe8] ss:$16 sps:$4 sm:$0xff]   ;;  %v15841_v57 = vld [vmem:[#allocation8 + $0x104] ss:$16 sps:$4 sm:$0xff]  }
 0x227   :  { %v981_v35 = vpack.c.bf16 %v15302_v1, %v15302_v1  ;;  %v15844_v58 = vld [vmem:[#allocation8 + $0x10c] ss:$16 sps:$4 sm:$0xff]   ;;  %v15847_v60 = vld [vmem:[#allocation8 + $0x124] ss:$16 sps:$4 sm:$0xff]   ;;  %v15851_v3 = vld [vmem:[#allocation8 + $0x140] ss:$16 sps:$4 sm:$0xff]  }
 0x228   :  { %1842 = vmatpush1.bf16.msra.mxu0 %v15767_v59  ;;  %1924 = vmatpush1.bf16.msra.mxu1 %v15770_v47  ;;  %v15839_v59 = vld [vmem:[#allocation8 + $0x100] ss:$16 sps:$4 sm:$0xff]   ;;  %v15842_v47 = vld [vmem:[#allocation8 + $0x108] ss:$16 sps:$4 sm:$0xff]   ;;  %v15850_v61 = vld [vmem:[#allocation8 + $0x12c] ss:$16 sps:$4 sm:$0xff]  }
 0x229   :  { %17782 = vtanh.bf16 %v981_v35  ;;  %1843 = vmatprep.subr.bf16.mxu0 %v15775_v62  ;;  %1925 = vmatprep.subr.bf16.mxu1 %v15778_v63  ;;  %v15845_v62 = vld [vmem:[#allocation8 + $0x120] ss:$16 sps:$4 sm:$0xff]   ;;  %v15848_v63 = vld [vmem:[#allocation8 + $0x128] ss:$16 sps:$4 sm:$0xff]   ;;  %v15853_v1 = vld [vmem:[#allocation8 + $0x144] ss:$16 sps:$4 sm:$0xff]  }
 0x22a   :  { %17784 = vtanh.bf16 %v980_v49  ;;  %v15856_v2 = vld [vmem:[#allocation8 + $0x14c] ss:$16 sps:$4 sm:$0xff]   ;;  %v15854_v35 = vld [vmem:[#allocation8 + $0x148] ss:$16 sps:$4 sm:$0xff]   ;;  %v15857_v49 = vld [vmem:[#allocation8 + $0x160] ss:$16 sps:$4 sm:$0xff]  }
 0x22c   :  { %1844 = vmatpush1.bf16.msra.mxu0 %v15773_v6  ;;  %1926 = vmatpush1.bf16.msra.mxu1 %v15776_v7  ;;  %v15859_v6 = vld [vmem:[#allocation8 + $0x164] ss:$16 sps:$4 sm:$0xff]   ;;  %v15862_v7 = vld [vmem:[#allocation8 + $0x16c] ss:$16 sps:$4 sm:$0xff]  }
 0x22d   :  { %1845 = vmatprep.subr.bf16.mxu0 %v15781_v8  ;;  %1927 = vmatprep.subr.bf16.mxu1 %v15784_v9  ;;  %v15860_v8 = vld [vmem:[#allocation8 + $0x168] ss:$16 sps:$4 sm:$0xff]   ;;  %v15865_v9 = vld [vmem:[#allocation8 + $0x184] ss:$16 sps:$4 sm:$0xff]  }
 0x230   :  { %1846 = vmatpush1.bf16.msra.mxu0 %v15779_v10  ;;  %1928 = vmatpush1.bf16.msra.mxu1 %v15782_v11  ;;  %v15868_v10 = vld [vmem:[#allocation8 + $0x18c] ss:$16 sps:$4 sm:$0xff]   ;;  %v15863_v11 = vld [vmem:[#allocation8 + $0x180] ss:$16 sps:$4 sm:$0xff]  }
 0x231   :  { %1847 = vmatprep.subr.bf16.mxu0 %v15787_v12  ;;  %1929 = vmatprep.subr.bf16.mxu1 %v15790_v13  ;;  %v15866_v12 = vld [vmem:[#allocation8 + $0x188] ss:$16 sps:$4 sm:$0xff]   ;;  %v15871_v13 = vld [vmem:[#allocation8 + $0x1a4] ss:$16 sps:$4 sm:$0xff]  }
 0x234   :  { %v18498_v20 = vpop.eup %17782  ;;  %1848 = vmatpush1.bf16.msra.mxu0 %v15785_v14  ;;  %1930 = vmatpush1.bf16.msra.mxu1 %v15788_v15  ;;  %v15874_v14 = vld [vmem:[#allocation8 + $0x1ac] ss:$16 sps:$4 sm:$0xff]   ;;  %v15869_v15 = vld [vmem:[#allocation8 + $0x1a0] ss:$16 sps:$4 sm:$0xff]  }
 0x235   :  { %1849 = vmatprep.mubr.bf16.mxu0 %v18498_v20  ;;  %1931 = vmatprep.mubr.bf16.mxu1 %v18498_v20  ;;  %v18502_v23 = vpop.eup %17784 }
 0x236   :  { %2738 = vmatprep.subr.bf16.mxu0 %v15793_v16  ;;  %2820 = vmatprep.subr.bf16.mxu1 %v15796_v17  ;;  %v15872_v16 = vld [vmem:[#allocation8 + $0x1a8] ss:$16 sps:$4 sm:$0xff]   ;;  %v15877_v17 = vld [vmem:[#allocation8 + $0x1c4] ss:$16 sps:$4 sm:$0xff]  }
 0x237   :  { %1850 = vmatmul.mubr.bf16.vlgmr.msra.gmra.mrb[4].mxu0 %v18502_v23  ;;  %1932 = vmatmul.mubr.bf16.vlgmr.msra.gmra.mrb[8].mxu1 %v18502_v23 }
 0x238   :  { %2739 = vmatpush1.bf16.msra.mxu0 %v15791_v18  ;;  %2821 = vmatpush1.bf16.msra.mxu1 %v15794_v19  ;;  %v15875_v18 = vld [vmem:[#allocation8 + $0x1c0] ss:$16 sps:$4 sm:$0xff]   ;;  %v15878_v19 = vld [vmem:[#allocation8 + $0x1c8] ss:$16 sps:$4 sm:$0xff]  }
 0x239   :  { %2740 = vmatprep.subr.bf16.mxu0 %v15799_v21  ;;  %2822 = vmatprep.subr.bf16.mxu1 %v15802_v22  ;;  %v15880_v21 = vld [vmem:[#allocation8 + $0x1cc] ss:$16 sps:$4 sm:$0xff]   ;;  %v15883_v22 = vld [vmem:[#allocation8 + $0x1e4] ss:$16 sps:$4 sm:$0xff]  }
 0x23c   :  { %2741 = vmatpush1.bf16.msra.mxu0 %v15797_v24  ;;  %2823 = vmatpush1.bf16.msra.mxu1 %v15800_v25  ;;  %v15886_v24 = vld [vmem:[#allocation8 + $0x1ec] ss:$16 sps:$4 sm:$0xff]   ;;  %v15881_v25 = vld [vmem:[#allocation8 + $0x1e0] ss:$16 sps:$4 sm:$0xff]  }
 0x23d   :  { %2742 = vmatprep.subr.bf16.mxu0 %v15805_v26  ;;  %2824 = vmatprep.subr.bf16.mxu1 %v15808_v27  ;;  %v15884_v26 = vld [vmem:[#allocation8 + $0x1e8] ss:$16 sps:$4 sm:$0xff]   ;;  %v15889_v27 = vld [vmem:[#allocation8 + $0x204] ss:$16 sps:$4 sm:$0xff]  }
 0x240   :  { %2743 = vmatpush1.bf16.msra.mxu0 %v15803_v28  ;;  %2825 = vmatpush1.bf16.msra.mxu1 %v15806_v29  ;;  %v15892_v28 = vld [vmem:[#allocation8 + $0x20c] ss:$16 sps:$4 sm:$0xff]   ;;  %v18509_v29 = vld [vmem:[%s18811_s23] sm:$0xf] }
 0x241   :  { %2744 = vmatprep.subr.bf16.mxu0 %v15811_v30  ;;  %2826 = vmatprep.subr.bf16.mxu1 %v15814_v31  ;;  %v1119_v30 = vrot.slane %v18509_v29, %v18466_v48  ;;  %v1123_v31 = vrot.slane %v18509_v29, %v18474_v50 }
 0x244   :  { %2745 = vmatpush1.bf16.msra.mxu0 %v15809_v32  ;;  %2827 = vmatpush1.bf16.msra.mxu1 %v15812_v33  ;;  %v1131_v32 = vrot.slane %v18509_v29, %v18492_v51 }
 0x245   :  { %2746 = vmatprep.subr.bf16.mxu0 %v15817_v34  ;;  %2828 = vmatprep.subr.bf16.mxu1 %v15820_v36 }
 0x248   :  { %2747 = vmatpush1.bf16.msra.mxu0 %v15815_v37  ;;  %2829 = vmatpush1.bf16.msra.mxu1 %v15818_v38 }
 0x249   :  { %2748 = vmatprep.subr.bf16.mxu0 %v15823_v39  ;;  %2830 = vmatprep.subr.bf16.mxu1 %v15826_v40 }
 0x24c   :  { %2749 = vmatpush1.bf16.msra.mxu0 %v15821_v41  ;;  %2831 = vmatpush1.bf16.msra.mxu1 %v15824_v42 }
 0x24d   :  { %2750 = vmatprep.subr.bf16.mxu0 %v15829_v43  ;;  %2832 = vmatprep.subr.bf16.mxu1 %v15832_v45 }
 0x250   :  { %2751 = vmatpush1.bf16.msra.mxu0 %v15827_v46  ;;  %2833 = vmatpush1.bf16.msra.mxu1 %v15830_v52 }
 0x251   :  { %2752 = vmatprep.subr.bf16.mxu0 %v15835_v53  ;;  %2834 = vmatprep.subr.bf16.mxu1 %v15838_v54  ;;  %v15887_v54 = vld [vmem:[#allocation8 + $0x200] ss:$16 sps:$4 sm:$0xff]  }
 0x254   :  { %2753 = vmatpush1.bf16.msra.mxu0 %v15833_v55  ;;  %2835 = vmatpush1.bf16.msra.mxu1 %v15836_v56  ;;  %v15890_v55 = vld [vmem:[#allocation8 + $0x208] ss:$16 sps:$4 sm:$0xff]   ;;  %v15895_v56 = vld [vmem:[#allocation8 + $0x224] ss:$16 sps:$4 sm:$0xff]  }
 0x255   :  { %2754 = vmatprep.subr.bf16.mxu0 %v15841_v57  ;;  %2836 = vmatprep.subr.bf16.mxu1 %v15844_v58  ;;  %v15898_v57 = vld [vmem:[#allocation8 + $0x22c] ss:$16 sps:$4 sm:$0xff]  }
 0x258   :  { %2755 = vmatpush1.bf16.msra.mxu0 %v15839_v59  ;;  %2837 = vmatpush1.bf16.msra.mxu1 %v15842_v47  ;;  %v15893_v47 = vld [vmem:[#allocation8 + $0x220] ss:$16 sps:$4 sm:$0xff]  }
 0x259   :  { %2756 = vmatprep.subr.bf16.mxu0 %v15847_v60  ;;  %2838 = vmatprep.subr.bf16.mxu1 %v15850_v61  ;;  %v15896_v60 = vld [vmem:[#allocation8 + $0x228] ss:$16 sps:$4 sm:$0xff]   ;;  %v15901_v61 = vld [vmem:[#allocation8 + $0x244] ss:$16 sps:$4 sm:$0xff]  }
 0x25c   :  { %2757 = vmatpush1.bf16.msra.mxu0 %v15845_v62  ;;  %2839 = vmatpush1.bf16.msra.mxu1 %v15848_v63  ;;  %v15904_v62 = vld [vmem:[#allocation8 + $0x24c] ss:$16 sps:$4 sm:$0xff]  }
 0x25d   :  { %2758 = vmatprep.subr.bf16.mxu0 %v15853_v1  ;;  %2840 = vmatprep.subr.bf16.mxu1 %v15856_v2  ;;  %v15899_v1 = vld [vmem:[#allocation8 + $0x240] ss:$16 sps:$4 sm:$0xff]   ;;  %v15902_v2 = vld [vmem:[#allocation8 + $0x248] ss:$16 sps:$4 sm:$0xff]  }
 0x260   :  { %2759 = vmatpush1.bf16.msra.mxu0 %v15851_v3  ;;  %2841 = vmatpush1.bf16.msra.mxu1 %v15854_v35  ;;  %v15907_v3 = vld [vmem:[#allocation8 + $0x264] ss:$16 sps:$4 sm:$0xff]   ;;  %v15910_v35 = vld [vmem:[#allocation8 + $0x26c] ss:$16 sps:$4 sm:$0xff]  }
 0x261   :  { %2760 = vmatprep.subr.bf16.mxu0 %v15859_v6  ;;  %2842 = vmatprep.subr.bf16.mxu1 %v15862_v7  ;;  %v15905_v6 = vld [vmem:[#allocation8 + $0x260] ss:$16 sps:$4 sm:$0xff]   ;;  %v15908_v7 = vld [vmem:[#allocation8 + $0x268] ss:$16 sps:$4 sm:$0xff]  }
 0x264   :  { %2761 = vmatpush1.bf16.msra.mxu0 %v15857_v49  ;;  %2843 = vmatpush1.bf16.msra.mxu1 %v15860_v8  ;;  %v15913_v49 = vld [vmem:[#allocation8 + $0x284] ss:$16 sps:$4 sm:$0xff]   ;;  %v15916_v8 = vld [vmem:[#allocation8 + $0x28c] ss:$16 sps:$4 sm:$0xff]  }
 0x265   :  { %2762 = vmatprep.subr.bf16.mxu0 %v15865_v9  ;;  %2844 = vmatprep.subr.bf16.mxu1 %v15868_v10  ;;  %v15911_v9 = vld [vmem:[#allocation8 + $0x280] ss:$16 sps:$4 sm:$0xff]   ;;  %v15914_v10 = vld [vmem:[#allocation8 + $0x288] ss:$16 sps:$4 sm:$0xff]  }
 0x268   :  { %2763 = vmatpush1.bf16.msra.mxu0 %v15863_v11  ;;  %2845 = vmatpush1.bf16.msra.mxu1 %v15866_v12  ;;  %v15919_v11 = vld [vmem:[#allocation8 + $0x2a4] ss:$16 sps:$4 sm:$0xff]   ;;  %v15922_v12 = vld [vmem:[#allocation8 + $0x2ac] ss:$16 sps:$4 sm:$0xff]  }
 0x269   :  { %2764 = vmatprep.subr.bf16.mxu0 %v15871_v13  ;;  %2846 = vmatprep.subr.bf16.mxu1 %v15874_v14  ;;  %v15917_v13 = vld [vmem:[#allocation8 + $0x2a0] ss:$16 sps:$4 sm:$0xff]   ;;  %v15920_v14 = vld [vmem:[#allocation8 + $0x2a8] ss:$16 sps:$4 sm:$0xff]  }
 0x26c   :  { %2765 = vmatpush1.bf16.msra.mxu0 %v15869_v15  ;;  %2847 = vmatpush1.bf16.msra.mxu1 %v15872_v16  ;;  %v15925_v15 = vld [vmem:[#allocation8 + $0x2c4] ss:$16 sps:$4 sm:$0xff]   ;;  %v15928_v16 = vld [vmem:[#allocation8 + $0x2cc] ss:$16 sps:$4 sm:$0xff]  }
 0x26d   :  { %2766 = vmatprep.subr.bf16.mxu0 %v15877_v17  ;;  %2848 = vmatprep.subr.bf16.mxu1 %v15880_v21  ;;  %v15923_v17 = vld [vmem:[#allocation8 + $0x2c0] ss:$16 sps:$4 sm:$0xff]   ;;  %v15934_v21 = vld [vmem:[#allocation8 + $0x2ec] ss:$16 sps:$4 sm:$0xff]  }
 0x270   :  { %2767 = vmatpush1.bf16.msra.mxu0 %v15875_v18  ;;  %2849 = vmatpush1.bf16.msra.mxu1 %v15878_v19  ;;  %v15926_v18 = vld [vmem:[#allocation8 + $0x2c8] ss:$16 sps:$4 sm:$0xff]   ;;  %v15931_v19 = vld [vmem:[#allocation8 + $0x2e4] ss:$16 sps:$4 sm:$0xff]  }
 0x271   :  { %2768 = vmatprep.subr.bf16.mxu0 %v15883_v22  ;;  %2850 = vmatprep.subr.bf16.mxu1 %v15886_v24  ;;  %v15929_v22 = vld [vmem:[#allocation8 + $0x2e0] ss:$16 sps:$4 sm:$0xff]   ;;  %v15932_v24 = vld [vmem:[#allocation8 + $0x2e8] ss:$16 sps:$4 sm:$0xff]  }
 0x274   :  { %2769 = vmatpush1.bf16.msra.mxu0 %v15881_v25  ;;  %2851 = vmatpush1.bf16.msra.mxu1 %v15884_v26  ;;  %v15937_v25 = vld [vmem:[#allocation8 + $0x304] ss:$16 sps:$4 sm:$0xff]   ;;  %v15940_v26 = vld [vmem:[#allocation8 + $0x30c] ss:$16 sps:$4 sm:$0xff]  }
 0x275   :  { %2779 = vmatprep.subr.bf16.mxu0 %v15889_v27  ;;  %2861 = vmatprep.subr.bf16.mxu1 %v15892_v28  ;;  %v15935_v27 = vld [vmem:[#allocation8 + $0x300] ss:$16 sps:$4 sm:$0xff]   ;;  %v15938_v28 = vld [vmem:[#allocation8 + $0x308] ss:$16 sps:$4 sm:$0xff]  }
 0x30a   :  { %v1851_v33 = vpop.f32.mrb[4].mxu0  ;;  %v18517_v34 = vpop.f32.mrb[8].mxu1 }
 0x30b   :  { %v15303_v36 = vadd.f32 %v1851_v33, %v1119_v30  ;;  %v1853_v37 = vpop.f32.mrb[5].mxu0  ;;  %v1935_v38 = vpop.f32.mrb[9].mxu1  ;;  %v15943_v30 = vld [vmem:[#allocation8 + $0x324] ss:$16 sps:$4 sm:$0xff]   ;;  %v15944_v33 = vld [vmem:[#allocation8 + $0x328] ss:$16 sps:$4 sm:$0xff]  }
 0x30c   :  { %v15304_v39 = vadd.f32 %v1853_v37, %v1123_v31  ;;  %v15306_v40 = vadd.f32 %v1935_v38, %v1131_v32  ;;  %v1855_v41 = vpop.f32.mrb[6].mxu0  ;;  %v1937_v42 = vpop.f32.mrb[10].mxu1  ;;  %v15946_v31 = vld [vmem:[#allocation8 + $0x32c] ss:$16 sps:$4 sm:$0xff]   ;;  %v15941_v32 = vld [vmem:[#allocation8 + $0x320] ss:$16 sps:$4 sm:$0xff]  }
 0x30d   :  { %v1856_v43 = vpop.f32.mrb[7].mxu0  ;;  %v1938_v45 = vpop.f32.mrb[11].mxu1  ;;  %v1940_v46 = vpack.c.bf16 %v15303_v36, %v15303_v36  ;;  %v15949_v36 = vld [vmem:[#allocation8 + $0x344] ss:$16 sps:$4 sm:$0xff]   ;;  %v15952_v37 = vld [vmem:[#allocation8 + $0x34c] ss:$16 sps:$4 sm:$0xff]  }
 0x30e   :  { %v1941_v52 = vpack.c.bf16 %v15304_v39, %v15304_v39  ;;  %v1943_v53 = vpack.c.bf16 %v15306_v40, %v15306_v40  ;;  %v15947_v38 = vld [vmem:[#allocation8 + $0x340] ss:$16 sps:$4 sm:$0xff]   ;;  %v15950_v39 = vld [vmem:[#allocation8 + $0x348] ss:$16 sps:$4 sm:$0xff]   ;;  %v15955_v40 = vld [vmem:[#allocation8 + $0x364] ss:$16 sps:$4 sm:$0xff]   ;;  %v1127_v45 = vrot.slane %v18509_v29, %v18489_v44 }
 0x30f   :  { %v15958_v41 = vld [vmem:[#allocation8 + $0x36c] ss:$16 sps:$4 sm:$0xff]   ;;  %v15953_v42 = vld [vmem:[#allocation8 + $0x360] ss:$16 sps:$4 sm:$0xff]   ;;  %v15956_v43 = vld [vmem:[#allocation8 + $0x368] ss:$16 sps:$4 sm:$0xff]  }
 0x310   :  { %17786 = vtanh.bf16 %v1941_v52  ;;  %v15964_v52 = vld [vmem:[#allocation8 + $0x38c] ss:$16 sps:$4 sm:$0xff]   ;;  %v15973_v29 = vld [vmem:[#allocation8 + $0x3c4] ss:$16 sps:$4 sm:$0xff]  }
 0x311   :  { %17788 = vtanh.bf16 %v1940_v46  ;;  %v15961_v46 = vld [vmem:[#allocation8 + $0x384] ss:$16 sps:$4 sm:$0xff]  }
 0x312   :  { %17790 = vtanh.bf16 %v1943_v53  ;;  %v15959_v53 = vld [vmem:[#allocation8 + $0x380] ss:$16 sps:$4 sm:$0xff]  }
 0x31b   :  { %v17787_v58 = vpop.eup %17786 }
 0x31c   :  { %v17789_v59 = vpop.eup %17788  ;;  %2770 = vmatprep.mubr.bf16.mxu0 %v17787_v58  ;;  %2852 = vmatprep.mubr.bf16.mxu1 %v17787_v58  ;;  %v15965_v58 = vld [vmem:[#allocation8 + $0x3a0] ss:$16 sps:$4 sm:$0xff]  }
 0x31d   :  { %2771 = vmatmul.mubr.bf16.vlgmr.msra.gmra.mrb[8].mxu0 %v17789_v59  ;;  %2853 = vmatmul.mubr.bf16.vlgmr.msra.gmra.mrb[12].mxu1 %v17789_v59  ;;  %v17791_v63 = vpop.eup %17790  ;;  %v15968_v59 = vld [vmem:[#allocation8 + $0x3a8] ss:$16 sps:$4 sm:$0xff]  }
 0x31e   :  { %2780 = vmatpush1.bf16.msra.mxu0 %v15887_v54  ;;  %2862 = vmatpush1.bf16.msra.mxu1 %v15890_v55  ;;  %v15962_v54 = vld [vmem:[#allocation8 + $0x388] ss:$16 sps:$4 sm:$0xff]   ;;  %v15305_v55 = vadd.f32 %v18517_v34, %v1127_v45  ;;  %v15982_v34 = vld [vmem:[#allocation8 + $0x3ec] ss:$16 sps:$4 sm:$0xff]  }
 0x31f   :  { %2811 = vmatprep.mubr.bf16.mxu0 %v17791_v63  ;;  %2893 = vmatprep.mubr.bf16.mxu1 %v17791_v63  ;;  %v15979_v63 = vld [vmem:[#allocation8 + $0x3e4] ss:$16 sps:$4 sm:$0xff]  }
 0x320   :  { %2781 = vmatprep.subr.bf16.mxu0 %v15895_v56  ;;  %2863 = vmatprep.subr.bf16.mxu1 %v15898_v57  ;;  %v15967_v56 = vld [vmem:[#allocation8 + $0x3a4] ss:$16 sps:$4 sm:$0xff]   ;;  %v15970_v57 = vld [vmem:[#allocation8 + $0x3ac] ss:$16 sps:$4 sm:$0xff]  }
 0x322   :  { %2782 = vmatpush1.bf16.msra.mxu0 %v15893_v47  ;;  %2864 = vmatpush1.bf16.msra.mxu1 %v15896_v60  ;;  %v1942_v47 = vpack.c.bf16 %v15305_v55, %v15305_v55  ;;  %v15976_v60 = vld [vmem:[#allocation8 + $0x3cc] ss:$16 sps:$4 sm:$0xff]  }
 0x323   :  { %2783 = vmatprep.subr.bf16.mxu0 %v15901_v61  ;;  %2865 = vmatprep.subr.bf16.mxu1 %v15904_v62  ;;  %v15971_v61 = vld [vmem:[#allocation8 + $0x3c0] ss:$16 sps:$4 sm:$0xff]   ;;  %v15974_v62 = vld [vmem:[#allocation8 + $0x3c8] ss:$16 sps:$4 sm:$0xff]  }
 0x324   :  { %17792 = vtanh.bf16 %v1942_v47 }
 0x326   :  { %2784 = vmatpush1.bf16.msra.mxu0 %v15899_v1  ;;  %2866 = vmatpush1.bf16.msra.mxu1 %v15902_v2  ;;  %v15977_v1 = vld [vmem:[#allocation8 + $0x3e0] ss:$16 sps:$4 sm:$0xff]   ;;  %v15980_v2 = vld [vmem:[#allocation8 + $0x3e8] ss:$16 sps:$4 sm:$0xff]  }
 0x327   :  { %2785 = vmatprep.subr.bf16.mxu0 %v15907_v3  ;;  %2867 = vmatprep.subr.bf16.mxu1 %v15910_v35  ;;  %v15983_v3 = vld [vmem:[#allocation10 + $0x40] sm:$0xff]  }
 0x328   :  { %v15984_v35 = vld [vmem:[#allocation10 + $0xc0] sm:$0xff]  }
 0x32a   :  { %2786 = vmatpush1.bf16.msra.mxu0 %v15905_v6  ;;  %2868 = vmatpush1.bf16.msra.mxu1 %v15908_v7  ;;  %v15985_v6 = vld [vmem:[#allocation10] sm:$0xff]  }
 0x32b   :  { %2787 = vmatprep.subr.bf16.mxu0 %v15913_v49  ;;  %2869 = vmatprep.subr.bf16.mxu1 %v15916_v8  ;;  %v15986_v7 = vld [vmem:[#allocation10 + $0x80] sm:$0xff]   ;;  %v15987_v49 = vld [vmem:[#allocation10 + $0x48] sm:$0xff]  }
 0x32c   :  { %v15988_v8 = vld [vmem:[#allocation10 + $0xc8] sm:$0xff]  }
 0x32e   :  { %2788 = vmatpush1.bf16.msra.mxu0 %v15911_v9  ;;  %2870 = vmatpush1.bf16.msra.mxu1 %v15914_v10  ;;  %v15989_v10 = vld [vmem:[#allocation10 + $0x8] sm:$0xff]  }
 0x32f   :  { %2789 = vmatprep.subr.bf16.mxu0 %v15919_v11  ;;  %2871 = vmatprep.subr.bf16.mxu1 %v15922_v12  ;;  %v17793_v9 = vpop.eup %17792  ;;  %v15990_v11 = vld [vmem:[#allocation10 + $0x88] sm:$0xff]   ;;  %v15991_v12 = vld [vmem:[#allocation10 + $0x50] sm:$0xff]  }
 0x332   :  { %2790 = vmatpush1.bf16.msra.mxu0 %v15917_v13  ;;  %2872 = vmatpush1.bf16.msra.mxu1 %v15920_v14  ;;  %v15992_v13 = vld [vmem:[#allocation10 + $0xd0] sm:$0xff]  }
 0x333   :  { %2791 = vmatprep.subr.bf16.mxu0 %v15925_v15  ;;  %2873 = vmatprep.subr.bf16.mxu1 %v15928_v16  ;;  %v15993_v14 = vld [vmem:[#allocation10 + $0x10] sm:$0xff]   ;;  %v15995_v16 = vld [vmem:[#allocation10 + $0x58] sm:$0xff]  }
 0x334   :  { %v15994_v15 = vld [vmem:[#allocation10 + $0x90] sm:$0xff]  }
 0x336   :  { %2792 = vmatpush1.bf16.msra.mxu0 %v15923_v17  ;;  %2874 = vmatpush1.bf16.msra.mxu1 %v15926_v18  ;;  %v15996_v17 = vld [vmem:[#allocation10 + $0xd8] sm:$0xff]  }
 0x337   :  { %2793 = vmatprep.subr.bf16.mxu0 %v15931_v19  ;;  %2875 = vmatprep.subr.bf16.mxu1 %v15934_v21  ;;  %v15997_v18 = vld [vmem:[#allocation10 + $0x18] sm:$0xff]   ;;  %v15999_v21 = vld [vmem:[#allocation10 + $0x60] sm:$0xff]  }
 0x338   :  { %v15998_v19 = vld [vmem:[#allocation10 + $0x98] sm:$0xff]  }
 0x33a   :  { %2794 = vmatpush1.bf16.msra.mxu0 %v15929_v22  ;;  %2876 = vmatpush1.bf16.msra.mxu1 %v15932_v24  ;;  %v16000_v22 = vld [vmem:[#allocation10 + $0xe0] sm:$0xff]  }
 0x33b   :  { %2795 = vmatprep.subr.bf16.mxu0 %v15937_v25  ;;  %2877 = vmatprep.subr.bf16.mxu1 %v15940_v26  ;;  %v16001_v24 = vld [vmem:[#allocation10 + $0x20] sm:$0xff]   ;;  %v16003_v26 = vld [vmem:[#allocation10 + $0x68] sm:$0xff]  }
 0x33c   :  { %v16002_v25 = vld [vmem:[#allocation10 + $0xa0] sm:$0xff]  }
 0x33e   :  { %2796 = vmatpush1.bf16.msra.mxu0 %v15935_v27  ;;  %2878 = vmatpush1.bf16.msra.mxu1 %v15938_v28  ;;  %v16004_v27 = vld [vmem:[#allocation10 + $0xe8] sm:$0xff]  }
 0x33f   :  { %2797 = vmatprep.subr.bf16.mxu0 %v15943_v30  ;;  %2879 = vmatprep.subr.bf16.mxu1 %v15946_v31  ;;  %v16005_v28 = vld [vmem:[#allocation10 + $0x28] sm:$0xff]   ;;  %v16007_v31 = vld [vmem:[#allocation10 + $0x70] sm:$0xff]  }
 0x340   :  { %v16006_v30 = vld [vmem:[#allocation10 + $0xa8] sm:$0xff]  }
 0x342   :  { %2798 = vmatpush1.bf16.msra.mxu0 %v15941_v32  ;;  %2880 = vmatpush1.bf16.msra.mxu1 %v15944_v33  ;;  %v16008_v32 = vld [vmem:[#allocation10 + $0xf0] sm:$0xff]  }
 0x343   :  { %2799 = vmatprep.subr.bf16.mxu0 %v15949_v36  ;;  %2881 = vmatprep.subr.bf16.mxu1 %v15952_v37  ;;  %v16009_v33 = vld [vmem:[#allocation10 + $0x30] sm:$0xff]   ;;  %v16011_v37 = vld [vmem:[#allocation10 + $0x78] sm:$0xff]  }
 0x344   :  { %v16010_v36 = vld [vmem:[#allocation10 + $0xb0] sm:$0xff]  }
 0x346   :  { %2800 = vmatpush1.bf16.msra.mxu0 %v15947_v38  ;;  %2882 = vmatpush1.bf16.msra.mxu1 %v15950_v39  ;;  %v16012_v38 = vld [vmem:[#allocation10 + $0xf8] sm:$0xff]  }
 0x347   :  { %2801 = vmatprep.subr.bf16.mxu0 %v15955_v40  ;;  %2883 = vmatprep.subr.bf16.mxu1 %v15958_v41  ;;  %v16013_v39 = vld [vmem:[#allocation10 + $0x38] sm:$0xff]   ;;  %v16015_v41 = vld [vmem:[#allocation10 + $0x140] sm:$0xff]  }
 0x348   :  { %v16014_v40 = vld [vmem:[#allocation10 + $0xb8] sm:$0xff]  }
 0x34a   :  { %2802 = vmatpush1.bf16.msra.mxu0 %v15953_v42  ;;  %2884 = vmatpush1.bf16.msra.mxu1 %v15956_v43  ;;  %v16016_v42 = vld [vmem:[#allocation10 + $0x1c0] sm:$0xff]   ;;  %v2076_v43 = vld [vmem:[%s18771_s6] sm:$0xf] }
 0x34b   :  { %2803 = vmatprep.subr.bf16.mxu0 %v15961_v46  ;;  %2885 = vmatprep.subr.bf16.mxu1 %v15964_v52  ;;  %v2081_v45 = vrot.slane %v2076_v43, %v18466_v48  ;;  %v2089_v46 = vrot.slane %v2076_v43, %v18489_v44  ;;  %v2085_v52 = vrot.slane %v2076_v43, %v18474_v50 }
 0x34e   :  { %2804 = vmatpush1.bf16.msra.mxu0 %v15959_v53  ;;  %2886 = vmatpush1.bf16.msra.mxu1 %v15962_v54  ;;  %v2093_v53 = vrot.slane %v2076_v43, %v18492_v51  ;;  %v16048_v43 = vld [vmem:[#allocation11 + $0x8] sm:$0xff]  }
 0x34f   :  { %2805 = vmatprep.subr.bf16.mxu0 %v15967_v56  ;;  %2887 = vmatprep.subr.bf16.mxu1 %v15970_v57 }
 0x352   :  { %2806 = vmatpush1.bf16.msra.mxu0 %v15965_v58  ;;  %2888 = vmatpush1.bf16.msra.mxu1 %v15968_v59 }
 0x353   :  { %2807 = vmatprep.subr.bf16.mxu0 %v15973_v29  ;;  %2889 = vmatprep.subr.bf16.mxu1 %v15976_v60 }
 0x356   :  { %2808 = vmatpush1.bf16.msra.mxu0 %v15971_v61  ;;  %2890 = vmatpush1.bf16.msra.mxu1 %v15974_v62 }
 0x357   :  { %2809 = vmatprep.subr.bf16.mxu0 %v15979_v63  ;;  %2891 = vmatprep.subr.bf16.mxu1 %v15982_v34 }
 0x35a   :  { %2810 = vmatpush1.bf16.msra.mxu0 %v15977_v1  ;;  %2892 = vmatpush1.bf16.msra.mxu1 %v15980_v2 }
 0x35b   :  { %14975 = vmatprep.subr.bf16.mxu0 %v15983_v3  ;;  %14997 = vmatprep.subr.bf16.mxu1 %v15984_v35 }
 0x35d   :  { %2812 = vmatmul.mubr.bf16.vlgmr.msra.gmra.mrb[8].mxu0 %v17793_v9  ;;  %2894 = vmatmul.mubr.bf16.vlgmr.msra.gmra.mrb[12].mxu1 %v17793_v9  ;;  %v16019_v9 = vld [vmem:[#allocation10 + $0x148] sm:$0xff]  }
 0x35e   :  { %14976 = vmatpush3.bf16.msra.mxu0 %v15985_v6  ;;  %14998 = vmatpush3.bf16.msra.mxu1 %v15986_v7  ;;  %v16017_v6 = vld [vmem:[#allocation10 + $0x100] sm:$0xff]  }
 0x35f   :  { %14977 = vmatprep.subr.bf16.mxu0 %v15987_v49  ;;  %14999 = vmatprep.subr.bf16.mxu1 %v15988_v8  ;;  %v16018_v49 = vld [vmem:[#allocation10 + $0x180] sm:$0xff]  }
 0x362   :  { %14978 = vmatpush3.bf16.msra.mxu0 %v15989_v10  ;;  %15000 = vmatpush3.bf16.msra.mxu1 %v15990_v11  ;;  %v16020_v11 = vld [vmem:[#allocation10 + $0x1c8] sm:$0xff]  }
 0x363   :  { %14979 = vmatprep.subr.bf16.mxu0 %v15991_v12  ;;  %15001 = vmatprep.subr.bf16.mxu1 %v15992_v13  ;;  %v16021_v12 = vld [vmem:[#allocation10 + $0x108] sm:$0xff]  }
 0x364   :  { %v16022_v13 = vld [vmem:[#allocation10 + $0x188] sm:$0xff]  }
 0x366   :  { %14980 = vmatpush3.bf16.msra.mxu0 %v15993_v14  ;;  %15002 = vmatpush3.bf16.msra.mxu1 %v15994_v15  ;;  %v16023_v14 = vld [vmem:[#allocation10 + $0x150] sm:$0xff]  }
 0x367   :  { %14981 = vmatprep.subr.bf16.mxu0 %v15995_v16  ;;  %15003 = vmatprep.subr.bf16.mxu1 %v15996_v17  ;;  %v16024_v15 = vld [vmem:[#allocation10 + $0x1d0] sm:$0xff]  }
 0x368   :  { %v16025_v16 = vld [vmem:[#allocation10 + $0x110] sm:$0xff]  }
 0x369   :  { %v16026_v17 = vld [vmem:[#allocation10 + $0x190] sm:$0xff]  }
 0x36a   :  { %14982 = vmatpush3.bf16.msra.mxu0 %v15997_v18  ;;  %15004 = vmatpush3.bf16.msra.mxu1 %v15998_v19  ;;  %v16027_v18 = vld [vmem:[#allocation10 + $0x158] sm:$0xff]  }
 0x36b   :  { %14983 = vmatprep.subr.bf16.mxu0 %v15999_v21  ;;  %15005 = vmatprep.subr.bf16.mxu1 %v16000_v22  ;;  %v16028_v19 = vld [vmem:[#allocation10 + $0x1d8] sm:$0xff]   ;;  %v16031_v22 = vld [vmem:[#allocation10 + $0x160] sm:$0xff]  }
 0x36c   :  { %v16029_v21 = vld [vmem:[#allocation10 + $0x118] sm:$0xff]  }
 0x36e   :  { %14984 = vmatpush3.bf16.msra.mxu0 %v16001_v24  ;;  %15006 = vmatpush3.bf16.msra.mxu1 %v16002_v25  ;;  %v16032_v24 = vld [vmem:[#allocation10 + $0x1e0] sm:$0xff]  }
 0x36f   :  { %14985 = vmatprep.subr.bf16.mxu0 %v16003_v26  ;;  %15007 = vmatprep.subr.bf16.mxu1 %v16004_v27  ;;  %v16034_v25 = vld [vmem:[#allocation10 + $0x1a0] sm:$0xff]   ;;  %v16035_v26 = vld [vmem:[#allocation10 + $0x168] sm:$0xff]  }
 0x370   :  { %v16036_v27 = vld [vmem:[#allocation10 + $0x1e8] sm:$0xff]  }
 0x372   :  { %14986 = vmatpush3.bf16.msra.mxu0 %v16005_v28  ;;  %15008 = vmatpush3.bf16.msra.mxu1 %v16006_v30  ;;  %v16037_v28 = vld [vmem:[#allocation10 + $0x128] sm:$0xff]  }
 0x373   :  { %14987 = vmatprep.subr.bf16.mxu0 %v16007_v31  ;;  %15009 = vmatprep.subr.bf16.mxu1 %v16008_v32  ;;  %v16038_v30 = vld [vmem:[#allocation10 + $0x1a8] sm:$0xff]   ;;  %v16039_v31 = vld [vmem:[#allocation10 + $0x170] sm:$0xff]  }
 0x374   :  { %v16040_v32 = vld [vmem:[#allocation10 + $0x1f0] sm:$0xff]  }
 0x376   :  { %14988 = vmatpush3.bf16.msra.mxu0 %v16009_v33  ;;  %15010 = vmatpush3.bf16.msra.mxu1 %v16010_v36  ;;  %v16041_v33 = vld [vmem:[#allocation10 + $0x130] sm:$0xff]  }
 0x377   :  { %14989 = vmatprep.subr.bf16.mxu0 %v16011_v37  ;;  %15011 = vmatprep.subr.bf16.mxu1 %v16012_v38  ;;  %v16042_v36 = vld [vmem:[#allocation10 + $0x1b0] sm:$0xff]   ;;  %v16043_v37 = vld [vmem:[#allocation10 + $0x178] sm:$0xff]  }
 0x378   :  { %v16044_v38 = vld [vmem:[#allocation10 + $0x1f8] sm:$0xff]  }
 0x37a   :  { %14990 = vmatpush3.bf16.msra.mxu0 %v16013_v39  ;;  %15012 = vmatpush3.bf16.msra.mxu1 %v16014_v40  ;;  %v16045_v39 = vld [vmem:[#allocation10 + $0x138] sm:$0xff]  }
 0x37b   :  { %15019 = vmatprep.subr.bf16.mxu0 %v16015_v41  ;;  %15041 = vmatprep.subr.bf16.mxu1 %v16016_v42  ;;  %v16046_v40 = vld [vmem:[#allocation10 + $0x1b8] sm:$0xff]   ;;  %v16047_v41 = vld [vmem:[#allocation11] sm:$0xff]   ;;  %v18187_v42 = vmov 0.0  }
 0x430   :  { %v2813_v54 = vpop.f32.mrb[8].mxu0  ;;  %v2895_v55 = vpop.f32.mrb[12].mxu1 }
 0x431   :  { %v15307_v56 = vadd.f32 %v2813_v54, %v2081_v45  ;;  %v15309_v57 = vadd.f32 %v2895_v55, %v2089_v46  ;;  %v2815_v58 = vpop.f32.mrb[9].mxu0  ;;  %v2897_v59 = vpop.f32.mrb[13].mxu1  ;;  %v16049_v45 = vld [vmem:[#allocation11 + $0x10] sm:$0xff]   ;;  %v16050_v46 = vld [vmem:[#allocation11 + $0x18] sm:$0xff]  }
 0x432   :  { %v15308_v47 = vadd.f32 %v2815_v58, %v2085_v52  ;;  %v15310_v29 = vadd.f32 %v2897_v59, %v2093_v53  ;;  %v2817_v60 = vpop.f32.mrb[10].mxu0  ;;  %v2899_v61 = vpop.f32.mrb[14].mxu1  ;;  %v16053_v52 = vld [vmem:[#allocation11 + $0x30] sm:$0xff]   ;;  %v16054_v53 = vld [vmem:[#allocation11 + $0x38] sm:$0xff]  }
 0x433   :  { %v2902_v62 = vpack.c.bf16 %v15307_v56, %v15307_v56  ;;  %v2818_v63 = vpop.f32.mrb[11].mxu0  ;;  %v2900_v34 = vpop.f32.mrb[15].mxu1  ;;  %v2904_v3 = vpack.c.bf16 %v15309_v57, %v15309_v57  ;;  %v16055_v54 = vld [vmem:[#allocation13] ss:$16 sps:$4 sm:$0xff]   ;;  %v16057_v55 = vld [vmem:[#allocation13 + $0x4] ss:$16 sps:$4 sm:$0xff]  }
 0x434   :  { %v2903_v1 = vpack.c.bf16 %v15308_v47, %v15308_v47  ;;  %v2905_v2 = vpack.c.bf16 %v15310_v29, %v15310_v29  ;;  %v16060_v56 = vld [vmem:[#allocation13 + $0xc] ss:$16 sps:$4 sm:$0xff]   ;;  %v16063_v57 = vld [vmem:[#allocation13 + $0x24] ss:$16 sps:$4 sm:$0xff]   ;;  %v16061_v58 = vld [vmem:[#allocation13 + $0x20] ss:$16 sps:$4 sm:$0xff]  }
 0x435   :  { %17794 = vtanh.bf16 %v2902_v62  ;;  %v16069_v59 = vld [vmem:[#allocation13 + $0x44] ss:$16 sps:$4 sm:$0xff]   ;;  %v16067_v47 = vld [vmem:[#allocation13 + $0x40] ss:$16 sps:$4 sm:$0xff]   ;;  %v13704_v63 = vld [vmem:[%s18773_s8] ss:$0 sm:$0xff] }
 0x436   :  { %17796 = vtanh.bf16 %v2903_v1  ;;  %v16075_v29 = vld [vmem:[#allocation13 + $0x64] ss:$16 sps:$4 sm:$0xff]   ;;  %v16073_v60 = vld [vmem:[#allocation13 + $0x60] ss:$16 sps:$4 sm:$0xff]  }
 0x437   :  { %17798 = vtanh.bf16 %v2905_v2 }
 0x438   :  { %17800 = vtanh.bf16 %v2904_v3 }
 0x440   :  { %v17795_v35 = vpop.eup %17794 }
 0x441   :  { %v17797_v7 = vpop.eup %17796 }
 0x442   :  { %v17799_v8 = vpop.eup %17798  ;;  %3461 = vmatprep.mubr.bf16.mxu0 %v17797_v7 }
 0x443   :  { %v17801_v10 = vpop.eup %17800  ;;  %3501 = vmatprep.mubr.bf16.mxu1 %v17799_v8  ;;  %3462 = vmatmul.mubr.bf16.vlgmr.msra.gmra.mrb[12].mxu0 %v17795_v35 }
 0x444   :  { %3502 = vmatmul.mubr.bf16.vlgmr.msra.gmra.mrb[16].mxu1 %v17801_v10  ;;  %15020 = vmatpush3.bf16.msra.mxu0 %v16017_v6 }
 0x445   :  { %15042 = vmatpush3.bf16.msra.mxu1 %v16018_v49  ;;  %3541 = vmatprep.mubr.bf16.mxu0 %v18480_v4  ;;  %v16030_v4 = vld [vmem:[#allocation10 + $0x198] sm:$0xff]  }
 0x446   :  { %3581 = vmatprep.mubr.bf16.mxu1 %v18498_v20  ;;  %15021 = vmatprep.subr.bf16.mxu0 %v16019_v9  ;;  %v16033_v20 = vld [vmem:[#allocation10 + $0x120] sm:$0xff]  }
 0x447   :  { %15043 = vmatprep.subr.bf16.mxu1 %v16020_v11 }
 0x448   :  { %15022 = vmatpush3.bf16.msra.mxu0 %v16021_v12 }
 0x449   :  { %15044 = vmatpush3.bf16.msra.mxu1 %v16022_v13  ;;  %15023 = vmatprep.subr.bf16.mxu0 %v16023_v14 }
 0x44a   :  { %15045 = vmatprep.subr.bf16.mxu1 %v16024_v15 }
 0x44c   :  { %15024 = vmatpush3.bf16.msra.mxu0 %v16025_v16 }
 0x44d   :  { %15046 = vmatpush3.bf16.msra.mxu1 %v16026_v17  ;;  %15025 = vmatprep.subr.bf16.mxu0 %v16027_v18 }
 0x44e   :  { %15047 = vmatprep.subr.bf16.mxu1 %v16028_v19 }
 0x450   :  { %15026 = vmatpush3.bf16.msra.mxu0 %v16029_v21 }
 0x451   :  { %15048 = vmatpush3.bf16.msra.mxu1 %v16030_v4  ;;  %15027 = vmatprep.subr.bf16.mxu0 %v16031_v22  ;;  %v16058_v22 = vld [vmem:[#allocation13 + $0x8] ss:$16 sps:$4 sm:$0xff]  }
 0x452   :  { %15049 = vmatprep.subr.bf16.mxu1 %v16032_v24 }
 0x454   :  { %15028 = vmatpush3.bf16.msra.mxu0 %v16033_v20  ;;  %v16066_v20 = vld [vmem:[#allocation13 + $0x2c] ss:$16 sps:$4 sm:$0xff]  }
 0x455   :  { %15050 = vmatpush3.bf16.msra.mxu1 %v16034_v25  ;;  %15029 = vmatprep.subr.bf16.mxu0 %v16035_v26  ;;  %v16064_v25 = vld [vmem:[#allocation13 + $0x28] ss:$16 sps:$4 sm:$0xff]   ;;  %v16072_v26 = vld [vmem:[#allocation13 + $0x4c] ss:$16 sps:$4 sm:$0xff]  }
 0x456   :  { %15051 = vmatprep.subr.bf16.mxu1 %v16036_v27  ;;  %v16070_v27 = vld [vmem:[#allocation13 + $0x48] ss:$16 sps:$4 sm:$0xff]  }
 0x458   :  { %15030 = vmatpush3.bf16.msra.mxu0 %v16037_v28  ;;  %v16078_v28 = vld [vmem:[#allocation13 + $0x6c] ss:$16 sps:$4 sm:$0xff]  }
 0x459   :  { %15052 = vmatpush3.bf16.msra.mxu1 %v16038_v30  ;;  %15031 = vmatprep.subr.bf16.mxu0 %v16039_v31  ;;  %v16076_v30 = vld [vmem:[#allocation13 + $0x68] ss:$16 sps:$4 sm:$0xff]   ;;  %v16081_v31 = vld [vmem:[#allocation13 + $0x84] ss:$16 sps:$4 sm:$0xff]  }
 0x45a   :  { %15053 = vmatprep.subr.bf16.mxu1 %v16040_v32  ;;  %v16084_v32 = vld [vmem:[#allocation13 + $0x8c] ss:$16 sps:$4 sm:$0xff]  }
 0x45c   :  { %15032 = vmatpush3.bf16.msra.mxu0 %v16041_v33  ;;  %v16079_v33 = vld [vmem:[#allocation13 + $0x80] ss:$16 sps:$4 sm:$0xff]  }
 0x45d   :  { %15054 = vmatpush3.bf16.msra.mxu1 %v16042_v36  ;;  %15033 = vmatprep.subr.bf16.mxu0 %v16043_v37  ;;  %v16082_v36 = vld [vmem:[#allocation13 + $0x88] ss:$16 sps:$4 sm:$0xff]   ;;  %v16087_v37 = vld [vmem:[#allocation13 + $0xa4] ss:$16 sps:$4 sm:$0xff]  }
 0x45e   :  { %15055 = vmatprep.subr.bf16.mxu1 %v16044_v38  ;;  %v16090_v38 = vld [vmem:[#allocation13 + $0xac] ss:$16 sps:$4 sm:$0xff]  }
 0x460   :  { %15034 = vmatpush3.bf16.msra.mxu0 %v16045_v39  ;;  %v16085_v39 = vld [vmem:[#allocation13 + $0xa0] ss:$16 sps:$4 sm:$0xff]  }
 0x461   :  { %15056 = vmatpush3.bf16.msra.mxu1 %v16046_v40  ;;  %15257 = vmatprep.subr.bf16.mxu0 %v18187_v42  ;;  %v16088_v40 = vld [vmem:[#allocation13 + $0xa8] ss:$16 sps:$4 sm:$0xff]  }
 0x462   :  { %3918 = vmatprep.subr.bf16.mxu1 %v16057_v55  ;;  %v16108_v55 = vld [vmem:[#allocation14 + $0xc] ss:$16 sps:$4 sm:$0xff]  }
 0x463   :  { %3542 = vmatmul.mubr.bf16.vlgmr.msra.gmra.mrb[16].mxu0 %v18482_v5  ;;  %v16051_v5 = vld [vmem:[#allocation11 + $0x20] sm:$0xff]  }
 0x464   :  { %3582 = vmatmul.mubr.bf16.vlgmr.msra.gmra.mrb[20].mxu1 %v18502_v23  ;;  %15258 = vmatpush3.bf16.msra.mxu0 %v16047_v41  ;;  %v16052_v23 = vld [vmem:[#allocation11 + $0x28] sm:$0xff]   ;;  %v16093_v41 = vld [vmem:[#allocation13 + $0xc4] ss:$16 sps:$4 sm:$0xff]  }
 0x465   :  { %3950 = vmatprep.mubr.bf16.mxu1 %v18186_v0  ;;  %15259 = vmatprep.subr.bf16.mxu0 %v18187_v42 }
 0x466   :  { %15273 = vmatprep.mubr.msk.bf16.mxu0 %vm18188_vm0, %v18187_v42  ;;  %3919 = vmatpush1.bf16.msra.mxu1 %v16055_v54  ;;  %v16105_v54 = vld [vmem:[#allocation14 + $0x4] ss:$16 sps:$4 sm:$0xff]  }
 0x467   :  { %3920 = vmatprep.subr.bf16.mxu1 %v16063_v57 }
 0x468   :  { %15260 = vmatpush3.bf16.msra.mxu0 %v16048_v43  ;;  %v16096_v43 = vld [vmem:[#allocation13 + $0xcc] ss:$16 sps:$4 sm:$0xff]  }
 0x469   :  { %15261 = vmatprep.subr.bf16.mxu0 %v18187_v42 }
 0x46a   :  { %3921 = vmatpush1.bf16.msra.mxu1 %v16061_v58 }
 0x46b   :  { %3922 = vmatprep.subr.bf16.mxu1 %v16069_v59 }
 0x46c   :  { %15262 = vmatpush3.bf16.msra.mxu0 %v16049_v45  ;;  %v16091_v45 = vld [vmem:[#allocation13 + $0xc0] ss:$16 sps:$4 sm:$0xff]  }
 0x46d   :  { %15263 = vmatprep.subr.bf16.mxu0 %v18187_v42 }
 0x46e   :  { %3923 = vmatpush1.bf16.msra.mxu1 %v16067_v47 }
 0x46f   :  { %3924 = vmatprep.subr.bf16.mxu1 %v16075_v29 }
 0x470   :  { %15264 = vmatpush3.bf16.msra.mxu0 %v16050_v46  ;;  %v16094_v46 = vld [vmem:[#allocation13 + $0xc8] ss:$16 sps:$4 sm:$0xff]  }
 0x471   :  { %15265 = vmatprep.subr.bf16.mxu0 %v18187_v42 }
 0x472   :  { %3925 = vmatpush1.bf16.msra.mxu1 %v16073_v60 }
 0x473   :  { %3926 = vmatprep.subr.bf16.mxu1 %v16081_v31  ;;  %v16151_v31 = vld [vmem:[#allocation14 + $0x100] ss:$16 sps:$4 sm:$0xff]  }
 0x474   :  { %15266 = vmatpush3.bf16.msra.mxu0 %v16051_v5  ;;  %v16099_v5 = vld [vmem:[#allocation13 + $0xe4] ss:$16 sps:$4 sm:$0xff]  }
 0x475   :  { %15267 = vmatprep.subr.bf16.mxu0 %v18187_v42 }
 0x476   :  { %3927 = vmatpush1.bf16.msra.mxu1 %v16079_v33  ;;  %v16159_v33 = vld [vmem:[#allocation14 + $0x124] ss:$16 sps:$4 sm:$0xff]  }
 0x477   :  { %3928 = vmatprep.subr.bf16.mxu1 %v16087_v37  ;;  %v16157_v37 = vld [vmem:[#allocation14 + $0x120] ss:$16 sps:$4 sm:$0xff]  }
 0x478   :  { %15268 = vmatpush3.bf16.msra.mxu0 %v16052_v23  ;;  %v16102_v23 = vld [vmem:[#allocation13 + $0xec] ss:$16 sps:$4 sm:$0xff]  }
 0x479   :  { %15269 = vmatprep.subr.bf16.mxu0 %v18187_v42 }
 0x47a   :  { %3929 = vmatpush1.bf16.msra.mxu1 %v16085_v39  ;;  %v16165_v39 = vld [vmem:[#allocation14 + $0x144] ss:$16 sps:$4 sm:$0xff]  }
 0x47b   :  { %3930 = vmatprep.subr.bf16.mxu1 %v16093_v41  ;;  %v16163_v41 = vld [vmem:[#allocation14 + $0x140] ss:$16 sps:$4 sm:$0xff]  }
 0x47c   :  { %15270 = vmatpush3.bf16.msra.mxu0 %v16053_v52  ;;  %v16097_v52 = vld [vmem:[#allocation13 + $0xe0] ss:$16 sps:$4 sm:$0xff]  }
 0x47d   :  { %15271 = vmatprep.subr.bf16.mxu0 %v18187_v42 }
 0x47e   :  { %3931 = vmatpush1.bf16.msra.mxu1 %v16091_v45  ;;  %v16171_v45 = vld [vmem:[#allocation14 + $0x164] ss:$16 sps:$4 sm:$0xff]  }
 0x47f   :  { %3932 = vmatprep.subr.bf16.mxu1 %v16099_v5  ;;  %v16169_v5 = vld [vmem:[#allocation14 + $0x160] ss:$16 sps:$4 sm:$0xff]  }
 0x480   :  { %15272 = vmatpush3.bf16.msra.mxu0 %v16054_v53  ;;  %v16100_v53 = vld [vmem:[#allocation13 + $0xe8] ss:$16 sps:$4 sm:$0xff]  }
 0x481   :  { %3959 = vmatprep.subr.bf16.mxu0 %v16060_v56  ;;  %v13769_v56 = vld [vmem:[%s18775_s10] ss:$0 sm:$0xff] }
 0x482   :  { %3933 = vmatpush1.bf16.msra.mxu1 %v16097_v52  ;;  %v16177_v52 = vld [vmem:[#allocation14 + $0x184] ss:$16 sps:$4 sm:$0xff]  }
 0x483   :  { %4798 = vmatprep.subr.bf16.mxu1 %v16105_v54  ;;  %v16175_v54 = vld [vmem:[#allocation14 + $0x180] ss:$16 sps:$4 sm:$0xff]  }
 0x516   :  { %v14991_v61 = vpop.f32.mrb[12].mxu0 }
 0x517   :  { %v15013_v62 = vpop.f32.mrb[16].mxu1  ;;  %v14992_v34 = vpop.f32.mrb[13].mxu0 }
 0x518   :  { %v14993_v1 = vadd.f32 %v14992_v34, %v14991_v61  ;;  %v15014_v2 = vpop.f32.mrb[17].mxu1  ;;  %v14994_v3 = vpop.f32.mrb[14].mxu0  ;;  %v16103_v61 = vld [vmem:[#allocation14] ss:$16 sps:$4 sm:$0xff]   ;;  %v16114_v34 = vld [vmem:[#allocation14 + $0x2c] ss:$16 sps:$4 sm:$0xff]  }
 0x519   :  { %v15015_v35 = vadd.f32 %v15014_v2, %v15013_v62  ;;  %v15016_v6 = vpop.f32.mrb[18].mxu1  ;;  %v14995_v7 = vpop.f32.mrb[15].mxu0  ;;  %v16106_v62 = vld [vmem:[#allocation14 + $0x8] ss:$16 sps:$4 sm:$0xff]   ;;  %v16109_v2 = vld [vmem:[#allocation14 + $0x20] ss:$16 sps:$4 sm:$0xff]  }
 0x51a   :  { %v3464_v49 = vadd.f32 %v14993_v1, %v13704_v63  ;;  %v15017_v8 = vpop.f32.mrb[19].mxu1  ;;  %v16111_v63 = vld [vmem:[#allocation14 + $0x24] ss:$16 sps:$4 sm:$0xff]   ;;  %v16112_v3 = vld [vmem:[#allocation14 + $0x28] ss:$16 sps:$4 sm:$0xff]  }
 0x51b   :  { %v16120_v6 = vld [vmem:[#allocation14 + $0x4c] ss:$16 sps:$4 sm:$0xff]   ;;  %v16115_v7 = vld [vmem:[#allocation14 + $0x40] ss:$16 sps:$4 sm:$0xff]   ;;  %v16123_v8 = vld [vmem:[#allocation14 + $0x64] ss:$16 sps:$4 sm:$0xff]  }
 0x51c   :  { %v3504_v9 = vadd.f32 %v15015_v35, %v3464_v49  ;;  %v16117_v35 = vld [vmem:[#allocation14 + $0x44] ss:$16 sps:$4 sm:$0xff]   ;;  %v16118_v49 = vld [vmem:[#allocation14 + $0x48] ss:$16 sps:$4 sm:$0xff]  }
 0x536   :  { %v15035_v10 = vpop.f32.mrb[16].mxu0 }
 0x537   :  { %v15057_v11 = vpop.f32.mrb[20].mxu1  ;;  %v15036_v12 = vpop.f32.mrb[17].mxu0 }
 0x538   :  { %v15037_v13 = vadd.f32 %v15036_v12, %v15035_v10  ;;  %v15058_v14 = vpop.f32.mrb[21].mxu1  ;;  %v15038_v15 = vpop.f32.mrb[18].mxu0  ;;  %v16121_v10 = vld [vmem:[#allocation14 + $0x60] ss:$16 sps:$4 sm:$0xff]   ;;  %v16129_v12 = vld [vmem:[#allocation14 + $0x84] ss:$16 sps:$4 sm:$0xff]  }
 0x539   :  { %v15059_v16 = vadd.f32 %v15058_v14, %v15057_v11  ;;  %v15060_v17 = vpop.f32.mrb[22].mxu1  ;;  %v15039_v18 = vpop.f32.mrb[19].mxu0  ;;  %v16124_v11 = vld [vmem:[#allocation14 + $0x68] ss:$16 sps:$4 sm:$0xff]   ;;  %v16127_v14 = vld [vmem:[#allocation14 + $0x80] ss:$16 sps:$4 sm:$0xff]  }
 0x53a   :  { %v3544_v19 = vadd.f32 %v15037_v13, %v3504_v9  ;;  %v15061_v21 = vpop.f32.mrb[23].mxu1  ;;  %v16126_v9 = vld [vmem:[#allocation14 + $0x6c] ss:$16 sps:$4 sm:$0xff]   ;;  %v16130_v15 = vld [vmem:[#allocation14 + $0x88] ss:$16 sps:$4 sm:$0xff]  }
 0x53b   :  { %v16132_v13 = vld [vmem:[#allocation14 + $0x8c] ss:$16 sps:$4 sm:$0xff]   ;;  %v16133_v18 = vld [vmem:[#allocation14 + $0xa0] ss:$16 sps:$4 sm:$0xff]   ;;  %v16141_v21 = vld [vmem:[#allocation14 + $0xc4] ss:$16 sps:$4 sm:$0xff]  }
 0x53c   :  { %v3584_v4 = vadd.f32 %v15059_v16, %v3544_v19  ;;  %v16135_v16 = vld [vmem:[#allocation14 + $0xa4] ss:$16 sps:$4 sm:$0xff]   ;;  %v16138_v17 = vld [vmem:[#allocation14 + $0xac] ss:$16 sps:$4 sm:$0xff]   ;;  %v16136_v19 = vld [vmem:[#allocation14 + $0xa8] ss:$16 sps:$4 sm:$0xff]  }
 0x53e   :  { %3589 = vst [vmem:[#allocation20] sm:$0xff] %v3584_v4  ;;  %v3590_v24 = vpack.c.bf16 %v3584_v4, %v3584_v4  ;;  %v16144_v4 = vld [vmem:[#allocation14 + $0xcc] ss:$16 sps:$4 sm:$0xff]  }
 0x540   :  { %15274 = vmatmul.mubr.bf16.vlgmr.msra.gmra.mrb[20].mxu0 %v3590_v24  ;;  %v16142_v24 = vld [vmem:[#allocation14 + $0xc8] ss:$16 sps:$4 sm:$0xff]  }
 0x541   :  { %3960 = vmatpush1.bf16.msra.mxu0 %v16058_v22  ;;  %3991 = vmatprep.mubr.bf16.mxu0 %v18186_v0  ;;  %v16139_v22 = vld [vmem:[#allocation14 + $0xc0] ss:$16 sps:$4 sm:$0xff]  }
 0x542   :  { %3961 = vmatprep.subr.bf16.mxu0 %v16066_v20  ;;  %v16147_v20 = vld [vmem:[#allocation14 + $0xe4] ss:$16 sps:$4 sm:$0xff]  }
 0x545   :  { %3962 = vmatpush1.bf16.msra.mxu0 %v16064_v25  ;;  %v16150_v25 = vld [vmem:[#allocation14 + $0xec] ss:$16 sps:$4 sm:$0xff]  }
 0x546   :  { %3963 = vmatprep.subr.bf16.mxu0 %v16072_v26  ;;  %v16145_v26 = vld [vmem:[#allocation14 + $0xe0] ss:$16 sps:$4 sm:$0xff]  }
 0x549   :  { %3964 = vmatpush1.bf16.msra.mxu0 %v16070_v27  ;;  %v16148_v27 = vld [vmem:[#allocation14 + $0xe8] ss:$16 sps:$4 sm:$0xff]  }
 0x54a   :  { %3965 = vmatprep.subr.bf16.mxu0 %v16078_v28  ;;  %v16153_v28 = vld [vmem:[#allocation14 + $0x104] ss:$16 sps:$4 sm:$0xff]  }
 0x54d   :  { %3966 = vmatpush1.bf16.msra.mxu0 %v16076_v30  ;;  %v16156_v30 = vld [vmem:[#allocation14 + $0x10c] ss:$16 sps:$4 sm:$0xff]  }
 0x54e   :  { %3967 = vmatprep.subr.bf16.mxu0 %v16084_v32  ;;  %v16154_v32 = vld [vmem:[#allocation14 + $0x108] ss:$16 sps:$4 sm:$0xff]  }
 0x551   :  { %3968 = vmatpush1.bf16.msra.mxu0 %v16082_v36  ;;  %v16162_v36 = vld [vmem:[#allocation14 + $0x12c] ss:$16 sps:$4 sm:$0xff]  }
 0x552   :  { %3969 = vmatprep.subr.bf16.mxu0 %v16090_v38  ;;  %v16160_v38 = vld [vmem:[#allocation14 + $0x128] ss:$16 sps:$4 sm:$0xff]  }
 0x555   :  { %3970 = vmatpush1.bf16.msra.mxu0 %v16088_v40  ;;  %v16168_v40 = vld [vmem:[#allocation14 + $0x14c] ss:$16 sps:$4 sm:$0xff]  }
 0x556   :  { %3971 = vmatprep.subr.bf16.mxu0 %v16096_v43  ;;  %v16166_v43 = vld [vmem:[#allocation14 + $0x148] ss:$16 sps:$4 sm:$0xff]  }
 0x559   :  { %3972 = vmatpush1.bf16.msra.mxu0 %v16094_v46  ;;  %v16174_v46 = vld [vmem:[#allocation14 + $0x16c] ss:$16 sps:$4 sm:$0xff]  }
 0x55a   :  { %3973 = vmatprep.subr.bf16.mxu0 %v16102_v23  ;;  %v16172_v23 = vld [vmem:[#allocation14 + $0x168] ss:$16 sps:$4 sm:$0xff]  }
 0x55d   :  { %3974 = vmatpush1.bf16.msra.mxu0 %v16100_v53  ;;  %v16180_v53 = vld [vmem:[#allocation14 + $0x18c] ss:$16 sps:$4 sm:$0xff]  }
 0x55e   :  { %4880 = vmatprep.subr.bf16.mxu0 %v16108_v55  ;;  %v16178_v55 = vld [vmem:[#allocation14 + $0x188] ss:$16 sps:$4 sm:$0xff]  }
 0x613   :  { %v3696_v57 = vpop.f32.mrb[20].mxu0 }
 0x614   :  { %v3697_v58 = vadd.f32 %v13769_v56, %v3696_v57  ;;  %v15275_v59 = vpop.f32.mrb[21].mxu0  ;;  %v16183_v56 = vld [vmem:[#allocation14 + $0x1a4] ss:$16 sps:$4 sm:$0xff]   ;;  %v16186_v57 = vld [vmem:[#allocation14 + $0x1ac] ss:$16 sps:$4 sm:$0xff]  }
 0x615   :  { %v3699_v47 = vpop.f32.mrb[22].mxu0  ;;  %v16184_v59 = vld [vmem:[#allocation14 + $0x1a8] ss:$16 sps:$4 sm:$0xff]  }
 0x616   :  { %v3702_v29 = vpack.c.bf16 %v3697_v58, %v3697_v58  ;;  %v15276_v60 = vpop.f32.mrb[23].mxu0  ;;  %v16181_v58 = vld [vmem:[#allocation14 + $0x1a0] ss:$16 sps:$4 sm:$0xff]   ;;  %v16189_v47 = vld [vmem:[#allocation14 + $0x1c4] ss:$16 sps:$4 sm:$0xff]  }
 0x617   :  { %v16190_v60 = vld [vmem:[#allocation14 + $0x1c8] ss:$16 sps:$4 sm:$0xff]  }
 0x618   :  { %17802 = vtanh.bf16 %v3702_v29  ;;  %v16187_v29 = vld [vmem:[#allocation14 + $0x1c0] ss:$16 sps:$4 sm:$0xff]  }
 0x623   :  { %v17803_v1 = vpop.eup %17802 }
 0x624   :  { %3951 = vmatmul.mubr.bf16.vlgmr.msra.gmra.mrb[24].mxu1 %v17803_v1  ;;  %3992 = vmatmul.mubr.bf16.vlgmr.msra.gmra.mrb[24].mxu0 %v17803_v1  ;;  %v16196_v1 = vld [vmem:[#allocation14 + $0x1e8] ss:$16 sps:$4 sm:$0xff]  }
 0x625   :  { %4799 = vmatpush1.bf16.msra.mxu1 %v16103_v61  ;;  %4881 = vmatpush1.bf16.msra.mxu0 %v16106_v62  ;;  %v16192_v61 = vld [vmem:[#allocation14 + $0x1cc] ss:$16 sps:$4 sm:$0xff]   ;;  %v16195_v62 = vld [vmem:[#allocation14 + $0x1e4] ss:$16 sps:$4 sm:$0xff]  }
 0x626   :  { %4800 = vmatprep.subr.bf16.mxu1 %v16111_v63  ;;  %4882 = vmatprep.subr.bf16.mxu0 %v16114_v34  ;;  %v16198_v63 = vld [vmem:[#allocation14 + $0x1ec] ss:$16 sps:$4 sm:$0xff]   ;;  %v16193_v34 = vld [vmem:[#allocation14 + $0x1e0] ss:$16 sps:$4 sm:$0xff]  }
 0x629   :  { %4801 = vmatpush1.bf16.msra.mxu1 %v16109_v2  ;;  %4883 = vmatpush1.bf16.msra.mxu0 %v16112_v3  ;;  %v16201_v2 = vld [vmem:[#allocation14 + $0x204] ss:$16 sps:$4 sm:$0xff]   ;;  %v16204_v3 = vld [vmem:[#allocation14 + $0x20c] ss:$16 sps:$4 sm:$0xff]  }
 0x62a   :  { %4802 = vmatprep.subr.bf16.mxu1 %v16117_v35  ;;  %4884 = vmatprep.subr.bf16.mxu0 %v16120_v6  ;;  %v18554_v35 = vld [vmem:[%s18777_s12] sm:$0xf] }
 0x62b   :  { %v3741_v6 = vrot.slane %v18554_v35, %v18466_v48 }
 0x62d   :  { %4803 = vmatpush1.bf16.msra.mxu1 %v16115_v7  ;;  %4885 = vmatpush1.bf16.msra.mxu0 %v16118_v49  ;;  %v3745_v7 = vrot.slane %v18554_v35, %v18474_v50  ;;  %v3753_v49 = vrot.slane %v18554_v35, %v18492_v51 }
 0x62e   :  { %4804 = vmatprep.subr.bf16.mxu1 %v16123_v8  ;;  %4886 = vmatprep.subr.bf16.mxu0 %v16126_v9 }
 0x631   :  { %4805 = vmatpush1.bf16.msra.mxu1 %v16121_v10  ;;  %4887 = vmatpush1.bf16.msra.mxu0 %v16124_v11 }
 0x632   :  { %4806 = vmatprep.subr.bf16.mxu1 %v16129_v12  ;;  %4888 = vmatprep.subr.bf16.mxu0 %v16132_v13 }
 0x635   :  { %4807 = vmatpush1.bf16.msra.mxu1 %v16127_v14  ;;  %4889 = vmatpush1.bf16.msra.mxu0 %v16130_v15 }
 0x636   :  { %4808 = vmatprep.subr.bf16.mxu1 %v16135_v16  ;;  %4890 = vmatprep.subr.bf16.mxu0 %v16138_v17 }
 0x639   :  { %4809 = vmatpush1.bf16.msra.mxu1 %v16133_v18  ;;  %4891 = vmatpush1.bf16.msra.mxu0 %v16136_v19 }
 0x63a   :  { %4810 = vmatprep.subr.bf16.mxu1 %v16141_v21  ;;  %4892 = vmatprep.subr.bf16.mxu0 %v16144_v4 }
 0x63d   :  { %4811 = vmatpush1.bf16.msra.mxu1 %v16139_v22  ;;  %4893 = vmatpush1.bf16.msra.mxu0 %v16142_v24  ;;  %v16199_v22 = vld [vmem:[#allocation14 + $0x200] ss:$16 sps:$4 sm:$0xff]   ;;  %v16202_v24 = vld [vmem:[#allocation14 + $0x208] ss:$16 sps:$4 sm:$0xff]  }
 0x63e   :  { %4812 = vmatprep.subr.bf16.mxu1 %v16147_v20  ;;  %4894 = vmatprep.subr.bf16.mxu0 %v16150_v25 }
 0x641   :  { %4813 = vmatpush1.bf16.msra.mxu1 %v16145_v26  ;;  %4895 = vmatpush1.bf16.msra.mxu0 %v16148_v27  ;;  %v16207_v26 = vld [vmem:[#allocation14 + $0x224] ss:$16 sps:$4 sm:$0xff]   ;;  %v16210_v27 = vld [vmem:[#allocation14 + $0x22c] ss:$16 sps:$4 sm:$0xff]  }
 0x642   :  { %4814 = vmatprep.subr.bf16.mxu1 %v16153_v28  ;;  %4896 = vmatprep.subr.bf16.mxu0 %v16156_v30  ;;  %v16205_v30 = vld [vmem:[#allocation14 + $0x220] ss:$16 sps:$4 sm:$0xff]  }
 0x645   :  { %4815 = vmatpush1.bf16.msra.mxu1 %v16151_v31  ;;  %4897 = vmatpush1.bf16.msra.mxu0 %v16154_v32  ;;  %v16208_v31 = vld [vmem:[#allocation14 + $0x228] ss:$16 sps:$4 sm:$0xff]   ;;  %v16213_v32 = vld [vmem:[#allocation14 + $0x244] ss:$16 sps:$4 sm:$0xff]  }
 0x646   :  { %4816 = vmatprep.subr.bf16.mxu1 %v16159_v33  ;;  %4898 = vmatprep.subr.bf16.mxu0 %v16162_v36  ;;  %v16216_v33 = vld [vmem:[#allocation14 + $0x24c] ss:$16 sps:$4 sm:$0xff]   ;;  %v16211_v36 = vld [vmem:[#allocation14 + $0x240] ss:$16 sps:$4 sm:$0xff]  }
 0x649   :  { %4817 = vmatpush1.bf16.msra.mxu1 %v16157_v37  ;;  %4899 = vmatpush1.bf16.msra.mxu0 %v16160_v38  ;;  %v16214_v37 = vld [vmem:[#allocation14 + $0x248] ss:$16 sps:$4 sm:$0xff]   ;;  %v16219_v38 = vld [vmem:[#allocation14 + $0x264] ss:$16 sps:$4 sm:$0xff]  }
 0x64a   :  { %4818 = vmatprep.subr.bf16.mxu1 %v16165_v39  ;;  %4900 = vmatprep.subr.bf16.mxu0 %v16168_v40  ;;  %v16222_v39 = vld [vmem:[#allocation14 + $0x26c] ss:$16 sps:$4 sm:$0xff]   ;;  %v16217_v40 = vld [vmem:[#allocation14 + $0x260] ss:$16 sps:$4 sm:$0xff]  }
 0x64d   :  { %4819 = vmatpush1.bf16.msra.mxu1 %v16163_v41  ;;  %4901 = vmatpush1.bf16.msra.mxu0 %v16166_v43  ;;  %v16220_v41 = vld [vmem:[#allocation14 + $0x268] ss:$16 sps:$4 sm:$0xff]   ;;  %v16225_v43 = vld [vmem:[#allocation14 + $0x284] ss:$16 sps:$4 sm:$0xff]  }
 0x64e   :  { %4820 = vmatprep.subr.bf16.mxu1 %v16171_v45  ;;  %4902 = vmatprep.subr.bf16.mxu0 %v16174_v46  ;;  %v16228_v45 = vld [vmem:[#allocation14 + $0x28c] ss:$16 sps:$4 sm:$0xff]   ;;  %v16223_v46 = vld [vmem:[#allocation14 + $0x280] ss:$16 sps:$4 sm:$0xff]  }
 0x651   :  { %4821 = vmatpush1.bf16.msra.mxu1 %v16169_v5  ;;  %4903 = vmatpush1.bf16.msra.mxu0 %v16172_v23  ;;  %v16226_v5 = vld [vmem:[#allocation14 + $0x288] ss:$16 sps:$4 sm:$0xff]   ;;  %v16231_v23 = vld [vmem:[#allocation14 + $0x2a4] ss:$16 sps:$4 sm:$0xff]  }
 0x652   :  { %4822 = vmatprep.subr.bf16.mxu1 %v16177_v52  ;;  %4904 = vmatprep.subr.bf16.mxu0 %v16180_v53  ;;  %v16234_v52 = vld [vmem:[#allocation14 + $0x2ac] ss:$16 sps:$4 sm:$0xff]   ;;  %v16229_v53 = vld [vmem:[#allocation14 + $0x2a0] ss:$16 sps:$4 sm:$0xff]  }
 0x655   :  { %4823 = vmatpush1.bf16.msra.mxu1 %v16175_v54  ;;  %4905 = vmatpush1.bf16.msra.mxu0 %v16178_v55  ;;  %v16232_v54 = vld [vmem:[#allocation14 + $0x2a8] ss:$16 sps:$4 sm:$0xff]   ;;  %v16237_v55 = vld [vmem:[#allocation14 + $0x2c4] ss:$16 sps:$4 sm:$0xff]  }
 0x656   :  { %4824 = vmatprep.subr.bf16.mxu1 %v16183_v56  ;;  %4906 = vmatprep.subr.bf16.mxu0 %v16186_v57  ;;  %v16240_v56 = vld [vmem:[#allocation14 + $0x2cc] ss:$16 sps:$4 sm:$0xff]   ;;  %v16235_v57 = vld [vmem:[#allocation14 + $0x2c0] ss:$16 sps:$4 sm:$0xff]  }
 0x659   :  { %4825 = vmatpush1.bf16.msra.mxu1 %v16181_v58  ;;  %4907 = vmatpush1.bf16.msra.mxu0 %v16184_v59  ;;  %v16238_v58 = vld [vmem:[#allocation14 + $0x2c8] ss:$16 sps:$4 sm:$0xff]   ;;  %v16243_v59 = vld [vmem:[#allocation14 + $0x2e4] ss:$16 sps:$4 sm:$0xff]  }
 0x65a   :  { %4826 = vmatprep.subr.bf16.mxu1 %v16189_v47  ;;  %4908 = vmatprep.subr.bf16.mxu0 %v16192_v61  ;;  %v16246_v47 = vld [vmem:[#allocation14 + $0x2ec] ss:$16 sps:$4 sm:$0xff]   ;;  %v16249_v61 = vld [vmem:[#allocation14 + $0x304] ss:$16 sps:$4 sm:$0xff]  }
 0x65d   :  { %4827 = vmatpush1.bf16.msra.mxu1 %v16187_v29  ;;  %4909 = vmatpush1.bf16.msra.mxu0 %v16190_v60  ;;  %v16241_v29 = vld [vmem:[#allocation14 + $0x2e0] ss:$16 sps:$4 sm:$0xff]   ;;  %v16244_v60 = vld [vmem:[#allocation14 + $0x2e8] ss:$16 sps:$4 sm:$0xff]  }
 0x65e   :  { %4828 = vmatprep.subr.bf16.mxu1 %v16195_v62  ;;  %4910 = vmatprep.subr.bf16.mxu0 %v16198_v63  ;;  %v16252_v62 = vld [vmem:[#allocation14 + $0x30c] ss:$16 sps:$4 sm:$0xff]   ;;  %v16247_v63 = vld [vmem:[#allocation14 + $0x300] ss:$16 sps:$4 sm:$0xff]  }
 0x661   :  { %4829 = vmatpush1.bf16.msra.mxu1 %v16193_v34  ;;  %4911 = vmatpush1.bf16.msra.mxu0 %v16196_v1  ;;  %v16250_v34 = vld [vmem:[#allocation14 + $0x308] ss:$16 sps:$4 sm:$0xff]   ;;  %v16255_v1 = vld [vmem:[#allocation14 + $0x324] ss:$16 sps:$4 sm:$0xff]  }
 0x662   :  { %4839 = vmatprep.subr.bf16.mxu1 %v16201_v2  ;;  %4921 = vmatprep.subr.bf16.mxu0 %v16204_v3  ;;  %v16258_v2 = vld [vmem:[#allocation14 + $0x32c] ss:$16 sps:$4 sm:$0xff]   ;;  %v16253_v3 = vld [vmem:[#allocation14 + $0x320] ss:$16 sps:$4 sm:$0xff]  }
 0x6f7   :  { %v3952_v8 = vpop.f32.mrb[24].mxu1  ;;  %v18562_v9 = vpop.f32.mrb[24].mxu0 }
 0x6f8   :  { %v3953_v10 = vadd.f32 %v3952_v8, %v3741_v6  ;;  %v3954_v11 = vpop.f32.mrb[25].mxu1  ;;  %v3995_v12 = vpop.f32.mrb[25].mxu0  ;;  %v16256_v6 = vld [vmem:[#allocation14 + $0x328] ss:$16 sps:$4 sm:$0xff]   ;;  %v16259_v8 = vld [vmem:[#allocation14 + $0x340] ss:$16 sps:$4 sm:$0xff]  }
 0x6f9   :  { %v3955_v13 = vadd.f32 %v3954_v11, %v3745_v7  ;;  %v3996_v14 = vadd.f32 %v3995_v12, %v3753_v49  ;;  %v3956_v15 = vpop.f32.mrb[26].mxu1  ;;  %v3997_v16 = vpop.f32.mrb[26].mxu0  ;;  %v16261_v7 = vld [vmem:[#allocation14 + $0x344] ss:$16 sps:$4 sm:$0xff]   ;;  %v16264_v49 = vld [vmem:[#allocation14 + $0x34c] ss:$16 sps:$4 sm:$0xff]  }
 0x6fa   :  { %v3957_v17 = vpop.f32.mrb[27].mxu1  ;;  %v3998_v18 = vpop.f32.mrb[27].mxu0  ;;  %v4000_v19 = vpack.c.bf16 %v3953_v10, %v3953_v10  ;;  %v16262_v10 = vld [vmem:[#allocation14 + $0x348] ss:$16 sps:$4 sm:$0xff]   ;;  %v16267_v11 = vld [vmem:[#allocation14 + $0x364] ss:$16 sps:$4 sm:$0xff]  }
 0x6fb   :  { %v4001_v21 = vpack.c.bf16 %v3955_v13, %v3955_v13  ;;  %v4003_v4 = vpack.c.bf16 %v3996_v14, %v3996_v14  ;;  %v16270_v12 = vld [vmem:[#allocation14 + $0x36c] ss:$16 sps:$4 sm:$0xff]   ;;  %v3749_v13 = vrot.slane %v18554_v35, %v18489_v44  ;;  %v16265_v14 = vld [vmem:[#allocation14 + $0x360] ss:$16 sps:$4 sm:$0xff]   ;;  %v16268_v15 = vld [vmem:[#allocation14 + $0x368] ss:$16 sps:$4 sm:$0xff]  }
 0x6fc   :  { %v16273_v16 = vld [vmem:[#allocation14 + $0x384] ss:$16 sps:$4 sm:$0xff]   ;;  %v16276_v17 = vld [vmem:[#allocation14 + $0x38c] ss:$16 sps:$4 sm:$0xff]   ;;  %v16277_v35 = vld [vmem:[#allocation14 + $0x3a0] ss:$16 sps:$4 sm:$0xff]  }
 0x6fd   :  { %17804 = vtanh.bf16 %v4001_v21  ;;  %v3994_v18 = vadd.f32 %v18562_v9, %v3749_v13  ;;  %v16274_v21 = vld [vmem:[#allocation14 + $0x388] ss:$16 sps:$4 sm:$0xff]   ;;  %v16283_v9 = vld [vmem:[#allocation14 + $0x3c0] ss:$16 sps:$4 sm:$0xff]   ;;  %v16351_v13 = vld [vmem:[#allocation16 + $0x124] ss:$16 sps:$4 sm:$0xff]  }
 0x6fe   :  { %17806 = vtanh.bf16 %v4000_v19  ;;  %v16271_v19 = vld [vmem:[#allocation14 + $0x380] ss:$16 sps:$4 sm:$0xff]  }
 0x6ff   :  { %17808 = vtanh.bf16 %v4003_v4  ;;  %v16279_v4 = vld [vmem:[#allocation14 + $0x3a4] ss:$16 sps:$4 sm:$0xff]  }
 0x708   :  { %v17805_v20 = vpop.eup %17804 }
 0x709   :  { %v17807_v25 = vpop.eup %17806  ;;  %4830 = vmatprep.mubr.bf16.mxu1 %v17805_v20  ;;  %4912 = vmatprep.mubr.bf16.mxu0 %v17805_v20  ;;  %v16280_v20 = vld [vmem:[#allocation14 + $0x3a8] ss:$16 sps:$4 sm:$0xff]  }
 0x70a   :  { %4831 = vmatmul.mubr.bf16.vlgmr.msra.gmra.mrb[28].mxu1 %v17807_v25  ;;  %4913 = vmatmul.mubr.bf16.vlgmr.msra.gmra.mrb[28].mxu0 %v17807_v25  ;;  %v17809_v28 = vpop.eup %17808  ;;  %v16285_v25 = vld [vmem:[#allocation14 + $0x3c4] ss:$16 sps:$4 sm:$0xff]  }
 0x70b   :  { %4840 = vmatpush1.bf16.msra.mxu1 %v16199_v22  ;;  %4922 = vmatpush1.bf16.msra.mxu0 %v16202_v24  ;;  %v16282_v22 = vld [vmem:[#allocation14 + $0x3ac] ss:$16 sps:$4 sm:$0xff]   ;;  %v4002_v24 = vpack.c.bf16 %v3994_v18, %v3994_v18 }
 0x70c   :  { %4871 = vmatprep.mubr.bf16.mxu1 %v17809_v28  ;;  %4953 = vmatprep.mubr.bf16.mxu0 %v17809_v28  ;;  %v16291_v28 = vld [vmem:[#allocation14 + $0x3e4] ss:$16 sps:$4 sm:$0xff]   ;;  %v16360_v18 = vld [vmem:[#allocation16 + $0x14c] ss:$16 sps:$4 sm:$0xff]  }
 0x70d   :  { %4841 = vmatprep.subr.bf16.mxu1 %v16207_v26  ;;  %4923 = vmatprep.subr.bf16.mxu0 %v16210_v27  ;;  %v16288_v26 = vld [vmem:[#allocation14 + $0x3cc] ss:$16 sps:$4 sm:$0xff]   ;;  %17810 = vtanh.bf16 %v4002_v24  ;;  %v16286_v27 = vld [vmem:[#allocation14 + $0x3c8] ss:$16 sps:$4 sm:$0xff]   ;;  %v16361_v24 = vld [vmem:[#allocation16 + $0x160] ss:$16 sps:$4 sm:$0xff]  }
 0x70f   :  { %4842 = vmatpush1.bf16.msra.mxu1 %v16205_v30  ;;  %4924 = vmatpush1.bf16.msra.mxu0 %v16208_v31  ;;  %v16294_v30 = vld [vmem:[#allocation14 + $0x3ec] ss:$16 sps:$4 sm:$0xff]   ;;  %v16289_v31 = vld [vmem:[#allocation14 + $0x3e0] ss:$16 sps:$4 sm:$0xff]  }
 0x710   :  { %4843 = vmatprep.subr.bf16.mxu1 %v16213_v32  ;;  %4925 = vmatprep.subr.bf16.mxu0 %v16216_v33  ;;  %v16292_v32 = vld [vmem:[#allocation14 + $0x3e8] ss:$16 sps:$4 sm:$0xff]   ;;  %v16297_v33 = vld [vmem:[#allocation16 + $0x4] ss:$16 sps:$4 sm:$0xff]  }
 0x713   :  { %4844 = vmatpush1.bf16.msra.mxu1 %v16211_v36  ;;  %4926 = vmatpush1.bf16.msra.mxu0 %v16214_v37  ;;  %v16300_v36 = vld [vmem:[#allocation16 + $0xc] ss:$16 sps:$4 sm:$0xff]   ;;  %v16295_v37 = vld [vmem:[#allocation16] ss:$16 sps:$4 sm:$0xff]  }
 0x714   :  { %4845 = vmatprep.subr.bf16.mxu1 %v16219_v38  ;;  %4927 = vmatprep.subr.bf16.mxu0 %v16222_v39  ;;  %v16298_v38 = vld [vmem:[#allocation16 + $0x8] ss:$16 sps:$4 sm:$0xff]   ;;  %v16303_v39 = vld [vmem:[#allocation16 + $0x24] ss:$16 sps:$4 sm:$0xff]  }
 0x717   :  { %4846 = vmatpush1.bf16.msra.mxu1 %v16217_v40  ;;  %4928 = vmatpush1.bf16.msra.mxu0 %v16220_v41  ;;  %v16306_v40 = vld [vmem:[#allocation16 + $0x2c] ss:$16 sps:$4 sm:$0xff]  }
 0x718   :  { %4847 = vmatprep.subr.bf16.mxu1 %v16225_v43  ;;  %4929 = vmatprep.subr.bf16.mxu0 %v16228_v45  ;;  %v17811_v41 = vpop.eup %17810  ;;  %v16301_v43 = vld [vmem:[#allocation16 + $0x20] ss:$16 sps:$4 sm:$0xff]   ;;  %v16304_v45 = vld [vmem:[#allocation16 + $0x28] ss:$16 sps:$4 sm:$0xff]  }
 0x71b   :  { %4848 = vmatpush1.bf16.msra.mxu1 %v16223_v46  ;;  %4930 = vmatpush1.bf16.msra.mxu0 %v16226_v5  ;;  %v16309_v46 = vld [vmem:[#allocation16 + $0x44] ss:$16 sps:$4 sm:$0xff]   ;;  %v16312_v5 = vld [vmem:[#allocation16 + $0x4c] ss:$16 sps:$4 sm:$0xff]  }
 0x71c   :  { %4849 = vmatprep.subr.bf16.mxu1 %v16231_v23  ;;  %4931 = vmatprep.subr.bf16.mxu0 %v16234_v52  ;;  %v16307_v23 = vld [vmem:[#allocation16 + $0x40] ss:$16 sps:$4 sm:$0xff]   ;;  %v16310_v52 = vld [vmem:[#allocation16 + $0x48] ss:$16 sps:$4 sm:$0xff]  }
 0x71f   :  { %4850 = vmatpush1.bf16.msra.mxu1 %v16229_v53  ;;  %4932 = vmatpush1.bf16.msra.mxu0 %v16232_v54  ;;  %v16315_v53 = vld [vmem:[#allocation16 + $0x64] ss:$16 sps:$4 sm:$0xff]   ;;  %v16318_v54 = vld [vmem:[#allocation16 + $0x6c] ss:$16 sps:$4 sm:$0xff]  }
 0x720   :  { %4851 = vmatprep.subr.bf16.mxu1 %v16237_v55  ;;  %4933 = vmatprep.subr.bf16.mxu0 %v16240_v56  ;;  %v16313_v55 = vld [vmem:[#allocation16 + $0x60] ss:$16 sps:$4 sm:$0xff]   ;;  %v16316_v56 = vld [vmem:[#allocation16 + $0x68] ss:$16 sps:$4 sm:$0xff]  }
 0x723   :  { %4852 = vmatpush1.bf16.msra.mxu1 %v16235_v57  ;;  %4934 = vmatpush1.bf16.msra.mxu0 %v16238_v58  ;;  %v16321_v57 = vld [vmem:[#allocation16 + $0x84] ss:$16 sps:$4 sm:$0xff]   ;;  %v16324_v58 = vld [vmem:[#allocation16 + $0x8c] ss:$16 sps:$4 sm:$0xff]  }
 0x724   :  { %4853 = vmatprep.subr.bf16.mxu1 %v16243_v59  ;;  %4935 = vmatprep.subr.bf16.mxu0 %v16246_v47  ;;  %v16319_v59 = vld [vmem:[#allocation16 + $0x80] ss:$16 sps:$4 sm:$0xff]   ;;  %v16322_v47 = vld [vmem:[#allocation16 + $0x88] ss:$16 sps:$4 sm:$0xff]  }
 0x727   :  { %4854 = vmatpush1.bf16.msra.mxu1 %v16241_v29  ;;  %4936 = vmatpush1.bf16.msra.mxu0 %v16244_v60  ;;  %v16327_v29 = vld [vmem:[#allocation16 + $0xa4] ss:$16 sps:$4 sm:$0xff]   ;;  %v16330_v60 = vld [vmem:[#allocation16 + $0xac] ss:$16 sps:$4 sm:$0xff]  }
 0x728   :  { %4855 = vmatprep.subr.bf16.mxu1 %v16249_v61  ;;  %4937 = vmatprep.subr.bf16.mxu0 %v16252_v62  ;;  %v16325_v61 = vld [vmem:[#allocation16 + $0xa0] ss:$16 sps:$4 sm:$0xff]   ;;  %v16328_v62 = vld [vmem:[#allocation16 + $0xa8] ss:$16 sps:$4 sm:$0xff]  }
 0x72b   :  { %4856 = vmatpush1.bf16.msra.mxu1 %v16247_v63  ;;  %4938 = vmatpush1.bf16.msra.mxu0 %v16250_v34  ;;  %v16333_v63 = vld [vmem:[#allocation16 + $0xc4] ss:$16 sps:$4 sm:$0xff]   ;;  %v16336_v34 = vld [vmem:[#allocation16 + $0xcc] ss:$16 sps:$4 sm:$0xff]  }
 0x72c   :  { %4857 = vmatprep.subr.bf16.mxu1 %v16255_v1  ;;  %4939 = vmatprep.subr.bf16.mxu0 %v16258_v2  ;;  %v16331_v1 = vld [vmem:[#allocation16 + $0xc0] ss:$16 sps:$4 sm:$0xff]   ;;  %v16334_v2 = vld [vmem:[#allocation16 + $0xc8] ss:$16 sps:$4 sm:$0xff]  }
 0x72f   :  { %4858 = vmatpush1.bf16.msra.mxu1 %v16253_v3  ;;  %4940 = vmatpush1.bf16.msra.mxu0 %v16256_v6  ;;  %v16339_v3 = vld [vmem:[#allocation16 + $0xe4] ss:$16 sps:$4 sm:$0xff]   ;;  %v16342_v6 = vld [vmem:[#allocation16 + $0xec] ss:$16 sps:$4 sm:$0xff]  }
 0x730   :  { %4859 = vmatprep.subr.bf16.mxu1 %v16261_v7  ;;  %4941 = vmatprep.subr.bf16.mxu0 %v16264_v49  ;;  %v16337_v7 = vld [vmem:[#allocation16 + $0xe0] ss:$16 sps:$4 sm:$0xff]   ;;  %v16340_v49 = vld [vmem:[#allocation16 + $0xe8] ss:$16 sps:$4 sm:$0xff]  }
 0x733   :  { %4860 = vmatpush1.bf16.msra.mxu1 %v16259_v8  ;;  %4942 = vmatpush1.bf16.msra.mxu0 %v16262_v10  ;;  %v16345_v8 = vld [vmem:[#allocation16 + $0x104] ss:$16 sps:$4 sm:$0xff]   ;;  %v16348_v10 = vld [vmem:[#allocation16 + $0x10c] ss:$16 sps:$4 sm:$0xff]  }
 0x734   :  { %4861 = vmatprep.subr.bf16.mxu1 %v16267_v11  ;;  %4943 = vmatprep.subr.bf16.mxu0 %v16270_v12  ;;  %v16343_v11 = vld [vmem:[#allocation16 + $0x100] ss:$16 sps:$4 sm:$0xff]   ;;  %v16346_v12 = vld [vmem:[#allocation16 + $0x108] ss:$16 sps:$4 sm:$0xff]  }
 0x737   :  { %4862 = vmatpush1.bf16.msra.mxu1 %v16265_v14  ;;  %4944 = vmatpush1.bf16.msra.mxu0 %v16268_v15  ;;  %v16354_v14 = vld [vmem:[#allocation16 + $0x12c] ss:$16 sps:$4 sm:$0xff]   ;;  %v16349_v15 = vld [vmem:[#allocation16 + $0x120] ss:$16 sps:$4 sm:$0xff]  }
 0x738   :  { %4863 = vmatprep.subr.bf16.mxu1 %v16273_v16  ;;  %4945 = vmatprep.subr.bf16.mxu0 %v16276_v17  ;;  %v16352_v16 = vld [vmem:[#allocation16 + $0x128] ss:$16 sps:$4 sm:$0xff]   ;;  %v16357_v17 = vld [vmem:[#allocation16 + $0x144] ss:$16 sps:$4 sm:$0xff]  }
 0x73b   :  { %4864 = vmatpush1.bf16.msra.mxu1 %v16271_v19  ;;  %4946 = vmatpush1.bf16.msra.mxu0 %v16274_v21  ;;  %v16355_v19 = vld [vmem:[#allocation16 + $0x140] ss:$16 sps:$4 sm:$0xff]   ;;  %v16358_v21 = vld [vmem:[#allocation16 + $0x148] ss:$16 sps:$4 sm:$0xff]  }
 0x73c   :  { %4865 = vmatprep.subr.bf16.mxu1 %v16279_v4  ;;  %4947 = vmatprep.subr.bf16.mxu0 %v16282_v22  ;;  %v16363_v4 = vld [vmem:[#allocation16 + $0x164] ss:$16 sps:$4 sm:$0xff]   ;;  %v16366_v22 = vld [vmem:[#allocation16 + $0x16c] ss:$16 sps:$4 sm:$0xff]  }
 0x73f   :  { %4866 = vmatpush1.bf16.msra.mxu1 %v16277_v35  ;;  %4948 = vmatpush1.bf16.msra.mxu0 %v16280_v20  ;;  %v16364_v35 = vld [vmem:[#allocation16 + $0x168] ss:$16 sps:$4 sm:$0xff]   ;;  %v16369_v20 = vld [vmem:[#allocation16 + $0x184] ss:$16 sps:$4 sm:$0xff]  }
 0x740   :  { %4867 = vmatprep.subr.bf16.mxu1 %v16285_v25  ;;  %4949 = vmatprep.subr.bf16.mxu0 %v16288_v26  ;;  %v16372_v25 = vld [vmem:[#allocation16 + $0x18c] ss:$16 sps:$4 sm:$0xff]   ;;  %v16367_v26 = vld [vmem:[#allocation16 + $0x180] ss:$16 sps:$4 sm:$0xff]  }
 0x743   :  { %4868 = vmatpush1.bf16.msra.mxu1 %v16283_v9  ;;  %4950 = vmatpush1.bf16.msra.mxu0 %v16286_v27  ;;  %v16370_v9 = vld [vmem:[#allocation16 + $0x188] ss:$16 sps:$4 sm:$0xff]   ;;  %v16375_v27 = vld [vmem:[#allocation16 + $0x1a4] ss:$16 sps:$4 sm:$0xff]  }
 0x744   :  { %4869 = vmatprep.subr.bf16.mxu1 %v16291_v28  ;;  %4951 = vmatprep.subr.bf16.mxu0 %v16294_v30  ;;  %v16378_v28 = vld [vmem:[#allocation16 + $0x1ac] ss:$16 sps:$4 sm:$0xff]   ;;  %v16373_v30 = vld [vmem:[#allocation16 + $0x1a0] ss:$16 sps:$4 sm:$0xff]  }
 0x747   :  { %4870 = vmatpush1.bf16.msra.mxu1 %v16289_v31  ;;  %4952 = vmatpush1.bf16.msra.mxu0 %v16292_v32  ;;  %v16376_v31 = vld [vmem:[#allocation16 + $0x1a8] ss:$16 sps:$4 sm:$0xff]   ;;  %v16381_v32 = vld [vmem:[#allocation16 + $0x1c4] ss:$16 sps:$4 sm:$0xff]  }
 0x748   :  { %5760 = vmatprep.subr.bf16.mxu1 %v16297_v33  ;;  %5842 = vmatprep.subr.bf16.mxu0 %v16300_v36  ;;  %v16379_v33 = vld [vmem:[#allocation16 + $0x1c0] ss:$16 sps:$4 sm:$0xff]   ;;  %v16382_v36 = vld [vmem:[#allocation16 + $0x1c8] ss:$16 sps:$4 sm:$0xff]  }
 0x74a   :  { %4872 = vmatmul.mubr.bf16.vlgmr.msra.gmra.mrb[28].mxu1 %v17811_v41  ;;  %4954 = vmatmul.mubr.bf16.vlgmr.msra.gmra.mrb[28].mxu0 %v17811_v41  ;;  %v16388_v41 = vld [vmem:[#allocation16 + $0x1e8] ss:$16 sps:$4 sm:$0xff]  }
 0x74b   :  { %5761 = vmatpush1.bf16.msra.mxu1 %v16295_v37  ;;  %5843 = vmatpush1.bf16.msra.mxu0 %v16298_v38  ;;  %v16384_v37 = vld [vmem:[#allocation16 + $0x1cc] ss:$16 sps:$4 sm:$0xff]   ;;  %v16387_v38 = vld [vmem:[#allocation16 + $0x1e4] ss:$16 sps:$4 sm:$0xff]  }
 0x74c   :  { %5762 = vmatprep.subr.bf16.mxu1 %v16303_v39  ;;  %5844 = vmatprep.subr.bf16.mxu0 %v16306_v40  ;;  %v16390_v39 = vld [vmem:[#allocation16 + $0x1ec] ss:$16 sps:$4 sm:$0xff]   ;;  %v16385_v40 = vld [vmem:[#allocation16 + $0x1e0] ss:$16 sps:$4 sm:$0xff]  }
 0x74f   :  { %5763 = vmatpush1.bf16.msra.mxu1 %v16301_v43  ;;  %5845 = vmatpush1.bf16.msra.mxu0 %v16304_v45  ;;  %v16393_v43 = vld [vmem:[#allocation16 + $0x204] ss:$16 sps:$4 sm:$0xff]   ;;  %v16396_v45 = vld [vmem:[#allocation16 + $0x20c] ss:$16 sps:$4 sm:$0xff]  }
 0x750   :  { %5764 = vmatprep.subr.bf16.mxu1 %v16309_v46  ;;  %5846 = vmatprep.subr.bf16.mxu0 %v16312_v5  ;;  %v18570_v46 = vld [vmem:[%s18779_s14] sm:$0xf] }
 0x751   :  { %v4141_v5 = vrot.slane %v18570_v46, %v18466_v48 }
 0x753   :  { %5765 = vmatpush1.bf16.msra.mxu1 %v16307_v23  ;;  %5847 = vmatpush1.bf16.msra.mxu0 %v16310_v52  ;;  %v4145_v23 = vrot.slane %v18570_v46, %v18474_v50  ;;  %v4153_v52 = vrot.slane %v18570_v46, %v18492_v51 }
 0x754   :  { %5766 = vmatprep.subr.bf16.mxu1 %v16315_v53  ;;  %5848 = vmatprep.subr.bf16.mxu0 %v16318_v54 }
 0x757   :  { %5767 = vmatpush1.bf16.msra.mxu1 %v16313_v55  ;;  %5849 = vmatpush1.bf16.msra.mxu0 %v16316_v56 }
 0x758   :  { %5768 = vmatprep.subr.bf16.mxu1 %v16321_v57  ;;  %5850 = vmatprep.subr.bf16.mxu0 %v16324_v58 }
 0x75b   :  { %5769 = vmatpush1.bf16.msra.mxu1 %v16319_v59  ;;  %5851 = vmatpush1.bf16.msra.mxu0 %v16322_v47 }
 0x75c   :  { %5770 = vmatprep.subr.bf16.mxu1 %v16327_v29  ;;  %5852 = vmatprep.subr.bf16.mxu0 %v16330_v60 }
 0x75f   :  { %5771 = vmatpush1.bf16.msra.mxu1 %v16325_v61  ;;  %5853 = vmatpush1.bf16.msra.mxu0 %v16328_v62 }
 0x760   :  { %5772 = vmatprep.subr.bf16.mxu1 %v16333_v63  ;;  %5854 = vmatprep.subr.bf16.mxu0 %v16336_v34 }
 0x763   :  { %5773 = vmatpush1.bf16.msra.mxu1 %v16331_v1  ;;  %5855 = vmatpush1.bf16.msra.mxu0 %v16334_v2  ;;  %v16391_v1 = vld [vmem:[#allocation16 + $0x200] ss:$16 sps:$4 sm:$0xff]   ;;  %v16394_v2 = vld [vmem:[#allocation16 + $0x208] ss:$16 sps:$4 sm:$0xff]  }
 0x764   :  { %5774 = vmatprep.subr.bf16.mxu1 %v16339_v3  ;;  %5856 = vmatprep.subr.bf16.mxu0 %v16342_v6 }
 0x767   :  { %5775 = vmatpush1.bf16.msra.mxu1 %v16337_v7  ;;  %5857 = vmatpush1.bf16.msra.mxu0 %v16340_v49  ;;  %v16399_v7 = vld [vmem:[#allocation16 + $0x224] ss:$16 sps:$4 sm:$0xff]   ;;  %v16402_v49 = vld [vmem:[#allocation16 + $0x22c] ss:$16 sps:$4 sm:$0xff]  }
 0x768   :  { %5776 = vmatprep.subr.bf16.mxu1 %v16345_v8  ;;  %5858 = vmatprep.subr.bf16.mxu0 %v16348_v10  ;;  %v16397_v10 = vld [vmem:[#allocation16 + $0x220] ss:$16 sps:$4 sm:$0xff]  }
 0x76b   :  { %5777 = vmatpush1.bf16.msra.mxu1 %v16343_v11  ;;  %5859 = vmatpush1.bf16.msra.mxu0 %v16346_v12  ;;  %v16400_v11 = vld [vmem:[#allocation16 + $0x228] ss:$16 sps:$4 sm:$0xff]   ;;  %v16405_v12 = vld [vmem:[#allocation16 + $0x244] ss:$16 sps:$4 sm:$0xff]  }
 0x76c   :  { %5778 = vmatprep.subr.bf16.mxu1 %v16351_v13  ;;  %5860 = vmatprep.subr.bf16.mxu0 %v16354_v14  ;;  %v16408_v13 = vld [vmem:[#allocation16 + $0x24c] ss:$16 sps:$4 sm:$0xff]   ;;  %v16403_v14 = vld [vmem:[#allocation16 + $0x240] ss:$16 sps:$4 sm:$0xff]  }
 0x76f   :  { %5779 = vmatpush1.bf16.msra.mxu1 %v16349_v15  ;;  %5861 = vmatpush1.bf16.msra.mxu0 %v16352_v16  ;;  %v16406_v15 = vld [vmem:[#allocation16 + $0x248] ss:$16 sps:$4 sm:$0xff]   ;;  %v16411_v16 = vld [vmem:[#allocation16 + $0x264] ss:$16 sps:$4 sm:$0xff]  }
 0x770   :  { %5780 = vmatprep.subr.bf16.mxu1 %v16357_v17  ;;  %5862 = vmatprep.subr.bf16.mxu0 %v16360_v18  ;;  %v16414_v17 = vld [vmem:[#allocation16 + $0x26c] ss:$16 sps:$4 sm:$0xff]   ;;  %v16409_v18 = vld [vmem:[#allocation16 + $0x260] ss:$16 sps:$4 sm:$0xff]  }
 0x773   :  { %5781 = vmatpush1.bf16.msra.mxu1 %v16355_v19  ;;  %5863 = vmatpush1.bf16.msra.mxu0 %v16358_v21  ;;  %v16412_v19 = vld [vmem:[#allocation16 + $0x268] ss:$16 sps:$4 sm:$0xff]   ;;  %v16417_v21 = vld [vmem:[#allocation16 + $0x284] ss:$16 sps:$4 sm:$0xff]  }
 0x774   :  { %5782 = vmatprep.subr.bf16.mxu1 %v16363_v4  ;;  %5864 = vmatprep.subr.bf16.mxu0 %v16366_v22  ;;  %v16420_v4 = vld [vmem:[#allocation16 + $0x28c] ss:$16 sps:$4 sm:$0xff]   ;;  %v16415_v22 = vld [vmem:[#allocation16 + $0x280] ss:$16 sps:$4 sm:$0xff]  }
 0x777   :  { %5783 = vmatpush1.bf16.msra.mxu1 %v16361_v24  ;;  %5865 = vmatpush1.bf16.msra.mxu0 %v16364_v35  ;;  %v16418_v24 = vld [vmem:[#allocation16 + $0x288] ss:$16 sps:$4 sm:$0xff]   ;;  %v16423_v35 = vld [vmem:[#allocation16 + $0x2a4] ss:$16 sps:$4 sm:$0xff]  }
 0x778   :  { %5784 = vmatprep.subr.bf16.mxu1 %v16369_v20  ;;  %5866 = vmatprep.subr.bf16.mxu0 %v16372_v25  ;;  %v16426_v20 = vld [vmem:[#allocation16 + $0x2ac] ss:$16 sps:$4 sm:$0xff]   ;;  %v16421_v25 = vld [vmem:[#allocation16 + $0x2a0] ss:$16 sps:$4 sm:$0xff]  }
 0x77b   :  { %5785 = vmatpush1.bf16.msra.mxu1 %v16367_v26  ;;  %5867 = vmatpush1.bf16.msra.mxu0 %v16370_v9  ;;  %v16424_v26 = vld [vmem:[#allocation16 + $0x2a8] ss:$16 sps:$4 sm:$0xff]   ;;  %v16429_v9 = vld [vmem:[#allocation16 + $0x2c4] ss:$16 sps:$4 sm:$0xff]  }
 0x77c   :  { %5786 = vmatprep.subr.bf16.mxu1 %v16375_v27  ;;  %5868 = vmatprep.subr.bf16.mxu0 %v16378_v28  ;;  %v16432_v27 = vld [vmem:[#allocation16 + $0x2cc] ss:$16 sps:$4 sm:$0xff]   ;;  %v16427_v28 = vld [vmem:[#allocation16 + $0x2c0] ss:$16 sps:$4 sm:$0xff]  }
 0x77f   :  { %5787 = vmatpush1.bf16.msra.mxu1 %v16373_v30  ;;  %5869 = vmatpush1.bf16.msra.mxu0 %v16376_v31  ;;  %v16430_v30 = vld [vmem:[#allocation16 + $0x2c8] ss:$16 sps:$4 sm:$0xff]   ;;  %v16435_v31 = vld [vmem:[#allocation16 + $0x2e4] ss:$16 sps:$4 sm:$0xff]  }
 0x780   :  { %5788 = vmatprep.subr.bf16.mxu1 %v16381_v32  ;;  %5870 = vmatprep.subr.bf16.mxu0 %v16384_v37  ;;  %v16438_v32 = vld [vmem:[#allocation16 + $0x2ec] ss:$16 sps:$4 sm:$0xff]   ;;  %v16441_v37 = vld [vmem:[#allocation16 + $0x304] ss:$16 sps:$4 sm:$0xff]  }
 0x783   :  { %5789 = vmatpush1.bf16.msra.mxu1 %v16379_v33  ;;  %5871 = vmatpush1.bf16.msra.mxu0 %v16382_v36  ;;  %v16433_v33 = vld [vmem:[#allocation16 + $0x2e0] ss:$16 sps:$4 sm:$0xff]   ;;  %v16436_v36 = vld [vmem:[#allocation16 + $0x2e8] ss:$16 sps:$4 sm:$0xff]  }
 0x784   :  { %5790 = vmatprep.subr.bf16.mxu1 %v16387_v38  ;;  %5872 = vmatprep.subr.bf16.mxu0 %v16390_v39  ;;  %v16444_v38 = vld [vmem:[#allocation16 + $0x30c] ss:$16 sps:$4 sm:$0xff]   ;;  %v16439_v39 = vld [vmem:[#allocation16 + $0x300] ss:$16 sps:$4 sm:$0xff]  }
 0x787   :  { %5791 = vmatpush1.bf16.msra.mxu1 %v16385_v40  ;;  %5873 = vmatpush1.bf16.msra.mxu0 %v16388_v41  ;;  %v16442_v40 = vld [vmem:[#allocation16 + $0x308] ss:$16 sps:$4 sm:$0xff]   ;;  %v16447_v41 = vld [vmem:[#allocation16 + $0x324] ss:$16 sps:$4 sm:$0xff]  }
 0x788   :  { %5801 = vmatprep.subr.bf16.mxu1 %v16393_v43  ;;  %5883 = vmatprep.subr.bf16.mxu0 %v16396_v45  ;;  %v16450_v43 = vld [vmem:[#allocation16 + $0x32c] ss:$16 sps:$4 sm:$0xff]   ;;  %v16445_v45 = vld [vmem:[#allocation16 + $0x320] ss:$16 sps:$4 sm:$0xff]  }
 0x81d   :  { %v4873_v53 = vpop.f32.mrb[28].mxu1  ;;  %v18578_v54 = vpop.f32.mrb[28].mxu0 }
 0x81e   :  { %v15311_v55 = vadd.f32 %v4873_v53, %v4141_v5  ;;  %v4875_v56 = vpop.f32.mrb[29].mxu1  ;;  %v4957_v57 = vpop.f32.mrb[29].mxu0  ;;  %v16448_v5 = vld [vmem:[#allocation16 + $0x328] ss:$16 sps:$4 sm:$0xff]   ;;  %v16451_v53 = vld [vmem:[#allocation16 + $0x340] ss:$16 sps:$4 sm:$0xff]  }
 0x81f   :  { %v15312_v58 = vadd.f32 %v4875_v56, %v4145_v23  ;;  %v15314_v59 = vadd.f32 %v4957_v57, %v4153_v52  ;;  %v4877_v47 = vpop.f32.mrb[30].mxu1  ;;  %v4959_v29 = vpop.f32.mrb[30].mxu0  ;;  %v16453_v23 = vld [vmem:[#allocation16 + $0x344] ss:$16 sps:$4 sm:$0xff]   ;;  %v16456_v52 = vld [vmem:[#allocation16 + $0x34c] ss:$16 sps:$4 sm:$0xff]  }
 0x820   :  { %v4878_v60 = vpop.f32.mrb[31].mxu1  ;;  %v4960_v61 = vpop.f32.mrb[31].mxu0  ;;  %v4962_v62 = vpack.c.bf16 %v15311_v55, %v15311_v55  ;;  %v16454_v55 = vld [vmem:[#allocation16 + $0x348] ss:$16 sps:$4 sm:$0xff]   ;;  %v16459_v56 = vld [vmem:[#allocation16 + $0x364] ss:$16 sps:$4 sm:$0xff]  }
 0x821   :  { %v4963_v63 = vpack.c.bf16 %v15312_v58, %v15312_v58  ;;  %v4965_v34 = vpack.c.bf16 %v15314_v59, %v15314_v59  ;;  %v16462_v57 = vld [vmem:[#allocation16 + $0x36c] ss:$16 sps:$4 sm:$0xff]   ;;  %v4149_v58 = vrot.slane %v18570_v46, %v18489_v44  ;;  %v16457_v59 = vld [vmem:[#allocation16 + $0x360] ss:$16 sps:$4 sm:$0xff]   ;;  %v16460_v47 = vld [vmem:[#allocation16 + $0x368] ss:$16 sps:$4 sm:$0xff]  }
 0x822   :  { %v16465_v29 = vld [vmem:[#allocation16 + $0x384] ss:$16 sps:$4 sm:$0xff]   ;;  %v16468_v60 = vld [vmem:[#allocation16 + $0x38c] ss:$16 sps:$4 sm:$0xff]   ;;  %v16469_v46 = vld [vmem:[#allocation16 + $0x3a0] ss:$16 sps:$4 sm:$0xff]  }
 0x823   :  { %17812 = vtanh.bf16 %v4963_v63  ;;  %v15313_v61 = vadd.f32 %v18578_v54, %v4149_v58  ;;  %v16466_v63 = vld [vmem:[#allocation16 + $0x388] ss:$16 sps:$4 sm:$0xff]   ;;  %v16475_v54 = vld [vmem:[#allocation16 + $0x3c0] ss:$16 sps:$4 sm:$0xff]  }
 0x824   :  { %17814 = vtanh.bf16 %v4962_v62  ;;  %v16463_v62 = vld [vmem:[#allocation16 + $0x380] ss:$16 sps:$4 sm:$0xff]   ;;  %v16538_v58 = vld [vmem:[#allocation17 + $0x13c] ss:$12 sps:$4 sm:$0xff]  }
 0x825   :  { %17816 = vtanh.bf16 %v4965_v34  ;;  %v16471_v34 = vld [vmem:[#allocation16 + $0x3a4] ss:$16 sps:$4 sm:$0xff]  }
 0x82e   :  { %v17813_v3 = vpop.eup %17812 }
 0x82f   :  { %v17815_v6 = vpop.eup %17814  ;;  %5792 = vmatprep.mubr.bf16.mxu1 %v17813_v3  ;;  %5874 = vmatprep.mubr.bf16.mxu0 %v17813_v3  ;;  %v16472_v3 = vld [vmem:[#allocation16 + $0x3a8] ss:$16 sps:$4 sm:$0xff]  }
 0x830   :  { %5793 = vmatmul.mubr.bf16.vlgmr.msra.gmra.mrb[32].mxu1 %v17815_v6  ;;  %5875 = vmatmul.mubr.bf16.vlgmr.msra.gmra.mrb[32].mxu0 %v17815_v6  ;;  %v17817_v8 = vpop.eup %17816  ;;  %v16477_v6 = vld [vmem:[#allocation16 + $0x3c4] ss:$16 sps:$4 sm:$0xff]  }
 0x831   :  { %5802 = vmatpush1.bf16.msra.mxu1 %v16391_v1  ;;  %5884 = vmatpush1.bf16.msra.mxu0 %v16394_v2  ;;  %v16474_v1 = vld [vmem:[#allocation16 + $0x3ac] ss:$16 sps:$4 sm:$0xff]   ;;  %v4964_v2 = vpack.c.bf16 %v15313_v61, %v15313_v61  ;;  %v16544_v61 = vld [vmem:[#allocation17 + $0x158] ss:$12 sps:$4 sm:$0xff]  }
 0x832   :  { %5833 = vmatprep.mubr.bf16.mxu1 %v17817_v8  ;;  %5915 = vmatprep.mubr.bf16.mxu0 %v17817_v8  ;;  %v16483_v8 = vld [vmem:[#allocation16 + $0x3e4] ss:$16 sps:$4 sm:$0xff]  }
 0x833   :  { %5803 = vmatprep.subr.bf16.mxu1 %v16399_v7  ;;  %5885 = vmatprep.subr.bf16.mxu0 %v16402_v49  ;;  %v16480_v7 = vld [vmem:[#allocation16 + $0x3cc] ss:$16 sps:$4 sm:$0xff]   ;;  %17818 = vtanh.bf16 %v4964_v2  ;;  %v16478_v49 = vld [vmem:[#allocation16 + $0x3c8] ss:$16 sps:$4 sm:$0xff]  }
 0x834   :  { %v16546_v2 = vld [vmem:[#allocation17 + $0x168] ss:$12 sps:$4 sm:$0xff]  }
 0x835   :  { %5804 = vmatpush1.bf16.msra.mxu1 %v16397_v10  ;;  %5886 = vmatpush1.bf16.msra.mxu0 %v16400_v11  ;;  %v16486_v10 = vld [vmem:[#allocation16 + $0x3ec] ss:$16 sps:$4 sm:$0xff]   ;;  %v16481_v11 = vld [vmem:[#allocation16 + $0x3e0] ss:$16 sps:$4 sm:$0xff]  }
 0x836   :  { %5805 = vmatprep.subr.bf16.mxu1 %v16405_v12  ;;  %5887 = vmatprep.subr.bf16.mxu0 %v16408_v13  ;;  %v16484_v12 = vld [vmem:[#allocation16 + $0x3e8] ss:$16 sps:$4 sm:$0xff]   ;;  %v16489_v13 = vld [vmem:[#allocation17 + $0x4] ss:$12 sps:$4 sm:$0xff]  }
 0x839   :  { %5806 = vmatpush1.bf16.msra.mxu1 %v16403_v14  ;;  %5888 = vmatpush1.bf16.msra.mxu0 %v16406_v15  ;;  %v16514_v14 = vld [vmem:[#allocation17 + $0xc8] ss:$12 sps:$4 sm:$0xff]   ;;  %v16487_v15 = vld [vmem:[#allocation17] ss:$12 sps:$4 sm:$0xff]  }
 0x83a   :  { %5807 = vmatprep.subr.bf16.mxu1 %v16411_v16  ;;  %5889 = vmatprep.subr.bf16.mxu0 %v16414_v17  ;;  %v16515_v16 = vld [vmem:[#allocation17 + $0x8] ss:$12 sps:$4 sm:$0xff]  }
 0x83b   :  { %v16492_v17 = vld [vmem:[#allocation17 + $0x1c] ss:$12 sps:$4 sm:$0xff]  }
 0x83d   :  { %5808 = vmatpush1.bf16.msra.mxu1 %v16409_v18  ;;  %5890 = vmatpush1.bf16.msra.mxu0 %v16412_v19  ;;  %v16519_v18 = vld [vmem:[#allocation17 + $0xe0] ss:$12 sps:$4 sm:$0xff]  }
 0x83e   :  { %5809 = vmatprep.subr.bf16.mxu1 %v16417_v21  ;;  %5891 = vmatprep.subr.bf16.mxu0 %v16420_v4  ;;  %v17819_v19 = vpop.eup %17818  ;;  %v16490_v21 = vld [vmem:[#allocation17 + $0x18] ss:$12 sps:$4 sm:$0xff]   ;;  %v16520_v4 = vld [vmem:[#allocation17 + $0x20] ss:$12 sps:$4 sm:$0xff]  }
 0x841   :  { %5810 = vmatpush1.bf16.msra.mxu1 %v16415_v22  ;;  %5892 = vmatpush1.bf16.msra.mxu0 %v16418_v24  ;;  %v16495_v22 = vld [vmem:[#allocation17 + $0x34] ss:$12 sps:$4 sm:$0xff]   ;;  %v16524_v24 = vld [vmem:[#allocation17 + $0xf8] ss:$12 sps:$4 sm:$0xff]  }
 0x842   :  { %5811 = vmatprep.subr.bf16.mxu1 %v16423_v35  ;;  %5893 = vmatprep.subr.bf16.mxu0 %v16426_v20  ;;  %v16493_v35 = vld [vmem:[#allocation17 + $0x30] ss:$12 sps:$4 sm:$0xff]   ;;  %v16525_v20 = vld [vmem:[#allocation17 + $0x38] ss:$12 sps:$4 sm:$0xff]  }
 0x845   :  { %5812 = vmatpush1.bf16.msra.mxu1 %v16421_v25  ;;  %5894 = vmatpush1.bf16.msra.mxu0 %v16424_v26  ;;  %v16498_v25 = vld [vmem:[#allocation17 + $0x4c] ss:$12 sps:$4 sm:$0xff]   ;;  %v16529_v26 = vld [vmem:[#allocation17 + $0x110] ss:$12 sps:$4 sm:$0xff]  }
 0x846   :  { %5813 = vmatprep.subr.bf16.mxu1 %v16429_v9  ;;  %5895 = vmatprep.subr.bf16.mxu0 %v16432_v27  ;;  %v16496_v9 = vld [vmem:[#allocation17 + $0x48] ss:$12 sps:$4 sm:$0xff]   ;;  %v16530_v27 = vld [vmem:[#allocation17 + $0x50] ss:$12 sps:$4 sm:$0xff]  }
 0x849   :  { %5814 = vmatpush1.bf16.msra.mxu1 %v16427_v28  ;;  %5896 = vmatpush1.bf16.msra.mxu0 %v16430_v30  ;;  %v16501_v28 = vld [vmem:[#allocation17 + $0x64] ss:$12 sps:$4 sm:$0xff]   ;;  %v16499_v30 = vld [vmem:[#allocation17 + $0x60] ss:$12 sps:$4 sm:$0xff]  }
 0x84a   :  { %5815 = vmatprep.subr.bf16.mxu1 %v16435_v31  ;;  %5897 = vmatprep.subr.bf16.mxu0 %v16438_v32  ;;  %v16504_v31 = vld [vmem:[#allocation17 + $0x7c] ss:$12 sps:$4 sm:$0xff]   ;;  %v16502_v32 = vld [vmem:[#allocation17 + $0x78] ss:$12 sps:$4 sm:$0xff]  }
 0x84d   :  { %5816 = vmatpush1.bf16.msra.mxu1 %v16433_v33  ;;  %5898 = vmatpush1.bf16.msra.mxu0 %v16436_v36  ;;  %v16507_v33 = vld [vmem:[#allocation17 + $0x94] ss:$12 sps:$4 sm:$0xff]   ;;  %v16505_v36 = vld [vmem:[#allocation17 + $0x90] ss:$12 sps:$4 sm:$0xff]  }
 0x84e   :  { %5817 = vmatprep.subr.bf16.mxu1 %v16441_v37  ;;  %5899 = vmatprep.subr.bf16.mxu0 %v16444_v38  ;;  %v16510_v37 = vld [vmem:[#allocation17 + $0xac] ss:$12 sps:$4 sm:$0xff]   ;;  %v16508_v38 = vld [vmem:[#allocation17 + $0xa8] ss:$12 sps:$4 sm:$0xff]  }
 0x851   :  { %5818 = vmatpush1.bf16.msra.mxu1 %v16439_v39  ;;  %5900 = vmatpush1.bf16.msra.mxu0 %v16442_v40  ;;  %v16513_v39 = vld [vmem:[#allocation17 + $0xc4] ss:$12 sps:$4 sm:$0xff]   ;;  %v16511_v40 = vld [vmem:[#allocation17 + $0xc0] ss:$12 sps:$4 sm:$0xff]  }
 0x852   :  { %5819 = vmatprep.subr.bf16.mxu1 %v16447_v41  ;;  %5901 = vmatprep.subr.bf16.mxu0 %v16450_v43  ;;  %v16518_v41 = vld [vmem:[#allocation17 + $0xdc] ss:$12 sps:$4 sm:$0xff]   ;;  %v16516_v43 = vld [vmem:[#allocation17 + $0xd8] ss:$12 sps:$4 sm:$0xff]  }
 0x855   :  { %5820 = vmatpush1.bf16.msra.mxu1 %v16445_v45  ;;  %5902 = vmatpush1.bf16.msra.mxu0 %v16448_v5  ;;  %v16523_v45 = vld [vmem:[#allocation17 + $0xf4] ss:$12 sps:$4 sm:$0xff]   ;;  %v16521_v5 = vld [vmem:[#allocation17 + $0xf0] ss:$12 sps:$4 sm:$0xff]  }
 0x856   :  { %5821 = vmatprep.subr.bf16.mxu1 %v16453_v23  ;;  %5903 = vmatprep.subr.bf16.mxu0 %v16456_v52  ;;  %v16528_v23 = vld [vmem:[#allocation17 + $0x10c] ss:$12 sps:$4 sm:$0xff]   ;;  %v16526_v52 = vld [vmem:[#allocation17 + $0x108] ss:$12 sps:$4 sm:$0xff]  }
 0x859   :  { %5822 = vmatpush1.bf16.msra.mxu1 %v16451_v53  ;;  %5904 = vmatpush1.bf16.msra.mxu0 %v16454_v55  ;;  %v16533_v53 = vld [vmem:[#allocation17 + $0x124] ss:$12 sps:$4 sm:$0xff]   ;;  %v16534_v55 = vld [vmem:[#allocation17 + $0x128] ss:$12 sps:$4 sm:$0xff]  }
 0x85a   :  { %5823 = vmatprep.subr.bf16.mxu1 %v16459_v56  ;;  %5905 = vmatprep.subr.bf16.mxu0 %v16462_v57  ;;  %v16531_v56 = vld [vmem:[#allocation17 + $0x120] ss:$12 sps:$4 sm:$0xff]   ;;  %v16535_v57 = vld [vmem:[#allocation17 + $0x68] ss:$12 sps:$4 sm:$0xff]  }
 0x85d   :  { %5824 = vmatpush1.bf16.msra.mxu1 %v16457_v59  ;;  %5906 = vmatpush1.bf16.msra.mxu0 %v16460_v47  ;;  %v16539_v59 = vld [vmem:[#allocation17 + $0x140] ss:$12 sps:$4 sm:$0xff]   ;;  %v16536_v47 = vld [vmem:[#allocation17 + $0x138] ss:$12 sps:$4 sm:$0xff]  }
 0x85e   :  { %5825 = vmatprep.subr.bf16.mxu1 %v16465_v29  ;;  %5907 = vmatprep.subr.bf16.mxu0 %v16468_v60  ;;  %v16540_v29 = vld [vmem:[#allocation17 + $0x80] ss:$12 sps:$4 sm:$0xff]  }
 0x85f   :  { %v16543_v60 = vld [vmem:[#allocation17 + $0x154] ss:$12 sps:$4 sm:$0xff]  }
 0x861   :  { %5826 = vmatpush1.bf16.msra.mxu1 %v16463_v62  ;;  %5908 = vmatpush1.bf16.msra.mxu0 %v16466_v63  ;;  %v16541_v62 = vld [vmem:[#allocation17 + $0x150] ss:$12 sps:$4 sm:$0xff]   ;;  %v16545_v63 = vld [vmem:[#allocation17 + $0x98] ss:$12 sps:$4 sm:$0xff]  }
 0x862   :  { %5827 = vmatprep.subr.bf16.mxu1 %v16471_v34  ;;  %5909 = vmatprep.subr.bf16.mxu0 %v16474_v1  ;;  %v16548_v34 = vld [vmem:[#allocation17 + $0x16c] ss:$12 sps:$4 sm:$0xff]   ;;  %v16549_v1 = vld [vmem:[#allocation17 + $0x170] ss:$12 sps:$4 sm:$0xff]  }
 0x865   :  { %5828 = vmatpush1.bf16.msra.mxu1 %v16469_v46  ;;  %5910 = vmatpush1.bf16.msra.mxu0 %v16472_v3  ;;  %v16550_v46 = vld [vmem:[#allocation17 + $0xb0] ss:$12 sps:$4 sm:$0xff]  }
 0x866   :  { %5829 = vmatprep.subr.bf16.mxu1 %v16477_v6  ;;  %5911 = vmatprep.subr.bf16.mxu0 %v16480_v7  ;;  %v16553_v3 = vld [vmem:[#allocation17 + $0x184] ss:$12 sps:$4 sm:$0xff]   ;;  %v16554_v6 = vld [vmem:[#allocation17 + $0x248] ss:$12 sps:$4 sm:$0xff]  }
 0x867   :  { %v5098_v7 = vld [vmem:[%s18781_s16] sm:$0xf] }
 0x869   :  { %5830 = vmatpush1.bf16.msra.mxu1 %v16475_v54  ;;  %5912 = vmatpush1.bf16.msra.mxu0 %v16478_v49  ;;  %v5103_v54 = vrot.slane %v5098_v7, %v18466_v48  ;;  %v5107_v49 = vrot.slane %v5098_v7, %v18474_v50 }
 0x86a   :  { %5831 = vmatprep.subr.bf16.mxu1 %v16483_v8  ;;  %5913 = vmatprep.subr.bf16.mxu0 %v16486_v10  ;;  %v5115_v8 = vrot.slane %v5098_v7, %v18492_v51 }
 0x86d   :  { %5832 = vmatpush1.bf16.msra.mxu1 %v16481_v11  ;;  %5914 = vmatpush1.bf16.msra.mxu0 %v16484_v12 }
 0x86e   :  { %6589 = vmatprep.subr.bf16.mxu1 %v16489_v13  ;;  %15072 = vmatprep.subr.bf16.mxu0 %v16514_v14 }
 0x870   :  { %5834 = vmatmul.mubr.bf16.vlgmr.msra.gmra.mrb[32].mxu1 %v17819_v19  ;;  %5916 = vmatmul.mubr.bf16.vlgmr.msra.gmra.mrb[32].mxu0 %v17819_v19 }
 0x871   :  { %6590 = vmatpush1.bf16.msra.mxu1 %v16487_v15  ;;  %15073 = vmatpush3.bf16.msra.mxu0 %v16515_v16 }
 0x872   :  { %6591 = vmatprep.subr.bf16.mxu1 %v16492_v17  ;;  %15074 = vmatprep.subr.bf16.mxu0 %v16519_v18 }
 0x875   :  { %6592 = vmatpush1.bf16.msra.mxu1 %v16490_v21  ;;  %15075 = vmatpush3.bf16.msra.mxu0 %v16520_v4 }
 0x876   :  { %6593 = vmatprep.subr.bf16.mxu1 %v16495_v22  ;;  %15076 = vmatprep.subr.bf16.mxu0 %v16524_v24 }
 0x879   :  { %6594 = vmatpush1.bf16.msra.mxu1 %v16493_v35  ;;  %15077 = vmatpush3.bf16.msra.mxu0 %v16525_v20  ;;  %v16551_v35 = vld [vmem:[#allocation17 + $0x180] ss:$12 sps:$4 sm:$0xff]   ;;  %v16555_v20 = vld [vmem:[#allocation17 + $0x188] ss:$12 sps:$4 sm:$0xff]  }
 0x87a   :  { %6595 = vmatprep.subr.bf16.mxu1 %v16498_v25  ;;  %15078 = vmatprep.subr.bf16.mxu0 %v16529_v26 }
 0x87d   :  { %6596 = vmatpush1.bf16.msra.mxu1 %v16496_v9  ;;  %15079 = vmatpush3.bf16.msra.mxu0 %v16530_v27  ;;  %v16558_v9 = vld [vmem:[#allocation17 + $0x19c] ss:$12 sps:$4 sm:$0xff]   ;;  %v16559_v27 = vld [vmem:[#allocation17 + $0x260] ss:$12 sps:$4 sm:$0xff]  }
 0x87e   :  { %6597 = vmatprep.subr.bf16.mxu1 %v16501_v28  ;;  %15080 = vmatprep.subr.bf16.mxu0 %v16534_v55  ;;  %v16578_v55 = vld [vmem:[#allocation17 + $0x1fc] ss:$12 sps:$4 sm:$0xff]  }
 0x881   :  { %6598 = vmatpush1.bf16.msra.mxu1 %v16499_v30  ;;  %15081 = vmatpush3.bf16.msra.mxu0 %v16535_v57  ;;  %v16556_v30 = vld [vmem:[#allocation17 + $0x198] ss:$12 sps:$4 sm:$0xff]  }
 0x882   :  { %6599 = vmatprep.subr.bf16.mxu1 %v16504_v31  ;;  %15082 = vmatprep.subr.bf16.mxu0 %v16539_v59  ;;  %v16560_v31 = vld [vmem:[#allocation17 + $0x1a0] ss:$12 sps:$4 sm:$0xff]  }
 0x883   :  { %v16580_v59 = vld [vmem:[#allocation17 + $0x200] ss:$12 sps:$4 sm:$0xff]  }
 0x885   :  { %6600 = vmatpush1.bf16.msra.mxu1 %v16502_v32  ;;  %15083 = vmatpush3.bf16.msra.mxu0 %v16540_v29  ;;  %v16563_v32 = vld [vmem:[#allocation17 + $0x1b4] ss:$12 sps:$4 sm:$0xff]   ;;  %v16584_v29 = vld [vmem:[#allocation17 + $0x2d8] ss:$12 sps:$4 sm:$0xff]  }
 0x886   :  { %6601 = vmatprep.subr.bf16.mxu1 %v16507_v33  ;;  %15084 = vmatprep.subr.bf16.mxu0 %v16544_v61  ;;  %v16564_v33 = vld [vmem:[#allocation17 + $0x278] ss:$12 sps:$4 sm:$0xff]  }
 0x887   :  { %v16585_v61 = vld [vmem:[#allocation17 + $0x218] ss:$12 sps:$4 sm:$0xff]  }
 0x889   :  { %6602 = vmatpush1.bf16.msra.mxu1 %v16505_v36  ;;  %15085 = vmatpush3.bf16.msra.mxu0 %v16545_v63  ;;  %v16561_v36 = vld [vmem:[#allocation17 + $0x1b0] ss:$12 sps:$4 sm:$0xff]  }
 0x88a   :  { %6603 = vmatprep.subr.bf16.mxu1 %v16510_v37  ;;  %15086 = vmatprep.subr.bf16.mxu0 %v16549_v1  ;;  %v16565_v37 = vld [vmem:[#allocation17 + $0x1b8] ss:$12 sps:$4 sm:$0xff]   ;;  %v16589_v63 = vld [vmem:[#allocation17 + $0x2f0] ss:$12 sps:$4 sm:$0xff]  }
 0x88b   :  { %v16590_v1 = vld [vmem:[#allocation17 + $0x230] ss:$12 sps:$4 sm:$0xff]  }
 0x88d   :  { %6604 = vmatpush1.bf16.msra.mxu1 %v16508_v38  ;;  %15087 = vmatpush3.bf16.msra.mxu0 %v16550_v46  ;;  %v16568_v38 = vld [vmem:[#allocation17 + $0x1cc] ss:$12 sps:$4 sm:$0xff]   ;;  %v16596_v46 = vld [vmem:[#allocation5 + $0x4] ss:$16 sps:$4 sm:$0xff]  }
 0x88e   :  { %6605 = vmatprep.subr.bf16.mxu1 %v16513_v39  ;;  %15094 = vmatprep.subr.bf16.mxu0 %v16554_v6  ;;  %v16569_v39 = vld [vmem:[#allocation17 + $0x290] ss:$12 sps:$4 sm:$0xff]   ;;  %v16591_v6 = vld [vmem:[#allocation17 + $0x240] ss:$12 sps:$4 sm:$0xff]  }
 0x891   :  { %6606 = vmatpush1.bf16.msra.mxu1 %v16511_v40  ;;  %v5111_v40 = vrot.slane %v5098_v7, %v18489_v44  ;;  %v16594_v7 = vld [vmem:[#allocation5] ss:$16 sps:$4 sm:$0xff]  }
 0x892   :  { %6607 = vmatprep.subr.bf16.mxu1 %v16518_v41  ;;  %v16566_v41 = vld [vmem:[#allocation17 + $0x1c8] ss:$12 sps:$4 sm:$0xff]  }
 0x895   :  { %6608 = vmatpush1.bf16.msra.mxu1 %v16516_v43  ;;  %v16570_v43 = vld [vmem:[#allocation17 + $0x1d0] ss:$12 sps:$4 sm:$0xff]  }
 0x896   :  { %6609 = vmatprep.subr.bf16.mxu1 %v16523_v45  ;;  %v16573_v45 = vld [vmem:[#allocation17 + $0x1e4] ss:$12 sps:$4 sm:$0xff]  }
 0x899   :  { %6610 = vmatpush1.bf16.msra.mxu1 %v16521_v5  ;;  %v16574_v5 = vld [vmem:[#allocation17 + $0x2a8] ss:$12 sps:$4 sm:$0xff]  }
 0x89a   :  { %6611 = vmatprep.subr.bf16.mxu1 %v16528_v23 }
 0x89d   :  { %6612 = vmatpush1.bf16.msra.mxu1 %v16526_v52  ;;  %v16571_v52 = vld [vmem:[#allocation17 + $0x1e0] ss:$12 sps:$4 sm:$0xff]  }
 0x89e   :  { %6613 = vmatprep.subr.bf16.mxu1 %v16533_v53  ;;  %v16575_v53 = vld [vmem:[#allocation17 + $0x1e8] ss:$12 sps:$4 sm:$0xff]  }
 0x8a1   :  { %6614 = vmatpush1.bf16.msra.mxu1 %v16531_v56  ;;  %v16579_v56 = vld [vmem:[#allocation17 + $0x2c0] ss:$12 sps:$4 sm:$0xff]  }
 0x8a2   :  { %6615 = vmatprep.subr.bf16.mxu1 %v16538_v58  ;;  %v16576_v58 = vld [vmem:[#allocation17 + $0x1f8] ss:$12 sps:$4 sm:$0xff]  }
 0x8a5   :  { %6616 = vmatpush1.bf16.msra.mxu1 %v16536_v47  ;;  %v16583_v47 = vld [vmem:[#allocation17 + $0x214] ss:$12 sps:$4 sm:$0xff]  }
 0x8a6   :  { %6617 = vmatprep.subr.bf16.mxu1 %v16543_v60  ;;  %v16581_v60 = vld [vmem:[#allocation17 + $0x210] ss:$12 sps:$4 sm:$0xff]  }
 0x8a9   :  { %6618 = vmatpush1.bf16.msra.mxu1 %v16541_v62  ;;  %v16588_v62 = vld [vmem:[#allocation17 + $0x22c] ss:$12 sps:$4 sm:$0xff]  }
 0x8aa   :  { %6619 = vmatprep.subr.bf16.mxu1 %v16548_v34  ;;  %v16586_v34 = vld [vmem:[#allocation17 + $0x228] ss:$12 sps:$4 sm:$0xff]  }
 0x8ad   :  { %6620 = vmatpush1.bf16.msra.mxu1 %v16546_v2  ;;  %v16593_v2 = vld [vmem:[#allocation17 + $0x244] ss:$12 sps:$4 sm:$0xff]  }
 0x8ae   :  { %6630 = vmatprep.subr.bf16.mxu1 %v16553_v3  ;;  %v18590_v3 = vld [vmem:[#allocation2 + $0xc] sm:$0xff] }
 0x943   :  { %v5835_v10 = vpop.f32.mrb[32].mxu1  ;;  %v5917_v11 = vpop.f32.mrb[32].mxu0 }
 0x944   :  { %v15315_v12 = vadd.f32 %v5835_v10, %v5103_v54  ;;  %v5837_v13 = vpop.f32.mrb[33].mxu1  ;;  %v5919_v14 = vpop.f32.mrb[33].mxu0  ;;  %v15317_v23 = vadd.f32 %v5917_v11, %v5111_v40  ;;  %v16599_v54 = vld [vmem:[#allocation17 + $0x25c] ss:$12 sps:$4 sm:$0xff]   ;;  %v18596_v10 = vcombine.high %v18590_v3, %v18590_v3  ;;  %v16597_v11 = vld [vmem:[#allocation17 + $0x258] ss:$12 sps:$4 sm:$0xff]  }
 0x945   :  { %v15316_v15 = vadd.f32 %v5837_v13, %v5107_v49  ;;  %v15318_v16 = vadd.f32 %v5919_v14, %v5115_v8  ;;  %v5839_v17 = vpop.f32.mrb[34].mxu1  ;;  %v5921_v18 = vpop.f32.mrb[34].mxu0  ;;  %v16602_v49 = vld [vmem:[#allocation5 + $0x24] ss:$16 sps:$4 sm:$0xff]   ;;  %v16639_v40 = vld [vmem:[#allocation5 + $0x100] ss:$16 sps:$4 sm:$0xff]  }
 0x946   :  { %v5840_v19 = vpop.f32.mrb[35].mxu1  ;;  %v5922_v21 = vpop.f32.mrb[35].mxu0  ;;  %v5924_v4 = vpack.c.bf16 %v15315_v12, %v15315_v12  ;;  %v5926_v57 = vpack.c.bf16 %v15317_v23, %v15317_v23  ;;  %v16600_v12 = vld [vmem:[#allocation5 + $0x20] ss:$16 sps:$4 sm:$0xff]   ;;  %v16608_v14 = vld [vmem:[#allocation5 + $0x44] ss:$16 sps:$4 sm:$0xff]  }
 0x947   :  { %v5925_v22 = vpack.c.bf16 %v15316_v15, %v15316_v15  ;;  %v5927_v24 = vpack.c.bf16 %v15318_v16, %v15318_v16  ;;  %v16605_v13 = vld [vmem:[#allocation17 + $0x274] ss:$12 sps:$4 sm:$0xff]   ;;  %v16603_v15 = vld [vmem:[#allocation17 + $0x270] ss:$12 sps:$4 sm:$0xff]   ;;  %v16611_v17 = vld [vmem:[#allocation17 + $0x28c] ss:$12 sps:$4 sm:$0xff]  }
 0x948   :  { %v16606_v16 = vld [vmem:[#allocation5 + $0x40] ss:$16 sps:$4 sm:$0xff]   ;;  %v16614_v18 = vld [vmem:[#allocation5 + $0x64] ss:$16 sps:$4 sm:$0xff]   ;;  %v16648_v23 = vld [vmem:[#allocation5 + $0x28] ss:$16 sps:$4 sm:$0xff]  }
 0x949   :  { %17820 = vtanh.bf16 %v5925_v22  ;;  %v16609_v19 = vld [vmem:[#allocation17 + $0x288] ss:$12 sps:$4 sm:$0xff]   ;;  %v16612_v21 = vld [vmem:[#allocation5 + $0x60] ss:$16 sps:$4 sm:$0xff]  }
 0x94a   :  { %17822 = vtanh.bf16 %v5924_v4  ;;  %v16617_v4 = vld [vmem:[#allocation17 + $0x2a4] ss:$12 sps:$4 sm:$0xff]  }
 0x94b   :  { %17824 = vtanh.bf16 %v5927_v24  ;;  %v16620_v22 = vld [vmem:[#allocation5 + $0x84] ss:$16 sps:$4 sm:$0xff]   ;;  %v16615_v24 = vld [vmem:[#allocation17 + $0x2a0] ss:$12 sps:$4 sm:$0xff]  }
 0x94c   :  { %17826 = vtanh.bf16 %v5926_v57  ;;  %v16659_v57 = vld [vmem:[#allocation5 + $0x164] ss:$16 sps:$4 sm:$0xff]  }
 0x954   :  { %v17821_v25 = vpop.eup %17820 }
 0x955   :  { %v17823_v26 = vpop.eup %17822  ;;  %6621 = vmatprep.mubr.bf16.mxu1 %v17821_v25  ;;  %6703 = vmatprep.mubr.bf16.mxu0 %v17821_v25  ;;  %v16626_v25 = vld [vmem:[#allocation5 + $0xa4] ss:$16 sps:$4 sm:$0xff]  }
 0x956   :  { %6622 = vmatmul.mubr.bf16.vlgmr.msra.gmra.mrb[36].mxu1 %v17823_v26  ;;  %6704 = vmatmul.mubr.bf16.vlgmr.msra.gmra.mrb[36].mxu0 %v17823_v26  ;;  %v17825_v28 = vpop.eup %17824  ;;  %v16621_v26 = vld [vmem:[#allocation17 + $0x2b8] ss:$12 sps:$4 sm:$0xff]  }
 0x957   :  { %6631 = vmatpush1.bf16.msra.mxu1 %v16551_v35  ;;  %15095 = vmatpush3.bf16.msra.mxu0 %v16555_v20  ;;  %v18592_v8 = vpop.eup %17826  ;;  %v16618_v35 = vld [vmem:[#allocation5 + $0x80] ss:$16 sps:$4 sm:$0xff]   ;;  %v16623_v20 = vld [vmem:[#allocation17 + $0x2bc] ss:$12 sps:$4 sm:$0xff]  }
 0x958   :  { %6662 = vmatprep.mubr.bf16.mxu1 %v17825_v28  ;;  %6743 = vmatprep.mubr.bf16.mxu0 %v17825_v28  ;;  %v16632_v28 = vld [vmem:[#allocation5 + $0xc4] ss:$16 sps:$4 sm:$0xff]  }
 0x959   :  { %6632 = vmatprep.subr.bf16.mxu1 %v16558_v9  ;;  %15096 = vmatprep.subr.bf16.mxu0 %v16559_v27  ;;  %v16624_v9 = vld [vmem:[#allocation5 + $0xa0] ss:$16 sps:$4 sm:$0xff]  }
 0x95a   :  { %v16629_v27 = vld [vmem:[#allocation17 + $0x2d4] ss:$12 sps:$4 sm:$0xff]  }
 0x95b   :  { %6633 = vmatpush1.bf16.msra.mxu1 %v16556_v30  ;;  %15097 = vmatpush3.bf16.msra.mxu0 %v16560_v31  ;;  %v16627_v30 = vld [vmem:[#allocation17 + $0x2d0] ss:$12 sps:$4 sm:$0xff]  }
 0x95c   :  { %6634 = vmatprep.subr.bf16.mxu1 %v16563_v32  ;;  %15098 = vmatprep.subr.bf16.mxu0 %v16564_v33  ;;  %v16630_v31 = vld [vmem:[#allocation5 + $0xc0] ss:$16 sps:$4 sm:$0xff]   ;;  %v16635_v32 = vld [vmem:[#allocation17 + $0x2ec] ss:$12 sps:$4 sm:$0xff]   ;;  %v16638_v33 = vld [vmem:[#allocation5 + $0xe4] ss:$16 sps:$4 sm:$0xff]  }
 0x95f   :  { %6635 = vmatpush1.bf16.msra.mxu1 %v16561_v36  ;;  %15099 = vmatpush3.bf16.msra.mxu0 %v16565_v37  ;;  %v16633_v36 = vld [vmem:[#allocation17 + $0x2e8] ss:$12 sps:$4 sm:$0xff]   ;;  %v16636_v37 = vld [vmem:[#allocation5 + $0xe0] ss:$16 sps:$4 sm:$0xff]  }
 0x960   :  { %6636 = vmatprep.subr.bf16.mxu1 %v16568_v38  ;;  %15100 = vmatprep.subr.bf16.mxu0 %v16569_v39  ;;  %v16641_v38 = vld [vmem:[#allocation5 + $0x104] ss:$16 sps:$4 sm:$0xff]   ;;  %v16644_v39 = vld [vmem:[#allocation5 + $0xc] ss:$16 sps:$4 sm:$0xff]  }
 0x963   :  { %6637 = vmatpush1.bf16.msra.mxu1 %v16566_v41  ;;  %15101 = vmatpush3.bf16.msra.mxu0 %v16570_v43  ;;  %v16642_v41 = vld [vmem:[#allocation5 + $0x8] ss:$16 sps:$4 sm:$0xff]   ;;  %v16647_v43 = vld [vmem:[#allocation5 + $0x124] ss:$16 sps:$4 sm:$0xff]  }
 0x964   :  { %6638 = vmatprep.subr.bf16.mxu1 %v16573_v45  ;;  %15102 = vmatprep.subr.bf16.mxu0 %v16574_v5  ;;  %v16650_v45 = vld [vmem:[#allocation5 + $0x2c] ss:$16 sps:$4 sm:$0xff]   ;;  %v16645_v5 = vld [vmem:[#allocation5 + $0x120] ss:$16 sps:$4 sm:$0xff]  }
 0x967   :  { %6639 = vmatpush1.bf16.msra.mxu1 %v16571_v52  ;;  %15103 = vmatpush3.bf16.msra.mxu0 %v16575_v53  ;;  %v16653_v52 = vld [vmem:[#allocation5 + $0x144] ss:$16 sps:$4 sm:$0xff]   ;;  %v16656_v53 = vld [vmem:[#allocation5 + $0x4c] ss:$16 sps:$4 sm:$0xff]  }
 0x968   :  { %6640 = vmatprep.subr.bf16.mxu1 %v16578_v55  ;;  %15104 = vmatprep.subr.bf16.mxu0 %v16579_v56  ;;  %v16651_v55 = vld [vmem:[#allocation5 + $0x140] ss:$16 sps:$4 sm:$0xff]   ;;  %v16654_v56 = vld [vmem:[#allocation5 + $0x48] ss:$16 sps:$4 sm:$0xff]  }
 0x96b   :  { %6641 = vmatpush1.bf16.msra.mxu1 %v16576_v58  ;;  %15105 = vmatpush3.bf16.msra.mxu0 %v16580_v59  ;;  %v16662_v58 = vld [vmem:[#allocation5 + $0x6c] ss:$16 sps:$4 sm:$0xff]   ;;  %v16657_v59 = vld [vmem:[#allocation5 + $0x160] ss:$16 sps:$4 sm:$0xff]  }
 0x96c   :  { %6642 = vmatprep.subr.bf16.mxu1 %v16583_v47  ;;  %15106 = vmatprep.subr.bf16.mxu0 %v16584_v29  ;;  %v16660_v47 = vld [vmem:[#allocation5 + $0x68] ss:$16 sps:$4 sm:$0xff]   ;;  %v16665_v29 = vld [vmem:[#allocation5 + $0x184] ss:$16 sps:$4 sm:$0xff]  }
 0x96f   :  { %6643 = vmatpush1.bf16.msra.mxu1 %v16581_v60  ;;  %15107 = vmatpush3.bf16.msra.mxu0 %v16585_v61  ;;  %v16668_v60 = vld [vmem:[#allocation5 + $0x8c] ss:$16 sps:$4 sm:$0xff]   ;;  %v16663_v61 = vld [vmem:[#allocation5 + $0x180] ss:$16 sps:$4 sm:$0xff]  }
 0x970   :  { %6644 = vmatprep.subr.bf16.mxu1 %v16588_v62  ;;  %15108 = vmatprep.subr.bf16.mxu0 %v16589_v63  ;;  %v16666_v62 = vld [vmem:[#allocation5 + $0x88] ss:$16 sps:$4 sm:$0xff]   ;;  %v16671_v63 = vld [vmem:[#allocation5 + $0x1a4] ss:$16 sps:$4 sm:$0xff]  }
 0x973   :  { %6645 = vmatpush1.bf16.msra.mxu1 %v16586_v34  ;;  %15109 = vmatpush3.bf16.msra.mxu0 %v16590_v1  ;;  %v16674_v34 = vld [vmem:[#allocation5 + $0xac] ss:$16 sps:$4 sm:$0xff]   ;;  %v16669_v1 = vld [vmem:[#allocation5 + $0x1a0] ss:$16 sps:$4 sm:$0xff]  }
 0x974   :  { %6646 = vmatprep.subr.bf16.mxu1 %v16593_v2  ;;  %7368 = vmatprep.subr.bf16.mxu0 %v16596_v46  ;;  %v16672_v2 = vld [vmem:[#allocation5 + $0xa8] ss:$16 sps:$4 sm:$0xff]   ;;  %v16677_v46 = vld [vmem:[#allocation5 + $0x1c4] ss:$16 sps:$4 sm:$0xff]  }
 0x976   :  { %6744 = vmatmul.mubr.bf16.vlgmr.msra.gmra.mrb[40].mxu0 %v18592_v8 }
 0x977   :  { %6647 = vmatpush1.bf16.msra.mxu1 %v16591_v6  ;;  %7369 = vmatpush1.bf16.msra.mxu0 %v16594_v7  ;;  %v16680_v6 = vld [vmem:[#allocation5 + $0xcc] ss:$16 sps:$4 sm:$0xff]   ;;  %v16675_v7 = vld [vmem:[#allocation5 + $0x1c0] ss:$16 sps:$4 sm:$0xff]  }
 0x978   :  { %6648 = vmatprep.subr.bf16.mxu1 %v16599_v54  ;;  %7370 = vmatprep.subr.bf16.mxu0 %v16602_v49  ;;  %v16678_v54 = vld [vmem:[#allocation5 + $0xc8] ss:$16 sps:$4 sm:$0xff]   ;;  %v16683_v49 = vld [vmem:[#allocation5 + $0x1e4] ss:$16 sps:$4 sm:$0xff]  }
 0x979   :  { %7400 = vmatprep.mubr.bf16.mxu0 %v18596_v10 }
 0x97b   :  { %6649 = vmatpush1.bf16.msra.mxu1 %v16597_v11  ;;  %7371 = vmatpush1.bf16.msra.mxu0 %v16600_v12  ;;  %v16684_v11 = vld [vmem:[#allocation5 + $0xe8] ss:$16 sps:$4 sm:$0xff]   ;;  %v16691_v12 = vld [vmem:[#allocation5 + $0x204] ss:$16 sps:$4 sm:$0xff]  }
 0x97c   :  { %6650 = vmatprep.subr.bf16.mxu1 %v16605_v13  ;;  %7372 = vmatprep.subr.bf16.mxu0 %v16608_v14  ;;  %v16694_v13 = vld [vmem:[#allocation5 + $0x10c] ss:$16 sps:$4 sm:$0xff]   ;;  %v18604_v14 = vcombine.low %v18590_v3, %v18590_v3  ;;  %v16701_v3 = vld [vmem:[#allocation5 + $0x240] ss:$16 sps:$4 sm:$0xff]  }
 0x97f   :  { %6651 = vmatpush1.bf16.msra.mxu1 %v16603_v15  ;;  %7373 = vmatpush1.bf16.msra.mxu0 %v16606_v16  ;;  %v16689_v15 = vld [vmem:[#allocation5 + $0x200] ss:$16 sps:$4 sm:$0xff]   ;;  %v16692_v16 = vld [vmem:[#allocation5 + $0x108] ss:$16 sps:$4 sm:$0xff]  }
 0x980   :  { %6652 = vmatprep.subr.bf16.mxu1 %v16611_v17  ;;  %7374 = vmatprep.subr.bf16.mxu0 %v16614_v18  ;;  %v16697_v17 = vld [vmem:[#allocation5 + $0x224] ss:$16 sps:$4 sm:$0xff]   ;;  %v16700_v18 = vld [vmem:[#allocation5 + $0x12c] ss:$16 sps:$4 sm:$0xff]  }
 0x983   :  { %6653 = vmatpush1.bf16.msra.mxu1 %v16609_v19  ;;  %7375 = vmatpush1.bf16.msra.mxu0 %v16612_v21  ;;  %v16695_v19 = vld [vmem:[#allocation5 + $0x220] ss:$16 sps:$4 sm:$0xff]   ;;  %v16698_v21 = vld [vmem:[#allocation5 + $0x128] ss:$16 sps:$4 sm:$0xff]  }
 0x984   :  { %6654 = vmatprep.subr.bf16.mxu1 %v16617_v4  ;;  %7376 = vmatprep.subr.bf16.mxu0 %v16620_v22  ;;  %v16703_v4 = vld [vmem:[#allocation5 + $0x244] ss:$16 sps:$4 sm:$0xff]   ;;  %v16706_v22 = vld [vmem:[#allocation5 + $0x14c] ss:$16 sps:$4 sm:$0xff]  }
 0x987   :  { %6655 = vmatpush1.bf16.msra.mxu1 %v16615_v24  ;;  %7377 = vmatpush1.bf16.msra.mxu0 %v16618_v35  ;;  %v16704_v24 = vld [vmem:[#allocation5 + $0x148] ss:$16 sps:$4 sm:$0xff]   ;;  %v16709_v35 = vld [vmem:[#allocation5 + $0x264] ss:$16 sps:$4 sm:$0xff]  }
 0x988   :  { %6656 = vmatprep.subr.bf16.mxu1 %v16623_v20  ;;  %7378 = vmatprep.subr.bf16.mxu0 %v16626_v25  ;;  %v16712_v20 = vld [vmem:[#allocation5 + $0x16c] ss:$16 sps:$4 sm:$0xff]   ;;  %v16707_v25 = vld [vmem:[#allocation5 + $0x260] ss:$16 sps:$4 sm:$0xff]  }
 0x98b   :  { %6657 = vmatpush1.bf16.msra.mxu1 %v16621_v26  ;;  %7379 = vmatpush1.bf16.msra.mxu0 %v16624_v9  ;;  %v16710_v26 = vld [vmem:[#allocation5 + $0x168] ss:$16 sps:$4 sm:$0xff]   ;;  %v16715_v9 = vld [vmem:[#allocation5 + $0x284] ss:$16 sps:$4 sm:$0xff]  }
 0x98c   :  { %6658 = vmatprep.subr.bf16.mxu1 %v16629_v27  ;;  %7380 = vmatprep.subr.bf16.mxu0 %v16632_v28  ;;  %v16718_v27 = vld [vmem:[#allocation5 + $0x18c] ss:$16 sps:$4 sm:$0xff]   ;;  %v16713_v28 = vld [vmem:[#allocation5 + $0x280] ss:$16 sps:$4 sm:$0xff]  }
 0x98f   :  { %6659 = vmatpush1.bf16.msra.mxu1 %v16627_v30  ;;  %7381 = vmatpush1.bf16.msra.mxu0 %v16630_v31  ;;  %v16716_v30 = vld [vmem:[#allocation5 + $0x188] ss:$16 sps:$4 sm:$0xff]   ;;  %v16721_v31 = vld [vmem:[#allocation5 + $0x2a4] ss:$16 sps:$4 sm:$0xff]  }
 0x990   :  { %6660 = vmatprep.subr.bf16.mxu1 %v16635_v32  ;;  %7382 = vmatprep.subr.bf16.mxu0 %v16638_v33  ;;  %v16724_v32 = vld [vmem:[#allocation5 + $0x1ac] ss:$16 sps:$4 sm:$0xff]   ;;  %v16719_v33 = vld [vmem:[#allocation5 + $0x2a0] ss:$16 sps:$4 sm:$0xff]  }
 0x993   :  { %6661 = vmatpush1.bf16.msra.mxu1 %v16633_v36  ;;  %7383 = vmatpush1.bf16.msra.mxu0 %v16636_v37  ;;  %v16722_v36 = vld [vmem:[#allocation5 + $0x1a8] ss:$16 sps:$4 sm:$0xff]   ;;  %v16727_v37 = vld [vmem:[#allocation5 + $0x2c4] ss:$16 sps:$4 sm:$0xff]  }
 0x994   :  { %7384 = vmatprep.subr.bf16.mxu0 %v16641_v38  ;;  %7450 = vmatprep.subr.bf16.mxu1 %v16644_v39  ;;  %v16730_v38 = vld [vmem:[#allocation5 + $0x1cc] ss:$16 sps:$4 sm:$0xff]   ;;  %v16725_v39 = vld [vmem:[#allocation5 + $0x2c0] ss:$16 sps:$4 sm:$0xff]  }
 0x996   :  { %6663 = vmatmul.mubr.bf16.vlgmr.msra.gmra.mrb[36].mxu1 %v18592_v8  ;;  %v16686_v8 = vld [vmem:[#allocation5 + $0xec] ss:$16 sps:$4 sm:$0xff]  }
 0x997   :  { %7385 = vmatpush1.bf16.msra.mxu0 %v16639_v40  ;;  %7451 = vmatpush1.bf16.msra.mxu1 %v16642_v41  ;;  %v16728_v40 = vld [vmem:[#allocation5 + $0x1c8] ss:$16 sps:$4 sm:$0xff]   ;;  %v16733_v41 = vld [vmem:[#allocation5 + $0x2e4] ss:$16 sps:$4 sm:$0xff]  }
 0x998   :  { %7386 = vmatprep.subr.bf16.mxu0 %v16647_v43  ;;  %7452 = vmatprep.subr.bf16.mxu1 %v16650_v45  ;;  %v16736_v43 = vld [vmem:[#allocation5 + $0x1ec] ss:$16 sps:$4 sm:$0xff]   ;;  %v16731_v45 = vld [vmem:[#allocation5 + $0x2e0] ss:$16 sps:$4 sm:$0xff]  }
 0x999   :  { %7482 = vmatprep.mubr.bf16.mxu1 %v18596_v10  ;;  %v16681_v10 = vld [vmem:[#allocation5 + $0x1e0] ss:$16 sps:$4 sm:$0xff]  }
 0x99b   :  { %7387 = vmatpush1.bf16.msra.mxu0 %v16645_v5  ;;  %7453 = vmatpush1.bf16.msra.mxu1 %v16648_v23  ;;  %v16734_v5 = vld [vmem:[#allocation5 + $0x1e8] ss:$16 sps:$4 sm:$0xff]   ;;  %v16740_v23 = vld [vmem:[#allocation5 + $0x20c] ss:$16 sps:$4 sm:$0xff]  }
 0x99c   :  { %7388 = vmatprep.subr.bf16.mxu0 %v16653_v52  ;;  %7454 = vmatprep.subr.bf16.mxu1 %v16656_v53  ;;  %v16737_v52 = vld [vmem:[#allocation2 + $0x14] ss:$0 sps:$4 sm:$0xff]   ;;  %v16738_v53 = vld [vmem:[#allocation5 + $0x208] ss:$16 sps:$4 sm:$0xff]  }
 0x99f   :  { %7389 = vmatpush1.bf16.msra.mxu0 %v16651_v55  ;;  %7455 = vmatpush1.bf16.msra.mxu1 %v16654_v56  ;;  %v16743_v55 = vld [vmem:[#allocation5 + $0x22c] ss:$16 sps:$4 sm:$0xff]   ;;  %v16741_v56 = vld [vmem:[#allocation5 + $0x228] ss:$16 sps:$4 sm:$0xff]  }
 0x9a0   :  { %7390 = vmatprep.subr.bf16.mxu0 %v16659_v57  ;;  %7456 = vmatprep.subr.bf16.mxu1 %v16662_v58  ;;  %v16746_v57 = vld [vmem:[#allocation5 + $0x24c] ss:$16 sps:$4 sm:$0xff]   ;;  %v16744_v58 = vld [vmem:[#allocation5 + $0x248] ss:$16 sps:$4 sm:$0xff]  }
 0x9a3   :  { %7391 = vmatpush1.bf16.msra.mxu0 %v16657_v59  ;;  %7457 = vmatpush1.bf16.msra.mxu1 %v16660_v47  ;;  %v16749_v59 = vld [vmem:[#allocation5 + $0x26c] ss:$16 sps:$4 sm:$0xff]   ;;  %v16747_v47 = vld [vmem:[#allocation5 + $0x268] ss:$16 sps:$4 sm:$0xff]  }
 0x9a4   :  { %7392 = vmatprep.subr.bf16.mxu0 %v16665_v29  ;;  %7458 = vmatprep.subr.bf16.mxu1 %v16668_v60  ;;  %v16752_v29 = vld [vmem:[#allocation5 + $0x28c] ss:$16 sps:$4 sm:$0xff]   ;;  %v16750_v60 = vld [vmem:[#allocation5 + $0x288] ss:$16 sps:$4 sm:$0xff]  }
 0x9a7   :  { %7393 = vmatpush1.bf16.msra.mxu0 %v16663_v61  ;;  %7459 = vmatpush1.bf16.msra.mxu1 %v16666_v62  ;;  %v16755_v61 = vld [vmem:[#allocation5 + $0x2ac] ss:$16 sps:$4 sm:$0xff]   ;;  %v16753_v62 = vld [vmem:[#allocation5 + $0x2a8] ss:$16 sps:$4 sm:$0xff]  }
 0x9a8   :  { %7394 = vmatprep.subr.bf16.mxu0 %v16671_v63  ;;  %7460 = vmatprep.subr.bf16.mxu1 %v16674_v34  ;;  %v16758_v63 = vld [vmem:[#allocation5 + $0x2cc] ss:$16 sps:$4 sm:$0xff]   ;;  %v16756_v34 = vld [vmem:[#allocation5 + $0x2c8] ss:$16 sps:$4 sm:$0xff]  }
 0x9ab   :  { %7395 = vmatpush1.bf16.msra.mxu0 %v16669_v1  ;;  %7461 = vmatpush1.bf16.msra.mxu1 %v16672_v2  ;;  %v16761_v1 = vld [vmem:[#allocation5 + $0x2ec] ss:$16 sps:$4 sm:$0xff]   ;;  %v16759_v2 = vld [vmem:[#allocation5 + $0x2e8] ss:$16 sps:$4 sm:$0xff]  }
 0x9ac   :  { %7396 = vmatprep.subr.bf16.mxu0 %v16677_v46  ;;  %7462 = vmatprep.subr.bf16.mxu1 %v16680_v6  ;;  %v16762_v46 = vld [vmem:[#allocation7] ss:$16 sps:$4 sm:$0xff]   ;;  %v16764_v6 = vld [vmem:[#allocation7 + $0x4] ss:$16 sps:$4 sm:$0xff]  }
 0x9af   :  { %7397 = vmatpush1.bf16.msra.mxu0 %v16675_v7  ;;  %7463 = vmatpush1.bf16.msra.mxu1 %v16678_v54  ;;  %v16765_v7 = vld [vmem:[#allocation7 + $0x8] ss:$16 sps:$4 sm:$0xff]   ;;  %v16767_v54 = vld [vmem:[#allocation7 + $0xc] ss:$16 sps:$4 sm:$0xff]  }
 0x9b0   :  { %7398 = vmatprep.subr.bf16.mxu0 %v16683_v49  ;;  %7464 = vmatprep.subr.bf16.mxu1 %v16686_v8  ;;  %v16770_v49 = vld [vmem:[#allocation7 + $0x24] ss:$16 sps:$4 sm:$0xff]   ;;  %v16773_v8 = vld [vmem:[#allocation7 + $0x2c] ss:$16 sps:$4 sm:$0xff]  }
 0x9b3   :  { %7399 = vmatpush1.bf16.msra.mxu0 %v16681_v10  ;;  %7465 = vmatpush1.bf16.msra.mxu1 %v16684_v11  ;;  %v16768_v10 = vld [vmem:[#allocation7 + $0x20] ss:$16 sps:$4 sm:$0xff]   ;;  %v16771_v11 = vld [vmem:[#allocation7 + $0x28] ss:$16 sps:$4 sm:$0xff]  }
 0x9b4   :  { %7409 = vmatprep.subr.bf16.mxu0 %v16691_v12  ;;  %7466 = vmatprep.subr.bf16.mxu1 %v16694_v13  ;;  %v16776_v12 = vld [vmem:[#allocation7 + $0x44] ss:$16 sps:$4 sm:$0xff]   ;;  %v16779_v13 = vld [vmem:[#allocation7 + $0x4c] ss:$16 sps:$4 sm:$0xff]  }
 0x9b6   :  { %7401 = vmatmul.mubr.bf16.vlgmr.msra.gmra.mrb[44].mxu0 %v18604_v14 }
 0x9b7   :  { %7410 = vmatpush1.bf16.msra.mxu0 %v16689_v15  ;;  %7467 = vmatpush1.bf16.msra.mxu1 %v16692_v16  ;;  %v16777_v15 = vld [vmem:[#allocation7 + $0x48] ss:$16 sps:$4 sm:$0xff]   ;;  %v16782_v16 = vld [vmem:[#allocation7 + $0x64] ss:$16 sps:$4 sm:$0xff]  }
 0x9b8   :  { %7411 = vmatprep.subr.bf16.mxu0 %v16697_v17  ;;  %7468 = vmatprep.subr.bf16.mxu1 %v16700_v18  ;;  %v16785_v17 = vld [vmem:[#allocation7 + $0x6c] ss:$16 sps:$4 sm:$0xff]   ;;  %v16780_v18 = vld [vmem:[#allocation7 + $0x60] ss:$16 sps:$4 sm:$0xff]  }
 0x9b9   :  { %7441 = vmatprep.mubr.bf16.mxu0 %v18186_v0 }
 0x9bb   :  { %7412 = vmatpush1.bf16.msra.mxu0 %v16695_v19  ;;  %7469 = vmatpush1.bf16.msra.mxu1 %v16698_v21  ;;  %v16783_v19 = vld [vmem:[#allocation7 + $0x68] ss:$16 sps:$4 sm:$0xff]   ;;  %v16788_v21 = vld [vmem:[#allocation7 + $0x84] ss:$16 sps:$4 sm:$0xff]  }
 0x9bc   :  { %7413 = vmatprep.subr.bf16.mxu0 %v16703_v4  ;;  %7470 = vmatprep.subr.bf16.mxu1 %v16706_v22  ;;  %v16791_v4 = vld [vmem:[#allocation7 + $0x8c] ss:$16 sps:$4 sm:$0xff]   ;;  %v16786_v22 = vld [vmem:[#allocation7 + $0x80] ss:$16 sps:$4 sm:$0xff]  }
 0x9bf   :  { %7414 = vmatpush1.bf16.msra.mxu0 %v16701_v3  ;;  %7471 = vmatpush1.bf16.msra.mxu1 %v16704_v24  ;;  %v16789_v3 = vld [vmem:[#allocation7 + $0x88] ss:$16 sps:$4 sm:$0xff]   ;;  %v16794_v24 = vld [vmem:[#allocation7 + $0xa4] ss:$16 sps:$4 sm:$0xff]  }
 0x9c0   :  { %7415 = vmatprep.subr.bf16.mxu0 %v16709_v35  ;;  %7472 = vmatprep.subr.bf16.mxu1 %v16712_v20  ;;  %v16797_v35 = vld [vmem:[#allocation7 + $0xac] ss:$16 sps:$4 sm:$0xff]   ;;  %v16792_v20 = vld [vmem:[#allocation7 + $0xa0] ss:$16 sps:$4 sm:$0xff]  }
 0x9c3   :  { %7416 = vmatpush1.bf16.msra.mxu0 %v16707_v25  ;;  %7473 = vmatpush1.bf16.msra.mxu1 %v16710_v26  ;;  %v16795_v25 = vld [vmem:[#allocation7 + $0xa8] ss:$16 sps:$4 sm:$0xff]   ;;  %v16800_v26 = vld [vmem:[#allocation7 + $0xc4] ss:$16 sps:$4 sm:$0xff]  }
 0x9c4   :  { %7417 = vmatprep.subr.bf16.mxu0 %v16715_v9  ;;  %7474 = vmatprep.subr.bf16.mxu1 %v16718_v27  ;;  %v16803_v9 = vld [vmem:[#allocation7 + $0xcc] ss:$16 sps:$4 sm:$0xff]   ;;  %v16798_v27 = vld [vmem:[#allocation7 + $0xc0] ss:$16 sps:$4 sm:$0xff]  }
 0x9c7   :  { %7418 = vmatpush1.bf16.msra.mxu0 %v16713_v28  ;;  %7475 = vmatpush1.bf16.msra.mxu1 %v16716_v30  ;;  %v16801_v28 = vld [vmem:[#allocation7 + $0xc8] ss:$16 sps:$4 sm:$0xff]   ;;  %v16806_v30 = vld [vmem:[#allocation7 + $0xe4] ss:$16 sps:$4 sm:$0xff]  }
 0x9c8   :  { %7419 = vmatprep.subr.bf16.mxu0 %v16721_v31  ;;  %7476 = vmatprep.subr.bf16.mxu1 %v16724_v32  ;;  %v16809_v31 = vld [vmem:[#allocation7 + $0xec] ss:$16 sps:$4 sm:$0xff]   ;;  %v16804_v32 = vld [vmem:[#allocation7 + $0xe0] ss:$16 sps:$4 sm:$0xff]  }
 0x9cb   :  { %7420 = vmatpush1.bf16.msra.mxu0 %v16719_v33  ;;  %7477 = vmatpush1.bf16.msra.mxu1 %v16722_v36  ;;  %v16807_v33 = vld [vmem:[#allocation7 + $0xe8] ss:$16 sps:$4 sm:$0xff]   ;;  %v16812_v36 = vld [vmem:[#allocation7 + $0x104] ss:$16 sps:$4 sm:$0xff]  }
 0x9cc   :  { %7421 = vmatprep.subr.bf16.mxu0 %v16727_v37  ;;  %7478 = vmatprep.subr.bf16.mxu1 %v16730_v38  ;;  %v16815_v37 = vld [vmem:[#allocation7 + $0x10c] ss:$16 sps:$4 sm:$0xff]   ;;  %v16810_v38 = vld [vmem:[#allocation7 + $0x100] ss:$16 sps:$4 sm:$0xff]  }
 0x9cf   :  { %7422 = vmatpush1.bf16.msra.mxu0 %v16725_v39  ;;  %7479 = vmatpush1.bf16.msra.mxu1 %v16728_v40  ;;  %v16813_v39 = vld [vmem:[#allocation7 + $0x108] ss:$16 sps:$4 sm:$0xff]   ;;  %v16818_v40 = vld [vmem:[#allocation7 + $0x124] ss:$16 sps:$4 sm:$0xff]  }
 0x9d0   :  { %7423 = vmatprep.subr.bf16.mxu0 %v16733_v41  ;;  %7480 = vmatprep.subr.bf16.mxu1 %v16736_v43  ;;  %v16821_v41 = vld [vmem:[#allocation7 + $0x12c] ss:$16 sps:$4 sm:$0xff]   ;;  %v16816_v43 = vld [vmem:[#allocation7 + $0x120] ss:$16 sps:$4 sm:$0xff]  }
 0x9d3   :  { %7424 = vmatpush1.bf16.msra.mxu0 %v16731_v45  ;;  %7481 = vmatpush1.bf16.msra.mxu1 %v16734_v5  ;;  %v16819_v45 = vld [vmem:[#allocation7 + $0x128] ss:$16 sps:$4 sm:$0xff]   ;;  %v16824_v5 = vld [vmem:[#allocation7 + $0x144] ss:$16 sps:$4 sm:$0xff]  }
 0x9d4   :  { %7491 = vmatprep.subr.bf16.mxu1 %v16740_v23  ;;  %8330 = vmatprep.subr.bf16.mxu0 %v16764_v6  ;;  %v16827_v23 = vld [vmem:[#allocation7 + $0x14c] ss:$16 sps:$4 sm:$0xff]   ;;  %v16840_v6 = vld [vmem:[#allocation7 + $0x1a0] ss:$16 sps:$4 sm:$0xff]  }
 0x9d6   :  { %7442 = vmatmul.mubr.bf16.vlgmr.msra.gmra.mrb[44].mxu0 %v16737_v52  ;;  %7483 = vmatmul.mubr.bf16.vlgmr.msra.gmra.mrb[40].mxu1 %v18604_v14  ;;  %v16774_v14 = vld [vmem:[#allocation7 + $0x40] ss:$16 sps:$4 sm:$0xff]  }
 0x9d7   :  { %7492 = vmatpush1.bf16.msra.mxu1 %v16738_v53  ;;  %7523 = vmatprep.mubr.bf16.mxu1 %v18186_v0  ;;  %v16825_v53 = vld [vmem:[#allocation7 + $0x148] ss:$16 sps:$4 sm:$0xff]  }
 0x9d8   :  { %7493 = vmatprep.subr.bf16.mxu1 %v16743_v55  ;;  %8331 = vmatpush1.bf16.msra.mxu0 %v16762_v46  ;;  %v16830_v55 = vld [vmem:[#allocation7 + $0x164] ss:$16 sps:$4 sm:$0xff]   ;;  %v16845_v46 = vld [vmem:[#allocation7 + $0x1ac] ss:$16 sps:$4 sm:$0xff]  }
 0x9d9   :  { %8332 = vmatprep.subr.bf16.mxu0 %v16770_v49  ;;  %v16846_v49 = vld [vmem:[#allocation7 + $0x1c0] ss:$16 sps:$4 sm:$0xff]  }
 0x9db   :  { %7494 = vmatpush1.bf16.msra.mxu1 %v16741_v56  ;;  %v16833_v56 = vld [vmem:[#allocation7 + $0x16c] ss:$16 sps:$4 sm:$0xff]  }
 0x9dc   :  { %7495 = vmatprep.subr.bf16.mxu1 %v16746_v57  ;;  %8333 = vmatpush1.bf16.msra.mxu0 %v16768_v10  ;;  %v16828_v57 = vld [vmem:[#allocation7 + $0x160] ss:$16 sps:$4 sm:$0xff]   ;;  %v16851_v10 = vld [vmem:[#allocation7 + $0x1cc] ss:$16 sps:$4 sm:$0xff]  }
 0x9dd   :  { %8334 = vmatprep.subr.bf16.mxu0 %v16776_v12  ;;  %v16857_v12 = vld [vmem:[#allocation7 + $0x1ec] ss:$16 sps:$4 sm:$0xff]  }
 0x9df   :  { %7496 = vmatpush1.bf16.msra.mxu1 %v16744_v58  ;;  %v16831_v58 = vld [vmem:[#allocation7 + $0x168] ss:$16 sps:$4 sm:$0xff]  }
 0x9e0   :  { %7497 = vmatprep.subr.bf16.mxu1 %v16749_v59  ;;  %8335 = vmatpush1.bf16.msra.mxu0 %v16774_v14  ;;  %v16855_v14 = vld [vmem:[#allocation7 + $0x1e8] ss:$16 sps:$4 sm:$0xff]  }
 0x9e1   :  { %8336 = vmatprep.subr.bf16.mxu0 %v16782_v16  ;;  %v16863_v16 = vld [vmem:[#allocation7 + $0x20c] ss:$16 sps:$4 sm:$0xff]  }
 0x9e3   :  { %7498 = vmatpush1.bf16.msra.mxu1 %v16747_v47  ;;  %v16836_v47 = vld [vmem:[#allocation7 + $0x184] ss:$16 sps:$4 sm:$0xff]  }
 0x9e4   :  { %7499 = vmatprep.subr.bf16.mxu1 %v16752_v29  ;;  %8337 = vmatpush1.bf16.msra.mxu0 %v16780_v18  ;;  %v16839_v29 = vld [vmem:[#allocation7 + $0x18c] ss:$16 sps:$4 sm:$0xff]  }
 0x9e5   :  { %8338 = vmatprep.subr.bf16.mxu0 %v16788_v21 }
 0x9e7   :  { %7500 = vmatpush1.bf16.msra.mxu1 %v16750_v60 }
 0x9e8   :  { %7501 = vmatprep.subr.bf16.mxu1 %v16755_v61  ;;  %8339 = vmatpush1.bf16.msra.mxu0 %v16786_v22  ;;  %v16834_v61 = vld [vmem:[#allocation7 + $0x180] ss:$16 sps:$4 sm:$0xff]  }
 0x9e9   :  { %8340 = vmatprep.subr.bf16.mxu0 %v16794_v24 }
 0x9eb   :  { %7502 = vmatpush1.bf16.msra.mxu1 %v16753_v62  ;;  %v16837_v62 = vld [vmem:[#allocation7 + $0x188] ss:$16 sps:$4 sm:$0xff]  }
 0x9ec   :  { %7503 = vmatprep.subr.bf16.mxu1 %v16758_v63  ;;  %8341 = vmatpush1.bf16.msra.mxu0 %v16792_v20 }
 0x9ed   :  { %8342 = vmatprep.subr.bf16.mxu0 %v16800_v26 }
 0x9ef   :  { %7504 = vmatpush1.bf16.msra.mxu1 %v16756_v34 }
 0x9f0   :  { %7505 = vmatprep.subr.bf16.mxu1 %v16761_v1  ;;  %8343 = vmatpush1.bf16.msra.mxu0 %v16798_v27 }
 0x9f1   :  { %8344 = vmatprep.subr.bf16.mxu0 %v16806_v30 }
 0x9f3   :  { %7506 = vmatpush1.bf16.msra.mxu1 %v16759_v2  ;;  %v16842_v2 = vld [vmem:[#allocation7 + $0x1a4] ss:$16 sps:$4 sm:$0xff]  }
 0x9f4   :  { %8412 = vmatprep.subr.bf16.mxu1 %v16767_v54  ;;  %8345 = vmatpush1.bf16.msra.mxu0 %v16804_v32  ;;  %v16848_v54 = vld [vmem:[#allocation7 + $0x1c4] ss:$16 sps:$4 sm:$0xff]  }
 0x9f5   :  { %8346 = vmatprep.subr.bf16.mxu0 %v16812_v36 }
 0x9f6   :  { %7524 = vmatmul.mubr.bf16.vlgmr.msra.gmra.mrb[40].mxu1 %v16737_v52  ;;  %v16822_v52 = vld [vmem:[#allocation7 + $0x140] ss:$16 sps:$4 sm:$0xff]  }
 0x9f7   :  { %8413 = vmatpush1.bf16.msra.mxu1 %v16765_v7  ;;  %v16843_v7 = vld [vmem:[#allocation7 + $0x1a8] ss:$16 sps:$4 sm:$0xff]  }
 0x9f8   :  { %8414 = vmatprep.subr.bf16.mxu1 %v16773_v8  ;;  %8347 = vmatpush1.bf16.msra.mxu0 %v16810_v38  ;;  %v16849_v8 = vld [vmem:[#allocation7 + $0x1c8] ss:$16 sps:$4 sm:$0xff]  }
 0x9f9   :  { %8348 = vmatprep.subr.bf16.mxu0 %v16818_v40 }
 0x9fb   :  { %8415 = vmatpush1.bf16.msra.mxu1 %v16771_v11  ;;  %v16854_v11 = vld [vmem:[#allocation7 + $0x1e4] ss:$16 sps:$4 sm:$0xff]  }
 0x9fc   :  { %8416 = vmatprep.subr.bf16.mxu1 %v16779_v13  ;;  %8349 = vmatpush1.bf16.msra.mxu0 %v16816_v43  ;;  %v16852_v13 = vld [vmem:[#allocation7 + $0x1e0] ss:$16 sps:$4 sm:$0xff]  }
 0x9fd   :  { %8350 = vmatprep.subr.bf16.mxu0 %v16824_v5 }
 0x9ff   :  { %8417 = vmatpush1.bf16.msra.mxu1 %v16777_v15  ;;  %v16860_v15 = vld [vmem:[#allocation7 + $0x204] ss:$16 sps:$4 sm:$0xff]  }
 0xa00   :  { %8418 = vmatprep.subr.bf16.mxu1 %v16785_v17  ;;  %8351 = vmatpush1.bf16.msra.mxu0 %v16822_v52  ;;  %v6060_v17 = vld [vmem:[%s18783_s18] sm:$0x7] }
 0xa01   :  { %8352 = vmatprep.subr.bf16.mxu0 %v16830_v55  ;;  %v6073_v18 = vrot.slane %v6060_v17, %v18489_v44  ;;  %v6069_v26 = vrot.slane %v6060_v17, %v18474_v50  ;;  %v16858_v55 = vld [vmem:[#allocation7 + $0x200] ss:$16 sps:$4 sm:$0xff]  }
 0xa03   :  { %8419 = vmatpush1.bf16.msra.mxu1 %v16783_v19 }
 0xa04   :  { %8420 = vmatprep.subr.bf16.mxu1 %v16791_v4  ;;  %8353 = vmatpush1.bf16.msra.mxu0 %v16828_v57 }
 0xa05   :  { %8354 = vmatprep.subr.bf16.mxu0 %v16836_v47 }
 0xa07   :  { %8421 = vmatpush1.bf16.msra.mxu1 %v16789_v3 }
 0xa08   :  { %8422 = vmatprep.subr.bf16.mxu1 %v16797_v35  ;;  %8355 = vmatpush1.bf16.msra.mxu0 %v16834_v61  ;;  %v16872_v61 = vld [vmem:[#allocation7 + $0x244] ss:$16 sps:$4 sm:$0xff]  }
 0xa09   :  { %8356 = vmatprep.subr.bf16.mxu0 %v16842_v2  ;;  %v16881_v2 = vld [vmem:[#allocation7 + $0x26c] ss:$16 sps:$4 sm:$0xff]  }
 0xa0b   :  { %8423 = vmatpush1.bf16.msra.mxu1 %v16795_v25  ;;  %v6065_v25 = vrot.slane %v6060_v17, %v18466_v48 }
 0xa0c   :  { %8424 = vmatprep.subr.bf16.mxu1 %v16803_v9  ;;  %8357 = vmatpush1.bf16.msra.mxu0 %v16840_v6  ;;  %v16879_v6 = vld [vmem:[#allocation7 + $0x268] ss:$16 sps:$4 sm:$0xff]  }
 0xa0d   :  { %8358 = vmatprep.subr.bf16.mxu0 %v16848_v54  ;;  %v16887_v54 = vld [vmem:[#allocation7 + $0x28c] ss:$16 sps:$4 sm:$0xff]  }
 0xa0f   :  { %8425 = vmatpush1.bf16.msra.mxu1 %v16801_v28 }
 0xa10   :  { %8426 = vmatprep.subr.bf16.mxu1 %v16809_v31  ;;  %8359 = vmatpush1.bf16.msra.mxu0 %v16846_v49 }
 0xa11   :  { %8360 = vmatprep.subr.bf16.mxu0 %v16854_v11  ;;  %v16885_v11 = vld [vmem:[#allocation7 + $0x288] ss:$16 sps:$4 sm:$0xff]  }
 0xa13   :  { %8427 = vmatpush1.bf16.msra.mxu1 %v16807_v33 }
 0xa14   :  { %8428 = vmatprep.subr.bf16.mxu1 %v16815_v37  ;;  %8361 = vmatpush1.bf16.msra.mxu0 %v16852_v13  ;;  %v18619_v37 = vld [vmem:[%s18810_s29] sm:$0xf]  ;;  %v16890_v13 = vld [vmem:[#allocation7 + $0x2a4] ss:$16 sps:$4 sm:$0xff]  }
 0xa15   :  { %8371 = vmatprep.subr.bf16.mxu0 %v16860_v15  ;;  %v6860_v38 = vrot.slane %v18619_v37, %v18466_v48  ;;  %v6872_v49 = vrot.slane %v18619_v37, %v18492_v51 }
 0xa17   :  { %8429 = vmatpush1.bf16.msra.mxu1 %v16813_v39  ;;  %v6864_v39 = vrot.slane %v18619_v37, %v18474_v50 }
 0xa18   :  { %8430 = vmatprep.subr.bf16.mxu1 %v16821_v41 }
 0xa1b   :  { %8431 = vmatpush1.bf16.msra.mxu1 %v16819_v45 }
 0xa1c   :  { %8432 = vmatprep.subr.bf16.mxu1 %v16827_v23 }
 0xa1f   :  { %8433 = vmatpush1.bf16.msra.mxu1 %v16825_v53 }
 0xa20   :  { %8434 = vmatprep.subr.bf16.mxu1 %v16833_v56  ;;  %v16861_v56 = vld [vmem:[#allocation7 + $0x208] ss:$16 sps:$4 sm:$0xff]  }
 0xa23   :  { %8435 = vmatpush1.bf16.msra.mxu1 %v16831_v58  ;;  %v16866_v58 = vld [vmem:[#allocation7 + $0x224] ss:$16 sps:$4 sm:$0xff]  }
 0xa24   :  { %8436 = vmatprep.subr.bf16.mxu1 %v16839_v29  ;;  %v16864_v29 = vld [vmem:[#allocation7 + $0x220] ss:$16 sps:$4 sm:$0xff]  }
 0xa27   :  { %8437 = vmatpush1.bf16.msra.mxu1 %v16837_v62  ;;  %v16875_v62 = vld [vmem:[#allocation7 + $0x24c] ss:$16 sps:$4 sm:$0xff]  }
 0xa28   :  { %8438 = vmatprep.subr.bf16.mxu1 %v16845_v46  ;;  %v16876_v46 = vld [vmem:[#allocation7 + $0x260] ss:$16 sps:$4 sm:$0xff]  }
 0xa29   :  { %v15088_v59 = vpop.f32.mrb[36].mxu0 }
 0xa2a   :  { %v15089_v60 = vpop.f32.mrb[37].mxu0 }
 0xa2b   :  { %v15090_v63 = vadd.f32 %v15089_v60, %v15088_v59  ;;  %v15091_v34 = vpop.f32.mrb[38].mxu0  ;;  %8439 = vmatpush1.bf16.msra.mxu1 %v16843_v7  ;;  %v16869_v59 = vld [vmem:[#allocation7 + $0x22c] ss:$16 sps:$4 sm:$0xff]   ;;  %v16867_v60 = vld [vmem:[#allocation7 + $0x228] ss:$16 sps:$4 sm:$0xff]  }
 0xa2c   :  { %v15092_v1 = vpop.f32.mrb[39].mxu0  ;;  %8440 = vmatprep.subr.bf16.mxu1 %v16851_v10  ;;  %v16873_v34 = vld [vmem:[#allocation7 + $0x248] ss:$16 sps:$4 sm:$0xff]   ;;  %v16884_v7 = vld [vmem:[#allocation7 + $0x284] ss:$16 sps:$4 sm:$0xff]  }
 0xa2d   :  { %v6706_v4 = vadd.f32 %v15090_v63, %v6073_v18  ;;  %v16870_v63 = vld [vmem:[#allocation7 + $0x240] ss:$16 sps:$4 sm:$0xff]   ;;  %v16878_v1 = vld [vmem:[#allocation7 + $0x264] ss:$16 sps:$4 sm:$0xff]  }
 0xa2e   :  { %v16882_v10 = vld [vmem:[#allocation7 + $0x280] ss:$16 sps:$4 sm:$0xff]  }
 0xa2f   :  { %8441 = vmatpush1.bf16.msra.mxu1 %v16849_v8 }
 0xa30   :  { %8442 = vmatprep.subr.bf16.mxu1 %v16857_v12 }
 0xa33   :  { %8443 = vmatpush1.bf16.msra.mxu1 %v16855_v14  ;;  %v16893_v14 = vld [vmem:[#allocation7 + $0x2ac] ss:$16 sps:$4 sm:$0xff]  }
 0xa34   :  { %8453 = vmatprep.subr.bf16.mxu1 %v16863_v16 }
 0xa49   :  { %v15110_v19 = vpop.f32.mrb[40].mxu0 }
 0xa4a   :  { %v15111_v21 = vpop.f32.mrb[41].mxu0 }
 0xa4b   :  { %v15112_v22 = vadd.f32 %v15111_v21, %v15110_v19  ;;  %v15113_v3 = vpop.f32.mrb[42].mxu0  ;;  %v16888_v19 = vld [vmem:[#allocation7 + $0x2a0] ss:$16 sps:$4 sm:$0xff]   ;;  %v16891_v21 = vld [vmem:[#allocation7 + $0x2a8] ss:$16 sps:$4 sm:$0xff]  }
 0xa4c   :  { %v15114_v24 = vpop.f32.mrb[43].mxu0  ;;  %v16894_v3 = vld [vmem:[#allocation7 + $0x2c0] ss:$16 sps:$4 sm:$0xff]  }
 0xa4d   :  { %v6746_v35 = vadd.f32 %v15112_v22, %v6706_v4  ;;  %v16896_v4 = vld [vmem:[#allocation7 + $0x2c4] ss:$16 sps:$4 sm:$0xff]   ;;  %v16899_v22 = vld [vmem:[#allocation7 + $0x2cc] ss:$16 sps:$4 sm:$0xff]   ;;  %v16897_v24 = vld [vmem:[#allocation7 + $0x2c8] ss:$16 sps:$4 sm:$0xff]  }
 0xa4f   :  { %17828 = vtanh.f32 %v6746_v35  ;;  %v16902_v35 = vld [vmem:[#allocation7 + $0x2e4] ss:$16 sps:$4 sm:$0xff]  }
 0xa59   :  { %v17829_v20 = vpop.eup %17828 }
 0xa5a   :  { %6756 = vst [vmem:[#allocation19 + $0x10] sm:$0xff] %v17829_v20  ;;  %v16905_v20 = vld [vmem:[#allocation7 + $0x2ec] ss:$16 sps:$4 sm:$0xff]  }
 0xa69   :  { %v6664_v9 = vpop.f32.mrb[36].mxu1 }
 0xa6a   :  { %v15319_v27 = vadd.f32 %v6664_v9, %v6065_v25  ;;  %v6666_v28 = vpop.f32.mrb[37].mxu1  ;;  %v16900_v25 = vld [vmem:[#allocation7 + $0x2e0] ss:$16 sps:$4 sm:$0xff]   ;;  %v16908_v9 = vld [vmem:[#allocation7 + $0x304] ss:$16 sps:$4 sm:$0xff]  }
 0xa6b   :  { %v15320_v30 = vadd.f32 %v6666_v28, %v6069_v26  ;;  %v6668_v31 = vpop.f32.mrb[38].mxu1  ;;  %v16903_v26 = vld [vmem:[#allocation7 + $0x2e8] ss:$16 sps:$4 sm:$0xff]   ;;  %v16906_v28 = vld [vmem:[#allocation7 + $0x300] ss:$16 sps:$4 sm:$0xff]  }
 0xa6c   :  { %17830 = vtanh.f32 %v15319_v27  ;;  %v6669_v32 = vpop.f32.mrb[39].mxu1  ;;  %v16911_v27 = vld [vmem:[#allocation7 + $0x30c] ss:$16 sps:$4 sm:$0xff]  }
 0xa6d   :  { %17832 = vtanh.f32 %v15320_v30  ;;  %v16909_v30 = vld [vmem:[#allocation7 + $0x308] ss:$16 sps:$4 sm:$0xff]   ;;  %v16914_v32 = vld [vmem:[#allocation7 + $0x324] ss:$16 sps:$4 sm:$0xff]  }
 0xa76   :  { %v17831_v33 = vpop.eup %17830 }
 0xa77   :  { %v17833_v36 = vpop.eup %17832  ;;  %6754 = vst [vmem:[#allocation19] sm:$0xff] %v17831_v33  ;;  %v16917_v33 = vld [vmem:[#allocation7 + $0x32c] ss:$16 sps:$4 sm:$0xff]  }
 0xa78   :  { %6755 = vst [vmem:[#allocation19 + $0x8] sm:$0xff] %v17833_v36  ;;  %v16912_v36 = vld [vmem:[#allocation7 + $0x320] ss:$16 sps:$4 sm:$0xff]  }
 0xaa9   :  { %v7443_v40 = vpop.f32.mrb[44].mxu0 }
 0xaaa   :  { %v15321_v41 = vadd.f32 %v7443_v40, %v6860_v38  ;;  %v7445_v43 = vpop.f32.mrb[45].mxu0  ;;  %v16915_v38 = vld [vmem:[#allocation7 + $0x328] ss:$16 sps:$4 sm:$0xff]   ;;  %v16923_v40 = vld [vmem:[#allocation7 + $0x34c] ss:$16 sps:$4 sm:$0xff]  }
 0xaab   :  { %v15322_v45 = vadd.f32 %v7445_v43, %v6864_v39  ;;  %v7447_v5 = vpop.f32.mrb[46].mxu0  ;;  %v16920_v39 = vld [vmem:[#allocation7 + $0x344] ss:$16 sps:$4 sm:$0xff]   ;;  %v16921_v43 = vld [vmem:[#allocation7 + $0x348] ss:$16 sps:$4 sm:$0xff]  }
 0xaac   :  { %v7532_v23 = vpack.c.bf16 %v15321_v41, %v15321_v41  ;;  %v7448_v52 = vpop.f32.mrb[47].mxu0  ;;  %v16918_v41 = vld [vmem:[#allocation7 + $0x340] ss:$16 sps:$4 sm:$0xff]   ;;  %v16929_v5 = vld [vmem:[#allocation7 + $0x36c] ss:$16 sps:$4 sm:$0xff]  }
 0xaad   :  { %v7533_v53 = vpack.c.bf16 %v15322_v45, %v15322_v45  ;;  %v16926_v45 = vld [vmem:[#allocation7 + $0x364] ss:$16 sps:$4 sm:$0xff]   ;;  %v16924_v52 = vld [vmem:[#allocation7 + $0x360] ss:$16 sps:$4 sm:$0xff]  }
 0xaaf   :  { %17834 = vtanh.bf16 %v7533_v53  ;;  %v16927_v53 = vld [vmem:[#allocation7 + $0x368] ss:$16 sps:$4 sm:$0xff]  }
 0xab0   :  { %17836 = vtanh.bf16 %v7532_v23  ;;  %v6868_v23 = vrot.slane %v18619_v37, %v18489_v44  ;;  %v16936_v37 = vld [vmem:[#allocation7 + $0x3a0] ss:$16 sps:$4 sm:$0xff]  }
 0xaba   :  { %v18625_v57 = vpop.eup %17834 }
 0xabb   :  { %v18627_v47 = vpop.eup %17836  ;;  %8362 = vmatprep.mubr.bf16.mxu0 %v18625_v57  ;;  %8444 = vmatprep.mubr.bf16.mxu1 %v18625_v57 }
 0xabc   :  { %8363 = vmatmul.mubr.bf16.vlgmr.msra.gmra.mrb[48].mxu0 %v18627_v47  ;;  %8445 = vmatmul.mubr.bf16.vlgmr.msra.gmra.mrb[44].mxu1 %v18627_v47 }
 0xabd   :  { %8372 = vmatpush1.bf16.msra.mxu0 %v16858_v55  ;;  %8454 = vmatpush1.bf16.msra.mxu1 %v16861_v56  ;;  %v16932_v55 = vld [vmem:[#allocation7 + $0x384] ss:$16 sps:$4 sm:$0xff]   ;;  %v16935_v56 = vld [vmem:[#allocation7 + $0x38c] ss:$16 sps:$4 sm:$0xff]  }
 0xabe   :  { %8373 = vmatprep.subr.bf16.mxu0 %v16866_v58  ;;  %8455 = vmatprep.subr.bf16.mxu1 %v16869_v59  ;;  %v16930_v59 = vld [vmem:[#allocation7 + $0x380] ss:$16 sps:$4 sm:$0xff]  }
 0xac1   :  { %8374 = vmatpush1.bf16.msra.mxu0 %v16864_v29  ;;  %8456 = vmatpush1.bf16.msra.mxu1 %v16867_v60  ;;  %v16933_v29 = vld [vmem:[#allocation7 + $0x388] ss:$16 sps:$4 sm:$0xff]   ;;  %v16938_v60 = vld [vmem:[#allocation7 + $0x3a4] ss:$16 sps:$4 sm:$0xff]  }
 0xac2   :  { %8375 = vmatprep.subr.bf16.mxu0 %v16872_v61  ;;  %8457 = vmatprep.subr.bf16.mxu1 %v16875_v62  ;;  %v16941_v61 = vld [vmem:[#allocation7 + $0x3ac] ss:$16 sps:$4 sm:$0xff]  }
 0xac5   :  { %8376 = vmatpush1.bf16.msra.mxu0 %v16870_v63  ;;  %8458 = vmatpush1.bf16.msra.mxu1 %v16873_v34  ;;  %v16939_v63 = vld [vmem:[#allocation7 + $0x3a8] ss:$16 sps:$4 sm:$0xff]   ;;  %v16944_v34 = vld [vmem:[#allocation7 + $0x3c4] ss:$16 sps:$4 sm:$0xff]  }
 0xac6   :  { %8377 = vmatprep.subr.bf16.mxu0 %v16878_v1  ;;  %8459 = vmatprep.subr.bf16.mxu1 %v16881_v2  ;;  %v16947_v1 = vld [vmem:[#allocation7 + $0x3cc] ss:$16 sps:$4 sm:$0xff]   ;;  %v16942_v2 = vld [vmem:[#allocation7 + $0x3c0] ss:$16 sps:$4 sm:$0xff]  }
 0xac9   :  { %8378 = vmatpush1.bf16.msra.mxu0 %v16876_v46  ;;  %8460 = vmatpush1.bf16.msra.mxu1 %v16879_v6  ;;  %v18635_v8 = vpop.f32.mrb[40].mxu1  ;;  %v16945_v46 = vld [vmem:[#allocation7 + $0x3c8] ss:$16 sps:$4 sm:$0xff]   ;;  %v16950_v6 = vld [vmem:[#allocation7 + $0x3e4] ss:$16 sps:$4 sm:$0xff]  }
 0xaca   :  { %v7527_v12 = vpop.f32.mrb[41].mxu1  ;;  %8379 = vmatprep.subr.bf16.mxu0 %v16884_v7  ;;  %8461 = vmatprep.subr.bf16.mxu1 %v16887_v54  ;;  %v15323_v58 = vadd.f32 %v18635_v8, %v6868_v23  ;;  %v16953_v7 = vld [vmem:[#allocation7 + $0x3ec] ss:$16 sps:$4 sm:$0xff]   ;;  %v16948_v54 = vld [vmem:[#allocation7 + $0x3e0] ss:$16 sps:$4 sm:$0xff]  }
 0xacb   :  { %v15324_v15 = vadd.f32 %v7527_v12, %v6872_v49  ;;  %v7529_v16 = vpop.f32.mrb[42].mxu1  ;;  %v16951_v49 = vld [vmem:[#allocation7 + $0x3e8] ss:$16 sps:$4 sm:$0xff]   ;;  %v16956_v8 = vld [vmem:[#allocation8 + $0x4] ss:$16 sps:$4 sm:$0xff]  }
 0xacc   :  { %v7530_v17 = vpop.f32.mrb[43].mxu1  ;;  %v7534_v62 = vpack.c.bf16 %v15323_v58, %v15323_v58  ;;  %v16957_v12 = vld [vmem:[#allocation8 + $0x8] ss:$16 sps:$4 sm:$0xff]   ;;  %v16960_v16 = vld [vmem:[#allocation8 + $0x20] ss:$16 sps:$4 sm:$0xff]  }
 0xacd   :  { %v7535_v18 = vpack.c.bf16 %v15324_v15, %v15324_v15  ;;  %8380 = vmatpush1.bf16.msra.mxu0 %v16882_v10  ;;  %8462 = vmatpush1.bf16.msra.mxu1 %v16885_v11  ;;  %v16959_v10 = vld [vmem:[#allocation8 + $0xc] ss:$16 sps:$4 sm:$0xff]   ;;  %v16954_v11 = vld [vmem:[#allocation8] ss:$16 sps:$4 sm:$0xff]   ;;  %v16963_v17 = vld [vmem:[#allocation8 + $0x28] ss:$16 sps:$4 sm:$0xff]  }
 0xace   :  { %8381 = vmatprep.subr.bf16.mxu0 %v16890_v13  ;;  %8463 = vmatprep.subr.bf16.mxu1 %v16893_v14  ;;  %v16962_v13 = vld [vmem:[#allocation8 + $0x24] ss:$16 sps:$4 sm:$0xff]   ;;  %v16965_v14 = vld [vmem:[#allocation8 + $0x2c] ss:$16 sps:$4 sm:$0xff]   ;;  %v17008_v58 = vld [vmem:[#allocation8 + $0x120] ss:$16 sps:$4 sm:$0xff]  }
 0xacf   :  { %17838 = vtanh.bf16 %v7535_v18  ;;  %v16968_v18 = vld [vmem:[#allocation8 + $0x44] ss:$16 sps:$4 sm:$0xff]   ;;  %v17007_v23 = vld [vmem:[#allocation8 + $0x10c] ss:$16 sps:$4 sm:$0xff]  }
 0xad0   :  { %17840 = vtanh.bf16 %v7534_v62  ;;  %v17017_v62 = vld [vmem:[#allocation8 + $0x148] ss:$16 sps:$4 sm:$0xff]  }
 0xad1   :  { %8382 = vmatpush1.bf16.msra.mxu0 %v16888_v19  ;;  %8464 = vmatpush1.bf16.msra.mxu1 %v16891_v21  ;;  %v16971_v19 = vld [vmem:[#allocation8 + $0x4c] ss:$16 sps:$4 sm:$0xff]   ;;  %v16966_v21 = vld [vmem:[#allocation8 + $0x40] ss:$16 sps:$4 sm:$0xff]  }
 0xad2   :  { %8383 = vmatprep.subr.bf16.mxu0 %v16896_v4  ;;  %8465 = vmatprep.subr.bf16.mxu1 %v16899_v22  ;;  %v16969_v4 = vld [vmem:[#allocation8 + $0x48] ss:$16 sps:$4 sm:$0xff]   ;;  %v16974_v22 = vld [vmem:[#allocation8 + $0x64] ss:$16 sps:$4 sm:$0xff]  }
 0xad5   :  { %8384 = vmatpush1.bf16.msra.mxu0 %v16894_v3  ;;  %8466 = vmatpush1.bf16.msra.mxu1 %v16897_v24  ;;  %v16977_v3 = vld [vmem:[#allocation8 + $0x6c] ss:$16 sps:$4 sm:$0xff]   ;;  %v16972_v24 = vld [vmem:[#allocation8 + $0x60] ss:$16 sps:$4 sm:$0xff]  }
 0xad6   :  { %8385 = vmatprep.subr.bf16.mxu0 %v16902_v35  ;;  %8467 = vmatprep.subr.bf16.mxu1 %v16905_v20  ;;  %v16975_v35 = vld [vmem:[#allocation8 + $0x68] ss:$16 sps:$4 sm:$0xff]   ;;  %v16980_v20 = vld [vmem:[#allocation8 + $0x84] ss:$16 sps:$4 sm:$0xff]  }
 0xad9   :  { %8386 = vmatpush1.bf16.msra.mxu0 %v16900_v25  ;;  %8468 = vmatpush1.bf16.msra.mxu1 %v16903_v26  ;;  %v16983_v25 = vld [vmem:[#allocation8 + $0x8c] ss:$16 sps:$4 sm:$0xff]   ;;  %v16978_v26 = vld [vmem:[#allocation8 + $0x80] ss:$16 sps:$4 sm:$0xff]  }
 0xada   :  { %v18637_v31 = vpop.eup %17838  ;;  %8387 = vmatprep.subr.bf16.mxu0 %v16908_v9  ;;  %8469 = vmatprep.subr.bf16.mxu1 %v16911_v27  ;;  %v16981_v9 = vld [vmem:[#allocation8 + $0x88] ss:$16 sps:$4 sm:$0xff]   ;;  %v16986_v27 = vld [vmem:[#allocation8 + $0xa4] ss:$16 sps:$4 sm:$0xff]  }
 0xadb   :  { %8403 = vmatprep.mubr.bf16.mxu0 %v18637_v31  ;;  %8485 = vmatprep.mubr.bf16.mxu1 %v18637_v31  ;;  %v18644_v15 = vpop.eup %17840 }
 0xadd   :  { %8388 = vmatpush1.bf16.msra.mxu0 %v16906_v28  ;;  %8470 = vmatpush1.bf16.msra.mxu1 %v16909_v30  ;;  %v16989_v28 = vld [vmem:[#allocation8 + $0xac] ss:$16 sps:$4 sm:$0xff]   ;;  %v16984_v30 = vld [vmem:[#allocation8 + $0xa0] ss:$16 sps:$4 sm:$0xff]  }
 0xade   :  { %8389 = vmatprep.subr.bf16.mxu0 %v16914_v32  ;;  %8471 = vmatprep.subr.bf16.mxu1 %v16917_v33  ;;  %v16987_v32 = vld [vmem:[#allocation8 + $0xa8] ss:$16 sps:$4 sm:$0xff]   ;;  %v16992_v33 = vld [vmem:[#allocation8 + $0xc4] ss:$16 sps:$4 sm:$0xff]  }
 0xae1   :  { %8390 = vmatpush1.bf16.msra.mxu0 %v16912_v36  ;;  %8472 = vmatpush1.bf16.msra.mxu1 %v16915_v38  ;;  %v16995_v36 = vld [vmem:[#allocation8 + $0xcc] ss:$16 sps:$4 sm:$0xff]   ;;  %v16990_v38 = vld [vmem:[#allocation8 + $0xc0] ss:$16 sps:$4 sm:$0xff]  }
 0xae2   :  { %8391 = vmatprep.subr.bf16.mxu0 %v16920_v39  ;;  %8473 = vmatprep.subr.bf16.mxu1 %v16923_v40  ;;  %v16993_v39 = vld [vmem:[#allocation8 + $0xc8] ss:$16 sps:$4 sm:$0xff]   ;;  %v16998_v40 = vld [vmem:[#allocation8 + $0xe4] ss:$16 sps:$4 sm:$0xff]  }
 0xae5   :  { %8392 = vmatpush1.bf16.msra.mxu0 %v16918_v41  ;;  %8474 = vmatpush1.bf16.msra.mxu1 %v16921_v43  ;;  %v17001_v41 = vld [vmem:[#allocation8 + $0xec] ss:$16 sps:$4 sm:$0xff]   ;;  %v16996_v43 = vld [vmem:[#allocation8 + $0xe0] ss:$16 sps:$4 sm:$0xff]  }
 0xae6   :  { %8393 = vmatprep.subr.bf16.mxu0 %v16926_v45  ;;  %8475 = vmatprep.subr.bf16.mxu1 %v16929_v5  ;;  %v16999_v45 = vld [vmem:[#allocation8 + $0xe8] ss:$16 sps:$4 sm:$0xff]   ;;  %v17004_v5 = vld [vmem:[#allocation8 + $0x104] ss:$16 sps:$4 sm:$0xff]  }
 0xae9   :  { %8394 = vmatpush1.bf16.msra.mxu0 %v16924_v52  ;;  %8476 = vmatpush1.bf16.msra.mxu1 %v16927_v53  ;;  %v17002_v52 = vld [vmem:[#allocation8 + $0x100] ss:$16 sps:$4 sm:$0xff]   ;;  %v17005_v53 = vld [vmem:[#allocation8 + $0x108] ss:$16 sps:$4 sm:$0xff]  }
 0xaea   :  { %8395 = vmatprep.subr.bf16.mxu0 %v16932_v55  ;;  %8477 = vmatprep.subr.bf16.mxu1 %v16935_v56  ;;  %v17010_v55 = vld [vmem:[#allocation8 + $0x124] ss:$16 sps:$4 sm:$0xff]   ;;  %v17013_v56 = vld [vmem:[#allocation8 + $0x12c] ss:$16 sps:$4 sm:$0xff]  }
 0xaed   :  { %8396 = vmatpush1.bf16.msra.mxu0 %v16930_v59  ;;  %8478 = vmatpush1.bf16.msra.mxu1 %v16933_v29  ;;  %v17011_v59 = vld [vmem:[#allocation8 + $0x128] ss:$16 sps:$4 sm:$0xff]   ;;  %v17016_v29 = vld [vmem:[#allocation8 + $0x144] ss:$16 sps:$4 sm:$0xff]  }
 0xaee   :  { %8397 = vmatprep.subr.bf16.mxu0 %v16938_v60  ;;  %8479 = vmatprep.subr.bf16.mxu1 %v16941_v61  ;;  %v17019_v60 = vld [vmem:[#allocation8 + $0x14c] ss:$16 sps:$4 sm:$0xff]   ;;  %v17014_v61 = vld [vmem:[#allocation8 + $0x140] ss:$16 sps:$4 sm:$0xff]  }
 0xaf1   :  { %8398 = vmatpush1.bf16.msra.mxu0 %v16936_v37  ;;  %8480 = vmatpush1.bf16.msra.mxu1 %v16939_v63  ;;  %v17022_v37 = vld [vmem:[#allocation8 + $0x164] ss:$16 sps:$4 sm:$0xff]   ;;  %v17025_v63 = vld [vmem:[#allocation8 + $0x16c] ss:$16 sps:$4 sm:$0xff]  }
 0xaf2   :  { %8399 = vmatprep.subr.bf16.mxu0 %v16944_v34  ;;  %8481 = vmatprep.subr.bf16.mxu1 %v16947_v1  ;;  %v17020_v34 = vld [vmem:[#allocation8 + $0x160] ss:$16 sps:$4 sm:$0xff]   ;;  %v17023_v1 = vld [vmem:[#allocation8 + $0x168] ss:$16 sps:$4 sm:$0xff]  }
 0xaf5   :  { %8400 = vmatpush1.bf16.msra.mxu0 %v16942_v2  ;;  %8482 = vmatpush1.bf16.msra.mxu1 %v16945_v46  ;;  %v17028_v2 = vld [vmem:[#allocation8 + $0x184] ss:$16 sps:$4 sm:$0xff]   ;;  %v17031_v46 = vld [vmem:[#allocation8 + $0x18c] ss:$16 sps:$4 sm:$0xff]  }
 0xaf6   :  { %8401 = vmatprep.subr.bf16.mxu0 %v16950_v6  ;;  %8483 = vmatprep.subr.bf16.mxu1 %v16953_v7  ;;  %v17026_v6 = vld [vmem:[#allocation8 + $0x180] ss:$16 sps:$4 sm:$0xff]   ;;  %v17029_v7 = vld [vmem:[#allocation8 + $0x188] ss:$16 sps:$4 sm:$0xff]  }
 0xaf9   :  { %8402 = vmatpush1.bf16.msra.mxu0 %v16948_v54  ;;  %8484 = vmatpush1.bf16.msra.mxu1 %v16951_v49  ;;  %v17034_v54 = vld [vmem:[#allocation8 + $0x1a4] ss:$16 sps:$4 sm:$0xff]   ;;  %v17037_v49 = vld [vmem:[#allocation8 + $0x1ac] ss:$16 sps:$4 sm:$0xff]  }
 0xafa   :  { %9292 = vmatprep.subr.bf16.mxu0 %v16956_v8  ;;  %9374 = vmatprep.subr.bf16.mxu1 %v16959_v10  ;;  %v17032_v8 = vld [vmem:[#allocation8 + $0x1a0] ss:$16 sps:$4 sm:$0xff]   ;;  %v17035_v10 = vld [vmem:[#allocation8 + $0x1a8] ss:$16 sps:$4 sm:$0xff]  }
 0xafc   :  { %8404 = vmatmul.mubr.bf16.vlgmr.msra.gmra.mrb[48].mxu0 %v18644_v15  ;;  %8486 = vmatmul.mubr.bf16.vlgmr.msra.gmra.mrb[44].mxu1 %v18644_v15 }
 0xafd   :  { %9293 = vmatpush1.bf16.msra.mxu0 %v16954_v11  ;;  %9375 = vmatpush1.bf16.msra.mxu1 %v16957_v12  ;;  %v17040_v11 = vld [vmem:[#allocation8 + $0x1c4] ss:$16 sps:$4 sm:$0xff]   ;;  %v17038_v12 = vld [vmem:[#allocation8 + $0x1c0] ss:$16 sps:$4 sm:$0xff]  }
 0xafe   :  { %9294 = vmatprep.subr.bf16.mxu0 %v16962_v13  ;;  %9376 = vmatprep.subr.bf16.mxu1 %v16965_v14  ;;  %v17041_v13 = vld [vmem:[#allocation8 + $0x1c8] ss:$16 sps:$4 sm:$0xff]   ;;  %v17043_v14 = vld [vmem:[#allocation8 + $0x1cc] ss:$16 sps:$4 sm:$0xff]  }
 0xb01   :  { %9295 = vmatpush1.bf16.msra.mxu0 %v16960_v16  ;;  %9377 = vmatpush1.bf16.msra.mxu1 %v16963_v17  ;;  %v17046_v16 = vld [vmem:[#allocation8 + $0x1e4] ss:$16 sps:$4 sm:$0xff]   ;;  %v17049_v17 = vld [vmem:[#allocation8 + $0x1ec] ss:$16 sps:$4 sm:$0xff]  }
 0xb02   :  { %9296 = vmatprep.subr.bf16.mxu0 %v16968_v18  ;;  %9378 = vmatprep.subr.bf16.mxu1 %v16971_v19  ;;  %v17044_v18 = vld [vmem:[#allocation8 + $0x1e0] ss:$16 sps:$4 sm:$0xff]   ;;  %v17047_v19 = vld [vmem:[#allocation8 + $0x1e8] ss:$16 sps:$4 sm:$0xff]  }
 0xb05   :  { %9297 = vmatpush1.bf16.msra.mxu0 %v16966_v21  ;;  %9379 = vmatpush1.bf16.msra.mxu1 %v16969_v4  ;;  %v17052_v21 = vld [vmem:[#allocation8 + $0x204] ss:$16 sps:$4 sm:$0xff]   ;;  %v17055_v4 = vld [vmem:[#allocation8 + $0x20c] ss:$16 sps:$4 sm:$0xff]  }
 0xb06   :  { %9298 = vmatprep.subr.bf16.mxu0 %v16974_v22  ;;  %9380 = vmatprep.subr.bf16.mxu1 %v16977_v3  ;;  %v18651_v22 = vld [vmem:[%s18811_s23] sm:$0xf] }
 0xb07   :  { %v7673_v3 = vrot.slane %v18651_v22, %v18466_v48 }
 0xb09   :  { %9299 = vmatpush1.bf16.msra.mxu0 %v16972_v24  ;;  %9381 = vmatpush1.bf16.msra.mxu1 %v16975_v35  ;;  %v7677_v24 = vrot.slane %v18651_v22, %v18474_v50  ;;  %v7685_v35 = vrot.slane %v18651_v22, %v18492_v51 }
 0xb0a   :  { %9300 = vmatprep.subr.bf16.mxu0 %v16980_v20  ;;  %9382 = vmatprep.subr.bf16.mxu1 %v16983_v25 }
 0xb0d   :  { %9301 = vmatpush1.bf16.msra.mxu0 %v16978_v26  ;;  %9383 = vmatpush1.bf16.msra.mxu1 %v16981_v9 }
 0xb0e   :  { %9302 = vmatprep.subr.bf16.mxu0 %v16986_v27  ;;  %9384 = vmatprep.subr.bf16.mxu1 %v16989_v28 }
 0xb11   :  { %9303 = vmatpush1.bf16.msra.mxu0 %v16984_v30  ;;  %9385 = vmatpush1.bf16.msra.mxu1 %v16987_v32 }
 0xb12   :  { %9304 = vmatprep.subr.bf16.mxu0 %v16992_v33  ;;  %9386 = vmatprep.subr.bf16.mxu1 %v16995_v36 }
 0xb15   :  { %9305 = vmatpush1.bf16.msra.mxu0 %v16990_v38  ;;  %9387 = vmatpush1.bf16.msra.mxu1 %v16993_v39 }
 0xb16   :  { %9306 = vmatprep.subr.bf16.mxu0 %v16998_v40  ;;  %9388 = vmatprep.subr.bf16.mxu1 %v17001_v41 }
 0xb19   :  { %9307 = vmatpush1.bf16.msra.mxu0 %v16996_v43  ;;  %9389 = vmatpush1.bf16.msra.mxu1 %v16999_v45  ;;  %v17050_v43 = vld [vmem:[#allocation8 + $0x200] ss:$16 sps:$4 sm:$0xff]   ;;  %v17053_v45 = vld [vmem:[#allocation8 + $0x208] ss:$16 sps:$4 sm:$0xff]  }
 0xb1a   :  { %9308 = vmatprep.subr.bf16.mxu0 %v17004_v5  ;;  %9390 = vmatprep.subr.bf16.mxu1 %v17007_v23 }
 0xb1d   :  { %9309 = vmatpush1.bf16.msra.mxu0 %v17002_v52  ;;  %9391 = vmatpush1.bf16.msra.mxu1 %v17005_v53  ;;  %v17058_v52 = vld [vmem:[#allocation8 + $0x224] ss:$16 sps:$4 sm:$0xff]   ;;  %v17061_v53 = vld [vmem:[#allocation8 + $0x22c] ss:$16 sps:$4 sm:$0xff]  }
 0xb1e   :  { %9310 = vmatprep.subr.bf16.mxu0 %v17010_v55  ;;  %9392 = vmatprep.subr.bf16.mxu1 %v17013_v56  ;;  %v17056_v56 = vld [vmem:[#allocation8 + $0x220] ss:$16 sps:$4 sm:$0xff]  }
 0xb21   :  { %9311 = vmatpush1.bf16.msra.mxu0 %v17008_v58  ;;  %9393 = vmatpush1.bf16.msra.mxu1 %v17011_v59  ;;  %v17059_v58 = vld [vmem:[#allocation8 + $0x228] ss:$16 sps:$4 sm:$0xff]   ;;  %v17064_v59 = vld [vmem:[#allocation8 + $0x244] ss:$16 sps:$4 sm:$0xff]  }
 0xb22   :  { %9312 = vmatprep.subr.bf16.mxu0 %v17016_v29  ;;  %9394 = vmatprep.subr.bf16.mxu1 %v17019_v60  ;;  %v17067_v29 = vld [vmem:[#allocation8 + $0x24c] ss:$16 sps:$4 sm:$0xff]   ;;  %v17062_v60 = vld [vmem:[#allocation8 + $0x240] ss:$16 sps:$4 sm:$0xff]  }
 0xb25   :  { %9313 = vmatpush1.bf16.msra.mxu0 %v17014_v61  ;;  %9395 = vmatpush1.bf16.msra.mxu1 %v17017_v62  ;;  %v17065_v61 = vld [vmem:[#allocation8 + $0x248] ss:$16 sps:$4 sm:$0xff]   ;;  %v17070_v62 = vld [vmem:[#allocation8 + $0x264] ss:$16 sps:$4 sm:$0xff]  }
 0xb26   :  { %9314 = vmatprep.subr.bf16.mxu0 %v17022_v37  ;;  %9396 = vmatprep.subr.bf16.mxu1 %v17025_v63  ;;  %v17073_v37 = vld [vmem:[#allocation8 + $0x26c] ss:$16 sps:$4 sm:$0xff]   ;;  %v17068_v63 = vld [vmem:[#allocation8 + $0x260] ss:$16 sps:$4 sm:$0xff]  }
 0xb29   :  { %9315 = vmatpush1.bf16.msra.mxu0 %v17020_v34  ;;  %9397 = vmatpush1.bf16.msra.mxu1 %v17023_v1  ;;  %v17071_v34 = vld [vmem:[#allocation8 + $0x268] ss:$16 sps:$4 sm:$0xff]   ;;  %v17076_v1 = vld [vmem:[#allocation8 + $0x284] ss:$16 sps:$4 sm:$0xff]  }
 0xb2a   :  { %9316 = vmatprep.subr.bf16.mxu0 %v17028_v2  ;;  %9398 = vmatprep.subr.bf16.mxu1 %v17031_v46  ;;  %v17079_v2 = vld [vmem:[#allocation8 + $0x28c] ss:$16 sps:$4 sm:$0xff]   ;;  %v17074_v46 = vld [vmem:[#allocation8 + $0x280] ss:$16 sps:$4 sm:$0xff]  }
 0xb2d   :  { %9317 = vmatpush1.bf16.msra.mxu0 %v17026_v6  ;;  %9399 = vmatpush1.bf16.msra.mxu1 %v17029_v7  ;;  %v17077_v6 = vld [vmem:[#allocation8 + $0x288] ss:$16 sps:$4 sm:$0xff]   ;;  %v17082_v7 = vld [vmem:[#allocation8 + $0x2a4] ss:$16 sps:$4 sm:$0xff]  }
 0xb2e   :  { %9318 = vmatprep.subr.bf16.mxu0 %v17034_v54  ;;  %9400 = vmatprep.subr.bf16.mxu1 %v17037_v49  ;;  %v17085_v54 = vld [vmem:[#allocation8 + $0x2ac] ss:$16 sps:$4 sm:$0xff]   ;;  %v17080_v49 = vld [vmem:[#allocation8 + $0x2a0] ss:$16 sps:$4 sm:$0xff]  }
 0xb31   :  { %9319 = vmatpush1.bf16.msra.mxu0 %v17032_v8  ;;  %9401 = vmatpush1.bf16.msra.mxu1 %v17035_v10  ;;  %v17083_v8 = vld [vmem:[#allocation8 + $0x2a8] ss:$16 sps:$4 sm:$0xff]   ;;  %v17088_v10 = vld [vmem:[#allocation8 + $0x2c4] ss:$16 sps:$4 sm:$0xff]  }
 0xb32   :  { %9320 = vmatprep.subr.bf16.mxu0 %v17040_v11  ;;  %9402 = vmatprep.subr.bf16.mxu1 %v17043_v14  ;;  %v17091_v11 = vld [vmem:[#allocation8 + $0x2cc] ss:$16 sps:$4 sm:$0xff]   ;;  %v17094_v14 = vld [vmem:[#allocation8 + $0x2e4] ss:$16 sps:$4 sm:$0xff]  }
 0xb35   :  { %9321 = vmatpush1.bf16.msra.mxu0 %v17038_v12  ;;  %9403 = vmatpush1.bf16.msra.mxu1 %v17041_v13  ;;  %v17086_v12 = vld [vmem:[#allocation8 + $0x2c0] ss:$16 sps:$4 sm:$0xff]   ;;  %v17089_v13 = vld [vmem:[#allocation8 + $0x2c8] ss:$16 sps:$4 sm:$0xff]  }
 0xb36   :  { %9322 = vmatprep.subr.bf16.mxu0 %v17046_v16  ;;  %9404 = vmatprep.subr.bf16.mxu1 %v17049_v17  ;;  %v17097_v16 = vld [vmem:[#allocation8 + $0x2ec] ss:$16 sps:$4 sm:$0xff]   ;;  %v17092_v17 = vld [vmem:[#allocation8 + $0x2e0] ss:$16 sps:$4 sm:$0xff]  }
 0xb39   :  { %9323 = vmatpush1.bf16.msra.mxu0 %v17044_v18  ;;  %9405 = vmatpush1.bf16.msra.mxu1 %v17047_v19  ;;  %v17095_v18 = vld [vmem:[#allocation8 + $0x2e8] ss:$16 sps:$4 sm:$0xff]   ;;  %v17100_v19 = vld [vmem:[#allocation8 + $0x304] ss:$16 sps:$4 sm:$0xff]  }
 0xb3a   :  { %9333 = vmatprep.subr.bf16.mxu0 %v17052_v21  ;;  %9415 = vmatprep.subr.bf16.mxu1 %v17055_v4  ;;  %v17103_v21 = vld [vmem:[#allocation8 + $0x30c] ss:$16 sps:$4 sm:$0xff]   ;;  %v17098_v4 = vld [vmem:[#allocation8 + $0x300] ss:$16 sps:$4 sm:$0xff]  }
 0xbcf   :  { %v8405_v20 = vpop.f32.mrb[48].mxu0  ;;  %v18659_v25 = vpop.f32.mrb[44].mxu1 }
 0xbd0   :  { %v15325_v26 = vadd.f32 %v8405_v20, %v7673_v3  ;;  %v8407_v9 = vpop.f32.mrb[49].mxu0  ;;  %v8489_v27 = vpop.f32.mrb[45].mxu1  ;;  %v17101_v3 = vld [vmem:[#allocation8 + $0x308] ss:$16 sps:$4 sm:$0xff]   ;;  %v17104_v20 = vld [vmem:[#allocation8 + $0x320] ss:$16 sps:$4 sm:$0xff]  }
 0xbd1   :  { %v15326_v28 = vadd.f32 %v8407_v9, %v7677_v24  ;;  %v15328_v30 = vadd.f32 %v8489_v27, %v7685_v35  ;;  %v8409_v32 = vpop.f32.mrb[50].mxu0  ;;  %v8491_v33 = vpop.f32.mrb[46].mxu1  ;;  %v17106_v24 = vld [vmem:[#allocation8 + $0x324] ss:$16 sps:$4 sm:$0xff]   ;;  %v17109_v35 = vld [vmem:[#allocation8 + $0x32c] ss:$16 sps:$4 sm:$0xff]  }
 0xbd2   :  { %v8410_v36 = vpop.f32.mrb[51].mxu0  ;;  %v8492_v38 = vpop.f32.mrb[47].mxu1  ;;  %v8494_v39 = vpack.c.bf16 %v15325_v26, %v15325_v26  ;;  %v17107_v26 = vld [vmem:[#allocation8 + $0x328] ss:$16 sps:$4 sm:$0xff]   ;;  %v17112_v9 = vld [vmem:[#allocation8 + $0x344] ss:$16 sps:$4 sm:$0xff]  }
 0xbd3   :  { %v8495_v40 = vpack.c.bf16 %v15326_v28, %v15326_v28  ;;  %v8497_v41 = vpack.c.bf16 %v15328_v30, %v15328_v30  ;;  %v17115_v27 = vld [vmem:[#allocation8 + $0x34c] ss:$16 sps:$4 sm:$0xff]   ;;  %v17110_v28 = vld [vmem:[#allocation8 + $0x340] ss:$16 sps:$4 sm:$0xff]   ;;  %v17113_v30 = vld [vmem:[#allocation8 + $0x348] ss:$16 sps:$4 sm:$0xff]   ;;  %v7681_v36 = vrot.slane %v18651_v22, %v18489_v44 }
 0xbd4   :  { %v17118_v32 = vld [vmem:[#allocation8 + $0x364] ss:$16 sps:$4 sm:$0xff]   ;;  %v17121_v33 = vld [vmem:[#allocation8 + $0x36c] ss:$16 sps:$4 sm:$0xff]   ;;  %v17116_v38 = vld [vmem:[#allocation8 + $0x360] ss:$16 sps:$4 sm:$0xff]  }
 0xbd5   :  { %17842 = vtanh.bf16 %v8495_v40  ;;  %v17124_v40 = vld [vmem:[#allocation8 + $0x384] ss:$16 sps:$4 sm:$0xff]   ;;  %v17128_v22 = vld [vmem:[#allocation8 + $0x3a0] ss:$16 sps:$4 sm:$0xff]  }
 0xbd6   :  { %17844 = vtanh.bf16 %v8494_v39  ;;  %v17119_v39 = vld [vmem:[#allocation8 + $0x368] ss:$16 sps:$4 sm:$0xff]  }
 0xbd7   :  { %17846 = vtanh.bf16 %v8497_v41  ;;  %v17127_v41 = vld [vmem:[#allocation8 + $0x38c] ss:$16 sps:$4 sm:$0xff]  }
 0xbe0   :  { %v17843_v5 = vpop.eup %17842 }
 0xbe1   :  { %v17845_v23 = vpop.eup %17844  ;;  %9324 = vmatprep.mubr.bf16.mxu0 %v17843_v5  ;;  %9406 = vmatprep.mubr.bf16.mxu1 %v17843_v5  ;;  %v17125_v5 = vld [vmem:[#allocation8 + $0x388] ss:$16 sps:$4 sm:$0xff]  }
 0xbe2   :  { %9325 = vmatmul.mubr.bf16.vlgmr.msra.gmra.mrb[52].mxu0 %v17845_v23  ;;  %9407 = vmatmul.mubr.bf16.vlgmr.msra.gmra.mrb[48].mxu1 %v17845_v23  ;;  %v17847_v55 = vpop.eup %17846  ;;  %v17130_v23 = vld [vmem:[#allocation8 + $0x3a4] ss:$16 sps:$4 sm:$0xff]  }
 0xbe3   :  { %9334 = vmatpush1.bf16.msra.mxu0 %v17050_v43  ;;  %9416 = vmatpush1.bf16.msra.mxu1 %v17053_v45  ;;  %v15327_v43 = vadd.f32 %v18659_v25, %v7681_v36  ;;  %v17122_v45 = vld [vmem:[#allocation8 + $0x380] ss:$16 sps:$4 sm:$0xff]  }
 0xbe4   :  { %9365 = vmatprep.mubr.bf16.mxu0 %v17847_v55  ;;  %9447 = vmatprep.mubr.bf16.mxu1 %v17847_v55  ;;  %v17131_v55 = vld [vmem:[#allocation8 + $0x3a8] ss:$16 sps:$4 sm:$0xff]   ;;  %v17134_v25 = vld [vmem:[#allocation8 + $0x3c0] ss:$16 sps:$4 sm:$0xff]  }
 0xbe5   :  { %9335 = vmatprep.subr.bf16.mxu0 %v17058_v52  ;;  %9417 = vmatprep.subr.bf16.mxu1 %v17061_v53  ;;  %v17133_v52 = vld [vmem:[#allocation8 + $0x3ac] ss:$16 sps:$4 sm:$0xff]   ;;  %v8496_v53 = vpack.c.bf16 %v15327_v43, %v15327_v43 }
 0xbe7   :  { %9336 = vmatpush1.bf16.msra.mxu0 %v17056_v56  ;;  %9418 = vmatpush1.bf16.msra.mxu1 %v17059_v58  ;;  %v17136_v56 = vld [vmem:[#allocation8 + $0x3c4] ss:$16 sps:$4 sm:$0xff]   ;;  %v17139_v58 = vld [vmem:[#allocation8 + $0x3cc] ss:$16 sps:$4 sm:$0xff]   ;;  %17848 = vtanh.bf16 %v8496_v53 }
 0xbe8   :  { %9337 = vmatprep.subr.bf16.mxu0 %v17064_v59  ;;  %9419 = vmatprep.subr.bf16.mxu1 %v17067_v29  ;;  %v17137_v59 = vld [vmem:[#allocation8 + $0x3c8] ss:$16 sps:$4 sm:$0xff]   ;;  %v17142_v29 = vld [vmem:[#allocation8 + $0x3e4] ss:$16 sps:$4 sm:$0xff]  }
 0xbeb   :  { %9338 = vmatpush1.bf16.msra.mxu0 %v17062_v60  ;;  %9420 = vmatpush1.bf16.msra.mxu1 %v17065_v61  ;;  %v17145_v60 = vld [vmem:[#allocation8 + $0x3ec] ss:$16 sps:$4 sm:$0xff]   ;;  %v17140_v61 = vld [vmem:[#allocation8 + $0x3e0] ss:$16 sps:$4 sm:$0xff]  }
 0xbec   :  { %9339 = vmatprep.subr.bf16.mxu0 %v17070_v62  ;;  %9421 = vmatprep.subr.bf16.mxu1 %v17073_v37  ;;  %v17143_v62 = vld [vmem:[#allocation8 + $0x3e8] ss:$16 sps:$4 sm:$0xff]   ;;  %v17146_v37 = vld [vmem:[#allocation10 + $0x140] sm:$0xff]  }
 0xbef   :  { %9340 = vmatpush1.bf16.msra.mxu0 %v17068_v63  ;;  %9422 = vmatpush1.bf16.msra.mxu1 %v17071_v34  ;;  %v17162_v63 = vld [vmem:[#allocation10 + $0x40] sm:$0xff]  }
 0xbf0   :  { %9341 = vmatprep.subr.bf16.mxu0 %v17076_v1  ;;  %9423 = vmatprep.subr.bf16.mxu1 %v17079_v2  ;;  %v17147_v34 = vld [vmem:[#allocation10 + $0x100] sm:$0xff]   ;;  %v17148_v1 = vld [vmem:[#allocation10 + $0x148] sm:$0xff]  }
 0xbf1   :  { %v17163_v2 = vld [vmem:[#allocation10] sm:$0xff]  }
 0xbf3   :  { %9342 = vmatpush1.bf16.msra.mxu0 %v17074_v46  ;;  %9424 = vmatpush1.bf16.msra.mxu1 %v17077_v6  ;;  %v17849_v46 = vpop.eup %17848  ;;  %v17164_v6 = vld [vmem:[#allocation10 + $0x48] sm:$0xff]  }
 0xbf4   :  { %9343 = vmatprep.subr.bf16.mxu0 %v17082_v7  ;;  %9425 = vmatprep.subr.bf16.mxu1 %v17085_v54  ;;  %v17149_v7 = vld [vmem:[#allocation10 + $0x108] sm:$0xff]   ;;  %v17150_v54 = vld [vmem:[#allocation10 + $0x150] sm:$0xff]  }
 0xbf7   :  { %9344 = vmatpush1.bf16.msra.mxu0 %v17080_v49  ;;  %9426 = vmatpush1.bf16.msra.mxu1 %v17083_v8  ;;  %v17165_v49 = vld [vmem:[#allocation10 + $0x8] sm:$0xff]   ;;  %v17166_v8 = vld [vmem:[#allocation10 + $0x50] sm:$0xff]  }
 0xbf8   :  { %9345 = vmatprep.subr.bf16.mxu0 %v17088_v10  ;;  %9427 = vmatprep.subr.bf16.mxu1 %v17091_v11  ;;  %v17151_v10 = vld [vmem:[#allocation10 + $0x110] sm:$0xff]   ;;  %v17152_v11 = vld [vmem:[#allocation10 + $0x158] sm:$0xff]  }
 0xbfb   :  { %9346 = vmatpush1.bf16.msra.mxu0 %v17086_v12  ;;  %9428 = vmatpush1.bf16.msra.mxu1 %v17089_v13  ;;  %v17167_v12 = vld [vmem:[#allocation10 + $0x10] sm:$0xff]   ;;  %v17168_v13 = vld [vmem:[#allocation10 + $0x58] sm:$0xff]  }
 0xbfc   :  { %9347 = vmatprep.subr.bf16.mxu0 %v17094_v14  ;;  %9429 = vmatprep.subr.bf16.mxu1 %v17097_v16  ;;  %v17153_v14 = vld [vmem:[#allocation10 + $0x118] sm:$0xff]   ;;  %v17154_v16 = vld [vmem:[#allocation10 + $0x160] sm:$0xff]  }
 0xbff   :  { %9348 = vmatpush1.bf16.msra.mxu0 %v17092_v17  ;;  %9430 = vmatpush1.bf16.msra.mxu1 %v17095_v18  ;;  %v17155_v17 = vld [vmem:[#allocation10 + $0x120] sm:$0xff]   ;;  %v17156_v18 = vld [vmem:[#allocation10 + $0x168] sm:$0xff]  }
 0xc00   :  { %9349 = vmatprep.subr.bf16.mxu0 %v17100_v19  ;;  %9431 = vmatprep.subr.bf16.mxu1 %v17103_v21  ;;  %v17157_v19 = vld [vmem:[#allocation10 + $0x128] sm:$0xff]   ;;  %v17158_v21 = vld [vmem:[#allocation10 + $0x170] sm:$0xff]  }
 0xc03   :  { %9350 = vmatpush1.bf16.msra.mxu0 %v17098_v4  ;;  %9432 = vmatpush1.bf16.msra.mxu1 %v17101_v3  ;;  %v17159_v4 = vld [vmem:[#allocation10 + $0x130] sm:$0xff]   ;;  %v17160_v3 = vld [vmem:[#allocation10 + $0x178] sm:$0xff]  }
 0xc04   :  { %9351 = vmatprep.subr.bf16.mxu0 %v17106_v24  ;;  %9433 = vmatprep.subr.bf16.mxu1 %v17109_v35  ;;  %v17161_v24 = vld [vmem:[#allocation10 + $0x138] sm:$0xff]   ;;  %v17170_v35 = vld [vmem:[#allocation10 + $0x60] sm:$0xff]  }
 0xc07   :  { %9352 = vmatpush1.bf16.msra.mxu0 %v17104_v20  ;;  %9434 = vmatpush1.bf16.msra.mxu1 %v17107_v26  ;;  %v17171_v20 = vld [vmem:[#allocation10 + $0x20] sm:$0xff]   ;;  %v17172_v26 = vld [vmem:[#allocation10 + $0x68] sm:$0xff]  }
 0xc08   :  { %9353 = vmatprep.subr.bf16.mxu0 %v17112_v9  ;;  %9435 = vmatprep.subr.bf16.mxu1 %v17115_v27  ;;  %v17173_v9 = vld [vmem:[#allocation10 + $0x28] sm:$0xff]   ;;  %v17174_v27 = vld [vmem:[#allocation10 + $0x70] sm:$0xff]  }
 0xc0b   :  { %9354 = vmatpush1.bf16.msra.mxu0 %v17110_v28  ;;  %9436 = vmatpush1.bf16.msra.mxu1 %v17113_v30  ;;  %v17175_v28 = vld [vmem:[#allocation10 + $0x30] sm:$0xff]   ;;  %v17176_v30 = vld [vmem:[#allocation10 + $0x78] sm:$0xff]  }
 0xc0c   :  { %9355 = vmatprep.subr.bf16.mxu0 %v17118_v32  ;;  %9437 = vmatprep.subr.bf16.mxu1 %v17121_v33  ;;  %v17177_v32 = vld [vmem:[#allocation10 + $0x38] sm:$0xff]   ;;  %v8630_v33 = vld [vmem:[%s18771_s6] sm:$0xf] }
 0xc0d   :  { %v8635_v36 = vrot.slane %v8630_v33, %v18466_v48 }
 0xc0f   :  { %9356 = vmatpush1.bf16.msra.mxu0 %v17116_v38  ;;  %9438 = vmatpush1.bf16.msra.mxu1 %v17119_v39  ;;  %v8639_v38 = vrot.slane %v8630_v33, %v18474_v50  ;;  %v8647_v39 = vrot.slane %v8630_v33, %v18492_v51 }
 0xc10   :  { %9357 = vmatprep.subr.bf16.mxu0 %v17124_v40  ;;  %9439 = vmatprep.subr.bf16.mxu1 %v17127_v41 }
 0xc13   :  { %9358 = vmatpush1.bf16.msra.mxu0 %v17122_v45  ;;  %9440 = vmatpush1.bf16.msra.mxu1 %v17125_v5 }
 0xc14   :  { %9359 = vmatprep.subr.bf16.mxu0 %v17130_v23  ;;  %9441 = vmatprep.subr.bf16.mxu1 %v17133_v52 }
 0xc17   :  { %9360 = vmatpush1.bf16.msra.mxu0 %v17128_v22  ;;  %9442 = vmatpush1.bf16.msra.mxu1 %v17131_v55 }
 0xc18   :  { %9361 = vmatprep.subr.bf16.mxu0 %v17136_v56  ;;  %9443 = vmatprep.subr.bf16.mxu1 %v17139_v58 }
 0xc1b   :  { %9362 = vmatpush1.bf16.msra.mxu0 %v17134_v25  ;;  %9444 = vmatpush1.bf16.msra.mxu1 %v17137_v59 }
 0xc1c   :  { %9363 = vmatprep.subr.bf16.mxu0 %v17142_v29  ;;  %9445 = vmatprep.subr.bf16.mxu1 %v17145_v60  ;;  %v17179_v29 = vld [vmem:[#allocation10 + $0x80] sm:$0xff]  }
 0xc1f   :  { %9364 = vmatpush1.bf16.msra.mxu0 %v17140_v61  ;;  %9446 = vmatpush1.bf16.msra.mxu1 %v17143_v62  ;;  %v17180_v61 = vld [vmem:[#allocation10 + $0xc8] sm:$0xff]  }
 0xc20   :  { %15160 = vmatprep.subr.bf16.mxu1 %v17146_v37  ;;  %15116 = vmatprep.subr.bf16.mxu0 %v17162_v63  ;;  %v17181_v63 = vld [vmem:[#allocation10 + $0x88] sm:$0xff]  }
 0xc22   :  { %9366 = vmatmul.mubr.bf16.vlgmr.msra.gmra.mrb[52].mxu0 %v17849_v46  ;;  %9448 = vmatmul.mubr.bf16.vlgmr.msra.gmra.mrb[48].mxu1 %v17849_v46  ;;  %v8643_v46 = vrot.slane %v8630_v33, %v18489_v44  ;;  %v17205_v33 = vld [vmem:[#allocation10 + $0x1a8] sm:$0xff]  }
 0xc23   :  { %15161 = vmatpush3.bf16.msra.mxu1 %v17147_v34  ;;  %10095 = vmatprep.mubr.bf16.mxu1 %v18625_v57  ;;  %v17169_v57 = vld [vmem:[#allocation10 + $0x18] sm:$0xff]   ;;  %v17182_v34 = vld [vmem:[#allocation10 + $0xd0] sm:$0xff]  }
 0xc24   :  { %15162 = vmatprep.subr.bf16.mxu1 %v17148_v1  ;;  %15117 = vmatpush3.bf16.msra.mxu0 %v17163_v2  ;;  %v17183_v1 = vld [vmem:[#allocation10 + $0x90] sm:$0xff]   ;;  %v17184_v2 = vld [vmem:[#allocation10 + $0xd8] sm:$0xff]  }
 0xc25   :  { %15118 = vmatprep.subr.bf16.mxu0 %v17164_v6  ;;  %v17185_v6 = vld [vmem:[#allocation10 + $0x98] sm:$0xff]  }
 0xc27   :  { %15163 = vmatpush3.bf16.msra.mxu1 %v17149_v7  ;;  %v17186_v7 = vld [vmem:[#allocation10 + $0xe0] sm:$0xff]  }
 0xc28   :  { %15164 = vmatprep.subr.bf16.mxu1 %v17150_v54  ;;  %15119 = vmatpush3.bf16.msra.mxu0 %v17165_v49 }
 0xc29   :  { %15120 = vmatprep.subr.bf16.mxu0 %v17166_v8 }
 0xc2b   :  { %15165 = vmatpush3.bf16.msra.mxu1 %v17151_v10  ;;  %v17187_v10 = vld [vmem:[#allocation10 + $0xa0] sm:$0xff]  }
 0xc2c   :  { %15166 = vmatprep.subr.bf16.mxu1 %v17152_v11  ;;  %15121 = vmatpush3.bf16.msra.mxu0 %v17167_v12 }
 0xc2d   :  { %15122 = vmatprep.subr.bf16.mxu0 %v17168_v13  ;;  %v17188_v13 = vld [vmem:[#allocation10 + $0xe8] sm:$0xff]  }
 0xc2f   :  { %15167 = vmatpush3.bf16.msra.mxu1 %v17153_v14 }
 0xc30   :  { %15168 = vmatprep.subr.bf16.mxu1 %v17154_v16  ;;  %15123 = vmatpush3.bf16.msra.mxu0 %v17169_v57  ;;  %v17189_v57 = vld [vmem:[#allocation10 + $0xa8] sm:$0xff]  }
 0xc31   :  { %15124 = vmatprep.subr.bf16.mxu0 %v17170_v35 }
 0xc33   :  { %15169 = vmatpush3.bf16.msra.mxu1 %v17155_v17  ;;  %v17190_v17 = vld [vmem:[#allocation10 + $0xf0] sm:$0xff]  }
 0xc34   :  { %15170 = vmatprep.subr.bf16.mxu1 %v17156_v18  ;;  %15125 = vmatpush3.bf16.msra.mxu0 %v17171_v20  ;;  %v17191_v18 = vld [vmem:[#allocation10 + $0xb0] sm:$0xff]   ;;  %v17197_v20 = vld [vmem:[#allocation10 + $0x188] sm:$0xff]  }
 0xc35   :  { %15126 = vmatprep.subr.bf16.mxu0 %v17172_v26  ;;  %v17198_v26 = vld [vmem:[#allocation10 + $0x1d0] sm:$0xff]  }
 0xc37   :  { %15171 = vmatpush3.bf16.msra.mxu1 %v17157_v19  ;;  %v17192_v19 = vld [vmem:[#allocation10 + $0xf8] sm:$0xff]  }
 0xc38   :  { %15172 = vmatprep.subr.bf16.mxu1 %v17158_v21  ;;  %15127 = vmatpush3.bf16.msra.mxu0 %v17173_v9  ;;  %v17193_v21 = vld [vmem:[#allocation10 + $0xb8] sm:$0xff]   ;;  %v17199_v9 = vld [vmem:[#allocation10 + $0x190] sm:$0xff]  }
 0xc39   :  { %15128 = vmatprep.subr.bf16.mxu0 %v17174_v27  ;;  %v17200_v27 = vld [vmem:[#allocation10 + $0x1d8] sm:$0xff]  }
 0xc3b   :  { %15173 = vmatpush3.bf16.msra.mxu1 %v17159_v4  ;;  %v17194_v4 = vld [vmem:[#allocation10 + $0x1c0] sm:$0xff]  }
 0xc3c   :  { %15174 = vmatprep.subr.bf16.mxu1 %v17160_v3  ;;  %15129 = vmatpush3.bf16.msra.mxu0 %v17175_v28  ;;  %v17195_v3 = vld [vmem:[#allocation10 + $0x180] sm:$0xff]   ;;  %v17201_v28 = vld [vmem:[#allocation10 + $0x198] sm:$0xff]  }
 0xc3d   :  { %15130 = vmatprep.subr.bf16.mxu0 %v17176_v30  ;;  %v17202_v30 = vld [vmem:[#allocation10 + $0x1e0] sm:$0xff]  }
 0xc3f   :  { %15175 = vmatpush3.bf16.msra.mxu1 %v17161_v24  ;;  %v17196_v24 = vld [vmem:[#allocation10 + $0x1c8] sm:$0xff]  }
 0xc40   :  { %15277 = vmatprep.subr.bf16.mxu1 %v18187_v42  ;;  %15131 = vmatpush3.bf16.msra.mxu0 %v17177_v32  ;;  %v17203_v32 = vld [vmem:[#allocation10 + $0x1a0] sm:$0xff]  }
 0xc42   :  { %10096 = vmatmul.mubr.bf16.vlgmr.msra.gmra.mrb[52].mxu1 %v18627_v47  ;;  %v17178_v47 = vld [vmem:[#allocation10 + $0xc0] sm:$0xff]  }
 0xc43   :  { %15293 = vmatprep.mubr.msk.bf16.mxu1 %vm18188_vm0, %v18187_v42  ;;  %15138 = vmatprep.subr.bf16.mxu0 %v17178_v47  ;;  %v17204_v47 = vld [vmem:[#allocation10 + $0x1e8] sm:$0xff]  }
 0xcf5   :  { %v9367_v40 = vpop.f32.mrb[52].mxu0  ;;  %v9449_v41 = vpop.f32.mrb[48].mxu1 }
 0xcf6   :  { %v15329_v43 = vadd.f32 %v9367_v40, %v8635_v36  ;;  %v9369_v45 = vpop.f32.mrb[53].mxu0  ;;  %v9451_v5 = vpop.f32.mrb[49].mxu1  ;;  %v15331_v54 = vadd.f32 %v9449_v41, %v8643_v46  ;;  %v17206_v36 = vld [vmem:[#allocation10 + $0x1f0] sm:$0xff]   ;;  %v17210_v40 = vld [vmem:[#allocation11] sm:$0xff]   ;;  %v17211_v41 = vld [vmem:[#allocation11 + $0x8] sm:$0xff]  }
 0xcf7   :  { %v15330_v23 = vadd.f32 %v9369_v45, %v8639_v38  ;;  %v15332_v52 = vadd.f32 %v9451_v5, %v8647_v39  ;;  %v9371_v53 = vpop.f32.mrb[54].mxu0  ;;  %v9453_v22 = vpop.f32.mrb[50].mxu1  ;;  %v17208_v38 = vld [vmem:[#allocation10 + $0x1f8] sm:$0xff]   ;;  %15278 = vmatpush3.bf16.msra.mxu1 %v17210_v40  ;;  %v17214_v5 = vld [vmem:[#allocation11 + $0x20] sm:$0xff]  }
 0xcf8   :  { %v9372_v55 = vpop.f32.mrb[55].mxu0  ;;  %v9454_v56 = vpop.f32.mrb[51].mxu1  ;;  %v9456_v58 = vpack.c.bf16 %v15329_v43, %v15329_v43  ;;  %v9458_v16 = vpack.c.bf16 %v15331_v54, %v15331_v54  ;;  %v17209_v39 = vld [vmem:[#allocation10 + $0x1b8] sm:$0xff]   ;;  %15279 = vmatprep.subr.bf16.mxu1 %v18187_v42  ;;  %v17212_v43 = vld [vmem:[#allocation11 + $0x10] sm:$0xff]  }
 0xcf9   :  { %v9457_v25 = vpack.c.bf16 %v15330_v23, %v15330_v23  ;;  %v9459_v59 = vpack.c.bf16 %v15332_v52, %v15332_v52  ;;  %v17213_v45 = vld [vmem:[#allocation11 + $0x18] sm:$0xff]   ;;  %v17216_v23 = vld [vmem:[#allocation11 + $0x30] sm:$0xff]  }
 0xcfa   :  { %v17217_v52 = vld [vmem:[#allocation11 + $0x38] sm:$0xff]   ;;  %v17218_v53 = vld [vmem:[#allocation13] ss:$16 sps:$4 sm:$0xff]   ;;  %v17220_v22 = vld [vmem:[#allocation13 + $0x4] ss:$16 sps:$4 sm:$0xff]  }
 0xcfb   :  { %17850 = vtanh.bf16 %v9457_v25  ;;  %15280 = vmatpush3.bf16.msra.mxu1 %v17211_v41  ;;  %v17223_v55 = vld [vmem:[#allocation13 + $0xc] ss:$16 sps:$4 sm:$0xff]   ;;  %v17226_v56 = vld [vmem:[#allocation13 + $0x24] ss:$16 sps:$4 sm:$0xff]   ;;  %v17263_v40 = vld [vmem:[#allocation13 + $0xe8] ss:$16 sps:$4 sm:$0xff]  }
 0xcfc   :  { %17852 = vtanh.bf16 %v9456_v58  ;;  %15281 = vmatprep.subr.bf16.mxu1 %v18187_v42  ;;  %v17224_v58 = vld [vmem:[#allocation13 + $0x20] ss:$16 sps:$4 sm:$0xff]   ;;  %v17232_v25 = vld [vmem:[#allocation13 + $0x44] ss:$16 sps:$4 sm:$0xff]  }
 0xcfd   :  { %17854 = vtanh.bf16 %v9459_v59  ;;  %v17230_v59 = vld [vmem:[#allocation13 + $0x40] ss:$16 sps:$4 sm:$0xff]   ;;  %v17268_v41 = vld [vmem:[#allocation14 + $0x4] ss:$16 sps:$4 sm:$0xff]  }
 0xcfe   :  { %17856 = vtanh.bf16 %v9458_v16 }
 0xcff   :  { %15282 = vmatpush3.bf16.msra.mxu1 %v17212_v43  ;;  %v17271_v43 = vld [vmem:[#allocation14 + $0xc] ss:$16 sps:$4 sm:$0xff]  }
 0xd00   :  { %15283 = vmatprep.subr.bf16.mxu1 %v18187_v42 }
 0xd03   :  { %15284 = vmatpush3.bf16.msra.mxu1 %v17213_v45  ;;  %v14582_v45 = vld [vmem:[%s18775_s10] ss:$0 sm:$0xff] }
 0xd04   :  { %15285 = vmatprep.subr.bf16.mxu1 %v18187_v42 }
 0xd06   :  { %v17851_v60 = vpop.eup %17850 }
 0xd07   :  { %v17853_v62 = vpop.eup %17852  ;;  %10015 = vmatprep.mubr.bf16.mxu0 %v17851_v60  ;;  %15286 = vmatpush3.bf16.msra.mxu1 %v17214_v5  ;;  %v17236_v60 = vld [vmem:[#allocation13 + $0x60] ss:$16 sps:$4 sm:$0xff]  }
 0xd08   :  { %v17855_v37 = vpop.eup %17854  ;;  %10016 = vmatmul.mubr.bf16.vlgmr.msra.gmra.mrb[56].mxu0 %v17853_v62  ;;  %15287 = vmatprep.subr.bf16.mxu1 %v18187_v42 }
 0xd09   :  { %15139 = vmatpush3.bf16.msra.mxu0 %v17179_v29  ;;  %10055 = vmatprep.mubr.bf16.mxu0 %v17855_v37  ;;  %v17857_v35 = vpop.eup %17856  ;;  %v17238_v29 = vld [vmem:[#allocation13 + $0x64] ss:$16 sps:$4 sm:$0xff]  }
 0xd0a   :  { %15140 = vmatprep.subr.bf16.mxu0 %v17180_v61 }
 0xd0d   :  { %15141 = vmatpush3.bf16.msra.mxu0 %v17181_v63 }
 0xd0e   :  { %15142 = vmatprep.subr.bf16.mxu0 %v17182_v34  ;;  %v14517_v34 = vld [vmem:[%s18773_s8] ss:$0 sm:$0xff] }
 0xd11   :  { %15143 = vmatpush3.bf16.msra.mxu0 %v17183_v1 }
 0xd12   :  { %15144 = vmatprep.subr.bf16.mxu0 %v17184_v2 }
 0xd15   :  { %v15176_v49 = vpop.f32.mrb[52].mxu1  ;;  %15145 = vmatpush3.bf16.msra.mxu0 %v17185_v6 }
 0xd16   :  { %v15177_v8 = vpop.f32.mrb[53].mxu1  ;;  %15146 = vmatprep.subr.bf16.mxu0 %v17186_v7 }
 0xd17   :  { %v18676_v11 = vadd.f32 %v15177_v8, %v15176_v49  ;;  %v15179_v12 = vpop.f32.mrb[54].mxu1 }
 0xd18   :  { %v15180_v14 = vpop.f32.mrb[55].mxu1 }
 0xd19   :  { %15147 = vmatpush3.bf16.msra.mxu0 %v17187_v10 }
 0xd1a   :  { %15148 = vmatprep.subr.bf16.mxu0 %v17188_v13 }
 0xd1d   :  { %15149 = vmatpush3.bf16.msra.mxu0 %v17189_v57 }
 0xd1e   :  { %15150 = vmatprep.subr.bf16.mxu0 %v17190_v17  ;;  %v17221_v17 = vld [vmem:[#allocation13 + $0x8] ss:$16 sps:$4 sm:$0xff]  }
 0xd21   :  { %15151 = vmatpush3.bf16.msra.mxu0 %v17191_v18 }
 0xd22   :  { %15152 = vmatprep.subr.bf16.mxu0 %v17192_v19  ;;  %v17229_v19 = vld [vmem:[#allocation13 + $0x2c] ss:$16 sps:$4 sm:$0xff]  }
 0xd25   :  { %15153 = vmatpush3.bf16.msra.mxu0 %v17193_v21  ;;  %v17227_v21 = vld [vmem:[#allocation13 + $0x28] ss:$16 sps:$4 sm:$0xff]  }
 0xd26   :  { %15182 = vmatprep.subr.bf16.mxu0 %v17194_v4  ;;  %v17235_v4 = vld [vmem:[#allocation13 + $0x4c] ss:$16 sps:$4 sm:$0xff]  }
 0xd28   :  { %10056 = vmatmul.mubr.bf16.vlgmr.msra.gmra.mrb[60].mxu0 %v17857_v35  ;;  %v17244_v35 = vld [vmem:[#allocation13 + $0x84] ss:$16 sps:$4 sm:$0xff]  }
 0xd29   :  { %15183 = vmatpush3.bf16.msra.mxu0 %v17195_v3  ;;  %10135 = vmatprep.mubr.bf16.mxu0 %v18637_v31  ;;  %v17207_v31 = vld [vmem:[#allocation10 + $0x1b0] sm:$0xff]   ;;  %v17233_v3 = vld [vmem:[#allocation13 + $0x48] ss:$16 sps:$4 sm:$0xff]  }
 0xd2a   :  { %15184 = vmatprep.subr.bf16.mxu0 %v17196_v24  ;;  %v17239_v24 = vld [vmem:[#allocation13 + $0x68] ss:$16 sps:$4 sm:$0xff]  }
 0xd2d   :  { %15185 = vmatpush3.bf16.msra.mxu0 %v17197_v20  ;;  %v17247_v20 = vld [vmem:[#allocation13 + $0x8c] ss:$16 sps:$4 sm:$0xff]  }
 0xd2e   :  { %15186 = vmatprep.subr.bf16.mxu0 %v17198_v26  ;;  %v17242_v26 = vld [vmem:[#allocation13 + $0x80] ss:$16 sps:$4 sm:$0xff]  }
 0xd31   :  { %15187 = vmatpush3.bf16.msra.mxu0 %v17199_v9  ;;  %v17245_v9 = vld [vmem:[#allocation13 + $0x88] ss:$16 sps:$4 sm:$0xff]  }
 0xd32   :  { %15188 = vmatprep.subr.bf16.mxu0 %v17200_v27  ;;  %v17250_v27 = vld [vmem:[#allocation13 + $0xa4] ss:$16 sps:$4 sm:$0xff]  }
 0xd35   :  { %15189 = vmatpush3.bf16.msra.mxu0 %v17201_v28  ;;  %v17248_v28 = vld [vmem:[#allocation13 + $0xa0] ss:$16 sps:$4 sm:$0xff]  }
 0xd36   :  { %15190 = vmatprep.subr.bf16.mxu0 %v17202_v30  ;;  %v17251_v30 = vld [vmem:[#allocation13 + $0xa8] ss:$16 sps:$4 sm:$0xff]  }
 0xd39   :  { %15191 = vmatpush3.bf16.msra.mxu0 %v17203_v32  ;;  %v17256_v32 = vld [vmem:[#allocation13 + $0xc4] ss:$16 sps:$4 sm:$0xff]  }
 0xd3a   :  { %15192 = vmatprep.subr.bf16.mxu0 %v17204_v47  ;;  %v17254_v47 = vld [vmem:[#allocation13 + $0xc0] ss:$16 sps:$4 sm:$0xff]  }
 0xd3d   :  { %15193 = vmatpush3.bf16.msra.mxu0 %v17205_v33  ;;  %v17257_v33 = vld [vmem:[#allocation13 + $0xc8] ss:$16 sps:$4 sm:$0xff]  }
 0xd3e   :  { %15194 = vmatprep.subr.bf16.mxu0 %v17206_v36  ;;  %v17259_v36 = vld [vmem:[#allocation13 + $0xcc] ss:$16 sps:$4 sm:$0xff]  }
 0xd41   :  { %15195 = vmatpush3.bf16.msra.mxu0 %v17207_v31  ;;  %v17262_v31 = vld [vmem:[#allocation13 + $0xe4] ss:$16 sps:$4 sm:$0xff]  }
 0xd42   :  { %15196 = vmatprep.subr.bf16.mxu0 %v17208_v38  ;;  %v17265_v38 = vld [vmem:[#allocation13 + $0xec] ss:$16 sps:$4 sm:$0xff]  }
 0xd45   :  { %15197 = vmatpush3.bf16.msra.mxu0 %v17209_v39  ;;  %v17260_v39 = vld [vmem:[#allocation13 + $0xe0] ss:$16 sps:$4 sm:$0xff]  }
 0xd46   :  { %10472 = vmatprep.subr.bf16.mxu0 %v17220_v22 }
 0xd48   :  { %10136 = vmatmul.mubr.bf16.vlgmr.msra.gmra.mrb[64].mxu0 %v18644_v15  ;;  %v17215_v15 = vld [vmem:[#allocation11 + $0x28] sm:$0xff]  }
 0xd49   :  { %10504 = vmatprep.mubr.bf16.mxu0 %v18186_v0  ;;  %15288 = vmatpush3.bf16.msra.mxu1 %v17215_v15 }
 0xd4a   :  { %15289 = vmatprep.subr.bf16.mxu1 %v18187_v42  ;;  %10473 = vmatpush1.bf16.msra.mxu0 %v17218_v53 }
 0xd4b   :  { %10474 = vmatprep.subr.bf16.mxu0 %v17226_v56  ;;  %v17269_v56 = vld [vmem:[#allocation14 + $0x8] ss:$16 sps:$4 sm:$0xff]  }
 0xd4d   :  { %15290 = vmatpush3.bf16.msra.mxu1 %v17216_v23 }
 0xd4e   :  { %15291 = vmatprep.subr.bf16.mxu1 %v18187_v42  ;;  %10475 = vmatpush1.bf16.msra.mxu0 %v17224_v58  ;;  %v17274_v58 = vld [vmem:[#allocation14 + $0x24] ss:$16 sps:$4 sm:$0xff]  }
 0xd4f   :  { %10476 = vmatprep.subr.bf16.mxu0 %v17232_v25  ;;  %v17277_v25 = vld [vmem:[#allocation14 + $0x2c] ss:$16 sps:$4 sm:$0xff]  }
 0xd51   :  { %15292 = vmatpush3.bf16.msra.mxu1 %v17217_v52 }
 0xd52   :  { %10513 = vmatprep.subr.bf16.mxu1 %v17223_v55  ;;  %10477 = vmatpush1.bf16.msra.mxu0 %v17230_v59  ;;  %v17266_v55 = vld [vmem:[#allocation14] ss:$16 sps:$4 sm:$0xff]  }
 0xd53   :  { %10478 = vmatprep.subr.bf16.mxu0 %v17238_v29  ;;  %v17272_v29 = vld [vmem:[#allocation14 + $0x20] ss:$16 sps:$4 sm:$0xff]  }
 0xd56   :  { %10479 = vmatpush1.bf16.msra.mxu0 %v17236_v60  ;;  %v17275_v60 = vld [vmem:[#allocation14 + $0x28] ss:$16 sps:$4 sm:$0xff]  }
 0xd57   :  { %10480 = vmatprep.subr.bf16.mxu0 %v17244_v35  ;;  %v17322_v35 = vld [vmem:[#allocation14 + $0x124] ss:$16 sps:$4 sm:$0xff]  }
 0xd5a   :  { %10481 = vmatpush1.bf16.msra.mxu0 %v17242_v26  ;;  %v17320_v26 = vld [vmem:[#allocation14 + $0x120] ss:$16 sps:$4 sm:$0xff]  }
 0xd5b   :  { %10482 = vmatprep.subr.bf16.mxu0 %v17250_v27  ;;  %v17328_v27 = vld [vmem:[#allocation14 + $0x144] ss:$16 sps:$4 sm:$0xff]  }
 0xd5e   :  { %10483 = vmatpush1.bf16.msra.mxu0 %v17248_v28  ;;  %v17326_v28 = vld [vmem:[#allocation14 + $0x140] ss:$16 sps:$4 sm:$0xff]  }
 0xd5f   :  { %10484 = vmatprep.subr.bf16.mxu0 %v17256_v32  ;;  %v17334_v32 = vld [vmem:[#allocation14 + $0x164] ss:$16 sps:$4 sm:$0xff]  }
 0xd62   :  { %10485 = vmatpush1.bf16.msra.mxu0 %v17254_v47  ;;  %v17337_v47 = vld [vmem:[#allocation14 + $0x16c] ss:$16 sps:$4 sm:$0xff]  }
 0xd63   :  { %10486 = vmatprep.subr.bf16.mxu0 %v17262_v31  ;;  %v17340_v31 = vld [vmem:[#allocation14 + $0x184] ss:$16 sps:$4 sm:$0xff]  }
 0xd66   :  { %10487 = vmatpush1.bf16.msra.mxu0 %v17260_v39  ;;  %v17338_v39 = vld [vmem:[#allocation14 + $0x180] ss:$16 sps:$4 sm:$0xff]  }
 0xd67   :  { %11352 = vmatprep.subr.bf16.mxu0 %v17268_v41  ;;  %v17346_v41 = vld [vmem:[#allocation14 + $0x1a4] ss:$16 sps:$4 sm:$0xff]  }
 0xddb   :  { %v15132_v42 = vpop.f32.mrb[56].mxu0 }
 0xddc   :  { %v15133_v61 = vpop.f32.mrb[57].mxu0 }
 0xddd   :  { %v15134_v62 = vadd.f32 %v15133_v61, %v15132_v42  ;;  %v15135_v37 = vpop.f32.mrb[58].mxu0  ;;  %v17280_v42 = vld [vmem:[#allocation14 + $0x44] ss:$16 sps:$4 sm:$0xff]   ;;  %v17283_v61 = vld [vmem:[#allocation14 + $0x4c] ss:$16 sps:$4 sm:$0xff]  }
 0xdde   :  { %v15136_v63 = vpop.f32.mrb[59].mxu0  ;;  %v17281_v37 = vld [vmem:[#allocation14 + $0x48] ss:$16 sps:$4 sm:$0xff]  }
 0xddf   :  { %v10018_v46 = vadd.f32 %v15134_v62, %v14517_v34  ;;  %v17278_v62 = vld [vmem:[#allocation14 + $0x40] ss:$16 sps:$4 sm:$0xff]   ;;  %v17286_v63 = vld [vmem:[#allocation14 + $0x64] ss:$16 sps:$4 sm:$0xff]   ;;  %v17289_v34 = vld [vmem:[#allocation14 + $0x6c] ss:$16 sps:$4 sm:$0xff]  }
 0xdfb   :  { %v15154_v1 = vpop.f32.mrb[60].mxu0 }
 0xdfc   :  { %v15155_v2 = vpop.f32.mrb[61].mxu0 }
 0xdfd   :  { %v15156_v6 = vadd.f32 %v15155_v2, %v15154_v1  ;;  %v15157_v7 = vpop.f32.mrb[62].mxu0  ;;  %v17284_v1 = vld [vmem:[#allocation14 + $0x60] ss:$16 sps:$4 sm:$0xff]   ;;  %v17287_v2 = vld [vmem:[#allocation14 + $0x68] ss:$16 sps:$4 sm:$0xff]  }
 0xdfe   :  { %v15158_v54 = vpop.f32.mrb[63].mxu0  ;;  %v17290_v7 = vld [vmem:[#allocation14 + $0x80] ss:$16 sps:$4 sm:$0xff]  }
 0xdff   :  { %v10058_v49 = vadd.f32 %v15156_v6, %v10018_v46  ;;  %v17292_v46 = vld [vmem:[#allocation14 + $0x84] ss:$16 sps:$4 sm:$0xff]   ;;  %v17295_v6 = vld [vmem:[#allocation14 + $0x8c] ss:$16 sps:$4 sm:$0xff]   ;;  %v17293_v54 = vld [vmem:[#allocation14 + $0x88] ss:$16 sps:$4 sm:$0xff]  }
 0xe01   :  { %v10098_v8 = vadd.f32 %v18676_v11, %v10058_v49  ;;  %v17241_v11 = vld [vmem:[#allocation13 + $0x6c] ss:$16 sps:$4 sm:$0xff]   ;;  %v17298_v49 = vld [vmem:[#allocation14 + $0xa4] ss:$16 sps:$4 sm:$0xff]  }
 0xe1b   :  { %v15198_v10 = vpop.f32.mrb[64].mxu0 }
 0xe1c   :  { %v15199_v12 = vpop.f32.mrb[65].mxu0 }
 0xe1d   :  { %v15200_v13 = vadd.f32 %v15199_v12, %v15198_v10  ;;  %v15201_v14 = vpop.f32.mrb[66].mxu0  ;;  %v17296_v10 = vld [vmem:[#allocation14 + $0xa0] ss:$16 sps:$4 sm:$0xff]   ;;  %v17299_v12 = vld [vmem:[#allocation14 + $0xa8] ss:$16 sps:$4 sm:$0xff]  }
 0xe1e   :  { %v15202_v16 = vpop.f32.mrb[67].mxu0  ;;  %v17307_v14 = vld [vmem:[#allocation14 + $0xcc] ss:$16 sps:$4 sm:$0xff]  }
 0xe1f   :  { %v10138_v57 = vadd.f32 %v15200_v13, %v10098_v8  ;;  %v17301_v8 = vld [vmem:[#allocation14 + $0xac] ss:$16 sps:$4 sm:$0xff]   ;;  %v17304_v13 = vld [vmem:[#allocation14 + $0xc4] ss:$16 sps:$4 sm:$0xff]   ;;  %v17302_v16 = vld [vmem:[#allocation14 + $0xc0] ss:$16 sps:$4 sm:$0xff]  }
 0xe21   :  { %10143 = vst [vmem:[#allocation20 + $0x8] sm:$0xff] %v10138_v57  ;;  %v10144_v18 = vpack.c.bf16 %v10138_v57, %v10138_v57  ;;  %v17305_v57 = vld [vmem:[#allocation14 + $0xc8] ss:$16 sps:$4 sm:$0xff]  }
 0xe23   :  { %15294 = vmatmul.mubr.bf16.vlgmr.msra.gmra.mrb[56].mxu1 %v10144_v18  ;;  %v17313_v18 = vld [vmem:[#allocation14 + $0xec] ss:$16 sps:$4 sm:$0xff]  }
 0xe24   :  { %10514 = vmatpush1.bf16.msra.mxu1 %v17221_v17  ;;  %10545 = vmatprep.mubr.bf16.mxu1 %v18186_v0  ;;  %v17253_v0 = vld [vmem:[#allocation13 + $0xac] ss:$16 sps:$4 sm:$0xff]   ;;  %v17310_v17 = vld [vmem:[#allocation14 + $0xe4] ss:$16 sps:$4 sm:$0xff]  }
 0xe25   :  { %10515 = vmatprep.subr.bf16.mxu1 %v17229_v19  ;;  %v17308_v19 = vld [vmem:[#allocation14 + $0xe0] ss:$16 sps:$4 sm:$0xff]  }
 0xe28   :  { %10516 = vmatpush1.bf16.msra.mxu1 %v17227_v21  ;;  %v17311_v21 = vld [vmem:[#allocation14 + $0xe8] ss:$16 sps:$4 sm:$0xff]  }
 0xe29   :  { %10517 = vmatprep.subr.bf16.mxu1 %v17235_v4  ;;  %v17316_v4 = vld [vmem:[#allocation14 + $0x104] ss:$16 sps:$4 sm:$0xff]  }
 0xe2c   :  { %10518 = vmatpush1.bf16.msra.mxu1 %v17233_v3  ;;  %v17319_v3 = vld [vmem:[#allocation14 + $0x10c] ss:$16 sps:$4 sm:$0xff]  }
 0xe2d   :  { %10519 = vmatprep.subr.bf16.mxu1 %v17241_v11  ;;  %v17314_v11 = vld [vmem:[#allocation14 + $0x100] ss:$16 sps:$4 sm:$0xff]  }
 0xe30   :  { %10520 = vmatpush1.bf16.msra.mxu1 %v17239_v24  ;;  %v17317_v24 = vld [vmem:[#allocation14 + $0x108] ss:$16 sps:$4 sm:$0xff]  }
 0xe31   :  { %10521 = vmatprep.subr.bf16.mxu1 %v17247_v20  ;;  %v17325_v20 = vld [vmem:[#allocation14 + $0x12c] ss:$16 sps:$4 sm:$0xff]  }
 0xe34   :  { %10522 = vmatpush1.bf16.msra.mxu1 %v17245_v9  ;;  %v17323_v9 = vld [vmem:[#allocation14 + $0x128] ss:$16 sps:$4 sm:$0xff]  }
 0xe35   :  { %10523 = vmatprep.subr.bf16.mxu1 %v17253_v0  ;;  %v17331_v0 = vld [vmem:[#allocation14 + $0x14c] ss:$16 sps:$4 sm:$0xff]  }
 0xe38   :  { %10524 = vmatpush1.bf16.msra.mxu1 %v17251_v30  ;;  %v17329_v30 = vld [vmem:[#allocation14 + $0x148] ss:$16 sps:$4 sm:$0xff]  }
 0xe39   :  { %10525 = vmatprep.subr.bf16.mxu1 %v17259_v36  ;;  %v17335_v36 = vld [vmem:[#allocation14 + $0x168] ss:$16 sps:$4 sm:$0xff]  }
 0xe3c   :  { %10526 = vmatpush1.bf16.msra.mxu1 %v17257_v33  ;;  %v17332_v33 = vld [vmem:[#allocation14 + $0x160] ss:$16 sps:$4 sm:$0xff]  }
 0xe3d   :  { %10527 = vmatprep.subr.bf16.mxu1 %v17265_v38  ;;  %v17343_v38 = vld [vmem:[#allocation14 + $0x18c] ss:$16 sps:$4 sm:$0xff]  }
 0xe40   :  { %10528 = vmatpush1.bf16.msra.mxu1 %v17263_v40  ;;  %v17341_v40 = vld [vmem:[#allocation14 + $0x188] ss:$16 sps:$4 sm:$0xff]  }
 0xe41   :  { %11434 = vmatprep.subr.bf16.mxu1 %v17271_v43  ;;  %v17349_v43 = vld [vmem:[#allocation14 + $0x1ac] ss:$16 sps:$4 sm:$0xff]  }
 0xef6   :  { %v10250_v5 = vpop.f32.mrb[56].mxu1 }
 0xef7   :  { %v10251_v15 = vadd.f32 %v14582_v45, %v10250_v5  ;;  %v15295_v23 = vpop.f32.mrb[57].mxu1  ;;  %v17344_v45 = vld [vmem:[#allocation14 + $0x1a0] ss:$16 sps:$4 sm:$0xff]   ;;  %v17347_v5 = vld [vmem:[#allocation14 + $0x1a8] ss:$16 sps:$4 sm:$0xff]  }
 0xef8   :  { %v10253_v52 = vpop.f32.mrb[58].mxu1  ;;  %v17350_v23 = vld [vmem:[#allocation14 + $0x1c0] ss:$16 sps:$4 sm:$0xff]  }
 0xef9   :  { %v10256_v53 = vpack.c.bf16 %v10251_v15, %v10251_v15  ;;  %v15296_v22 = vpop.f32.mrb[59].mxu1  ;;  %v17352_v15 = vld [vmem:[#allocation14 + $0x1c4] ss:$16 sps:$4 sm:$0xff]   ;;  %v17353_v52 = vld [vmem:[#allocation14 + $0x1c8] ss:$16 sps:$4 sm:$0xff]  }
 0xefa   :  { %v17358_v22 = vld [vmem:[#allocation14 + $0x1e4] ss:$16 sps:$4 sm:$0xff]  }
 0xefb   :  { %17858 = vtanh.bf16 %v10256_v53  ;;  %v17355_v53 = vld [vmem:[#allocation14 + $0x1cc] ss:$16 sps:$4 sm:$0xff]  }
 0xf06   :  { %v17859_v59 = vpop.eup %17858 }
 0xf07   :  { %10505 = vmatmul.mubr.bf16.vlgmr.msra.gmra.mrb[68].mxu0 %v17859_v59  ;;  %10546 = vmatmul.mubr.bf16.vlgmr.msra.gmra.mrb[60].mxu1 %v17859_v59  ;;  %v17367_v59 = vld [vmem:[#allocation14 + $0x20c] ss:$16 sps:$4 sm:$0xff]  }
 0xf08   :  { %11353 = vmatpush1.bf16.msra.mxu0 %v17266_v55  ;;  %11435 = vmatpush1.bf16.msra.mxu1 %v17269_v56  ;;  %v17361_v55 = vld [vmem:[#allocation14 + $0x1ec] ss:$16 sps:$4 sm:$0xff]   ;;  %v17356_v56 = vld [vmem:[#allocation14 + $0x1e0] ss:$16 sps:$4 sm:$0xff]  }
 0xf09   :  { %11354 = vmatprep.subr.bf16.mxu0 %v17274_v58  ;;  %11436 = vmatprep.subr.bf16.mxu1 %v17277_v25  ;;  %v17359_v58 = vld [vmem:[#allocation14 + $0x1e8] ss:$16 sps:$4 sm:$0xff]   ;;  %v17364_v25 = vld [vmem:[#allocation14 + $0x204] ss:$16 sps:$4 sm:$0xff]  }
 0xf0c   :  { %11355 = vmatpush1.bf16.msra.mxu0 %v17272_v29  ;;  %11437 = vmatpush1.bf16.msra.mxu1 %v17275_v60  ;;  %v18699_v29 = vld [vmem:[%s18777_s12] sm:$0xf] }
 0xf0d   :  { %11356 = vmatprep.subr.bf16.mxu0 %v17280_v42  ;;  %11438 = vmatprep.subr.bf16.mxu1 %v17283_v61  ;;  %v10295_v60 = vrot.slane %v18699_v29, %v18466_v48  ;;  %v10299_v42 = vrot.slane %v18699_v29, %v18474_v50  ;;  %v10307_v61 = vrot.slane %v18699_v29, %v18492_v51 }
 0xf10   :  { %11357 = vmatpush1.bf16.msra.mxu0 %v17278_v62  ;;  %11439 = vmatpush1.bf16.msra.mxu1 %v17281_v37 }
 0xf11   :  { %11358 = vmatprep.subr.bf16.mxu0 %v17286_v63  ;;  %11440 = vmatprep.subr.bf16.mxu1 %v17289_v34 }
 0xf14   :  { %11359 = vmatpush1.bf16.msra.mxu0 %v17284_v1  ;;  %11441 = vmatpush1.bf16.msra.mxu1 %v17287_v2 }
 0xf15   :  { %11360 = vmatprep.subr.bf16.mxu0 %v17292_v46  ;;  %11442 = vmatprep.subr.bf16.mxu1 %v17295_v6 }
 0xf18   :  { %11361 = vmatpush1.bf16.msra.mxu0 %v17290_v7  ;;  %11443 = vmatpush1.bf16.msra.mxu1 %v17293_v54 }
 0xf19   :  { %11362 = vmatprep.subr.bf16.mxu0 %v17298_v49  ;;  %11444 = vmatprep.subr.bf16.mxu1 %v17301_v8 }
 0xf1c   :  { %11363 = vmatpush1.bf16.msra.mxu0 %v17296_v10  ;;  %11445 = vmatpush1.bf16.msra.mxu1 %v17299_v12 }
 0xf1d   :  { %11364 = vmatprep.subr.bf16.mxu0 %v17304_v13  ;;  %11446 = vmatprep.subr.bf16.mxu1 %v17307_v14  ;;  %v17362_v13 = vld [vmem:[#allocation14 + $0x200] ss:$16 sps:$4 sm:$0xff]   ;;  %v17365_v14 = vld [vmem:[#allocation14 + $0x208] ss:$16 sps:$4 sm:$0xff]  }
 0xf20   :  { %11365 = vmatpush1.bf16.msra.mxu0 %v17302_v16  ;;  %11447 = vmatpush1.bf16.msra.mxu1 %v17305_v57 }
 0xf21   :  { %11366 = vmatprep.subr.bf16.mxu0 %v17310_v17  ;;  %11448 = vmatprep.subr.bf16.mxu1 %v17313_v18  ;;  %v17370_v17 = vld [vmem:[#allocation14 + $0x224] ss:$16 sps:$4 sm:$0xff]   ;;  %v17373_v18 = vld [vmem:[#allocation14 + $0x22c] ss:$16 sps:$4 sm:$0xff]  }
 0xf24   :  { %11367 = vmatpush1.bf16.msra.mxu0 %v17308_v19  ;;  %11449 = vmatpush1.bf16.msra.mxu1 %v17311_v21  ;;  %v17368_v21 = vld [vmem:[#allocation14 + $0x220] ss:$16 sps:$4 sm:$0xff]  }
 0xf25   :  { %11368 = vmatprep.subr.bf16.mxu0 %v17316_v4  ;;  %11450 = vmatprep.subr.bf16.mxu1 %v17319_v3  ;;  %v17371_v4 = vld [vmem:[#allocation14 + $0x228] ss:$16 sps:$4 sm:$0xff]   ;;  %v17376_v3 = vld [vmem:[#allocation14 + $0x244] ss:$16 sps:$4 sm:$0xff]  }
 0xf28   :  { %11369 = vmatpush1.bf16.msra.mxu0 %v17314_v11  ;;  %11451 = vmatpush1.bf16.msra.mxu1 %v17317_v24  ;;  %v17379_v11 = vld [vmem:[#allocation14 + $0x24c] ss:$16 sps:$4 sm:$0xff]   ;;  %v17374_v24 = vld [vmem:[#allocation14 + $0x240] ss:$16 sps:$4 sm:$0xff]  }
 0xf29   :  { %11370 = vmatprep.subr.bf16.mxu0 %v17322_v35  ;;  %11452 = vmatprep.subr.bf16.mxu1 %v17325_v20  ;;  %v17377_v35 = vld [vmem:[#allocation14 + $0x248] ss:$16 sps:$4 sm:$0xff]   ;;  %v17382_v20 = vld [vmem:[#allocation14 + $0x264] ss:$16 sps:$4 sm:$0xff]  }
 0xf2c   :  { %11371 = vmatpush1.bf16.msra.mxu0 %v17320_v26  ;;  %11453 = vmatpush1.bf16.msra.mxu1 %v17323_v9  ;;  %v17385_v26 = vld [vmem:[#allocation14 + $0x26c] ss:$16 sps:$4 sm:$0xff]   ;;  %v17380_v9 = vld [vmem:[#allocation14 + $0x260] ss:$16 sps:$4 sm:$0xff]  }
 0xf2d   :  { %11372 = vmatprep.subr.bf16.mxu0 %v17328_v27  ;;  %11454 = vmatprep.subr.bf16.mxu1 %v17331_v0  ;;  %v17383_v27 = vld [vmem:[#allocation14 + $0x268] ss:$16 sps:$4 sm:$0xff]   ;;  %v17388_v0 = vld [vmem:[#allocation14 + $0x284] ss:$16 sps:$4 sm:$0xff]  }
 0xf30   :  { %11373 = vmatpush1.bf16.msra.mxu0 %v17326_v28  ;;  %11455 = vmatpush1.bf16.msra.mxu1 %v17329_v30  ;;  %v17391_v28 = vld [vmem:[#allocation14 + $0x28c] ss:$16 sps:$4 sm:$0xff]   ;;  %v17386_v30 = vld [vmem:[#allocation14 + $0x280] ss:$16 sps:$4 sm:$0xff]  }
 0xf31   :  { %11374 = vmatprep.subr.bf16.mxu0 %v17334_v32  ;;  %11456 = vmatprep.subr.bf16.mxu1 %v17337_v47  ;;  %v17389_v32 = vld [vmem:[#allocation14 + $0x288] ss:$16 sps:$4 sm:$0xff]   ;;  %v17394_v47 = vld [vmem:[#allocation14 + $0x2a4] ss:$16 sps:$4 sm:$0xff]  }
 0xf34   :  { %11375 = vmatpush1.bf16.msra.mxu0 %v17332_v33  ;;  %11457 = vmatpush1.bf16.msra.mxu1 %v17335_v36  ;;  %v17397_v33 = vld [vmem:[#allocation14 + $0x2ac] ss:$16 sps:$4 sm:$0xff]   ;;  %v17392_v36 = vld [vmem:[#allocation14 + $0x2a0] ss:$16 sps:$4 sm:$0xff]  }
 0xf35   :  { %11376 = vmatprep.subr.bf16.mxu0 %v17340_v31  ;;  %11458 = vmatprep.subr.bf16.mxu1 %v17343_v38  ;;  %v17395_v31 = vld [vmem:[#allocation14 + $0x2a8] ss:$16 sps:$4 sm:$0xff]   ;;  %v17400_v38 = vld [vmem:[#allocation14 + $0x2c4] ss:$16 sps:$4 sm:$0xff]  }
 0xf38   :  { %11377 = vmatpush1.bf16.msra.mxu0 %v17338_v39  ;;  %11459 = vmatpush1.bf16.msra.mxu1 %v17341_v40  ;;  %v17403_v39 = vld [vmem:[#allocation14 + $0x2cc] ss:$16 sps:$4 sm:$0xff]   ;;  %v17398_v40 = vld [vmem:[#allocation14 + $0x2c0] ss:$16 sps:$4 sm:$0xff]  }
 0xf39   :  { %11378 = vmatprep.subr.bf16.mxu0 %v17346_v41  ;;  %11460 = vmatprep.subr.bf16.mxu1 %v17349_v43  ;;  %v17401_v41 = vld [vmem:[#allocation14 + $0x2c8] ss:$16 sps:$4 sm:$0xff]   ;;  %v17406_v43 = vld [vmem:[#allocation14 + $0x2e4] ss:$16 sps:$4 sm:$0xff]  }
 0xf3c   :  { %11379 = vmatpush1.bf16.msra.mxu0 %v17344_v45  ;;  %11461 = vmatpush1.bf16.msra.mxu1 %v17347_v5  ;;  %v17409_v45 = vld [vmem:[#allocation14 + $0x2ec] ss:$16 sps:$4 sm:$0xff]   ;;  %v17404_v5 = vld [vmem:[#allocation14 + $0x2e0] ss:$16 sps:$4 sm:$0xff]  }
 0xf3d   :  { %11380 = vmatprep.subr.bf16.mxu0 %v17352_v15  ;;  %11462 = vmatprep.subr.bf16.mxu1 %v17355_v53  ;;  %v17407_v15 = vld [vmem:[#allocation14 + $0x2e8] ss:$16 sps:$4 sm:$0xff]   ;;  %v17410_v53 = vld [vmem:[#allocation14 + $0x300] ss:$16 sps:$4 sm:$0xff]  }
 0xf40   :  { %11381 = vmatpush1.bf16.msra.mxu0 %v17350_v23  ;;  %11463 = vmatpush1.bf16.msra.mxu1 %v17353_v52  ;;  %v17412_v23 = vld [vmem:[#allocation14 + $0x304] ss:$16 sps:$4 sm:$0xff]   ;;  %v17415_v52 = vld [vmem:[#allocation14 + $0x30c] ss:$16 sps:$4 sm:$0xff]  }
 0xf41   :  { %11382 = vmatprep.subr.bf16.mxu0 %v17358_v22  ;;  %11464 = vmatprep.subr.bf16.mxu1 %v17361_v55  ;;  %v17413_v22 = vld [vmem:[#allocation14 + $0x308] ss:$16 sps:$4 sm:$0xff]   ;;  %v17418_v55 = vld [vmem:[#allocation14 + $0x324] ss:$16 sps:$4 sm:$0xff]  }
 0xf44   :  { %11383 = vmatpush1.bf16.msra.mxu0 %v17356_v56  ;;  %11465 = vmatpush1.bf16.msra.mxu1 %v17359_v58  ;;  %v17421_v56 = vld [vmem:[#allocation14 + $0x32c] ss:$16 sps:$4 sm:$0xff]   ;;  %v17416_v58 = vld [vmem:[#allocation14 + $0x320] ss:$16 sps:$4 sm:$0xff]  }
 0xf45   :  { %11393 = vmatprep.subr.bf16.mxu0 %v17364_v25  ;;  %11475 = vmatprep.subr.bf16.mxu1 %v17367_v59  ;;  %v17419_v25 = vld [vmem:[#allocation14 + $0x328] ss:$16 sps:$4 sm:$0xff]   ;;  %v17424_v59 = vld [vmem:[#allocation14 + $0x344] ss:$16 sps:$4 sm:$0xff]  }
 0xfda   :  { %v10506_v62 = vpop.f32.mrb[68].mxu0  ;;  %v18707_v37 = vpop.f32.mrb[60].mxu1 }
 0xfdb   :  { %v10507_v63 = vadd.f32 %v10506_v62, %v10295_v60  ;;  %v10508_v34 = vpop.f32.mrb[69].mxu0  ;;  %v10549_v1 = vpop.f32.mrb[61].mxu1  ;;  %v17427_v60 = vld [vmem:[#allocation14 + $0x34c] ss:$16 sps:$4 sm:$0xff]   ;;  %v17430_v62 = vld [vmem:[#allocation14 + $0x364] ss:$16 sps:$4 sm:$0xff]  }
 0xfdc   :  { %v10509_v2 = vadd.f32 %v10508_v34, %v10299_v42  ;;  %v10550_v46 = vadd.f32 %v10549_v1, %v10307_v61  ;;  %v10510_v6 = vpop.f32.mrb[70].mxu0  ;;  %v10551_v7 = vpop.f32.mrb[62].mxu1  ;;  %v17422_v42 = vld [vmem:[#allocation14 + $0x340] ss:$16 sps:$4 sm:$0xff]   ;;  %v17425_v61 = vld [vmem:[#allocation14 + $0x348] ss:$16 sps:$4 sm:$0xff]   ;;  %v10303_v34 = vrot.slane %v18699_v29, %v18489_v44 }
 0xfdd   :  { %v10511_v54 = vpop.f32.mrb[71].mxu0  ;;  %v10552_v49 = vpop.f32.mrb[63].mxu1  ;;  %v10554_v8 = vpack.c.bf16 %v10507_v63, %v10507_v63  ;;  %v17433_v63 = vld [vmem:[#allocation14 + $0x36c] ss:$16 sps:$4 sm:$0xff]   ;;  %v17428_v1 = vld [vmem:[#allocation14 + $0x360] ss:$16 sps:$4 sm:$0xff]  }
 0xfde   :  { %v10555_v10 = vpack.c.bf16 %v10509_v2, %v10509_v2  ;;  %v10557_v12 = vpack.c.bf16 %v10550_v46, %v10550_v46  ;;  %v17431_v2 = vld [vmem:[#allocation14 + $0x368] ss:$16 sps:$4 sm:$0xff]   ;;  %v17436_v46 = vld [vmem:[#allocation14 + $0x384] ss:$16 sps:$4 sm:$0xff]   ;;  %v17439_v6 = vld [vmem:[#allocation14 + $0x38c] ss:$16 sps:$4 sm:$0xff]   ;;  %v10548_v7 = vadd.f32 %v18707_v37, %v10303_v34 }
 0xfdf   :  { %v17434_v54 = vld [vmem:[#allocation14 + $0x380] ss:$16 sps:$4 sm:$0xff]   ;;  %v17437_v49 = vld [vmem:[#allocation14 + $0x388] ss:$16 sps:$4 sm:$0xff]  }
 0xfe0   :  { %17860 = vtanh.bf16 %v10555_v10  ;;  %v17445_v10 = vld [vmem:[#allocation14 + $0x3ac] ss:$16 sps:$4 sm:$0xff]   ;;  %v17440_v29 = vld [vmem:[#allocation14 + $0x3a0] ss:$16 sps:$4 sm:$0xff]  }
 0xfe1   :  { %17862 = vtanh.bf16 %v10554_v8  ;;  %v17442_v8 = vld [vmem:[#allocation14 + $0x3a4] ss:$16 sps:$4 sm:$0xff]   ;;  %v17446_v37 = vld [vmem:[#allocation14 + $0x3c0] ss:$16 sps:$4 sm:$0xff]  }
 0xfe2   :  { %17864 = vtanh.bf16 %v10557_v12  ;;  %v10556_v12 = vpack.c.bf16 %v10548_v7, %v10548_v7  ;;  %v17512_v34 = vld [vmem:[#allocation16 + $0x120] ss:$16 sps:$4 sm:$0xff]   ;;  %v17521_v7 = vld [vmem:[#allocation16 + $0x148] ss:$16 sps:$4 sm:$0xff]  }
 0xfe4   :  { %17866 = vtanh.bf16 %v10556_v12  ;;  %v17532_v12 = vld [vmem:[#allocation16 + $0x184] ss:$16 sps:$4 sm:$0xff]  }
 0xfeb   :  { %v17861_v16 = vpop.eup %17860 }
 0xfec   :  { %v17863_v57 = vpop.eup %17862  ;;  %11384 = vmatprep.mubr.bf16.mxu0 %v17861_v16  ;;  %11466 = vmatprep.mubr.bf16.mxu1 %v17861_v16  ;;  %v17451_v16 = vld [vmem:[#allocation14 + $0x3cc] ss:$16 sps:$4 sm:$0xff]  }
 0xfed   :  { %11385 = vmatmul.mubr.bf16.vlgmr.msra.gmra.mrb[72].mxu0 %v17863_v57  ;;  %11467 = vmatmul.mubr.bf16.vlgmr.msra.gmra.mrb[64].mxu1 %v17863_v57  ;;  %v17865_v19 = vpop.eup %17864  ;;  %v17449_v57 = vld [vmem:[#allocation14 + $0x3c8] ss:$16 sps:$4 sm:$0xff]  }
 0xfee   :  { %11394 = vmatpush1.bf16.msra.mxu0 %v17362_v13  ;;  %11476 = vmatpush1.bf16.msra.mxu1 %v17365_v14  ;;  %v17443_v13 = vld [vmem:[#allocation14 + $0x3a8] ss:$16 sps:$4 sm:$0xff]   ;;  %v17448_v14 = vld [vmem:[#allocation14 + $0x3c4] ss:$16 sps:$4 sm:$0xff]  }
 0xfef   :  { %11425 = vmatprep.mubr.bf16.mxu0 %v17865_v19  ;;  %11507 = vmatprep.mubr.bf16.mxu1 %v17865_v19  ;;  %v17452_v19 = vld [vmem:[#allocation14 + $0x3e0] ss:$16 sps:$4 sm:$0xff]  }
 0xff0   :  { %11395 = vmatprep.subr.bf16.mxu0 %v17370_v17  ;;  %11477 = vmatprep.subr.bf16.mxu1 %v17373_v18  ;;  %v17454_v17 = vld [vmem:[#allocation14 + $0x3e4] ss:$16 sps:$4 sm:$0xff]   ;;  %v17457_v18 = vld [vmem:[#allocation14 + $0x3ec] ss:$16 sps:$4 sm:$0xff]  }
 0xff2   :  { %11396 = vmatpush1.bf16.msra.mxu0 %v17368_v21  ;;  %11478 = vmatpush1.bf16.msra.mxu1 %v17371_v4  ;;  %v17455_v21 = vld [vmem:[#allocation14 + $0x3e8] ss:$16 sps:$4 sm:$0xff]   ;;  %v17460_v4 = vld [vmem:[#allocation16 + $0x4] ss:$16 sps:$4 sm:$0xff]  }
 0xff3   :  { %11397 = vmatprep.subr.bf16.mxu0 %v17376_v3  ;;  %11479 = vmatprep.subr.bf16.mxu1 %v17379_v11  ;;  %v17463_v3 = vld [vmem:[#allocation16 + $0xc] ss:$16 sps:$4 sm:$0xff]   ;;  %v17458_v11 = vld [vmem:[#allocation16] ss:$16 sps:$4 sm:$0xff]  }
 0xff6   :  { %11398 = vmatpush1.bf16.msra.mxu0 %v17374_v24  ;;  %11480 = vmatpush1.bf16.msra.mxu1 %v17377_v35  ;;  %v17461_v24 = vld [vmem:[#allocation16 + $0x8] ss:$16 sps:$4 sm:$0xff]   ;;  %v17466_v35 = vld [vmem:[#allocation16 + $0x24] ss:$16 sps:$4 sm:$0xff]  }
 0xff7   :  { %11399 = vmatprep.subr.bf16.mxu0 %v17382_v20  ;;  %11481 = vmatprep.subr.bf16.mxu1 %v17385_v26  ;;  %v17469_v20 = vld [vmem:[#allocation16 + $0x2c] ss:$16 sps:$4 sm:$0xff]   ;;  %v17867_v26 = vpop.eup %17866 }
 0xffa   :  { %11400 = vmatpush1.bf16.msra.mxu0 %v17380_v9  ;;  %11482 = vmatpush1.bf16.msra.mxu1 %v17383_v27  ;;  %v17464_v9 = vld [vmem:[#allocation16 + $0x20] ss:$16 sps:$4 sm:$0xff]   ;;  %v17467_v27 = vld [vmem:[#allocation16 + $0x28] ss:$16 sps:$4 sm:$0xff]  }
 0xffb   :  { %11401 = vmatprep.subr.bf16.mxu0 %v17388_v0  ;;  %11483 = vmatprep.subr.bf16.mxu1 %v17391_v28  ;;  %v17472_v0 = vld [vmem:[#allocation16 + $0x44] ss:$16 sps:$4 sm:$0xff]   ;;  %v17475_v28 = vld [vmem:[#allocation16 + $0x4c] ss:$16 sps:$4 sm:$0xff]  }
 0xffe   :  { %11402 = vmatpush1.bf16.msra.mxu0 %v17386_v30  ;;  %11484 = vmatpush1.bf16.msra.mxu1 %v17389_v32  ;;  %v17470_v30 = vld [vmem:[#allocation16 + $0x40] ss:$16 sps:$4 sm:$0xff]   ;;  %v17473_v32 = vld [vmem:[#allocation16 + $0x48] ss:$16 sps:$4 sm:$0xff]  }
 0xfff   :  { %11403 = vmatprep.subr.bf16.mxu0 %v17394_v47  ;;  %11485 = vmatprep.subr.bf16.mxu1 %v17397_v33  ;;  %v17478_v47 = vld [vmem:[#allocation16 + $0x64] ss:$16 sps:$4 sm:$0xff]   ;;  %v17481_v33 = vld [vmem:[#allocation16 + $0x6c] ss:$16 sps:$4 sm:$0xff]  }
0x1002   :  { %11404 = vmatpush1.bf16.msra.mxu0 %v17392_v36  ;;  %11486 = vmatpush1.bf16.msra.mxu1 %v17395_v31  ;;  %v17476_v36 = vld [vmem:[#allocation16 + $0x60] ss:$16 sps:$4 sm:$0xff]   ;;  %v17479_v31 = vld [vmem:[#allocation16 + $0x68] ss:$16 sps:$4 sm:$0xff]  }
0x1003   :  { %11405 = vmatprep.subr.bf16.mxu0 %v17400_v38  ;;  %11487 = vmatprep.subr.bf16.mxu1 %v17403_v39  ;;  %v17484_v38 = vld [vmem:[#allocation16 + $0x84] ss:$16 sps:$4 sm:$0xff]   ;;  %v17487_v39 = vld [vmem:[#allocation16 + $0x8c] ss:$16 sps:$4 sm:$0xff]  }
0x1006   :  { %11406 = vmatpush1.bf16.msra.mxu0 %v17398_v40  ;;  %11488 = vmatpush1.bf16.msra.mxu1 %v17401_v41  ;;  %v17482_v40 = vld [vmem:[#allocation16 + $0x80] ss:$16 sps:$4 sm:$0xff]   ;;  %v17485_v41 = vld [vmem:[#allocation16 + $0x88] ss:$16 sps:$4 sm:$0xff]  }
0x1007   :  { %11407 = vmatprep.subr.bf16.mxu0 %v17406_v43  ;;  %11489 = vmatprep.subr.bf16.mxu1 %v17409_v45  ;;  %v17490_v43 = vld [vmem:[#allocation16 + $0xa4] ss:$16 sps:$4 sm:$0xff]   ;;  %v17493_v45 = vld [vmem:[#allocation16 + $0xac] ss:$16 sps:$4 sm:$0xff]  }
0x100a   :  { %11408 = vmatpush1.bf16.msra.mxu0 %v17404_v5  ;;  %11490 = vmatpush1.bf16.msra.mxu1 %v17407_v15  ;;  %v17488_v5 = vld [vmem:[#allocation16 + $0xa0] ss:$16 sps:$4 sm:$0xff]   ;;  %v17491_v15 = vld [vmem:[#allocation16 + $0xa8] ss:$16 sps:$4 sm:$0xff]  }
0x100b   :  { %11409 = vmatprep.subr.bf16.mxu0 %v17412_v23  ;;  %11491 = vmatprep.subr.bf16.mxu1 %v17415_v52  ;;  %v17496_v23 = vld [vmem:[#allocation16 + $0xc4] ss:$16 sps:$4 sm:$0xff]   ;;  %v17499_v52 = vld [vmem:[#allocation16 + $0xcc] ss:$16 sps:$4 sm:$0xff]  }
0x100e   :  { %11410 = vmatpush1.bf16.msra.mxu0 %v17410_v53  ;;  %11492 = vmatpush1.bf16.msra.mxu1 %v17413_v22  ;;  %v17494_v53 = vld [vmem:[#allocation16 + $0xc0] ss:$16 sps:$4 sm:$0xff]   ;;  %v17497_v22 = vld [vmem:[#allocation16 + $0xc8] ss:$16 sps:$4 sm:$0xff]  }
0x100f   :  { %11411 = vmatprep.subr.bf16.mxu0 %v17418_v55  ;;  %11493 = vmatprep.subr.bf16.mxu1 %v17421_v56  ;;  %v17502_v55 = vld [vmem:[#allocation16 + $0xe4] ss:$16 sps:$4 sm:$0xff]   ;;  %v17505_v56 = vld [vmem:[#allocation16 + $0xec] ss:$16 sps:$4 sm:$0xff]  }
0x1012   :  { %11412 = vmatpush1.bf16.msra.mxu0 %v17416_v58  ;;  %11494 = vmatpush1.bf16.msra.mxu1 %v17419_v25  ;;  %v17500_v58 = vld [vmem:[#allocation16 + $0xe0] ss:$16 sps:$4 sm:$0xff]   ;;  %v17503_v25 = vld [vmem:[#allocation16 + $0xe8] ss:$16 sps:$4 sm:$0xff]  }
0x1013   :  { %11413 = vmatprep.subr.bf16.mxu0 %v17424_v59  ;;  %11495 = vmatprep.subr.bf16.mxu1 %v17427_v60  ;;  %v17508_v59 = vld [vmem:[#allocation16 + $0x104] ss:$16 sps:$4 sm:$0xff]   ;;  %v17511_v60 = vld [vmem:[#allocation16 + $0x10c] ss:$16 sps:$4 sm:$0xff]  }
0x1016   :  { %11414 = vmatpush1.bf16.msra.mxu0 %v17422_v42  ;;  %11496 = vmatpush1.bf16.msra.mxu1 %v17425_v61  ;;  %v17506_v42 = vld [vmem:[#allocation16 + $0x100] ss:$16 sps:$4 sm:$0xff]   ;;  %v17509_v61 = vld [vmem:[#allocation16 + $0x108] ss:$16 sps:$4 sm:$0xff]  }
0x1017   :  { %11415 = vmatprep.subr.bf16.mxu0 %v17430_v62  ;;  %11497 = vmatprep.subr.bf16.mxu1 %v17433_v63  ;;  %v17514_v62 = vld [vmem:[#allocation16 + $0x124] ss:$16 sps:$4 sm:$0xff]   ;;  %v17517_v63 = vld [vmem:[#allocation16 + $0x12c] ss:$16 sps:$4 sm:$0xff]  }
0x101a   :  { %11416 = vmatpush1.bf16.msra.mxu0 %v17428_v1  ;;  %11498 = vmatpush1.bf16.msra.mxu1 %v17431_v2  ;;  %v17515_v1 = vld [vmem:[#allocation16 + $0x128] ss:$16 sps:$4 sm:$0xff]   ;;  %v17520_v2 = vld [vmem:[#allocation16 + $0x144] ss:$16 sps:$4 sm:$0xff]  }
0x101b   :  { %11417 = vmatprep.subr.bf16.mxu0 %v17436_v46  ;;  %11499 = vmatprep.subr.bf16.mxu1 %v17439_v6  ;;  %v17523_v46 = vld [vmem:[#allocation16 + $0x14c] ss:$16 sps:$4 sm:$0xff]   ;;  %v17518_v6 = vld [vmem:[#allocation16 + $0x140] ss:$16 sps:$4 sm:$0xff]  }
0x101e   :  { %11418 = vmatpush1.bf16.msra.mxu0 %v17434_v54  ;;  %11500 = vmatpush1.bf16.msra.mxu1 %v17437_v49  ;;  %v17526_v54 = vld [vmem:[#allocation16 + $0x164] ss:$16 sps:$4 sm:$0xff]   ;;  %v17529_v49 = vld [vmem:[#allocation16 + $0x16c] ss:$16 sps:$4 sm:$0xff]  }
0x101f   :  { %11419 = vmatprep.subr.bf16.mxu0 %v17442_v8  ;;  %11501 = vmatprep.subr.bf16.mxu1 %v17445_v10  ;;  %v17524_v8 = vld [vmem:[#allocation16 + $0x160] ss:$16 sps:$4 sm:$0xff]   ;;  %v17527_v10 = vld [vmem:[#allocation16 + $0x168] ss:$16 sps:$4 sm:$0xff]  }
0x1022   :  { %11420 = vmatpush1.bf16.msra.mxu0 %v17440_v29  ;;  %11502 = vmatpush1.bf16.msra.mxu1 %v17443_v13  ;;  %v17535_v29 = vld [vmem:[#allocation16 + $0x18c] ss:$16 sps:$4 sm:$0xff]   ;;  %v17530_v13 = vld [vmem:[#allocation16 + $0x180] ss:$16 sps:$4 sm:$0xff]  }
0x1023   :  { %11421 = vmatprep.subr.bf16.mxu0 %v17448_v14  ;;  %11503 = vmatprep.subr.bf16.mxu1 %v17451_v16  ;;  %v17533_v14 = vld [vmem:[#allocation16 + $0x188] ss:$16 sps:$4 sm:$0xff]   ;;  %v17538_v16 = vld [vmem:[#allocation16 + $0x1a4] ss:$16 sps:$4 sm:$0xff]  }
0x1026   :  { %11422 = vmatpush1.bf16.msra.mxu0 %v17446_v37  ;;  %11504 = vmatpush1.bf16.msra.mxu1 %v17449_v57  ;;  %v17541_v37 = vld [vmem:[#allocation16 + $0x1ac] ss:$16 sps:$4 sm:$0xff]   ;;  %v17536_v57 = vld [vmem:[#allocation16 + $0x1a0] ss:$16 sps:$4 sm:$0xff]  }
0x1027   :  { %11423 = vmatprep.subr.bf16.mxu0 %v17454_v17  ;;  %11505 = vmatprep.subr.bf16.mxu1 %v17457_v18  ;;  %v17539_v17 = vld [vmem:[#allocation16 + $0x1a8] ss:$16 sps:$4 sm:$0xff]   ;;  %v17544_v18 = vld [vmem:[#allocation16 + $0x1c4] ss:$16 sps:$4 sm:$0xff]  }
0x102a   :  { %11424 = vmatpush1.bf16.msra.mxu0 %v17452_v19  ;;  %11506 = vmatpush1.bf16.msra.mxu1 %v17455_v21  ;;  %v17542_v19 = vld [vmem:[#allocation16 + $0x1c0] ss:$16 sps:$4 sm:$0xff]   ;;  %v17545_v21 = vld [vmem:[#allocation16 + $0x1c8] ss:$16 sps:$4 sm:$0xff]  }
0x102b   :  { %12314 = vmatprep.subr.bf16.mxu0 %v17460_v4  ;;  %12396 = vmatprep.subr.bf16.mxu1 %v17463_v3  ;;  %v17547_v4 = vld [vmem:[#allocation16 + $0x1cc] ss:$16 sps:$4 sm:$0xff]   ;;  %v17550_v3 = vld [vmem:[#allocation16 + $0x1e4] ss:$16 sps:$4 sm:$0xff]  }
0x102d   :  { %11426 = vmatmul.mubr.bf16.vlgmr.msra.gmra.mrb[72].mxu0 %v17867_v26  ;;  %11508 = vmatmul.mubr.bf16.vlgmr.msra.gmra.mrb[64].mxu1 %v17867_v26  ;;  %v17559_v26 = vld [vmem:[#allocation16 + $0x20c] ss:$16 sps:$4 sm:$0xff]  }
0x102e   :  { %12315 = vmatpush1.bf16.msra.mxu0 %v17458_v11  ;;  %12397 = vmatpush1.bf16.msra.mxu1 %v17461_v24  ;;  %v17553_v11 = vld [vmem:[#allocation16 + $0x1ec] ss:$16 sps:$4 sm:$0xff]   ;;  %v17548_v24 = vld [vmem:[#allocation16 + $0x1e0] ss:$16 sps:$4 sm:$0xff]  }
0x102f   :  { %12316 = vmatprep.subr.bf16.mxu0 %v17466_v35  ;;  %12398 = vmatprep.subr.bf16.mxu1 %v17469_v20  ;;  %v17551_v35 = vld [vmem:[#allocation16 + $0x1e8] ss:$16 sps:$4 sm:$0xff]   ;;  %v17556_v20 = vld [vmem:[#allocation16 + $0x204] ss:$16 sps:$4 sm:$0xff]  }
0x1032   :  { %12317 = vmatpush1.bf16.msra.mxu0 %v17464_v9  ;;  %12399 = vmatpush1.bf16.msra.mxu1 %v17467_v27  ;;  %v18715_v9 = vld [vmem:[%s18779_s14] sm:$0xf] }
0x1033   :  { %12318 = vmatprep.subr.bf16.mxu0 %v17472_v0  ;;  %12400 = vmatprep.subr.bf16.mxu1 %v17475_v28  ;;  %v10695_v27 = vrot.slane %v18715_v9, %v18466_v48  ;;  %v10699_v0 = vrot.slane %v18715_v9, %v18474_v50  ;;  %v10707_v28 = vrot.slane %v18715_v9, %v18492_v51 }
0x1036   :  { %12319 = vmatpush1.bf16.msra.mxu0 %v17470_v30  ;;  %12401 = vmatpush1.bf16.msra.mxu1 %v17473_v32 }
0x1037   :  { %12320 = vmatprep.subr.bf16.mxu0 %v17478_v47  ;;  %12402 = vmatprep.subr.bf16.mxu1 %v17481_v33 }
0x103a   :  { %12321 = vmatpush1.bf16.msra.mxu0 %v17476_v36  ;;  %12403 = vmatpush1.bf16.msra.mxu1 %v17479_v31 }
0x103b   :  { %12322 = vmatprep.subr.bf16.mxu0 %v17484_v38  ;;  %12404 = vmatprep.subr.bf16.mxu1 %v17487_v39 }
0x103e   :  { %12323 = vmatpush1.bf16.msra.mxu0 %v17482_v40  ;;  %12405 = vmatpush1.bf16.msra.mxu1 %v17485_v41 }
0x103f   :  { %12324 = vmatprep.subr.bf16.mxu0 %v17490_v43  ;;  %12406 = vmatprep.subr.bf16.mxu1 %v17493_v45 }
0x1042   :  { %12325 = vmatpush1.bf16.msra.mxu0 %v17488_v5  ;;  %12407 = vmatpush1.bf16.msra.mxu1 %v17491_v15 }
0x1043   :  { %12326 = vmatprep.subr.bf16.mxu0 %v17496_v23  ;;  %12408 = vmatprep.subr.bf16.mxu1 %v17499_v52  ;;  %v17554_v23 = vld [vmem:[#allocation16 + $0x200] ss:$16 sps:$4 sm:$0xff]   ;;  %v17557_v52 = vld [vmem:[#allocation16 + $0x208] ss:$16 sps:$4 sm:$0xff]  }
0x1046   :  { %12327 = vmatpush1.bf16.msra.mxu0 %v17494_v53  ;;  %12409 = vmatpush1.bf16.msra.mxu1 %v17497_v22 }
0x1047   :  { %12328 = vmatprep.subr.bf16.mxu0 %v17502_v55  ;;  %12410 = vmatprep.subr.bf16.mxu1 %v17505_v56  ;;  %v17562_v55 = vld [vmem:[#allocation16 + $0x224] ss:$16 sps:$4 sm:$0xff]   ;;  %v17565_v56 = vld [vmem:[#allocation16 + $0x22c] ss:$16 sps:$4 sm:$0xff]  }
0x104a   :  { %12329 = vmatpush1.bf16.msra.mxu0 %v17500_v58  ;;  %12411 = vmatpush1.bf16.msra.mxu1 %v17503_v25  ;;  %v17560_v25 = vld [vmem:[#allocation16 + $0x220] ss:$16 sps:$4 sm:$0xff]  }
0x104b   :  { %12330 = vmatprep.subr.bf16.mxu0 %v17508_v59  ;;  %12412 = vmatprep.subr.bf16.mxu1 %v17511_v60  ;;  %v17563_v59 = vld [vmem:[#allocation16 + $0x228] ss:$16 sps:$4 sm:$0xff]   ;;  %v17568_v60 = vld [vmem:[#allocation16 + $0x244] ss:$16 sps:$4 sm:$0xff]  }
0x104e   :  { %12331 = vmatpush1.bf16.msra.mxu0 %v17506_v42  ;;  %12413 = vmatpush1.bf16.msra.mxu1 %v17509_v61  ;;  %v17571_v42 = vld [vmem:[#allocation16 + $0x24c] ss:$16 sps:$4 sm:$0xff]   ;;  %v17566_v61 = vld [vmem:[#allocation16 + $0x240] ss:$16 sps:$4 sm:$0xff]  }
0x104f   :  { %12332 = vmatprep.subr.bf16.mxu0 %v17514_v62  ;;  %12414 = vmatprep.subr.bf16.mxu1 %v17517_v63  ;;  %v17569_v62 = vld [vmem:[#allocation16 + $0x248] ss:$16 sps:$4 sm:$0xff]   ;;  %v17574_v63 = vld [vmem:[#allocation16 + $0x264] ss:$16 sps:$4 sm:$0xff]  }
0x1052   :  { %12333 = vmatpush1.bf16.msra.mxu0 %v17512_v34  ;;  %12415 = vmatpush1.bf16.msra.mxu1 %v17515_v1  ;;  %v17577_v34 = vld [vmem:[#allocation16 + $0x26c] ss:$16 sps:$4 sm:$0xff]   ;;  %v17572_v1 = vld [vmem:[#allocation16 + $0x260] ss:$16 sps:$4 sm:$0xff]  }
0x1053   :  { %12334 = vmatprep.subr.bf16.mxu0 %v17520_v2  ;;  %12416 = vmatprep.subr.bf16.mxu1 %v17523_v46  ;;  %v17575_v2 = vld [vmem:[#allocation16 + $0x268] ss:$16 sps:$4 sm:$0xff]   ;;  %v17580_v46 = vld [vmem:[#allocation16 + $0x284] ss:$16 sps:$4 sm:$0xff]  }
0x1056   :  { %12335 = vmatpush1.bf16.msra.mxu0 %v17518_v6  ;;  %12417 = vmatpush1.bf16.msra.mxu1 %v17521_v7  ;;  %v17583_v6 = vld [vmem:[#allocation16 + $0x28c] ss:$16 sps:$4 sm:$0xff]   ;;  %v17578_v7 = vld [vmem:[#allocation16 + $0x280] ss:$16 sps:$4 sm:$0xff]  }
0x1057   :  { %12336 = vmatprep.subr.bf16.mxu0 %v17526_v54  ;;  %12418 = vmatprep.subr.bf16.mxu1 %v17529_v49  ;;  %v17581_v54 = vld [vmem:[#allocation16 + $0x288] ss:$16 sps:$4 sm:$0xff]   ;;  %v17586_v49 = vld [vmem:[#allocation16 + $0x2a4] ss:$16 sps:$4 sm:$0xff]  }
0x105a   :  { %12337 = vmatpush1.bf16.msra.mxu0 %v17524_v8  ;;  %12419 = vmatpush1.bf16.msra.mxu1 %v17527_v10  ;;  %v17589_v8 = vld [vmem:[#allocation16 + $0x2ac] ss:$16 sps:$4 sm:$0xff]   ;;  %v17584_v10 = vld [vmem:[#allocation16 + $0x2a0] ss:$16 sps:$4 sm:$0xff]  }
0x105b   :  { %12338 = vmatprep.subr.bf16.mxu0 %v17532_v12  ;;  %12420 = vmatprep.subr.bf16.mxu1 %v17535_v29  ;;  %v17587_v12 = vld [vmem:[#allocation16 + $0x2a8] ss:$16 sps:$4 sm:$0xff]   ;;  %v17592_v29 = vld [vmem:[#allocation16 + $0x2c4] ss:$16 sps:$4 sm:$0xff]  }
0x105e   :  { %12339 = vmatpush1.bf16.msra.mxu0 %v17530_v13  ;;  %12421 = vmatpush1.bf16.msra.mxu1 %v17533_v14  ;;  %v17595_v13 = vld [vmem:[#allocation16 + $0x2cc] ss:$16 sps:$4 sm:$0xff]   ;;  %v17590_v14 = vld [vmem:[#allocation16 + $0x2c0] ss:$16 sps:$4 sm:$0xff]  }
0x105f   :  { %12340 = vmatprep.subr.bf16.mxu0 %v17538_v16  ;;  %12422 = vmatprep.subr.bf16.mxu1 %v17541_v37  ;;  %v17593_v16 = vld [vmem:[#allocation16 + $0x2c8] ss:$16 sps:$4 sm:$0xff]   ;;  %v17598_v37 = vld [vmem:[#allocation16 + $0x2e4] ss:$16 sps:$4 sm:$0xff]  }
0x1062   :  { %12341 = vmatpush1.bf16.msra.mxu0 %v17536_v57  ;;  %12423 = vmatpush1.bf16.msra.mxu1 %v17539_v17  ;;  %v17601_v57 = vld [vmem:[#allocation16 + $0x2ec] ss:$16 sps:$4 sm:$0xff]   ;;  %v17596_v17 = vld [vmem:[#allocation16 + $0x2e0] ss:$16 sps:$4 sm:$0xff]  }
0x1063   :  { %12342 = vmatprep.subr.bf16.mxu0 %v17544_v18  ;;  %12424 = vmatprep.subr.bf16.mxu1 %v17547_v4  ;;  %v17599_v18 = vld [vmem:[#allocation16 + $0x2e8] ss:$16 sps:$4 sm:$0xff]   ;;  %v17602_v4 = vld [vmem:[#allocation16 + $0x300] ss:$16 sps:$4 sm:$0xff]  }
0x1066   :  { %12343 = vmatpush1.bf16.msra.mxu0 %v17542_v19  ;;  %12425 = vmatpush1.bf16.msra.mxu1 %v17545_v21  ;;  %v17604_v19 = vld [vmem:[#allocation16 + $0x304] ss:$16 sps:$4 sm:$0xff]   ;;  %v17607_v21 = vld [vmem:[#allocation16 + $0x30c] ss:$16 sps:$4 sm:$0xff]  }
0x1067   :  { %12344 = vmatprep.subr.bf16.mxu0 %v17550_v3  ;;  %12426 = vmatprep.subr.bf16.mxu1 %v17553_v11  ;;  %v17605_v3 = vld [vmem:[#allocation16 + $0x308] ss:$16 sps:$4 sm:$0xff]   ;;  %v17610_v11 = vld [vmem:[#allocation16 + $0x324] ss:$16 sps:$4 sm:$0xff]  }
0x106a   :  { %12345 = vmatpush1.bf16.msra.mxu0 %v17548_v24  ;;  %12427 = vmatpush1.bf16.msra.mxu1 %v17551_v35  ;;  %v17613_v24 = vld [vmem:[#allocation16 + $0x32c] ss:$16 sps:$4 sm:$0xff]   ;;  %v17608_v35 = vld [vmem:[#allocation16 + $0x320] ss:$16 sps:$4 sm:$0xff]  }
0x106b   :  { %12355 = vmatprep.subr.bf16.mxu0 %v17556_v20  ;;  %12437 = vmatprep.subr.bf16.mxu1 %v17559_v26  ;;  %v17611_v20 = vld [vmem:[#allocation16 + $0x328] ss:$16 sps:$4 sm:$0xff]   ;;  %v17616_v26 = vld [vmem:[#allocation16 + $0x344] ss:$16 sps:$4 sm:$0xff]  }
0x1100   :  { %v11427_v30 = vpop.f32.mrb[72].mxu0  ;;  %v18723_v32 = vpop.f32.mrb[64].mxu1 }
0x1101   :  { %v15333_v47 = vadd.f32 %v11427_v30, %v10695_v27  ;;  %v11429_v33 = vpop.f32.mrb[73].mxu0  ;;  %v11511_v36 = vpop.f32.mrb[65].mxu1  ;;  %v17619_v27 = vld [vmem:[#allocation16 + $0x34c] ss:$16 sps:$4 sm:$0xff]   ;;  %v17622_v30 = vld [vmem:[#allocation16 + $0x364] ss:$16 sps:$4 sm:$0xff]  }
0x1102   :  { %v15334_v31 = vadd.f32 %v11429_v33, %v10699_v0  ;;  %v15336_v38 = vadd.f32 %v11511_v36, %v10707_v28  ;;  %v11431_v39 = vpop.f32.mrb[74].mxu0  ;;  %v11513_v40 = vpop.f32.mrb[66].mxu1  ;;  %v17614_v0 = vld [vmem:[#allocation16 + $0x340] ss:$16 sps:$4 sm:$0xff]   ;;  %v17617_v28 = vld [vmem:[#allocation16 + $0x348] ss:$16 sps:$4 sm:$0xff]   ;;  %v10703_v33 = vrot.slane %v18715_v9, %v18489_v44 }
0x1103   :  { %v11432_v41 = vpop.f32.mrb[75].mxu0  ;;  %v11514_v43 = vpop.f32.mrb[67].mxu1  ;;  %v11516_v45 = vpack.c.bf16 %v15333_v47, %v15333_v47  ;;  %v17625_v47 = vld [vmem:[#allocation16 + $0x36c] ss:$16 sps:$4 sm:$0xff]   ;;  %v17620_v36 = vld [vmem:[#allocation16 + $0x360] ss:$16 sps:$4 sm:$0xff]  }
0x1104   :  { %v11517_v5 = vpack.c.bf16 %v15334_v31, %v15334_v31  ;;  %v11519_v15 = vpack.c.bf16 %v15336_v38, %v15336_v38  ;;  %v17623_v31 = vld [vmem:[#allocation16 + $0x368] ss:$16 sps:$4 sm:$0xff]   ;;  %v17628_v38 = vld [vmem:[#allocation16 + $0x384] ss:$16 sps:$4 sm:$0xff]   ;;  %v17631_v39 = vld [vmem:[#allocation16 + $0x38c] ss:$16 sps:$4 sm:$0xff]   ;;  %v15335_v40 = vadd.f32 %v18723_v32, %v10703_v33 }
0x1105   :  { %v17626_v41 = vld [vmem:[#allocation16 + $0x380] ss:$16 sps:$4 sm:$0xff]   ;;  %v17629_v43 = vld [vmem:[#allocation16 + $0x388] ss:$16 sps:$4 sm:$0xff]  }
0x1106   :  { %17868 = vtanh.bf16 %v11517_v5  ;;  %v17637_v5 = vld [vmem:[#allocation16 + $0x3ac] ss:$16 sps:$4 sm:$0xff]   ;;  %v17632_v9 = vld [vmem:[#allocation16 + $0x3a0] ss:$16 sps:$4 sm:$0xff]   ;;  %v17699_v33 = vld [vmem:[#allocation17 + $0x138] ss:$12 sps:$4 sm:$0xff]  }
0x1107   :  { %17870 = vtanh.bf16 %v11516_v45  ;;  %v17634_v45 = vld [vmem:[#allocation16 + $0x3a4] ss:$16 sps:$4 sm:$0xff]   ;;  %v17638_v32 = vld [vmem:[#allocation16 + $0x3c0] ss:$16 sps:$4 sm:$0xff]  }
0x1108   :  { %17872 = vtanh.bf16 %v11519_v15  ;;  %v11518_v15 = vpack.c.bf16 %v15335_v40, %v15335_v40  ;;  %v17708_v40 = vld [vmem:[#allocation17 + $0x98] ss:$12 sps:$4 sm:$0xff]  }
0x110a   :  { %17874 = vtanh.bf16 %v11518_v15  ;;  %v17716_v15 = vld [vmem:[#allocation17 + $0x184] ss:$12 sps:$4 sm:$0xff]  }
0x1111   :  { %v17869_v53 = vpop.eup %17868 }
0x1112   :  { %v17871_v22 = vpop.eup %17870  ;;  %12346 = vmatprep.mubr.bf16.mxu0 %v17869_v53  ;;  %12428 = vmatprep.mubr.bf16.mxu1 %v17869_v53  ;;  %v17643_v53 = vld [vmem:[#allocation16 + $0x3cc] ss:$16 sps:$4 sm:$0xff]  }
0x1113   :  { %12347 = vmatmul.mubr.bf16.vlgmr.msra.gmra.mrb[76].mxu0 %v17871_v22  ;;  %12429 = vmatmul.mubr.bf16.vlgmr.msra.gmra.mrb[68].mxu1 %v17871_v22  ;;  %v17873_v58 = vpop.eup %17872  ;;  %v17641_v22 = vld [vmem:[#allocation16 + $0x3c8] ss:$16 sps:$4 sm:$0xff]  }
0x1114   :  { %12356 = vmatpush1.bf16.msra.mxu0 %v17554_v23  ;;  %12438 = vmatpush1.bf16.msra.mxu1 %v17557_v52  ;;  %v17635_v23 = vld [vmem:[#allocation16 + $0x3a8] ss:$16 sps:$4 sm:$0xff]   ;;  %v17640_v52 = vld [vmem:[#allocation16 + $0x3c4] ss:$16 sps:$4 sm:$0xff]  }
0x1115   :  { %12387 = vmatprep.mubr.bf16.mxu0 %v17873_v58  ;;  %12469 = vmatprep.mubr.bf16.mxu1 %v17873_v58  ;;  %v17644_v58 = vld [vmem:[#allocation16 + $0x3e0] ss:$16 sps:$4 sm:$0xff]  }
0x1116   :  { %12357 = vmatprep.subr.bf16.mxu0 %v17562_v55  ;;  %12439 = vmatprep.subr.bf16.mxu1 %v17565_v56  ;;  %v17646_v55 = vld [vmem:[#allocation16 + $0x3e4] ss:$16 sps:$4 sm:$0xff]   ;;  %v17649_v56 = vld [vmem:[#allocation16 + $0x3ec] ss:$16 sps:$4 sm:$0xff]  }
0x1118   :  { %12358 = vmatpush1.bf16.msra.mxu0 %v17560_v25  ;;  %12440 = vmatpush1.bf16.msra.mxu1 %v17563_v59  ;;  %v17647_v25 = vld [vmem:[#allocation16 + $0x3e8] ss:$16 sps:$4 sm:$0xff]   ;;  %v17652_v59 = vld [vmem:[#allocation17 + $0x4] ss:$12 sps:$4 sm:$0xff]  }
0x1119   :  { %12359 = vmatprep.subr.bf16.mxu0 %v17568_v60  ;;  %12441 = vmatprep.subr.bf16.mxu1 %v17571_v42  ;;  %v17677_v60 = vld [vmem:[#allocation17 + $0xc8] ss:$12 sps:$4 sm:$0xff]   ;;  %v17650_v42 = vld [vmem:[#allocation17] ss:$12 sps:$4 sm:$0xff]  }
0x111c   :  { %12360 = vmatpush1.bf16.msra.mxu0 %v17566_v61  ;;  %12442 = vmatpush1.bf16.msra.mxu1 %v17569_v62  ;;  %v17678_v61 = vld [vmem:[#allocation17 + $0x8] ss:$12 sps:$4 sm:$0xff]  }
0x111d   :  { %12361 = vmatprep.subr.bf16.mxu0 %v17574_v63  ;;  %12443 = vmatprep.subr.bf16.mxu1 %v17577_v34  ;;  %v17655_v62 = vld [vmem:[#allocation17 + $0x1c] ss:$12 sps:$4 sm:$0xff]   ;;  %v17682_v63 = vld [vmem:[#allocation17 + $0xe0] ss:$12 sps:$4 sm:$0xff]   ;;  %v17875_v34 = vpop.eup %17874 }
0x1120   :  { %12362 = vmatpush1.bf16.msra.mxu0 %v17572_v1  ;;  %12444 = vmatpush1.bf16.msra.mxu1 %v17575_v2  ;;  %v17653_v1 = vld [vmem:[#allocation17 + $0x18] ss:$12 sps:$4 sm:$0xff]   ;;  %v17683_v2 = vld [vmem:[#allocation17 + $0x20] ss:$12 sps:$4 sm:$0xff]  }
0x1121   :  { %12363 = vmatprep.subr.bf16.mxu0 %v17580_v46  ;;  %12445 = vmatprep.subr.bf16.mxu1 %v17583_v6  ;;  %v17658_v46 = vld [vmem:[#allocation17 + $0x34] ss:$12 sps:$4 sm:$0xff]   ;;  %v17687_v6 = vld [vmem:[#allocation17 + $0xf8] ss:$12 sps:$4 sm:$0xff]  }
0x1124   :  { %12364 = vmatpush1.bf16.msra.mxu0 %v17578_v7  ;;  %12446 = vmatpush1.bf16.msra.mxu1 %v17581_v54  ;;  %v17656_v7 = vld [vmem:[#allocation17 + $0x30] ss:$12 sps:$4 sm:$0xff]   ;;  %v17688_v54 = vld [vmem:[#allocation17 + $0x38] ss:$12 sps:$4 sm:$0xff]  }
0x1125   :  { %12365 = vmatprep.subr.bf16.mxu0 %v17586_v49  ;;  %12447 = vmatprep.subr.bf16.mxu1 %v17589_v8  ;;  %v17661_v49 = vld [vmem:[#allocation17 + $0x4c] ss:$12 sps:$4 sm:$0xff]   ;;  %v17692_v8 = vld [vmem:[#allocation17 + $0x110] ss:$12 sps:$4 sm:$0xff]  }
0x1128   :  { %12366 = vmatpush1.bf16.msra.mxu0 %v17584_v10  ;;  %12448 = vmatpush1.bf16.msra.mxu1 %v17587_v12  ;;  %v17659_v10 = vld [vmem:[#allocation17 + $0x48] ss:$12 sps:$4 sm:$0xff]   ;;  %v17693_v12 = vld [vmem:[#allocation17 + $0x50] ss:$12 sps:$4 sm:$0xff]  }
0x1129   :  { %12367 = vmatprep.subr.bf16.mxu0 %v17592_v29  ;;  %12449 = vmatprep.subr.bf16.mxu1 %v17595_v13  ;;  %v17664_v29 = vld [vmem:[#allocation17 + $0x64] ss:$12 sps:$4 sm:$0xff]   ;;  %v17662_v13 = vld [vmem:[#allocation17 + $0x60] ss:$12 sps:$4 sm:$0xff]  }
0x112c   :  { %12368 = vmatpush1.bf16.msra.mxu0 %v17590_v14  ;;  %12450 = vmatpush1.bf16.msra.mxu1 %v17593_v16  ;;  %v17667_v14 = vld [vmem:[#allocation17 + $0x7c] ss:$12 sps:$4 sm:$0xff]   ;;  %v17665_v16 = vld [vmem:[#allocation17 + $0x78] ss:$12 sps:$4 sm:$0xff]  }
0x112d   :  { %12369 = vmatprep.subr.bf16.mxu0 %v17598_v37  ;;  %12451 = vmatprep.subr.bf16.mxu1 %v17601_v57  ;;  %v17670_v37 = vld [vmem:[#allocation17 + $0x94] ss:$12 sps:$4 sm:$0xff]   ;;  %v17668_v57 = vld [vmem:[#allocation17 + $0x90] ss:$12 sps:$4 sm:$0xff]  }
0x1130   :  { %12370 = vmatpush1.bf16.msra.mxu0 %v17596_v17  ;;  %12452 = vmatpush1.bf16.msra.mxu1 %v17599_v18  ;;  %v17673_v17 = vld [vmem:[#allocation17 + $0xac] ss:$12 sps:$4 sm:$0xff]   ;;  %v17671_v18 = vld [vmem:[#allocation17 + $0xa8] ss:$12 sps:$4 sm:$0xff]  }
0x1131   :  { %12371 = vmatprep.subr.bf16.mxu0 %v17604_v19  ;;  %12453 = vmatprep.subr.bf16.mxu1 %v17607_v21  ;;  %v17676_v19 = vld [vmem:[#allocation17 + $0xc4] ss:$12 sps:$4 sm:$0xff]   ;;  %v17674_v21 = vld [vmem:[#allocation17 + $0xc0] ss:$12 sps:$4 sm:$0xff]  }
0x1134   :  { %12372 = vmatpush1.bf16.msra.mxu0 %v17602_v4  ;;  %12454 = vmatpush1.bf16.msra.mxu1 %v17605_v3  ;;  %v17681_v4 = vld [vmem:[#allocation17 + $0xdc] ss:$12 sps:$4 sm:$0xff]   ;;  %v17679_v3 = vld [vmem:[#allocation17 + $0xd8] ss:$12 sps:$4 sm:$0xff]  }
0x1135   :  { %12373 = vmatprep.subr.bf16.mxu0 %v17610_v11  ;;  %12455 = vmatprep.subr.bf16.mxu1 %v17613_v24  ;;  %v17686_v11 = vld [vmem:[#allocation17 + $0xf4] ss:$12 sps:$4 sm:$0xff]   ;;  %v17684_v24 = vld [vmem:[#allocation17 + $0xf0] ss:$12 sps:$4 sm:$0xff]  }
0x1138   :  { %12374 = vmatpush1.bf16.msra.mxu0 %v17608_v35  ;;  %12456 = vmatpush1.bf16.msra.mxu1 %v17611_v20  ;;  %v17691_v35 = vld [vmem:[#allocation17 + $0x10c] ss:$12 sps:$4 sm:$0xff]   ;;  %v17689_v20 = vld [vmem:[#allocation17 + $0x108] ss:$12 sps:$4 sm:$0xff]  }
0x1139   :  { %12375 = vmatprep.subr.bf16.mxu0 %v17616_v26  ;;  %12457 = vmatprep.subr.bf16.mxu1 %v17619_v27  ;;  %v17696_v26 = vld [vmem:[#allocation17 + $0x124] ss:$12 sps:$4 sm:$0xff]   ;;  %v17697_v27 = vld [vmem:[#allocation17 + $0x128] ss:$12 sps:$4 sm:$0xff]  }
0x113c   :  { %12376 = vmatpush1.bf16.msra.mxu0 %v17614_v0  ;;  %12458 = vmatpush1.bf16.msra.mxu1 %v17617_v28  ;;  %v17694_v0 = vld [vmem:[#allocation17 + $0x120] ss:$12 sps:$4 sm:$0xff]   ;;  %v17698_v28 = vld [vmem:[#allocation17 + $0x68] ss:$12 sps:$4 sm:$0xff]  }
0x113d   :  { %12377 = vmatprep.subr.bf16.mxu0 %v17622_v30  ;;  %12459 = vmatprep.subr.bf16.mxu1 %v17625_v47  ;;  %v17701_v30 = vld [vmem:[#allocation17 + $0x13c] ss:$12 sps:$4 sm:$0xff]   ;;  %v17702_v47 = vld [vmem:[#allocation17 + $0x140] ss:$12 sps:$4 sm:$0xff]  }
0x1140   :  { %12378 = vmatpush1.bf16.msra.mxu0 %v17620_v36  ;;  %12460 = vmatpush1.bf16.msra.mxu1 %v17623_v31  ;;  %v17703_v36 = vld [vmem:[#allocation17 + $0x80] ss:$12 sps:$4 sm:$0xff]  }
0x1141   :  { %12379 = vmatprep.subr.bf16.mxu0 %v17628_v38  ;;  %12461 = vmatprep.subr.bf16.mxu1 %v17631_v39  ;;  %v17706_v31 = vld [vmem:[#allocation17 + $0x154] ss:$12 sps:$4 sm:$0xff]   ;;  %v17707_v38 = vld [vmem:[#allocation17 + $0x158] ss:$12 sps:$4 sm:$0xff]   ;;  %v17704_v39 = vld [vmem:[#allocation17 + $0x150] ss:$12 sps:$4 sm:$0xff]  }
0x1144   :  { %12380 = vmatpush1.bf16.msra.mxu0 %v17626_v41  ;;  %12462 = vmatpush1.bf16.msra.mxu1 %v17629_v43  ;;  %v17711_v41 = vld [vmem:[#allocation17 + $0x16c] ss:$12 sps:$4 sm:$0xff]   ;;  %v17712_v43 = vld [vmem:[#allocation17 + $0x170] ss:$12 sps:$4 sm:$0xff]  }
0x1145   :  { %12381 = vmatprep.subr.bf16.mxu0 %v17634_v45  ;;  %12463 = vmatprep.subr.bf16.mxu1 %v17637_v5  ;;  %v17709_v45 = vld [vmem:[#allocation17 + $0x168] ss:$12 sps:$4 sm:$0xff]   ;;  %v17713_v5 = vld [vmem:[#allocation17 + $0xb0] ss:$12 sps:$4 sm:$0xff]  }
0x1148   :  { %12382 = vmatpush1.bf16.msra.mxu0 %v17632_v9  ;;  %12464 = vmatpush1.bf16.msra.mxu1 %v17635_v23  ;;  %v17717_v9 = vld [vmem:[#allocation17 + $0x248] ss:$12 sps:$4 sm:$0xff]  }
0x1149   :  { %12383 = vmatprep.subr.bf16.mxu0 %v17640_v52  ;;  %12465 = vmatprep.subr.bf16.mxu1 %v17643_v53  ;;  %v11652_v23 = vld [vmem:[%s18781_s16] sm:$0xf]  ;;  %s18189_s16 = smov [#allocation20]  }
0x114a   :  { %v11657_v52 = vrot.slane %v11652_v23, %v18466_v48  ;;  %v11661_v53 = vrot.slane %v11652_v23, %v18474_v50  ;;  %s13328_s11 = sshll.u32 %s18189_s16, 4  ;;  %s13329_s11 = int_to_ptr.vmem [resolvable:$true] %s13328_s11 }
0x114b   :  { %s18110_s21 = scalar_lea.vmem %s13329_s11, 256  ;;  %p18115_p11 = scmp.lt.s32.totalorder %s13329_s11, %s13329_s11 }
0x114c   :  { %12384 = vmatpush1.bf16.msra.mxu0 %v17638_v32  ;;  %12466 = vmatpush1.bf16.msra.mxu1 %v17641_v22  ;;  %v11669_v32 = vrot.slane %v11652_v23, %v18492_v51  ;;  %p18111_p10 = scmp.ne.s32.totalorder %s13329_s11, %s18110_s21  ;;  %p18116_p12 = scmp.lt.s32.totalorder %s18110_s21, %s18110_s21 }
0x114d   :  { %12385 = vmatprep.subr.bf16.mxu0 %v17646_v55  ;;  %12467 = vmatprep.subr.bf16.mxu1 %v17649_v56 }
0x114e   :  { %p18117_p13 = por %p18116_p12, %p18115_p11 }
0x1150   :  { %12386 = vmatpush1.bf16.msra.mxu0 %v17644_v58  ;;  %12468 = vmatpush1.bf16.msra.mxu1 %v17647_v25  ;;  %p18118_p0 = pnand %p18117_p13, %p18111_p10 }
0x1151   :  { %13143 = vmatprep.subr.bf16.mxu0 %v17652_v59  ;;  %15213 = vmatprep.subr.bf16.mxu1 %v17677_v60 }
0x1153   :  { %12388 = vmatmul.mubr.bf16.vlgmr.msra.gmra.mrb[76].mxu0 %v17875_v34  ;;  %12470 = vmatmul.mubr.bf16.vlgmr.msra.gmra.mrb[68].mxu1 %v17875_v34 }
0x1154   :  { %13144 = vmatpush1.bf16.msra.mxu0 %v17650_v42  ;;  %15214 = vmatpush3.bf16.msra.mxu1 %v17678_v61 }
0x1155   :  { %13145 = vmatprep.subr.bf16.mxu0 %v17655_v62  ;;  %15215 = vmatprep.subr.bf16.mxu1 %v17682_v63 }
0x1158   :  { %13146 = vmatpush1.bf16.msra.mxu0 %v17653_v1  ;;  %15216 = vmatpush3.bf16.msra.mxu1 %v17683_v2 }
0x1159   :  { %13147 = vmatprep.subr.bf16.mxu0 %v17658_v46  ;;  %15217 = vmatprep.subr.bf16.mxu1 %v17687_v6  ;;  %v17714_v46 = vld [vmem:[#allocation17 + $0x180] ss:$12 sps:$4 sm:$0xff]   ;;  %v17718_v6 = vld [vmem:[#allocation17 + $0x188] ss:$12 sps:$4 sm:$0xff]  }
0x115c   :  { %13148 = vmatpush1.bf16.msra.mxu0 %v17656_v7  ;;  %15218 = vmatpush3.bf16.msra.mxu1 %v17688_v54  ;;  %v17721_v54 = vld [vmem:[#allocation17 + $0x19c] ss:$12 sps:$4 sm:$0xff]  }
0x115d   :  { %13149 = vmatprep.subr.bf16.mxu0 %v17661_v49  ;;  %15219 = vmatprep.subr.bf16.mxu1 %v17692_v8  ;;  %v17722_v49 = vld [vmem:[#allocation17 + $0x260] ss:$12 sps:$4 sm:$0xff]  }
0x1160   :  { %13150 = vmatpush1.bf16.msra.mxu0 %v17659_v10  ;;  %15220 = vmatpush3.bf16.msra.mxu1 %v17693_v12  ;;  %v17719_v10 = vld [vmem:[#allocation17 + $0x198] ss:$12 sps:$4 sm:$0xff]   ;;  %v17723_v12 = vld [vmem:[#allocation17 + $0x1a0] ss:$12 sps:$4 sm:$0xff]  }
0x1161   :  { %13151 = vmatprep.subr.bf16.mxu0 %v17664_v29  ;;  %15221 = vmatprep.subr.bf16.mxu1 %v17697_v27  ;;  %v17726_v29 = vld [vmem:[#allocation17 + $0x1b4] ss:$12 sps:$4 sm:$0xff]   ;;  %v17739_v27 = vld [vmem:[#allocation17 + $0x1f8] ss:$12 sps:$4 sm:$0xff]  }
0x1164   :  { %13152 = vmatpush1.bf16.msra.mxu0 %v17662_v13  ;;  %15222 = vmatpush3.bf16.msra.mxu1 %v17698_v28  ;;  %v17727_v13 = vld [vmem:[#allocation17 + $0x278] ss:$12 sps:$4 sm:$0xff]   ;;  %v17746_v28 = vld [vmem:[#allocation17 + $0x214] ss:$12 sps:$4 sm:$0xff]  }
0x1165   :  { %13153 = vmatprep.subr.bf16.mxu0 %v17667_v14  ;;  %15223 = vmatprep.subr.bf16.mxu1 %v17702_v47  ;;  %v17724_v14 = vld [vmem:[#allocation17 + $0x1b0] ss:$12 sps:$4 sm:$0xff]  }
0x1166   :  { %v17744_v47 = vld [vmem:[#allocation17 + $0x210] ss:$12 sps:$4 sm:$0xff]  }
0x1168   :  { %13154 = vmatpush1.bf16.msra.mxu0 %v17665_v16  ;;  %15224 = vmatpush3.bf16.msra.mxu1 %v17703_v36  ;;  %v17728_v16 = vld [vmem:[#allocation17 + $0x1b8] ss:$12 sps:$4 sm:$0xff]  }
0x1169   :  { %13155 = vmatprep.subr.bf16.mxu0 %v17670_v37  ;;  %15225 = vmatprep.subr.bf16.mxu1 %v17707_v38  ;;  %v17731_v37 = vld [vmem:[#allocation17 + $0x1cc] ss:$12 sps:$4 sm:$0xff]   ;;  %v17749_v38 = vld [vmem:[#allocation17 + $0x228] ss:$12 sps:$4 sm:$0xff]  }
0x116a   :  { %v17751_v36 = vld [vmem:[#allocation17 + $0x22c] ss:$12 sps:$4 sm:$0xff]  }
0x116c   :  { %13156 = vmatpush1.bf16.msra.mxu0 %v17668_v57  ;;  %15226 = vmatpush3.bf16.msra.mxu1 %v17708_v40  ;;  %v17732_v57 = vld [vmem:[#allocation17 + $0x290] ss:$12 sps:$4 sm:$0xff]  }
0x116d   :  { %13157 = vmatprep.subr.bf16.mxu0 %v17673_v17  ;;  %15227 = vmatprep.subr.bf16.mxu1 %v17712_v43  ;;  %v11665_v17 = vrot.slane %v11652_v23, %v18489_v44  ;;  %v17756_v40 = vld [vmem:[#allocation17 + $0x244] ss:$12 sps:$4 sm:$0xff]   ;;  %v17759_v43 = vld [vmem:[#allocation17 + $0x25c] ss:$12 sps:$4 sm:$0xff]   ;;  %v17765_v23 = vld [vmem:[#allocation17 + $0x28c] ss:$12 sps:$4 sm:$0xff]  }
0x1170   :  { %13158 = vmatpush1.bf16.msra.mxu0 %v17671_v18  ;;  %15228 = vmatpush3.bf16.msra.mxu1 %v17713_v5  ;;  %v17729_v18 = vld [vmem:[#allocation17 + $0x1c8] ss:$12 sps:$4 sm:$0xff]   ;;  %v17757_v5 = vld [vmem:[#allocation17 + $0x258] ss:$12 sps:$4 sm:$0xff]  }
0x1171   :  { %13159 = vmatprep.subr.bf16.mxu0 %v17676_v19  ;;  %15235 = vmatprep.subr.bf16.mxu1 %v17717_v9  ;;  %v17733_v19 = vld [vmem:[#allocation17 + $0x1d0] ss:$12 sps:$4 sm:$0xff]  }
0x1172   :  { %v17760_v9 = vld [vmem:[#allocation17 + $0x270] ss:$12 sps:$4 sm:$0xff]  }
0x1174   :  { %13160 = vmatpush1.bf16.msra.mxu0 %v17674_v21  ;;  %v17736_v21 = vld [vmem:[#allocation17 + $0x1e4] ss:$12 sps:$4 sm:$0xff]  }
0x1175   :  { %13161 = vmatprep.subr.bf16.mxu0 %v17681_v4  ;;  %v17737_v4 = vld [vmem:[#allocation17 + $0x2a8] ss:$12 sps:$4 sm:$0xff]  }
0x1178   :  { %13162 = vmatpush1.bf16.msra.mxu0 %v17679_v3 }
0x1179   :  { %13163 = vmatprep.subr.bf16.mxu0 %v17686_v11  ;;  %v17734_v11 = vld [vmem:[#allocation17 + $0x1e0] ss:$12 sps:$4 sm:$0xff]  }
0x117c   :  { %13164 = vmatpush1.bf16.msra.mxu0 %v17684_v24  ;;  %v17738_v24 = vld [vmem:[#allocation17 + $0x1e8] ss:$12 sps:$4 sm:$0xff]  }
0x117d   :  { %13165 = vmatprep.subr.bf16.mxu0 %v17691_v35  ;;  %v17741_v35 = vld [vmem:[#allocation17 + $0x1fc] ss:$12 sps:$4 sm:$0xff]  }
0x1180   :  { %13166 = vmatpush1.bf16.msra.mxu0 %v17689_v20  ;;  %v17742_v20 = vld [vmem:[#allocation17 + $0x2c0] ss:$12 sps:$4 sm:$0xff]  }
0x1181   :  { %13167 = vmatprep.subr.bf16.mxu0 %v17696_v26 }
0x1184   :  { %13168 = vmatpush1.bf16.msra.mxu0 %v17694_v0  ;;  %v17743_v0 = vld [vmem:[#allocation17 + $0x200] ss:$12 sps:$4 sm:$0xff]  }
0x1185   :  { %13169 = vmatprep.subr.bf16.mxu0 %v17701_v30  ;;  %v17747_v30 = vld [vmem:[#allocation17 + $0x2d8] ss:$12 sps:$4 sm:$0xff]  }
0x1188   :  { %13170 = vmatpush1.bf16.msra.mxu0 %v17699_v33  ;;  %v17748_v33 = vld [vmem:[#allocation17 + $0x218] ss:$12 sps:$4 sm:$0xff]  }
0x1189   :  { %13171 = vmatprep.subr.bf16.mxu0 %v17706_v31  ;;  %v17752_v31 = vld [vmem:[#allocation17 + $0x2f0] ss:$12 sps:$4 sm:$0xff]  }
0x118c   :  { %13172 = vmatpush1.bf16.msra.mxu0 %v17704_v39  ;;  %v17753_v39 = vld [vmem:[#allocation17 + $0x230] ss:$12 sps:$4 sm:$0xff]  }
0x118d   :  { %13173 = vmatprep.subr.bf16.mxu0 %v17711_v41  ;;  %v17754_v41 = vld [vmem:[#allocation17 + $0x240] ss:$12 sps:$4 sm:$0xff]  }
0x1190   :  { %13174 = vmatpush1.bf16.msra.mxu0 %v17709_v45 }
0x1191   :  { %13184 = vmatprep.subr.bf16.mxu0 %v17716_v15  ;;  %v17762_v15 = vld [vmem:[#allocation17 + $0x274] ss:$12 sps:$4 sm:$0xff]  }
0x1226   :  { %v12389_v22 = vpop.f32.mrb[76].mxu0  ;;  %v12471_v55 = vpop.f32.mrb[68].mxu1 }
0x1227   :  { %v15337_v56 = vadd.f32 %v12389_v22, %v11657_v52  ;;  %v12391_v58 = vpop.f32.mrb[77].mxu0  ;;  %v12473_v25 = vpop.f32.mrb[69].mxu1  ;;  %v15339_v3 = vadd.f32 %v12471_v55, %v11665_v17  ;;  %v17763_v52 = vld [vmem:[#allocation17 + $0x288] ss:$12 sps:$4 sm:$0xff]   ;;  %v17769_v55 = vld [vmem:[#allocation17 + $0x2b8] ss:$12 sps:$4 sm:$0xff]  }
0x1228   :  { %v15338_v59 = vadd.f32 %v12391_v58, %v11661_v53  ;;  %v15340_v60 = vadd.f32 %v12473_v25, %v11669_v32  ;;  %v12393_v42 = vpop.f32.mrb[78].mxu0  ;;  %v12475_v61 = vpop.f32.mrb[70].mxu1  ;;  %v17768_v53 = vld [vmem:[#allocation17 + $0x2a4] ss:$12 sps:$4 sm:$0xff]   ;;  %v17766_v32 = vld [vmem:[#allocation17 + $0x2a0] ss:$12 sps:$4 sm:$0xff]  }
0x1229   :  { %v12394_v62 = vpop.f32.mrb[79].mxu0  ;;  %v12476_v63 = vpop.f32.mrb[71].mxu1  ;;  %v12478_v34 = vpack.c.bf16 %v15337_v56, %v15337_v56  ;;  %v12480_v26 = vpack.c.bf16 %v15339_v3, %v15339_v3  ;;  %v17771_v22 = vld [vmem:[#allocation17 + $0x2bc] ss:$12 sps:$4 sm:$0xff]   ;;  %v17774_v56 = vld [vmem:[#allocation17 + $0x2d4] ss:$12 sps:$4 sm:$0xff]  }
0x122a   :  { %v12479_v1 = vpack.c.bf16 %v15338_v59, %v15338_v59  ;;  %v12481_v2 = vpack.c.bf16 %v15340_v60, %v15340_v60  ;;  %v17772_v58 = vld [vmem:[#allocation17 + $0x2d0] ss:$12 sps:$4 sm:$0xff]   ;;  %v17777_v25 = vld [vmem:[#allocation17 + $0x2ec] ss:$12 sps:$4 sm:$0xff]   ;;  %v17775_v59 = vld [vmem:[#allocation17 + $0x2e8] ss:$12 sps:$4 sm:$0xff]  }
0x122c   :  { %17876 = vtanh.bf16 %v12479_v1 }
0x122d   :  { %17878 = vtanh.bf16 %v12478_v34 }
0x122e   :  { %17880 = vtanh.bf16 %v12481_v2 }
0x122f   :  { %17882 = vtanh.bf16 %v12480_v26 }
0x1237   :  { %v17877_v51 = vpop.eup %17876 }
0x1238   :  { %v17879_v7 = vpop.eup %17878  ;;  %13175 = vmatprep.mubr.bf16.mxu0 %v17877_v51  ;;  %13257 = vmatprep.mubr.bf16.mxu1 %v17877_v51 }
0x1239   :  { %13176 = vmatmul.mubr.bf16.vlgmr.msra.gmra.mrb[80].mxu0 %v17879_v7  ;;  %13258 = vmatmul.mubr.bf16.vlgmr.msra.gmra.mrb[72].mxu1 %v17879_v7  ;;  %v17881_v8 = vpop.eup %17880 }
0x123a   :  { %13185 = vmatpush1.bf16.msra.mxu0 %v17714_v46  ;;  %15236 = vmatpush3.bf16.msra.mxu1 %v17718_v6  ;;  %v17883_v45 = vpop.eup %17882 }
0x123b   :  { %13216 = vmatprep.mubr.bf16.mxu0 %v17881_v8  ;;  %13297 = vmatprep.mubr.bf16.mxu1 %v17881_v8 }
0x123c   :  { %13186 = vmatprep.subr.bf16.mxu0 %v17721_v54  ;;  %15237 = vmatprep.subr.bf16.mxu1 %v17722_v49 }
0x123e   :  { %13187 = vmatpush1.bf16.msra.mxu0 %v17719_v10  ;;  %15238 = vmatpush3.bf16.msra.mxu1 %v17723_v12 }
0x123f   :  { %13188 = vmatprep.subr.bf16.mxu0 %v17726_v29  ;;  %15239 = vmatprep.subr.bf16.mxu1 %v17727_v13 }
0x1242   :  { %13189 = vmatpush1.bf16.msra.mxu0 %v17724_v14  ;;  %15240 = vmatpush3.bf16.msra.mxu1 %v17728_v16 }
0x1243   :  { %13190 = vmatprep.subr.bf16.mxu0 %v17731_v37  ;;  %15241 = vmatprep.subr.bf16.mxu1 %v17732_v57 }
0x1246   :  { %13191 = vmatpush1.bf16.msra.mxu0 %v17729_v18  ;;  %15242 = vmatpush3.bf16.msra.mxu1 %v17733_v19 }
0x1247   :  { %13192 = vmatprep.subr.bf16.mxu0 %v17736_v21  ;;  %15243 = vmatprep.subr.bf16.mxu1 %v17737_v4 }
0x124a   :  { %13193 = vmatpush1.bf16.msra.mxu0 %v17734_v11  ;;  %15244 = vmatpush3.bf16.msra.mxu1 %v17738_v24 }
0x124b   :  { %13194 = vmatprep.subr.bf16.mxu0 %v17741_v35  ;;  %15245 = vmatprep.subr.bf16.mxu1 %v17742_v20 }
0x124e   :  { %13195 = vmatpush1.bf16.msra.mxu0 %v17739_v27  ;;  %15246 = vmatpush3.bf16.msra.mxu1 %v17743_v0 }
0x124f   :  { %13196 = vmatprep.subr.bf16.mxu0 %v17746_v28  ;;  %15247 = vmatprep.subr.bf16.mxu1 %v17747_v30 }
0x1252   :  { %13197 = vmatpush1.bf16.msra.mxu0 %v17744_v47  ;;  %15248 = vmatpush3.bf16.msra.mxu1 %v17748_v33 }
0x1253   :  { %13198 = vmatprep.subr.bf16.mxu0 %v17751_v36  ;;  %15249 = vmatprep.subr.bf16.mxu1 %v17752_v31 }
0x1256   :  { %13199 = vmatpush1.bf16.msra.mxu0 %v17749_v38  ;;  %15250 = vmatpush3.bf16.msra.mxu1 %v17753_v39 }
0x1257   :  { %13200 = vmatprep.subr.bf16.mxu0 %v17756_v40 }
0x1259   :  { %13298 = vmatmul.mubr.bf16.vlgmr.msra.gmra.mrb[76].mxu1 %v17883_v45 }
0x125a   :  { %13201 = vmatpush1.bf16.msra.mxu0 %v17754_v41 }
0x125b   :  { %13202 = vmatprep.subr.bf16.mxu0 %v17759_v43 }
0x125e   :  { %13203 = vmatpush1.bf16.msra.mxu0 %v17757_v5 }
0x125f   :  { %13204 = vmatprep.subr.bf16.mxu0 %v17762_v15 }
0x1262   :  { %13205 = vmatpush1.bf16.msra.mxu0 %v17760_v9 }
0x1263   :  { %13206 = vmatprep.subr.bf16.mxu0 %v17765_v23 }
0x1266   :  { %13207 = vmatpush1.bf16.msra.mxu0 %v17763_v52 }
0x1267   :  { %13208 = vmatprep.subr.bf16.mxu0 %v17768_v53 }
0x126a   :  { %13209 = vmatpush1.bf16.msra.mxu0 %v17766_v32 }
0x126b   :  { %13210 = vmatprep.subr.bf16.mxu0 %v17771_v22 }
0x126e   :  { %13211 = vmatpush1.bf16.msra.mxu0 %v17769_v55 }
0x126f   :  { %13212 = vmatprep.subr.bf16.mxu0 %v17774_v56 }
0x1272   :  { %13213 = vmatpush1.bf16.msra.mxu0 %v17772_v58 }
0x1273   :  { %13214 = vmatprep.subr.bf16.mxu0 %v17777_v25 }
0x1276   :  { %13215 = vmatpush1.bf16.msra.mxu0 %v17775_v59 }
0x1279   :  { %13217 = vmatmul.mubr.bf16.vlgmr.msra.gmra.mrb[80].mxu0 %v17883_v45 }
0x127a   :  { %18121 = shalt.err (!%p18118_p0)
}
0x127b   :  { %s18122_s26 = scalar_lea.hbm %s18785_s20, 256 }
0x127c   :  { %p18123_p1 = scmp.ne.s32.totalorder %s18785_s20, %s18122_s26  ;;  %p18126_p2 = scmp.lt.u32.totalorder %s18122_s26, %s18785_s20 }
0x127e   :  { %p18128_p3 = pnand %p18126_p2, %p18123_p1 }
0x1280   :  { %18131 = shalt.err (!%p18128_p3)
}
0x1281   :  { %s18190_s27 = smov 128   ;;  %s18191_s13 = smov 8   ;;  %v12614_v34 = vld [vmem:[%s18783_s18] sm:$0x7] }
0x1282   :  { %13334 = dma.vmem_to_hbm [thread:$0]  %s13329_s11, 256, %s18785_s20, [#allocation21], %s18190_s27, %s18190_s27, %s18191_s13   ;;  %v12627_v1 = vrot.slane %v12614_v34, %v18489_v44  ;;  %v12619_v10 = vrot.slane %v12614_v34, %v18466_v48  ;;  %v12623_v12 = vrot.slane %v12614_v34, %v18474_v50 }
0x1283   :  { %s18192_s18 = smov [#allocation19]  }
0x1284   :  { %s13316_s20 = sshll.u32 %s18192_s18, 4  ;;  %s13317_s20 = int_to_ptr.vmem [resolvable:$true] %s13316_s20 }
0x1285   :  { %s18132_s17 = scalar_lea.vmem %s13317_s20, 768  ;;  %p18137_p5 = scmp.lt.s32.totalorder %s13317_s20, %s13317_s20 }
0x1286   :  { %p18133_p4 = scmp.ne.s32.totalorder %s13317_s20, %s18132_s17  ;;  %p18138_p6 = scmp.lt.s32.totalorder %s18132_s17, %s18132_s17 }
0x1288   :  { %p18139_p7 = por %p18138_p6, %p18137_p5 }
0x128a   :  { %p18140_p8 = pnand %p18139_p7, %p18133_p4 }
0x130c   :  { %v15229_v60 = vpop.f32.mrb[72].mxu1 }
0x130d   :  { %v15230_v42 = vpop.f32.mrb[73].mxu1 }
0x130e   :  { %v15231_v61 = vadd.f32 %v15230_v42, %v15229_v60  ;;  %v15232_v62 = vpop.f32.mrb[74].mxu1 }
0x130f   :  { %v15233_v63 = vpop.f32.mrb[75].mxu1 }
0x1310   :  { %v13260_v6 = vadd.f32 %v15231_v61, %v12627_v1 }
0x132c   :  { %v15251_v2 = vpop.f32.mrb[76].mxu1 }
0x132d   :  { %v15252_v46 = vpop.f32.mrb[77].mxu1 }
0x132e   :  { %v15253_v51 = vadd.f32 %v15252_v46, %v15251_v2  ;;  %v15254_v7 = vpop.f32.mrb[78].mxu1 }
0x132f   :  { %v15255_v54 = vpop.f32.mrb[79].mxu1 }
0x1330   :  { %v13300_v49 = vadd.f32 %v15253_v51, %v13260_v6 }
0x1332   :  { %17884 = vtanh.f32 %v13300_v49 }
0x133c   :  { %v17885_v8 = vpop.eup %17884 }
0x133d   :  { %13310 = vst [vmem:[#allocation19 + $0x28] sm:$0xff] %v17885_v8 }
0x134c   :  { %v13218_v29 = vpop.f32.mrb[80].mxu0 }
0x134d   :  { %v15341_v13 = vadd.f32 %v13218_v29, %v12619_v10  ;;  %v13220_v14 = vpop.f32.mrb[81].mxu0 }
0x134e   :  { %v15342_v16 = vadd.f32 %v13220_v14, %v12623_v12  ;;  %v13222_v37 = vpop.f32.mrb[82].mxu0 }
0x134f   :  { %17886 = vtanh.f32 %v15341_v13  ;;  %v13223_v44 = vpop.f32.mrb[83].mxu0 }
0x1350   :  { %17888 = vtanh.f32 %v15342_v16 }
0x1359   :  { %v17887_v57 = vpop.eup %17886 }
0x135a   :  { %v17889_v17 = vpop.eup %17888  ;;  %13308 = vst [vmem:[#allocation19 + $0x18] sm:$0xff] %v17887_v57 }
0x135b   :  { %13309 = vst [vmem:[#allocation19 + $0x20] sm:$0xff] %v17889_v17 }
0x135c   :  { %18143 = shalt.err (!%p18140_p8)
}
0x135d   :  { %s18812_s6 = sld [smem:[#allocation35_spill]] }
0x1363   :  { %s18144_s2 = scalar_lea.hbm %s18812_s6, 768 }
0x1364   :  { %p18145_p9 = scmp.ne.s32.totalorder %s18812_s6, %s18144_s2  ;;  %p18148_p10 = scmp.lt.u32.totalorder %s18144_s2, %s18812_s6 }
0x1366   :  { %p18150_p11 = pnand %p18148_p10, %p18145_p9 }
0x1368   :  { %18153 = shalt.err (!%p18150_p11)
}
0x1369   :  { %s18193_s12 = smov 384   ;;  %s18194_s22 = smov 24  }
0x136a   :  { %13322 = dma.vmem_to_hbm [thread:$0]  %s13317_s20, 768, %s18812_s6, [#allocation4], %s18193_s12, %s18193_s12, %s18194_s22  }
0x136b   :  { %18166 = dma.done.wait [#allocation4], 768  }
0x136c   :  { %18167 = vsyncadd [#allocation4], 4294966528 }
0x136d   :  { %18168 = dma.done.wait [#allocation21], 256  }
0x136e   :  { %18169 = vsyncadd [#allocation21], 4294967040 }
0x136f   :  { %13341 = vsyncpa [#allocation3], 1 }
0x1370   :  { %13342 = vsyncpa [#allocation6], 1 }
0x1371   :  { %13343 = vsyncpa [#allocation9], 1 }
0x1372   :  { %13344 = vsyncpa [#allocation12], 1 }
0x1373   :  { %13345 = vsyncpa [#allocation15], 1 }
0x1374   :  { %13346 = vsyncpa [#allocation18], 1 }
0x1375   :  { %13347 = vsyncpa [#allocation4], 1 }
0x1376   :  { %13348 = vsyncpa [#allocation21], 1 }

</bundles_post_ra>
